<compile_context>
chip_gen: v6e
topology: v6e:2x2x1
jax: 0.10.0
libtpu: 0.0.40
codegen_flags: <defaults>
</compile_context>

<pallas_src>
import jax
import jax.numpy as jnp
import numpy as np
from jax.experimental import pallas as pl
from jax.experimental.pallas import tpu as pltpu

EPS = 1e-5
LANES = 128


def _round_up(x, m):
    return (x + m - 1) // m * m


def basic_block_kernel(xpad_ref, w1_ref, w2_ref, g1_ref, b1_ref, g2_ref,
                       b2_ref, out_ref, midpad_ref):
    # xpad_ref  : (N, H+2, W+2, C)  spatially pre-padded input, NHWC, C lane-padded
    # w1_ref    : (9*C, C)          im2col-ordered weights, row = (ky*3+kx)*C + cin
    # w2_ref    : (9*C, C)
    # g*/b*     : (1, C)            BN affine params (zero in padded lanes), f32
    # out_ref   : (N*H*W, C)        lane-dense output slab
    # midpad_ref: (N, H+2, W+2, C)  scratch for the padded intermediate, input dtype
    N, Hp, Wp, C = xpad_ref.shape
    H, W = Hp - 2, Wp - 2
    M = N * H * W
    inv_m = jnp.float32(1.0 / M)

    def conv3x3(src_ref, w_ref):
        # Per-tap accumulated dots: no (M, 9*C) im2col slab is ever built.
        # Weight blocks w_ref[t*C:(t+1)*C, :] are sublane-tile-aligned static
        # views (C == 128).  LHS taps stay in the staging dtype (bf16 in
        # production) so the MXU runs its native path; accumulation is f32.
        # TODO(synk): on v6e/v7x group adjacent taps into K=256 dots (pairs)
        # to fill the 2x256^2 systolic depth; K=128 is already native on v5e.
        # TODO(synk): with C == 128 (one lane tile), a (N, Hp, Wp*C) flat view
        # would make the kx shifts lane-tile-aligned column slices instead of
        # sublane-offset slices.
        acc = jnp.zeros((M, C), jnp.float32)
        t = 0
        for ky in range(3):
            for kx in range(3):
                tap = src_ref[:, ky:ky + H, kx:kx + W, :].reshape(M, C)
                acc = acc + jnp.dot(tap, w_ref[t * C:(t + 1) * C, :],
                                    preferred_element_type=jnp.float32)
                t += 1
        return acc

    def batch_norm(acc, g, b):
        # Train-mode BN folded to one mul + one add per element.  Two-pass
        # centered variance (numerically safer than sumsq/M - mu^2 for large
        # M / non-centered activations).  Stats and scale stay in f32.
        mu = jnp.sum(acc, axis=0, keepdims=True) * inv_m
        cen = acc - mu
        var = jnp.sum(cen * cen, axis=0, keepdims=True) * inv_m
        scale = g * jax.lax.rsqrt(var + EPS)                 # EUP rsqrt
        return cen * scale + b

    # ---- conv1 + bn1 + relu ----
    acc1 = conv3x3(xpad_ref, w1_ref)
    h = jnp.maximum(batch_norm(acc1, g1_ref[...], b1_ref[...]), 0.0)

    # ---- stage h in the matmul dtype; zero only the 1-pixel halo ----
    mdt = midpad_ref.dtype
    zrow = jnp.zeros((N, 1, Wp, C), mdt)
    zcol = jnp.zeros((N, Hp, 1, C), mdt)
    midpad_ref[:, 0:1, :, :] = zrow
    midpad_ref[:, Hp - 1:Hp, :, :] = zrow
    midpad_ref[:, :, 0:1, :] = zcol
    midpad_ref[:, :, Wp - 1:Wp, :] = zcol
    midpad_ref[:, 1:H + 1, 1:W + 1, :] = h.reshape(N, H, W, C).astype(mdt)

    # ---- conv2 + bn2 + residual + relu ----
    acc2 = conv3x3(midpad_ref, w2_ref)
    o = batch_norm(acc2, g2_ref[...], b2_ref[...])
    residual = xpad_ref[:, 1:H + 1, 1:W + 1, :].reshape(M, C).astype(jnp.float32)
    out_ref[...] = jnp.maximum(o + residual, 0.0).astype(out_ref.dtype)


def basic_block_forward(x_nchw, w1, w2, g1, b1, g2, b2, compute_dtype=None):
    """x_nchw: (N, C, H, W); w*: (C, C, 3, 3) PyTorch OIHW; g*/b*: (C,).

    compute_dtype: dtype for the MXU operands / staged intermediate (default:
    x.dtype).  Pass jnp.bfloat16 in production for the bf16 MXU fast path.
    """
    N, Cin, H, W = x_nchw.shape
    Cout = w1.shape[0]
    assert Cin == Cout, "BasicBlock with downsample=None needs inplanes == planes"
    C = Cin
    Cp = _round_up(C, LANES)                  # lane-dense channel padding
    dt = jnp.dtype(compute_dtype) if compute_dtype is not None else x_nchw.dtype
    # TODO(synk): for C << 128 (small HRNet branches) this padding wastes up to
    # 32x FLOPs/bytes; pack spatial W-blocks into the lane axis or batch
    # several branches per call instead of paying Cp=128.

    x_nhwc = jnp.transpose(x_nchw, (0, 2, 3, 1)).astype(dt)
    xpad = jnp.pad(x_nhwc, ((0, 0), (1, 1), (1, 1), (0, Cp - C)))

    def conv_mat(w):                          # OIHW -> im2col matrix (9*Cp, Cp)
        w_hwio = jnp.transpose(w, (2, 3, 1, 0))                       # (3,3,Ci,Co)
        w_hwio = jnp.pad(w_hwio, ((0, 0), (0, 0), (0, Cp - C), (0, Cp - C)))
        return w_hwio.reshape(9 * Cp, Cp).astype(dt)

    def bn_vec(v):                            # zero-padded lanes -> scale/bias = 0
        return jnp.pad(v, (0, Cp - C)).reshape(1, Cp).astype(jnp.float32)

    M = N * H * W
    itemsize = jnp.dtype(dt).itemsize
    xpad_bytes = N * (H + 2) * (W + 2) * Cp * itemsize
    est = (2 * xpad_bytes                      # xpad input + midpad scratch
           + 2 * 9 * Cp * Cp * itemsize        # weight matrices
           + M * Cp * jnp.dtype(x_nchw.dtype).itemsize   # output slab
           + 6 * M * Cp * 4)                   # f32 acc / centered / transients
    vmem_limit = int(min(max(est + (4 << 20), 16 << 20), 112 << 20))

    # TODO(synk): at very large HRNet shapes, convert to a gridded two-phase-BN
    # pipeline (pass 1: conv + per-tile sum/sumsq; pass 2: normalize + relu +
    # residual) tiled over N / H row-bands so HBM DMAs overlap compute and
    # v7x's two TensorCores can split the batch ("parallel" grid axis).
    out2d = pl.pallas_call(
        basic_block_kernel,
        out_shape=jax.ShapeDtypeStruct((M, Cp), x_nchw.dtype),
        in_specs=[pl.BlockSpec(memory_space=pltpu.MemorySpace.VMEM)] * 7,
        out_specs=pl.BlockSpec(memory_space=pltpu.MemorySpace.VMEM),
        scratch_shapes=[pltpu.VMEM((N, H + 2, W + 2, Cp), dt)],
        compiler_params=pltpu.CompilerParams(vmem_limit_bytes=vmem_limit),
    )(xpad, conv_mat(w1), conv_mat(w2),
      bn_vec(g1), bn_vec(b1), bn_vec(g2), bn_vec(b2))

    out_nhwc = out2d[:, :C].reshape(N, H, W, C)
    return jnp.transpose(out_nhwc, (0, 3, 1, 2))           # back to NCHW


def ref_basic_block(x, w1, w2, g1, b1, g2, b2):
    """Plain-JAX reference (NCHW), matching the PyTorch module in train mode."""
    def conv(y, w):
        return jax.lax.conv_general_dilated(
            y, w, window_strides=(1, 1), padding=((1, 1), (1, 1)),
            dimension_numbers=('NCHW', 'OIHW', 'NCHW'))

    def bn(y, g, b):
        mu = jnp.mean(y, axis=(0, 2, 3), keepdims=True)
        var = jnp.mean((y - mu) ** 2, axis=(0, 2, 3), keepdims=True)
        return ((y - mu) / jnp.sqrt(var + EPS) * g.reshape(1, -1, 1, 1)
                + b.reshape(1, -1, 1, 1))

    out = jax.nn.relu(bn(conv(x, w1), g1, b1))
    out = bn(conv(out, w2), g2, b2) + x
    return jax.nn.relu(out)


if __name__ == "__main__":
    N, C, H, W = 2, 4, 16, 16   # inplanes == planes == 4, stride=1, downsample=None
    key = jax.random.PRNGKey(0)
    k = jax.random.split(key, 7)

    x = jax.random.normal(k[0], (N, C, H, W), jnp.float32)
    w1 = jax.random.normal(k[1], (C, C, 3, 3), jnp.float32) * 0.1
    w2 = jax.random.normal(k[2], (C, C, 3, 3), jnp.float32) * 0.1
    g1 = 1.0 + 0.1 * jax.random.normal(k[3], (C,), jnp.float32)
    b1 = 0.1 * jax.random.normal(k[4], (C,), jnp.float32)
    g2 = 1.0 + 0.1 * jax.random.normal(k[5], (C,), jnp.float32)
    b2 = 0.1 * jax.random.normal(k[6], (C,), jnp.float32)

    fwd = jax.jit(basic_block_forward)
    out = jax.block_until_ready(fwd(x, w1, w2, g1, b1, g2, b2))

    ref = ref_basic_block(x, w1, w2, g1, b1, g2, b2)
    np.testing.assert_allclose(np.asarray(out), np.asarray(ref),
                               rtol=1e-3, atol=1e-3)

    print("KERNEL_OK")
</pallas_src>

<mosaic_0001>
module attributes {stable_mosaic.version = 11 : i64} {
  func.func @basic_block_kernel(%arg0: memref<2x18x18x128xf32, #tpu.memory_space<vmem>>, %arg1: memref<1152x128xf32, #tpu.memory_space<vmem>>, %arg2: memref<1152x128xf32, #tpu.memory_space<vmem>>, %arg3: memref<1x128xf32, #tpu.memory_space<vmem>>, %arg4: memref<1x128xf32, #tpu.memory_space<vmem>>, %arg5: memref<1x128xf32, #tpu.memory_space<vmem>>, %arg6: memref<1x128xf32, #tpu.memory_space<vmem>>, %arg7: memref<512x128xf32, #tpu.memory_space<vmem>>, %arg8: memref<2x18x18x128xf32, #tpu.memory_space<vmem>>) attributes {dimension_semantics = [], scalar_prefetch = 0 : i64, scratch_operands = 1 : i64, tpu.core_type = #tpu.core_type<tc>} {
    %cst = arith.constant 0.000000e+00 : f32
    %0 = vector.broadcast %cst : f32 to vector<512x128xf32>
    %c0 = arith.constant 0 : index
    %c0_0 = arith.constant 0 : index
    %c0_1 = arith.constant 0 : index
    %c0_2 = arith.constant 0 : index
    %1 = vector.load %arg0[%c0, %c0_0, %c0_1, %c0_2] : memref<2x18x18x128xf32, #tpu.memory_space<vmem>>, vector<2x16x16x128xf32>
    %2 = vector.shape_cast %1 : vector<2x16x16x128xf32> to vector<512x128xf32>
    %c0_3 = arith.constant 0 : index
    %c0_4 = arith.constant 0 : index
    %3 = vector.load %arg1[%c0_3, %c0_4] : memref<1152x128xf32, #tpu.memory_space<vmem>>, vector<128x128xf32>
    %cst_5 = arith.constant dense<0.000000e+00> : vector<512x128xf32>
    %4 = tpu.matmul %2, %3, %cst_5 {dimension_numbers = #tpu.dot_dimension_numbers<[1], [0], [0], [1], [0, 0, 1, 1], [], []>} : vector<512x128xf32>, vector<128x128xf32>, vector<512x128xf32> -> vector<512x128xf32>
    %5 = arith.addf %0, %4 : vector<512x128xf32>
    %c0_6 = arith.constant 0 : index
    %c0_7 = arith.constant 0 : index
    %c1 = arith.constant 1 : index
    %c0_8 = arith.constant 0 : index
    %6 = vector.load %arg0[%c0_6, %c0_7, %c1, %c0_8] : memref<2x18x18x128xf32, #tpu.memory_space<vmem>>, vector<2x16x16x128xf32>
    %7 = vector.shape_cast %6 : vector<2x16x16x128xf32> to vector<512x128xf32>
    %c128 = arith.constant 128 : index
    %c0_9 = arith.constant 0 : index
    %8 = vector.load %arg1[%c128, %c0_9] : memref<1152x128xf32, #tpu.memory_space<vmem>>, vector<128x128xf32>
    %cst_10 = arith.constant dense<0.000000e+00> : vector<512x128xf32>
    %9 = tpu.matmul %7, %8, %cst_10 {dimension_numbers = #tpu.dot_dimension_numbers<[1], [0], [0], [1], [0, 0, 1, 1], [], []>} : vector<512x128xf32>, vector<128x128xf32>, vector<512x128xf32> -> vector<512x128xf32>
    %10 = arith.addf %5, %9 : vector<512x128xf32>
    %c0_11 = arith.constant 0 : index
    %c0_12 = arith.constant 0 : index
    %c2 = arith.constant 2 : index
    %c0_13 = arith.constant 0 : index
    %11 = vector.load %arg0[%c0_11, %c0_12, %c2, %c0_13] : memref<2x18x18x128xf32, #tpu.memory_space<vmem>>, vector<2x16x16x128xf32>
    %12 = vector.shape_cast %11 : vector<2x16x16x128xf32> to vector<512x128xf32>
    %c256 = arith.constant 256 : index
    %c0_14 = arith.constant 0 : index
    %13 = vector.load %arg1[%c256, %c0_14] : memref<1152x128xf32, #tpu.memory_space<vmem>>, vector<128x128xf32>
    %cst_15 = arith.constant dense<0.000000e+00> : vector<512x128xf32>
    %14 = tpu.matmul %12, %13, %cst_15 {dimension_numbers = #tpu.dot_dimension_numbers<[1], [0], [0], [1], [0, 0, 1, 1], [], []>} : vector<512x128xf32>, vector<128x128xf32>, vector<512x128xf32> -> vector<512x128xf32>
    %15 = arith.addf %10, %14 : vector<512x128xf32>
    %c0_16 = arith.constant 0 : index
    %c1_17 = arith.constant 1 : index
    %c0_18 = arith.constant 0 : index
    %c0_19 = arith.constant 0 : index
    %16 = vector.load %arg0[%c0_16, %c1_17, %c0_18, %c0_19] : memref<2x18x18x128xf32, #tpu.memory_space<vmem>>, vector<2x16x16x128xf32>
    %17 = vector.shape_cast %16 : vector<2x16x16x128xf32> to vector<512x128xf32>
    %c384 = arith.constant 384 : index
    %c0_20 = arith.constant 0 : index
    %18 = vector.load %arg1[%c384, %c0_20] : memref<1152x128xf32, #tpu.memory_space<vmem>>, vector<128x128xf32>
    %cst_21 = arith.constant dense<0.000000e+00> : vector<512x128xf32>
    %19 = tpu.matmul %17, %18, %cst_21 {dimension_numbers = #tpu.dot_dimension_numbers<[1], [0], [0], [1], [0, 0, 1, 1], [], []>} : vector<512x128xf32>, vector<128x128xf32>, vector<512x128xf32> -> vector<512x128xf32>
    %20 = arith.addf %15, %19 : vector<512x128xf32>
    %c0_22 = arith.constant 0 : index
    %c1_23 = arith.constant 1 : index
    %c1_24 = arith.constant 1 : index
    %c0_25 = arith.constant 0 : index
    %21 = vector.load %arg0[%c0_22, %c1_23, %c1_24, %c0_25] : memref<2x18x18x128xf32, #tpu.memory_space<vmem>>, vector<2x16x16x128xf32>
    %22 = vector.shape_cast %21 : vector<2x16x16x128xf32> to vector<512x128xf32>
    %c512 = arith.constant 512 : index
    %c0_26 = arith.constant 0 : index
    %23 = vector.load %arg1[%c512, %c0_26] : memref<1152x128xf32, #tpu.memory_space<vmem>>, vector<128x128xf32>
    %cst_27 = arith.constant dense<0.000000e+00> : vector<512x128xf32>
    %24 = tpu.matmul %22, %23, %cst_27 {dimension_numbers = #tpu.dot_dimension_numbers<[1], [0], [0], [1], [0, 0, 1, 1], [], []>} : vector<512x128xf32>, vector<128x128xf32>, vector<512x128xf32> -> vector<512x128xf32>
    %25 = arith.addf %20, %24 : vector<512x128xf32>
    %c0_28 = arith.constant 0 : index
    %c1_29 = arith.constant 1 : index
    %c2_30 = arith.constant 2 : index
    %c0_31 = arith.constant 0 : index
    %26 = vector.load %arg0[%c0_28, %c1_29, %c2_30, %c0_31] : memref<2x18x18x128xf32, #tpu.memory_space<vmem>>, vector<2x16x16x128xf32>
    %27 = vector.shape_cast %26 : vector<2x16x16x128xf32> to vector<512x128xf32>
    %c640 = arith.constant 640 : index
    %c0_32 = arith.constant 0 : index
    %28 = vector.load %arg1[%c640, %c0_32] : memref<1152x128xf32, #tpu.memory_space<vmem>>, vector<128x128xf32>
    %cst_33 = arith.constant dense<0.000000e+00> : vector<512x128xf32>
    %29 = tpu.matmul %27, %28, %cst_33 {dimension_numbers = #tpu.dot_dimension_numbers<[1], [0], [0], [1], [0, 0, 1, 1], [], []>} : vector<512x128xf32>, vector<128x128xf32>, vector<512x128xf32> -> vector<512x128xf32>
    %30 = arith.addf %25, %29 : vector<512x128xf32>
    %c0_34 = arith.constant 0 : index
    %c2_35 = arith.constant 2 : index
    %c0_36 = arith.constant 0 : index
    %c0_37 = arith.constant 0 : index
    %31 = vector.load %arg0[%c0_34, %c2_35, %c0_36, %c0_37] : memref<2x18x18x128xf32, #tpu.memory_space<vmem>>, vector<2x16x16x128xf32>
    %32 = vector.shape_cast %31 : vector<2x16x16x128xf32> to vector<512x128xf32>
    %c768 = arith.constant 768 : index
    %c0_38 = arith.constant 0 : index
    %33 = vector.load %arg1[%c768, %c0_38] : memref<1152x128xf32, #tpu.memory_space<vmem>>, vector<128x128xf32>
    %cst_39 = arith.constant dense<0.000000e+00> : vector<512x128xf32>
    %34 = tpu.matmul %32, %33, %cst_39 {dimension_numbers = #tpu.dot_dimension_numbers<[1], [0], [0], [1], [0, 0, 1, 1], [], []>} : vector<512x128xf32>, vector<128x128xf32>, vector<512x128xf32> -> vector<512x128xf32>
    %35 = arith.addf %30, %34 : vector<512x128xf32>
    %c0_40 = arith.constant 0 : index
    %c2_41 = arith.constant 2 : index
    %c1_42 = arith.constant 1 : index
    %c0_43 = arith.constant 0 : index
    %36 = vector.load %arg0[%c0_40, %c2_41, %c1_42, %c0_43] : memref<2x18x18x128xf32, #tpu.memory_space<vmem>>, vector<2x16x16x128xf32>
    %37 = vector.shape_cast %36 : vector<2x16x16x128xf32> to vector<512x128xf32>
    %c896 = arith.constant 896 : index
    %c0_44 = arith.constant 0 : index
    %38 = vector.load %arg1[%c896, %c0_44] : memref<1152x128xf32, #tpu.memory_space<vmem>>, vector<128x128xf32>
    %cst_45 = arith.constant dense<0.000000e+00> : vector<512x128xf32>
    %39 = tpu.matmul %37, %38, %cst_45 {dimension_numbers = #tpu.dot_dimension_numbers<[1], [0], [0], [1], [0, 0, 1, 1], [], []>} : vector<512x128xf32>, vector<128x128xf32>, vector<512x128xf32> -> vector<512x128xf32>
    %40 = arith.addf %35, %39 : vector<512x128xf32>
    %c0_46 = arith.constant 0 : index
    %c2_47 = arith.constant 2 : index
    %c2_48 = arith.constant 2 : index
    %c0_49 = arith.constant 0 : index
    %41 = vector.load %arg0[%c0_46, %c2_47, %c2_48, %c0_49] : memref<2x18x18x128xf32, #tpu.memory_space<vmem>>, vector<2x16x16x128xf32>
    %42 = vector.shape_cast %41 : vector<2x16x16x128xf32> to vector<512x128xf32>
    %c1024 = arith.constant 1024 : index
    %c0_50 = arith.constant 0 : index
    %43 = vector.load %arg1[%c1024, %c0_50] : memref<1152x128xf32, #tpu.memory_space<vmem>>, vector<128x128xf32>
    %cst_51 = arith.constant dense<0.000000e+00> : vector<512x128xf32>
    %44 = tpu.matmul %42, %43, %cst_51 {dimension_numbers = #tpu.dot_dimension_numbers<[1], [0], [0], [1], [0, 0, 1, 1], [], []>} : vector<512x128xf32>, vector<128x128xf32>, vector<512x128xf32> -> vector<512x128xf32>
    %45 = arith.addf %40, %44 : vector<512x128xf32>
    %c0_52 = arith.constant 0 : index
    %c0_53 = arith.constant 0 : index
    %46 = vector.load %arg3[%c0_52, %c0_53] : memref<1x128xf32, #tpu.memory_space<vmem>>, vector<1x128xf32>
    %c0_54 = arith.constant 0 : index
    %c0_55 = arith.constant 0 : index
    %47 = vector.load %arg4[%c0_54, %c0_55] : memref<1x128xf32, #tpu.memory_space<vmem>>, vector<1x128xf32>
    %cst_56 = arith.constant dense<0.000000e+00> : vector<128xf32>
    %48 = vector.multi_reduction <add>, %45, %cst_56 [0] : vector<512x128xf32> to vector<128xf32>
    %49 = vector.shape_cast %48 : vector<128xf32> to vector<1x128xf32>
    %cst_57 = arith.constant 0.001953125 : f32
    %50 = vector.broadcast %cst_57 : f32 to vector<1x128xf32>
    %51 = arith.mulf %49, %50 : vector<1x128xf32>
    %52 = vector.broadcast %51 : vector<1x128xf32> to vector<512x128xf32>
    %53 = arith.subf %45, %52 : vector<512x128xf32>
    %54 = arith.mulf %53, %53 : vector<512x128xf32>
    %cst_58 = arith.constant dense<0.000000e+00> : vector<128xf32>
    %55 = vector.multi_reduction <add>, %54, %cst_58 [0] : vector<512x128xf32> to vector<128xf32>
    %56 = vector.shape_cast %55 : vector<128xf32> to vector<1x128xf32>
    %cst_59 = arith.constant 0.001953125 : f32
    %57 = vector.broadcast %cst_59 : f32 to vector<1x128xf32>
    %58 = arith.mulf %56, %57 : vector<1x128xf32>
    %cst_60 = arith.constant 9.99999974E-6 : f32
    %59 = vector.broadcast %cst_60 : f32 to vector<1x128xf32>
    %60 = arith.addf %58, %59 : vector<1x128xf32>
    %61 = math.rsqrt %60 : vector<1x128xf32>
    %62 = arith.mulf %46, %61 : vector<1x128xf32>
    %63 = vector.broadcast %62 : vector<1x128xf32> to vector<512x128xf32>
    %64 = arith.mulf %53, %63 : vector<512x128xf32>
    %65 = vector.broadcast %47 : vector<1x128xf32> to vector<512x128xf32>
    %66 = arith.addf %64, %65 : vector<512x128xf32>
    %cst_61 = arith.constant 0.000000e+00 : f32
    %67 = vector.broadcast %cst_61 : f32 to vector<512x128xf32>
    %68 = arith.maximumf %66, %67 : vector<512x128xf32>
    %cst_62 = arith.constant 0.000000e+00 : f32
    %69 = vector.broadcast %cst_62 : f32 to vector<2x1x18x128xf32>
    %cst_63 = arith.constant 0.000000e+00 : f32
    %70 = vector.broadcast %cst_63 : f32 to vector<2x18x1x128xf32>
    %c0_64 = arith.constant 0 : index
    %c0_65 = arith.constant 0 : index
    %c0_66 = arith.constant 0 : index
    %c0_67 = arith.constant 0 : index
    %71 = vector.load %arg8[%c0_64, %c0_65, %c0_66, %c0_67] : memref<2x18x18x128xf32, #tpu.memory_space<vmem>>, vector<2x1x18x128xf32>
    tpu.vector_store %arg8[%c0_64, %c0_65, %c0_66, %c0_67], %69 {strides = array<i32>} : memref<2x18x18x128xf32, #tpu.memory_space<vmem>>, vector<2x1x18x128xf32>,
    %c0_68 = arith.constant 0 : index
    %c17 = arith.constant 17 : index
    %c0_69 = arith.constant 0 : index
    %c0_70 = arith.constant 0 : index
    %72 = vector.load %arg8[%c0_68, %c17, %c0_69, %c0_70] : memref<2x18x18x128xf32, #tpu.memory_space<vmem>>, vector<2x1x18x128xf32>
    tpu.vector_store %arg8[%c0_68, %c17, %c0_69, %c0_70], %69 {strides = array<i32>} : memref<2x18x18x128xf32, #tpu.memory_space<vmem>>, vector<2x1x18x128xf32>,
    %c0_71 = arith.constant 0 : index
    %c0_72 = arith.constant 0 : index
    %c0_73 = arith.constant 0 : index
    %c0_74 = arith.constant 0 : index
    %73 = vector.load %arg8[%c0_71, %c0_72, %c0_73, %c0_74] : memref<2x18x18x128xf32, #tpu.memory_space<vmem>>, vector<2x18x1x128xf32>
    tpu.vector_store %arg8[%c0_71, %c0_72, %c0_73, %c0_74], %70 {strides = array<i32>} : memref<2x18x18x128xf32, #tpu.memory_space<vmem>>, vector<2x18x1x128xf32>,
    %c0_75 = arith.constant 0 : index
    %c0_76 = arith.constant 0 : index
    %c17_77 = arith.constant 17 : index
    %c0_78 = arith.constant 0 : index
    %74 = vector.load %arg8[%c0_75, %c0_76, %c17_77, %c0_78] : memref<2x18x18x128xf32, #tpu.memory_space<vmem>>, vector<2x18x1x128xf32>
    tpu.vector_store %arg8[%c0_75, %c0_76, %c17_77, %c0_78], %70 {strides = array<i32>} : memref<2x18x18x128xf32, #tpu.memory_space<vmem>>, vector<2x18x1x128xf32>,
    %75 = vector.shape_cast %68 : vector<512x128xf32> to vector<2x16x16x128xf32>
    %c0_79 = arith.constant 0 : index
    %c1_80 = arith.constant 1 : index
    %c1_81 = arith.constant 1 : index
    %c0_82 = arith.constant 0 : index
    %76 = vector.load %arg8[%c0_79, %c1_80, %c1_81, %c0_82] : memref<2x18x18x128xf32, #tpu.memory_space<vmem>>, vector<2x16x16x128xf32>
    tpu.vector_store %arg8[%c0_79, %c1_80, %c1_81, %c0_82], %75 {strides = array<i32>} : memref<2x18x18x128xf32, #tpu.memory_space<vmem>>, vector<2x16x16x128xf32>,
    %cst_83 = arith.constant 0.000000e+00 : f32
    %77 = vector.broadcast %cst_83 : f32 to vector<512x128xf32>
    %c0_84 = arith.constant 0 : index
    %c0_85 = arith.constant 0 : index
    %c0_86 = arith.constant 0 : index
    %c0_87 = arith.constant 0 : index
    %78 = vector.load %arg8[%c0_84, %c0_85, %c0_86, %c0_87] : memref<2x18x18x128xf32, #tpu.memory_space<vmem>>, vector<2x16x16x128xf32>
    %79 = vector.shape_cast %78 : vector<2x16x16x128xf32> to vector<512x128xf32>
    %c0_88 = arith.constant 0 : index
    %c0_89 = arith.constant 0 : index
    %80 = vector.load %arg2[%c0_88, %c0_89] : memref<1152x128xf32, #tpu.memory_space<vmem>>, vector<128x128xf32>
    %cst_90 = arith.constant dense<0.000000e+00> : vector<512x128xf32>
    %81 = tpu.matmul %79, %80, %cst_90 {dimension_numbers = #tpu.dot_dimension_numbers<[1], [0], [0], [1], [0, 0, 1, 1], [], []>} : vector<512x128xf32>, vector<128x128xf32>, vector<512x128xf32> -> vector<512x128xf32>
    %82 = arith.addf %77, %81 : vector<512x128xf32>
    %c0_91 = arith.constant 0 : index
    %c0_92 = arith.constant 0 : index
    %c1_93 = arith.constant 1 : index
    %c0_94 = arith.constant 0 : index
    %83 = vector.load %arg8[%c0_91, %c0_92, %c1_93, %c0_94] : memref<2x18x18x128xf32, #tpu.memory_space<vmem>>, vector<2x16x16x128xf32>
    %84 = vector.shape_cast %83 : vector<2x16x16x128xf32> to vector<512x128xf32>
    %c128_95 = arith.constant 128 : index
    %c0_96 = arith.constant 0 : index
    %85 = vector.load %arg2[%c128_95, %c0_96] : memref<1152x128xf32, #tpu.memory_space<vmem>>, vector<128x128xf32>
    %cst_97 = arith.constant dense<0.000000e+00> : vector<512x128xf32>
    %86 = tpu.matmul %84, %85, %cst_97 {dimension_numbers = #tpu.dot_dimension_numbers<[1], [0], [0], [1], [0, 0, 1, 1], [], []>} : vector<512x128xf32>, vector<128x128xf32>, vector<512x128xf32> -> vector<512x128xf32>
    %87 = arith.addf %82, %86 : vector<512x128xf32>
    %c0_98 = arith.constant 0 : index
    %c0_99 = arith.constant 0 : index
    %c2_100 = arith.constant 2 : index
    %c0_101 = arith.constant 0 : index
    %88 = vector.load %arg8[%c0_98, %c0_99, %c2_100, %c0_101] : memref<2x18x18x128xf32, #tpu.memory_space<vmem>>, vector<2x16x16x128xf32>
    %89 = vector.shape_cast %88 : vector<2x16x16x128xf32> to vector<512x128xf32>
    %c256_102 = arith.constant 256 : index
    %c0_103 = arith.constant 0 : index
    %90 = vector.load %arg2[%c256_102, %c0_103] : memref<1152x128xf32, #tpu.memory_space<vmem>>, vector<128x128xf32>
    %cst_104 = arith.constant dense<0.000000e+00> : vector<512x128xf32>
    %91 = tpu.matmul %89, %90, %cst_104 {dimension_numbers = #tpu.dot_dimension_numbers<[1], [0], [0], [1], [0, 0, 1, 1], [], []>} : vector<512x128xf32>, vector<128x128xf32>, vector<512x128xf32> -> vector<512x128xf32>
    %92 = arith.addf %87, %91 : vector<512x128xf32>
    %c0_105 = arith.constant 0 : index
    %c1_106 = arith.constant 1 : index
    %c0_107 = arith.constant 0 : index
    %c0_108 = arith.constant 0 : index
    %93 = vector.load %arg8[%c0_105, %c1_106, %c0_107, %c0_108] : memref<2x18x18x128xf32, #tpu.memory_space<vmem>>, vector<2x16x16x128xf32>
    %94 = vector.shape_cast %93 : vector<2x16x16x128xf32> to vector<512x128xf32>
    %c384_109 = arith.constant 384 : index
    %c0_110 = arith.constant 0 : index
    %95 = vector.load %arg2[%c384_109, %c0_110] : memref<1152x128xf32, #tpu.memory_space<vmem>>, vector<128x128xf32>
    %cst_111 = arith.constant dense<0.000000e+00> : vector<512x128xf32>
    %96 = tpu.matmul %94, %95, %cst_111 {dimension_numbers = #tpu.dot_dimension_numbers<[1], [0], [0], [1], [0, 0, 1, 1], [], []>} : vector<512x128xf32>, vector<128x128xf32>, vector<512x128xf32> -> vector<512x128xf32>
    %97 = arith.addf %92, %96 : vector<512x128xf32>
    %c0_112 = arith.constant 0 : index
    %c1_113 = arith.constant 1 : index
    %c1_114 = arith.constant 1 : index
    %c0_115 = arith.constant 0 : index
    %98 = vector.load %arg8[%c0_112, %c1_113, %c1_114, %c0_115] : memref<2x18x18x128xf32, #tpu.memory_space<vmem>>, vector<2x16x16x128xf32>
    %99 = vector.shape_cast %98 : vector<2x16x16x128xf32> to vector<512x128xf32>
    %c512_116 = arith.constant 512 : index
    %c0_117 = arith.constant 0 : index
    %100 = vector.load %arg2[%c512_116, %c0_117] : memref<1152x128xf32, #tpu.memory_space<vmem>>, vector<128x128xf32>
    %cst_118 = arith.constant dense<0.000000e+00> : vector<512x128xf32>
    %101 = tpu.matmul %99, %100, %cst_118 {dimension_numbers = #tpu.dot_dimension_numbers<[1], [0], [0], [1], [0, 0, 1, 1], [], []>} : vector<512x128xf32>, vector<128x128xf32>, vector<512x128xf32> -> vector<512x128xf32>
    %102 = arith.addf %97, %101 : vector<512x128xf32>
    %c0_119 = arith.constant 0 : index
    %c1_120 = arith.constant 1 : index
    %c2_121 = arith.constant 2 : index
    %c0_122 = arith.constant 0 : index
    %103 = vector.load %arg8[%c0_119, %c1_120, %c2_121, %c0_122] : memref<2x18x18x128xf32, #tpu.memory_space<vmem>>, vector<2x16x16x128xf32>
    %104 = vector.shape_cast %103 : vector<2x16x16x128xf32> to vector<512x128xf32>
    %c640_123 = arith.constant 640 : index
    %c0_124 = arith.constant 0 : index
    %105 = vector.load %arg2[%c640_123, %c0_124] : memref<1152x128xf32, #tpu.memory_space<vmem>>, vector<128x128xf32>
    %cst_125 = arith.constant dense<0.000000e+00> : vector<512x128xf32>
    %106 = tpu.matmul %104, %105, %cst_125 {dimension_numbers = #tpu.dot_dimension_numbers<[1], [0], [0], [1], [0, 0, 1, 1], [], []>} : vector<512x128xf32>, vector<128x128xf32>, vector<512x128xf32> -> vector<512x128xf32>
    %107 = arith.addf %102, %106 : vector<512x128xf32>
    %c0_126 = arith.constant 0 : index
    %c2_127 = arith.constant 2 : index
    %c0_128 = arith.constant 0 : index
    %c0_129 = arith.constant 0 : index
    %108 = vector.load %arg8[%c0_126, %c2_127, %c0_128, %c0_129] : memref<2x18x18x128xf32, #tpu.memory_space<vmem>>, vector<2x16x16x128xf32>
    %109 = vector.shape_cast %108 : vector<2x16x16x128xf32> to vector<512x128xf32>
    %c768_130 = arith.constant 768 : index
    %c0_131 = arith.constant 0 : index
    %110 = vector.load %arg2[%c768_130, %c0_131] : memref<1152x128xf32, #tpu.memory_space<vmem>>, vector<128x128xf32>
    %cst_132 = arith.constant dense<0.000000e+00> : vector<512x128xf32>
    %111 = tpu.matmul %109, %110, %cst_132 {dimension_numbers = #tpu.dot_dimension_numbers<[1], [0], [0], [1], [0, 0, 1, 1], [], []>} : vector<512x128xf32>, vector<128x128xf32>, vector<512x128xf32> -> vector<512x128xf32>
    %112 = arith.addf %107, %111 : vector<512x128xf32>
    %c0_133 = arith.constant 0 : index
    %c2_134 = arith.constant 2 : index
    %c1_135 = arith.constant 1 : index
    %c0_136 = arith.constant 0 : index
    %113 = vector.load %arg8[%c0_133, %c2_134, %c1_135, %c0_136] : memref<2x18x18x128xf32, #tpu.memory_space<vmem>>, vector<2x16x16x128xf32>
    %114 = vector.shape_cast %113 : vector<2x16x16x128xf32> to vector<512x128xf32>
    %c896_137 = arith.constant 896 : index
    %c0_138 = arith.constant 0 : index
    %115 = vector.load %arg2[%c896_137, %c0_138] : memref<1152x128xf32, #tpu.memory_space<vmem>>, vector<128x128xf32>
    %cst_139 = arith.constant dense<0.000000e+00> : vector<512x128xf32>
    %116 = tpu.matmul %114, %115, %cst_139 {dimension_numbers = #tpu.dot_dimension_numbers<[1], [0], [0], [1], [0, 0, 1, 1], [], []>} : vector<512x128xf32>, vector<128x128xf32>, vector<512x128xf32> -> vector<512x128xf32>
    %117 = arith.addf %112, %116 : vector<512x128xf32>
    %c0_140 = arith.constant 0 : index
    %c2_141 = arith.constant 2 : index
    %c2_142 = arith.constant 2 : index
    %c0_143 = arith.constant 0 : index
    %118 = vector.load %arg8[%c0_140, %c2_141, %c2_142, %c0_143] : memref<2x18x18x128xf32, #tpu.memory_space<vmem>>, vector<2x16x16x128xf32>
    %119 = vector.shape_cast %118 : vector<2x16x16x128xf32> to vector<512x128xf32>
    %c1024_144 = arith.constant 1024 : index
    %c0_145 = arith.constant 0 : index
    %120 = vector.load %arg2[%c1024_144, %c0_145] : memref<1152x128xf32, #tpu.memory_space<vmem>>, vector<128x128xf32>
    %cst_146 = arith.constant dense<0.000000e+00> : vector<512x128xf32>
    %121 = tpu.matmul %119, %120, %cst_146 {dimension_numbers = #tpu.dot_dimension_numbers<[1], [0], [0], [1], [0, 0, 1, 1], [], []>} : vector<512x128xf32>, vector<128x128xf32>, vector<512x128xf32> -> vector<512x128xf32>
    %122 = arith.addf %117, %121 : vector<512x128xf32>
    %c0_147 = arith.constant 0 : index
    %c0_148 = arith.constant 0 : index
    %123 = vector.load %arg5[%c0_147, %c0_148] : memref<1x128xf32, #tpu.memory_space<vmem>>, vector<1x128xf32>
    %c0_149 = arith.constant 0 : index
    %c0_150 = arith.constant 0 : index
    %124 = vector.load %arg6[%c0_149, %c0_150] : memref<1x128xf32, #tpu.memory_space<vmem>>, vector<1x128xf32>
    %cst_151 = arith.constant dense<0.000000e+00> : vector<128xf32>
    %125 = vector.multi_reduction <add>, %122, %cst_151 [0] : vector<512x128xf32> to vector<128xf32>
    %126 = vector.shape_cast %125 : vector<128xf32> to vector<1x128xf32>
    %cst_152 = arith.constant 0.001953125 : f32
    %127 = vector.broadcast %cst_152 : f32 to vector<1x128xf32>
    %128 = arith.mulf %126, %127 : vector<1x128xf32>
    %129 = vector.broadcast %128 : vector<1x128xf32> to vector<512x128xf32>
    %130 = arith.subf %122, %129 : vector<512x128xf32>
    %131 = arith.mulf %130, %130 : vector<512x128xf32>
    %cst_153 = arith.constant dense<0.000000e+00> : vector<128xf32>
    %132 = vector.multi_reduction <add>, %131, %cst_153 [0] : vector<512x128xf32> to vector<128xf32>
    %133 = vector.shape_cast %132 : vector<128xf32> to vector<1x128xf32>
    %cst_154 = arith.constant 0.001953125 : f32
    %134 = vector.broadcast %cst_154 : f32 to vector<1x128xf32>
    %135 = arith.mulf %133, %134 : vector<1x128xf32>
    %cst_155 = arith.constant 9.99999974E-6 : f32
    %136 = vector.broadcast %cst_155 : f32 to vector<1x128xf32>
    %137 = arith.addf %135, %136 : vector<1x128xf32>
    %138 = math.rsqrt %137 : vector<1x128xf32>
    %139 = arith.mulf %123, %138 : vector<1x128xf32>
    %140 = vector.broadcast %139 : vector<1x128xf32> to vector<512x128xf32>
    %141 = arith.mulf %130, %140 : vector<512x128xf32>
    %142 = vector.broadcast %124 : vector<1x128xf32> to vector<512x128xf32>
    %143 = arith.addf %141, %142 : vector<512x128xf32>
    %c0_156 = arith.constant 0 : index
    %c1_157 = arith.constant 1 : index
    %c1_158 = arith.constant 1 : index
    %c0_159 = arith.constant 0 : index
    %144 = vector.load %arg0[%c0_156, %c1_157, %c1_158, %c0_159] : memref<2x18x18x128xf32, #tpu.memory_space<vmem>>, vector<2x16x16x128xf32>
    %145 = vector.shape_cast %144 : vector<2x16x16x128xf32> to vector<512x128xf32>
    %146 = arith.addf %143, %145 : vector<512x128xf32>
    %cst_160 = arith.constant 0.000000e+00 : f32
    %147 = vector.broadcast %cst_160 : f32 to vector<512x128xf32>
    %148 = arith.maximumf %146, %147 : vector<512x128xf32>
    %c0_161 = arith.constant 0 : index
    %c0_162 = arith.constant 0 : index
    %149 = vector.load %arg7[%c0_161, %c0_162] : memref<512x128xf32, #tpu.memory_space<vmem>>, vector<512x128xf32>
    tpu.vector_store %arg7[%c0_161, %c0_162], %148 {strides = array<i32>} : memref<512x128xf32, #tpu.memory_space<vmem>>, vector<512x128xf32>,
    return
  }
}

</mosaic_0001>

<bundles_post_ra>
// kernel: basic_block_forward.1
= control target key start
LH: loop header
LB: loop body
LE: loop exit
PB: predicated region body
PF: predicated region fallthrough
CT: control target
= control target key end

     0   :  { %s22968_s1 = inlined_call_operand.vmem [shape: f32[1152,128], index: 1, kind: input, shape index: {}]   ;;  %s22969_s0 = inlined_call_operand.vmem [shape: f32[2,18,18,128], index: 0, kind: input, shape index: {}]   ;;  %s22970_s2 = inlined_call_operand.vmem [shape: f32[1152,128], index: 2, kind: input, shape index: {}]   ;;  %s22971_s3 = inlined_call_operand.vmem [shape: f32[1,128], index: 3, kind: input, shape index: {}]   ;;  %s22972_s4 = inlined_call_operand.vmem [shape: f32[1,128], index: 4, kind: input, shape index: {}]   ;;  %s22973_s5 = inlined_call_operand.vmem [shape: f32[1,128], index: 5, kind: input, shape index: {}]   ;;  %s22974_s6 = inlined_call_operand.vmem [shape: f32[1,128], index: 6, kind: input, shape index: {}]   ;;  %s22975_s7 = inlined_call_operand.vmem [shape: f32[512,128], index: 7, kind: output, shape index: {}]  }
   0x1   :  { %v185_v0 = vld [vmem:[%s22968_s1 + $0xf8] sm:$0xff]  ;;  %v184_v2 = vld [vmem:[%s22968_s1 + $0xf0] sm:$0xff]  ;;  %v183_v4 = vld [vmem:[%s22968_s1 + $0xe8] sm:$0xff] }
   0x2   :  { %v105_v1 = vld [vmem:[%s22968_s1 + $0x78] sm:$0xff]  ;;  %12485 = vmatprep.subr.mxu0 %v185_v0  ;;  %v104_v3 = vld [vmem:[%s22968_s1 + $0x70] sm:$0xff]  ;;  %v103_v5 = vld [vmem:[%s22968_s1 + $0x68] sm:$0xff] }
   0x3   :  { %12613 = vmatprep.subr.mxu1 %v105_v1  ;;  %12486 = vmatpush3.msra.mxu0 %v185_v0  ;;  %v182_v6 = vld [vmem:[%s22968_s1 + $0xe0] sm:$0xff]  ;;  %v181_v8 = vld [vmem:[%s22968_s1 + $0xd8] sm:$0xff]  ;;  %v180_v10 = vld [vmem:[%s22968_s1 + $0xd0] sm:$0xff] }
   0x4   :  { %12614 = vmatpush3.msra.mxu1 %v105_v1  ;;  %12487 = vmatprep.subr.mxu0 %v184_v2  ;;  %v102_v7 = vld [vmem:[%s22968_s1 + $0x60] sm:$0xff]  ;;  %v101_v9 = vld [vmem:[%s22968_s1 + $0x58] sm:$0xff]  ;;  %v100_v11 = vld [vmem:[%s22968_s1 + $0x50] sm:$0xff] }
   0x5   :  { %12615 = vmatprep.subr.mxu1 %v104_v3  ;;  %12488 = vmatpush3.msra.mxu0 %v184_v2  ;;  %v179_v12 = vld [vmem:[%s22968_s1 + $0xc8] sm:$0xff]  ;;  %v178_v14 = vld [vmem:[%s22968_s1 + $0xc0] sm:$0xff]  ;;  %v177_v16 = vld [vmem:[%s22968_s1 + $0xb8] sm:$0xff] }
   0x6   :  { %12616 = vmatpush3.msra.mxu1 %v104_v3  ;;  %12489 = vmatprep.subr.mxu0 %v183_v4  ;;  %v99_v13 = vld [vmem:[%s22968_s1 + $0x48] sm:$0xff]  ;;  %v98_v15 = vld [vmem:[%s22968_s1 + $0x40] sm:$0xff]  ;;  %v97_v17 = vld [vmem:[%s22968_s1 + $0x38] sm:$0xff] }
   0x7   :  { %12617 = vmatprep.subr.mxu1 %v103_v5  ;;  %12490 = vmatpush3.msra.mxu0 %v183_v4  ;;  %v176_v18 = vld [vmem:[%s22968_s1 + $0xb0] sm:$0xff]  ;;  %v175_v20 = vld [vmem:[%s22968_s1 + $0xa8] sm:$0xff]  ;;  %v174_v22 = vld [vmem:[%s22968_s1 + $0xa0] sm:$0xff] }
   0x8   :  { %12618 = vmatpush3.msra.mxu1 %v103_v5  ;;  %12491 = vmatprep.subr.mxu0 %v182_v6  ;;  %v96_v19 = vld [vmem:[%s22968_s1 + $0x30] sm:$0xff]  ;;  %v95_v21 = vld [vmem:[%s22968_s1 + $0x28] sm:$0xff]  ;;  %v94_v23 = vld [vmem:[%s22968_s1 + $0x20] sm:$0xff] }
   0x9   :  { %12619 = vmatprep.subr.mxu1 %v102_v7  ;;  %12492 = vmatpush3.msra.mxu0 %v182_v6  ;;  %v173_v24 = vld [vmem:[%s22968_s1 + $0x98] sm:$0xff]  ;;  %v172_v26 = vld [vmem:[%s22968_s1 + $0x90] sm:$0xff]  ;;  %v171_v28 = vld [vmem:[%s22968_s1 + $0x88] sm:$0xff] }
   0xa   :  { %12620 = vmatpush3.msra.mxu1 %v102_v7  ;;  %12493 = vmatprep.subr.mxu0 %v181_v8  ;;  %v93_v25 = vld [vmem:[%s22968_s1 + $0x18] sm:$0xff]  ;;  %v92_v27 = vld [vmem:[%s22968_s1 + $0x10] sm:$0xff]  ;;  %v91_v29 = vld [vmem:[%s22968_s1 + $0x8] sm:$0xff] }
   0xb   :  { %12621 = vmatprep.subr.mxu1 %v101_v9  ;;  %12494 = vmatpush3.msra.mxu0 %v181_v8  ;;  %v170_v30 = vld [vmem:[%s22968_s1 + $0x80] sm:$0xff]  ;;  %v107_v34 = vld [vmem:[%s22969_s0 + $0x9] sm:$0xff]  ;;  %v1035_v36 = vld [vmem:[%s22968_s1 + $0x178] sm:$0xff] }
   0xc   :  { %12622 = vmatpush3.msra.mxu1 %v101_v9  ;;  %12495 = vmatprep.subr.mxu0 %v180_v10  ;;  %v90_v31 = vld [vmem:[%s22968_s1] sm:$0xff]  ;;  %v27_v35 = vld [vmem:[%s22969_s0 + $0x8] sm:$0xff]  ;;  %v14954_v38 = vld [vmem:[%s22969_s0 + $0x18] sm:$0xff] }
   0xd   :  { %12623 = vmatprep.subr.mxu1 %v100_v11  ;;  %12496 = vmatpush3.msra.mxu0 %v180_v10  ;;  %v106_v32 = vld [vmem:[%s22969_s0 + $0x1] sm:$0xff]  ;;  %v108_v37 = vld [vmem:[%s22969_s0 + $0x19] sm:$0xff]  ;;  %v1034_v39 = vld [vmem:[%s22968_s1 + $0x170] sm:$0xff] }
   0xe   :  { %12624 = vmatpush3.msra.mxu1 %v100_v11  ;;  %12497 = vmatprep.subr.mxu0 %v179_v12  ;;  %v26_v33 = vld [vmem:[%s22969_s0] sm:$0xff]  ;;  %v110_v42 = vld [vmem:[%s22969_s0 + $0x31] sm:$0xff]  ;;  %v1033_v44 = vld [vmem:[%s22968_s1 + $0x168] sm:$0xff] }
   0xf   :  { %12625 = vmatprep.subr.mxu1 %v99_v13  ;;  %12498 = vmatpush3.msra.mxu0 %v179_v12  ;;  %v109_v40 = vld [vmem:[%s22969_s0 + $0x21] sm:$0xff]  ;;  %v14974_v43 = vld [vmem:[%s22969_s0 + $0x30] sm:$0xff]  ;;  %v111_v45 = vld [vmem:[%s22969_s0 + $0x39] sm:$0xff] }
  0x10   :  { %12626 = vmatpush3.msra.mxu1 %v99_v13  ;;  %12499 = vmatprep.subr.mxu0 %v178_v14  ;;  %v14965_v41 = vld [vmem:[%s22969_s0 + $0x20] sm:$0xff]  ;;  %v14987_v46 = vld [vmem:[%s22969_s0 + $0x38] sm:$0xff]  ;;  %v112_v47 = vld [vmem:[%s22969_s0 + $0x49] sm:$0xff] }
  0x11   :  { %12627 = vmatprep.subr.mxu1 %v98_v15  ;;  %12500 = vmatpush3.msra.mxu0 %v178_v14  ;;  %v14995_v48 = vld [vmem:[%s22969_s0 + $0x48] sm:$0xff]  ;;  %v1032_v49 = vld [vmem:[%s22968_s1 + $0x160] sm:$0xff]  ;;  %v113_v50 = vld [vmem:[%s22969_s0 + $0x51] sm:$0xff] }
  0x12   :  { %12628 = vmatpush3.msra.mxu1 %v98_v15  ;;  %12501 = vmatprep.subr.mxu0 %v177_v16  ;;  %v15008_v51 = vld [vmem:[%s22969_s0 + $0x50] sm:$0xff]  ;;  %v114_v52 = vld [vmem:[%s22969_s0 + $0x61] sm:$0xff]  ;;  %v1031_v54 = vld [vmem:[%s22968_s1 + $0x158] sm:$0xff] }
  0x13   :  { %12629 = vmatprep.subr.mxu1 %v97_v17  ;;  %12502 = vmatpush3.msra.mxu0 %v177_v16  ;;  %v15016_v53 = vld [vmem:[%s22969_s0 + $0x60] sm:$0xff]  ;;  %v115_v55 = vld [vmem:[%s22969_s0 + $0x69] sm:$0xff]  ;;  %v15037_v58 = vld [vmem:[%s22969_s0 + $0x78] sm:$0xff] }
  0x14   :  { %12630 = vmatpush3.msra.mxu1 %v97_v17  ;;  %12503 = vmatprep.subr.mxu0 %v176_v18  ;;  %v15029_v56 = vld [vmem:[%s22969_s0 + $0x68] sm:$0xff]  ;;  %v116_v57 = vld [vmem:[%s22969_s0 + $0x79] sm:$0xff]  ;;  %v1030_v60 = vld [vmem:[%s22968_s1 + $0x150] sm:$0xff] }
  0x15   :  { %12631 = vmatprep.subr.mxu1 %v96_v19  ;;  %12504 = vmatpush3.msra.mxu0 %v176_v18  ;;  %v1565_v59 = vld [vmem:[%s22968_s1 + $0x1f8] sm:$0xff]  ;;  %v1564_v61 = vld [vmem:[%s22968_s1 + $0x1f0] sm:$0xff]  ;;  %v117_v62 = vld [vmem:[%s22969_s0 + $0x81] sm:$0xff] }
  0x16   :  { %12632 = vmatpush3.msra.mxu1 %v96_v19  ;;  %12505 = vmatprep.subr.mxu0 %v175_v20  ;;  %v15056_v63 = vld [vmem:[%s22969_s0 + $0x80] sm:$0xff]  ;;  %v118_v0 = vld [vmem:[%s22969_s0 + $0x91] sm:$0xff]  ;;  %v1029_v2 = vld [vmem:[%s22968_s1 + $0x148] sm:$0xff] }
  0x17   :  { %12633 = vmatprep.subr.mxu1 %v95_v21  ;;  %12506 = vmatpush3.msra.mxu0 %v175_v20  ;;  %v15064_v1 = vld [vmem:[%s22969_s0 + $0x90] sm:$0xff]  ;;  %v1563_v3 = vld [vmem:[%s22968_s1 + $0x1e8] sm:$0xff]  ;;  %v119_v4 = vld [vmem:[%s22969_s0 + $0x99] sm:$0xff] }
  0x18   :  { %12634 = vmatpush3.msra.mxu1 %v95_v21  ;;  %12507 = vmatprep.subr.mxu0 %v174_v22  ;;  %v15080_v5 = vld [vmem:[%s22969_s0 + $0x98] sm:$0xff]  ;;  %v120_v6 = vld [vmem:[%s22969_s0 + $0xa9] sm:$0xff]  ;;  %v1028_v8 = vld [vmem:[%s22968_s1 + $0x140] sm:$0xff] }
  0x19   :  { %12635 = vmatprep.subr.mxu1 %v94_v23  ;;  %12508 = vmatpush3.msra.mxu0 %v174_v22  ;;  %v15088_v7 = vld [vmem:[%s22969_s0 + $0xa8] sm:$0xff]  ;;  %v1562_v9 = vld [vmem:[%s22968_s1 + $0x1e0] sm:$0xff]  ;;  %v121_v10 = vld [vmem:[%s22969_s0 + $0xb1] sm:$0xff] }
  0x1a   :  { %12636 = vmatpush3.msra.mxu1 %v94_v23  ;;  %12509 = vmatprep.subr.mxu0 %v173_v24  ;;  %v15104_v11 = vld [vmem:[%s22969_s0 + $0xb0] sm:$0xff]  ;;  %v122_v12 = vld [vmem:[%s22969_s0 + $0xc1] sm:$0xff]  ;;  %v1027_v14 = vld [vmem:[%s22968_s1 + $0x138] sm:$0xff] }
  0x1b   :  { %12637 = vmatprep.subr.mxu1 %v93_v25  ;;  %12510 = vmatpush3.msra.mxu0 %v173_v24  ;;  %v15112_v13 = vld [vmem:[%s22969_s0 + $0xc0] sm:$0xff]  ;;  %v1561_v15 = vld [vmem:[%s22968_s1 + $0x1d8] sm:$0xff]  ;;  %v123_v16 = vld [vmem:[%s22969_s0 + $0xc9] sm:$0xff] }
  0x1c   :  { %12638 = vmatpush3.msra.mxu1 %v93_v25  ;;  %12511 = vmatprep.subr.mxu0 %v172_v26  ;;  %v15128_v17 = vld [vmem:[%s22969_s0 + $0xc8] sm:$0xff]  ;;  %v124_v18 = vld [vmem:[%s22969_s0 + $0xd9] sm:$0xff]  ;;  %v1026_v20 = vld [vmem:[%s22968_s1 + $0x130] sm:$0xff] }
  0x1d   :  { %12639 = vmatprep.subr.mxu1 %v92_v27  ;;  %12512 = vmatpush3.msra.mxu0 %v172_v26  ;;  %v15136_v19 = vld [vmem:[%s22969_s0 + $0xd8] sm:$0xff]  ;;  %v1560_v21 = vld [vmem:[%s22968_s1 + $0x1d0] sm:$0xff]  ;;  %v125_v22 = vld [vmem:[%s22969_s0 + $0xe1] sm:$0xff] }
  0x1e   :  { %12640 = vmatpush3.msra.mxu1 %v92_v27  ;;  %12513 = vmatprep.subr.mxu0 %v171_v28  ;;  %v15152_v23 = vld [vmem:[%s22969_s0 + $0xe0] sm:$0xff]  ;;  %v126_v24 = vld [vmem:[%s22969_s0 + $0xf1] sm:$0xff]  ;;  %v1025_v26 = vld [vmem:[%s22968_s1 + $0x128] sm:$0xff] }
  0x1f   :  { %12641 = vmatprep.subr.mxu1 %v91_v29  ;;  %12514 = vmatpush3.msra.mxu0 %v171_v28  ;;  %v15160_v25 = vld [vmem:[%s22969_s0 + $0xf0] sm:$0xff]  ;;  %v1559_v27 = vld [vmem:[%s22968_s1 + $0x1c8] sm:$0xff]  ;;  %v127_v28 = vld [vmem:[%s22969_s0 + $0xf9] sm:$0xff] }
  0x20   :  { %12642 = vmatpush3.msra.mxu1 %v91_v29  ;;  %12515 = vmatprep.subr.mxu0 %v170_v30  ;;  %v15176_v29 = vld [vmem:[%s22969_s0 + $0xf8] sm:$0xff] }
  0x21   :  { %12643 = vmatprep.subr.mxu1 %v90_v31  ;;  %12516 = vmatpush3.msra.mxu0 %v170_v30  ;;  %v128_v30 = vld [vmem:[%s22969_s0 + $0x109] sm:$0xff] }
  0x22   :  { %12517 = vmatprep.mubr.f32.mxu0 %v106_v32  ;;  %12644 = vmatpush3.msra.mxu1 %v90_v31  ;;  %v15184_v31 = vld [vmem:[%s22969_s0 + $0x108] sm:$0xff]  ;;  %v1024_v32 = vld [vmem:[%s22968_s1 + $0x120] sm:$0xff] }
  0x23   :  { %12645 = vmatprep.mubr.f32.mxu1 %v26_v33  ;;  %12518 = vmatmul.mubr.f32.vlgmr.msra.gmra.mxu0 %v107_v34  ;;  %v1558_v33 = vld [vmem:[%s22968_s1 + $0x1c0] sm:$0xff]  ;;  %v129_v34 = vld [vmem:[%s22969_s0 + $0x111] sm:$0xff] }
  0x24   :  { %12646 = vmatmul.mubr.f32.vlgmr.msra.gmra.mxu1 %v27_v35  ;;  %12741 = vmatprep.subr.mxu0 %v1035_v36  ;;  %v15200_v35 = vld [vmem:[%s22969_s0 + $0x110] sm:$0xff] }
  0x25   :  { %12520 = vmatprep.mubr.f32.mxu0 %v108_v37  ;;  %12742 = vmatpush3.msra.mxu0 %v1035_v36  ;;  %v130_v36 = vld [vmem:[%s22969_s0 + $0x121] sm:$0xff] }
  0x26   :  { %12648 = vmatprep.mubr.f32.mxu1 %v14954_v38  ;;  %12743 = vmatprep.subr.mxu0 %v1034_v39  ;;  %v15208_v37 = vld [vmem:[%s22969_s0 + $0x120] sm:$0xff] }
  0x27   :  { %12521 = vmatmul.mubr.f32.gmra.mxu0 %v109_v40  ;;  %12869 = vmatprep.subr.mxu1 %v1565_v59  ;;  %v1557_v40 = vld [vmem:[%s22968_s1 + $0x1b8] sm:$0xff] }
  0x28   :  { %12649 = vmatmul.mubr.f32.gmra.mxu1 %v14965_v41  ;;  %12523 = vmatprep.mubr.f32.mxu0 %v110_v42  ;;  %v131_v42 = vld [vmem:[%s22969_s0 + $0x129] sm:$0xff] }
  0x29   :  { %12651 = vmatprep.mubr.f32.mxu1 %v14974_v43  ;;  %12744 = vmatpush3.msra.mxu0 %v1034_v39  ;;  %v1023_v39 = vld [vmem:[%s22968_s1 + $0x118] sm:$0xff] }
  0x2a   :  { %12745 = vmatprep.subr.mxu0 %v1033_v44  ;;  %12870 = vmatpush3.msra.mxu1 %v1565_v59  ;;  %v1021_v59 = vld [vmem:[%s22968_s1 + $0x108] sm:$0xff] }
  0x2b   :  { %12524 = vmatmul.mubr.f32.gmra.mxu0 %v111_v45  ;;  %12871 = vmatprep.subr.mxu1 %v1564_v61  ;;  %v132_v45 = vld [vmem:[%s22969_s0 + $0x139] sm:$0xff] }
  0x2c   :  { %12652 = vmatmul.mubr.f32.gmra.mxu1 %v14987_v46  ;;  %12526 = vmatprep.mubr.f32.mxu0 %v112_v47  ;;  %v15232_v47 = vld [vmem:[%s22969_s0 + $0x138] sm:$0xff] }
  0x2d   :  { %12654 = vmatprep.mubr.f32.mxu1 %v14995_v48  ;;  %12746 = vmatpush3.msra.mxu0 %v1033_v44  ;;  %v15224_v44 = vld [vmem:[%s22969_s0 + $0x128] sm:$0xff] }
  0x2e   :  { %12747 = vmatprep.subr.mxu0 %v1032_v49  ;;  %12872 = vmatpush3.msra.mxu1 %v1564_v61  ;;  %v135_v61 = vld [vmem:[%s22969_s0 + $0x159] sm:$0xff] }
  0x2f   :  { %12527 = vmatmul.mubr.f32.gmra.mxu0 %v113_v50  ;;  %12873 = vmatprep.subr.mxu1 %v1563_v3  ;;  %v1556_v50 = vld [vmem:[%s22968_s1 + $0x1b0] sm:$0xff] }
  0x30   :  { %12655 = vmatmul.mubr.f32.gmra.mxu1 %v15008_v51  ;;  %12529 = vmatprep.mubr.f32.mxu0 %v114_v52  ;;  %v133_v52 = vld [vmem:[%s22969_s0 + $0x141] sm:$0xff] }
  0x31   :  { %12657 = vmatprep.mubr.f32.mxu1 %v15016_v53  ;;  %12748 = vmatpush3.msra.mxu0 %v1032_v49  ;;  %v1022_v49 = vld [vmem:[%s22968_s1 + $0x110] sm:$0xff] }
  0x32   :  { %12749 = vmatprep.subr.mxu0 %v1031_v54  ;;  %12874 = vmatpush3.msra.mxu1 %v1563_v3  ;;  %v1020_v3 = vld [vmem:[%s22968_s1 + $0x100] sm:$0xff] }
  0x33   :  { %12530 = vmatmul.mubr.f32.gmra.mxu0 %v115_v55  ;;  %12875 = vmatprep.subr.mxu1 %v1562_v9  ;;  %v134_v55 = vld [vmem:[%s22969_s0 + $0x151] sm:$0xff] }
  0x34   :  { %12658 = vmatmul.mubr.f32.gmra.mxu1 %v15029_v56  ;;  %12532 = vmatprep.mubr.f32.mxu0 %v116_v57  ;;  %v15256_v57 = vld [vmem:[%s22969_s0 + $0x150] sm:$0xff] }
  0x35   :  { %12660 = vmatprep.mubr.f32.mxu1 %v15037_v58  ;;  %12750 = vmatpush3.msra.mxu0 %v1031_v54  ;;  %v15248_v54 = vld [vmem:[%s22969_s0 + $0x140] sm:$0xff] }
  0x36   :  { %12751 = vmatprep.subr.mxu0 %v1030_v60  ;;  %12876 = vmatpush3.msra.mxu1 %v1562_v9  ;;  %v138_v9 = vld [vmem:[%s22969_s0 + $0x1b1] sm:$0xff] }
  0x37   :  { %12533 = vmatmul.mubr.f32.gmra.mxu0 %v117_v62  ;;  %12877 = vmatprep.subr.mxu1 %v1561_v15  ;;  %v15272_v62 = vld [vmem:[%s22969_s0 + $0x158] sm:$0xff] }
  0x38   :  { %12661 = vmatmul.mubr.f32.gmra.mxu1 %v15056_v63  ;;  %12535 = vmatprep.mubr.f32.mxu0 %v118_v0  ;;  %v136_v0 = vld [vmem:[%s22969_s0 + $0x169] sm:$0xff] }
  0x39   :  { %12663 = vmatprep.mubr.f32.mxu1 %v15064_v1  ;;  %12752 = vmatpush3.msra.mxu0 %v1030_v60  ;;  %v1555_v60 = vld [vmem:[%s22968_s1 + $0x1a8] sm:$0xff] }
  0x3a   :  { %12753 = vmatprep.subr.mxu0 %v1029_v2  ;;  %12878 = vmatpush3.msra.mxu1 %v1561_v15  ;;  %v139_v15 = vld [vmem:[%s22969_s0 + $0x1b9] sm:$0xff] }
  0x3b   :  { %12536 = vmatmul.mubr.f32.gmra.mxu0 %v119_v4  ;;  %12879 = vmatprep.subr.mxu1 %v1560_v21  ;;  %v1554_v4 = vld [vmem:[%s22968_s1 + $0x1a0] sm:$0xff] }
  0x3c   :  { %12664 = vmatmul.mubr.f32.gmra.mxu1 %v15080_v5  ;;  %12538 = vmatprep.mubr.f32.mxu0 %v120_v6  ;;  %v137_v6 = vld [vmem:[%s22969_s0 + $0x171] sm:$0xff] }
  0x3d   :  { %12666 = vmatprep.mubr.f32.mxu1 %v15088_v7  ;;  %12754 = vmatpush3.msra.mxu0 %v1029_v2  ;;  %v15280_v2 = vld [vmem:[%s22969_s0 + $0x168] sm:$0xff] }
  0x3e   :  { %12755 = vmatprep.subr.mxu0 %v1028_v8  ;;  %12880 = vmatpush3.msra.mxu1 %v1560_v21  ;;  %v1552_v21 = vld [vmem:[%s22968_s1 + $0x190] sm:$0xff] }
  0x3f   :  { %12539 = vmatmul.mubr.f32.gmra.mxu0 %v121_v10  ;;  %12881 = vmatprep.subr.mxu1 %v1559_v27  ;;  %v58_v10 = vld [vmem:[%s22969_s0 + $0x1b0] sm:$0xff] }
  0x40   :  { %12667 = vmatmul.mubr.f32.gmra.mxu1 %v15104_v11  ;;  %12541 = vmatprep.mubr.f32.mxu0 %v122_v12  ;;  %v1553_v12 = vld [vmem:[%s22968_s1 + $0x198] sm:$0xff] }
  0x41   :  { %12669 = vmatprep.mubr.f32.mxu1 %v15112_v13  ;;  %12756 = vmatpush3.msra.mxu0 %v1028_v8  ;;  %v15296_v8 = vld [vmem:[%s22969_s0 + $0x170] sm:$0xff] }
  0x42   :  { %12757 = vmatprep.subr.mxu0 %v1027_v14  ;;  %12882 = vmatpush3.msra.mxu1 %v1559_v27  ;;  %v15346_v27 = vld [vmem:[%s22969_s0 + $0x1e0] sm:$0xff] }
  0x43   :  { %12542 = vmatmul.mubr.f32.gmra.mxu0 %v123_v16  ;;  %12883 = vmatprep.subr.mxu1 %v1558_v33  ;;  %v59_v16 = vld [vmem:[%s22969_s0 + $0x1b8] sm:$0xff] }
  0x44   :  { %12670 = vmatmul.mubr.f32.gmra.mxu1 %v15128_v17  ;;  %12544 = vmatprep.mubr.f32.mxu0 %v124_v18  ;;  %v140_v18 = vld [vmem:[%s22969_s0 + $0x1c9] sm:$0xff] }
  0x45   :  { %12672 = vmatprep.mubr.f32.mxu1 %v15136_v19  ;;  %12758 = vmatpush3.msra.mxu0 %v1027_v14  ;;  %v15311_v14 = vld [vmem:[%s22968_s1 + $0x278] sm:$0xff] }
  0x46   :  { %12759 = vmatprep.subr.mxu0 %v1026_v20  ;;  %12884 = vmatpush3.msra.mxu1 %v1558_v33  ;;  %v144_v33 = vld [vmem:[%s22969_s0 + $0x1f9] sm:$0xff] }
  0x47   :  { %12545 = vmatmul.mubr.f32.gmra.mxu0 %v125_v22  ;;  %12885 = vmatprep.subr.mxu1 %v1557_v40  ;;  %v141_v22 = vld [vmem:[%s22969_s0 + $0x1d1] sm:$0xff] }
  0x48   :  { %12673 = vmatmul.mubr.f32.gmra.mxu1 %v15152_v23  ;;  %12547 = vmatprep.mubr.f32.mxu0 %v126_v24  ;;  %v15338_v24 = vld [vmem:[%s22969_s0 + $0x1d0] sm:$0xff] }
  0x49   :  { %12675 = vmatprep.mubr.f32.mxu1 %v15160_v25  ;;  %12760 = vmatpush3.msra.mxu0 %v1026_v20  ;;  %v15325_v20 = vld [vmem:[%s22969_s0 + $0x1c8] sm:$0xff] }
  0x4a   :  { %12761 = vmatprep.subr.mxu0 %v1025_v26  ;;  %12886 = vmatpush3.msra.mxu1 %v1557_v40  ;;  %v15380_v40 = vld [vmem:[%s22969_s0 + $0x200] sm:$0xff] }
  0x4b   :  { %12548 = vmatmul.mubr.f32.gmra.mxu0 %v127_v28  ;;  %12887 = vmatprep.subr.mxu1 %v1556_v50  ;;  %v1551_v28 = vld [vmem:[%s22968_s1 + $0x188] sm:$0xff] }
  0x4c   :  { %12676 = vmatmul.mubr.f32.gmra.mxu1 %v15176_v29  ;;  %12550 = vmatprep.mubr.f32.mxu0 %v128_v30  ;;  %v143_v30 = vld [vmem:[%s22969_s0 + $0x1e9] sm:$0xff] }
  0x4d   :  { %12678 = vmatprep.mubr.f32.mxu1 %v15184_v31  ;;  %12762 = vmatpush3.msra.mxu0 %v1025_v26  ;;  %v142_v26 = vld [vmem:[%s22969_s0 + $0x1e1] sm:$0xff] }
  0x4e   :  { %12763 = vmatprep.subr.mxu0 %v1024_v32  ;;  %12888 = vmatpush3.msra.mxu1 %v1556_v50  ;;  %v15398_v50 = vld [vmem:[%s22969_s0 + $0x218] sm:$0xff] }
  0x4f   :  { %12551 = vmatmul.mubr.f32.gmra.mxu0 %v129_v34  ;;  %12889 = vmatprep.subr.mxu1 %v1555_v60  ;;  %v15367_v34 = vld [vmem:[%s22969_s0 + $0x1f8] sm:$0xff] }
  0x50   :  { %12679 = vmatmul.mubr.f32.gmra.mxu1 %v15200_v35  ;;  %12553 = vmatprep.mubr.f32.mxu0 %v130_v36  ;;  %v1550_v36 = vld [vmem:[%s22968_s1 + $0x180] sm:$0xff] }
  0x51   :  { %12681 = vmatprep.mubr.f32.mxu1 %v15208_v37  ;;  %12764 = vmatpush3.msra.mxu0 %v1024_v32  ;;  %v15359_v32 = vld [vmem:[%s22969_s0 + $0x1e8] sm:$0xff] }
  0x52   :  { %12765 = vmatprep.subr.mxu0 %v1023_v39  ;;  %12890 = vmatpush3.msra.mxu1 %v1555_v60  ;;  %v15416_v60 = vld [vmem:[%s22969_s0 + $0x230] sm:$0xff] }
  0x53   :  { %12554 = vmatmul.mubr.f32.gmra.mxu0 %v131_v42  ;;  %12891 = vmatprep.subr.mxu1 %v1554_v4  ;;  %v146_v42 = vld [vmem:[%s22969_s0 + $0x211] sm:$0xff] }
  0x54   :  { %12682 = vmatmul.mubr.f32.gmra.mxu1 %v15224_v44  ;;  %12556 = vmatprep.mubr.f32.mxu0 %v132_v45  ;;  %v15388_v45 = vld [vmem:[%s22969_s0 + $0x210] sm:$0xff] }
  0x55   :  { %12684 = vmatprep.mubr.f32.mxu1 %v15232_v47  ;;  %12766 = vmatpush3.msra.mxu0 %v1023_v39  ;;  %v145_v39 = vld [vmem:[%s22969_s0 + $0x201] sm:$0xff] }
  0x56   :  { %12767 = vmatprep.subr.mxu0 %v1022_v49  ;;  %12892 = vmatpush3.msra.mxu1 %v1554_v4  ;;  %v15434_v4 = vld [vmem:[%s22969_s0 + $0x248] sm:$0xff] }
  0x57   :  { %12557 = vmatmul.mubr.f32.gmra.mxu0 %v133_v52  ;;  %12893 = vmatprep.subr.mxu1 %v1553_v12  ;;  %v148_v52 = vld [vmem:[%s22969_s0 + $0x229] sm:$0xff] }
  0x58   :  { %12685 = vmatmul.mubr.f32.gmra.mxu1 %v15248_v54  ;;  %12559 = vmatprep.mubr.f32.mxu0 %v134_v55  ;;  %v15406_v55 = vld [vmem:[%s22969_s0 + $0x228] sm:$0xff] }
  0x59   :  { %12687 = vmatprep.mubr.f32.mxu1 %v15256_v57  ;;  %12768 = vmatpush3.msra.mxu0 %v1022_v49  ;;  %v147_v49 = vld [vmem:[%s22969_s0 + $0x219] sm:$0xff] }
  0x5a   :  { %12769 = vmatprep.subr.mxu0 %v1021_v59  ;;  %12894 = vmatpush3.msra.mxu1 %v1553_v12  ;;  %v15452_v12 = vld [vmem:[%s22969_s0 + $0x260] sm:$0xff] }
  0x5b   :  { %12560 = vmatmul.mubr.f32.gmra.mxu0 %v135_v61  ;;  %12895 = vmatprep.subr.mxu1 %v1552_v21  ;;  %v150_v61 = vld [vmem:[%s22969_s0 + $0x241] sm:$0xff] }
  0x5c   :  { %12688 = vmatmul.mubr.f32.gmra.mxu1 %v15272_v62  ;;  %12562 = vmatprep.mubr.f32.mxu0 %v136_v0  ;;  %v15424_v0 = vld [vmem:[%s22969_s0 + $0x240] sm:$0xff] }
  0x5d   :  { %12690 = vmatprep.mubr.f32.mxu1 %v15280_v2  ;;  %12770 = vmatpush3.msra.mxu0 %v1021_v59  ;;  %v149_v59 = vld [vmem:[%s22969_s0 + $0x231] sm:$0xff] }
  0x5e   :  { %12771 = vmatprep.subr.mxu0 %v1020_v3  ;;  %12896 = vmatpush3.msra.mxu1 %v1552_v21  ;;  %v15470_v21 = vld [vmem:[%s22969_s0 + $0x278] sm:$0xff] }
  0x5f   :  { %12563 = vmatmul.mubr.f32.gmra.mxu0 %v137_v6  ;;  %12897 = vmatprep.subr.mxu1 %v1551_v28  ;;  %v152_v6 = vld [vmem:[%s22969_s0 + $0x259] sm:$0xff] }
  0x60   :  { %12691 = vmatmul.mubr.f32.gmra.mxu1 %v15296_v8  ;;  %12565 = vmatprep.mubr.f32.mxu0 %v138_v9  ;;  %v15442_v9 = vld [vmem:[%s22969_s0 + $0x258] sm:$0xff] }
  0x61   :  { %12693 = vmatprep.mubr.f32.mxu1 %v58_v10  ;;  %12772 = vmatpush3.msra.mxu0 %v1020_v3  ;;  %v151_v3 = vld [vmem:[%s22969_s0 + $0x249] sm:$0xff]  ;;  %v153_v10 = vld [vmem:[%s22969_s0 + $0x261] sm:$0xff] }
  0x62   :  { %12997 = vmatprep.subr.mxu0 %v15311_v14  ;;  %12898 = vmatpush3.msra.mxu1 %v1551_v28  ;;  %v157_v28 = vld [vmem:[%s22969_s0 + $0x291] sm:$0xff] }
  0x63   :  { %12566 = vmatmul.mubr.f32.gmra.mxu0 %v139_v15  ;;  %12899 = vmatprep.subr.mxu1 %v1550_v36  ;;  %v154_v15 = vld [vmem:[%s22969_s0 + $0x271] sm:$0xff] }
  0x64   :  { %12694 = vmatmul.mubr.f32.gmra.mxu1 %v59_v16  ;;  %12568 = vmatprep.mubr.f32.mxu0 %v140_v18  ;;  %v15460_v16 = vld [vmem:[%s22969_s0 + $0x270] sm:$0xff]  ;;  %v155_v18 = vld [vmem:[%s22969_s0 + $0x279] sm:$0xff] }
  0x65   :  { %12696 = vmatprep.mubr.f32.mxu1 %v15325_v20  ;;  %12900 = vmatpush3.msra.mxu1 %v1550_v36  ;;  %v158_v36 = vld [vmem:[%s22969_s0 + $0x2a1] sm:$0xff] }
  0x67   :  { %12569 = vmatmul.mubr.f32.gmra.mxu0 %v141_v22  ;;  %v156_v22 = vld [vmem:[%s22969_s0 + $0x289] sm:$0xff] }
  0x68   :  { %12697 = vmatmul.mubr.f32.gmra.mxu1 %v15338_v24  ;;  %12571 = vmatprep.mubr.f32.mxu0 %v142_v26  ;;  %v15478_v26 = vld [vmem:[%s22969_s0 + $0x288] sm:$0xff] }
  0x69   :  { %12699 = vmatprep.mubr.f32.mxu1 %v15346_v27 }
  0x6b   :  { %12572 = vmatmul.mubr.f32.gmra.mxu0 %v143_v30  ;;  %v15488_v30 = vld [vmem:[%s22969_s0 + $0x290] sm:$0xff] }
  0x6c   :  { %12700 = vmatmul.mubr.f32.gmra.mxu1 %v15359_v32  ;;  %12574 = vmatprep.mubr.f32.mxu0 %v144_v33  ;;  %v15493_v33 = vld [vmem:[%s22968_s1 + $0x2f8] sm:$0xff] }
  0x6d   :  { %12702 = vmatprep.mubr.f32.mxu1 %v15367_v34  ;;  %13125 = vmatprep.subr.mxu1 %v15493_v33 }
  0x6f   :  { %12575 = vmatmul.mubr.f32.gmra.mxu0 %v145_v39  ;;  %v15501_v39 = vld [vmem:[%s22969_s0 + $0x2a0] sm:$0xff] }
  0x70   :  { %12703 = vmatmul.mubr.f32.gmra.mxu1 %v15380_v40  ;;  %12577 = vmatprep.mubr.f32.mxu0 %v146_v42  ;;  %v159_v42 = vld [vmem:[%s22969_s0 + $0x2a9] sm:$0xff] }
  0x71   :  { %12705 = vmatprep.mubr.f32.mxu1 %v15388_v45 }
  0x73   :  { %12578 = vmatmul.mubr.f32.gmra.mxu0 %v147_v49  ;;  %v15512_v49 = vld [vmem:[%s22969_s0 + $0x2a8] sm:$0xff] }
  0x74   :  { %12706 = vmatmul.mubr.f32.gmra.mxu1 %v15398_v50  ;;  %12580 = vmatprep.mubr.f32.mxu0 %v148_v52  ;;  %v160_v52 = vld [vmem:[%s22969_s0 + $0x2b9] sm:$0xff] }
  0x75   :  { %12708 = vmatprep.mubr.f32.mxu1 %v15406_v55 }
  0x77   :  { %12581 = vmatmul.mubr.f32.gmra.mxu0 %v149_v59  ;;  %v15520_v59 = vld [vmem:[%s22969_s0 + $0x2b8] sm:$0xff] }
  0x78   :  { %12709 = vmatmul.mubr.f32.gmra.mxu1 %v15416_v60  ;;  %12583 = vmatprep.mubr.f32.mxu0 %v150_v61  ;;  %v161_v61 = vld [vmem:[%s22969_s0 + $0x2c1] sm:$0xff] }
  0x79   :  { %12711 = vmatprep.mubr.f32.mxu1 %v15424_v0 }
  0x7b   :  { %12584 = vmatmul.mubr.f32.gmra.mxu0 %v151_v3  ;;  %v15530_v3 = vld [vmem:[%s22969_s0 + $0x2c0] sm:$0xff] }
  0x7c   :  { %12712 = vmatmul.mubr.f32.gmra.mxu1 %v15434_v4  ;;  %12586 = vmatprep.mubr.f32.mxu0 %v152_v6  ;;  %v162_v6 = vld [vmem:[%s22969_s0 + $0x2d1] sm:$0xff] }
  0x7d   :  { %12714 = vmatprep.mubr.f32.mxu1 %v15442_v9 }
  0x7f   :  { %12587 = vmatmul.mubr.f32.gmra.mxu0 %v153_v10  ;;  %v15538_v10 = vld [vmem:[%s22969_s0 + $0x2d0] sm:$0xff] }
  0x80   :  { %12715 = vmatmul.mubr.f32.gmra.mxu1 %v15452_v12  ;;  %12589 = vmatprep.mubr.f32.mxu0 %v154_v15  ;;  %v163_v15 = vld [vmem:[%s22969_s0 + $0x2d9] sm:$0xff] }
  0x81   :  { %12717 = vmatprep.mubr.f32.mxu1 %v15460_v16 }
  0x83   :  { %12590 = vmatmul.mubr.f32.gmra.mxu0 %v155_v18  ;;  %v15548_v18 = vld [vmem:[%s22969_s0 + $0x2d8] sm:$0xff] }
  0x84   :  { %12718 = vmatmul.mubr.f32.gmra.mxu1 %v15470_v21  ;;  %12592 = vmatprep.mubr.f32.mxu0 %v156_v22  ;;  %v164_v22 = vld [vmem:[%s22969_s0 + $0x2e9] sm:$0xff] }
  0x85   :  { %12720 = vmatprep.mubr.f32.mxu1 %v15478_v26 }
  0x87   :  { %12593 = vmatmul.mubr.f32.gmra.mxu0 %v157_v28  ;;  %v15556_v28 = vld [vmem:[%s22969_s0 + $0x2e8] sm:$0xff] }
  0x88   :  { %12721 = vmatmul.mubr.f32.gmra.mxu1 %v15488_v30  ;;  %12595 = vmatprep.mubr.f32.mxu0 %v158_v36  ;;  %v165_v36 = vld [vmem:[%s22969_s0 + $0x2f1] sm:$0xff] }
  0x89   :  { %12723 = vmatprep.mubr.f32.mxu1 %v15501_v39 }
  0x8b   :  { %12596 = vmatmul.mubr.f32.gmra.mxu0 %v159_v42  ;;  %v15566_v42 = vld [vmem:[%s22969_s0 + $0x2f0] sm:$0xff] }
  0x8c   :  { %12724 = vmatmul.mubr.f32.gmra.mxu1 %v15512_v49  ;;  %12598 = vmatprep.mubr.f32.mxu0 %v160_v52  ;;  %23092 = vst [vmem:[#allocation3_spill] sm:$0xff] %v15566_v42  ;;  %v166_v52 = vld [vmem:[%s22969_s0 + $0x301] sm:$0xff] }
  0x8d   :  { %12726 = vmatprep.mubr.f32.mxu1 %v15520_v59 }
  0x8f   :  { %12599 = vmatmul.mubr.f32.gmra.mxu0 %v161_v61  ;;  %v15574_v61 = vld [vmem:[%s22969_s0 + $0x300] sm:$0xff] }
  0x90   :  { %12727 = vmatmul.mubr.f32.gmra.mxu1 %v15530_v3  ;;  %12601 = vmatprep.mubr.f32.mxu0 %v162_v6  ;;  %23093 = vst [vmem:[#allocation4_spill] sm:$0xff] %v15574_v61  ;;  %v167_v6 = vld [vmem:[%s22969_s0 + $0x309] sm:$0xff] }
  0x91   :  { %12729 = vmatprep.mubr.f32.mxu1 %v15538_v10 }
  0x93   :  { %12602 = vmatmul.mubr.f32.gmra.mxu0 %v163_v15  ;;  %v15584_v15 = vld [vmem:[%s22969_s0 + $0x308] sm:$0xff] }
  0x94   :  { %12730 = vmatmul.mubr.f32.gmra.mxu1 %v15548_v18  ;;  %12604 = vmatprep.mubr.f32.mxu0 %v164_v22  ;;  %v168_v22 = vld [vmem:[%s22969_s0 + $0x319] sm:$0xff] }
  0x95   :  { %12732 = vmatprep.mubr.f32.mxu1 %v15556_v28 }
  0x97   :  { %12605 = vmatmul.mubr.f32.gmra.mxu0 %v165_v36  ;;  %v15592_v36 = vld [vmem:[%s22969_s0 + $0x318] sm:$0xff] }
  0x98   :  { %12733 = vmatmul.mubr.f32.gmra.mxu1 %v15566_v42  ;;  %12607 = vmatprep.mubr.f32.mxu0 %v166_v52  ;;  %23094 = vst [vmem:[#allocation5_spill] sm:$0xff] %v15592_v36  ;;  %v169_v52 = vld [vmem:[%s22969_s0 + $0x321] sm:$0xff] }
  0x99   :  { %12735 = vmatprep.mubr.f32.mxu1 %v15574_v61  ;;  %v15602_v61 = vld [vmem:[%s22969_s0 + $0x320] sm:$0xff] }
  0x9a   :  { %v956_v42 = vld [vmem:[%s22969_s0 + $0x2] sm:$0xff] }
  0x9b   :  { %12608 = vmatmul.mubr.f32.gmra.mxu0 %v167_v6  ;;  %v957_v6 = vld [vmem:[%s22969_s0 + $0xa] sm:$0xff] }
  0x9c   :  { %12736 = vmatmul.mubr.f32.gmra.mxu1 %v15584_v15  ;;  %12610 = vmatprep.mubr.f32.mxu0 %v168_v22  ;;  %v15615_v22 = vld [vmem:[%s22969_s0 + $0x1a] sm:$0xff] }
  0x9d   :  { %12738 = vmatprep.mubr.f32.mxu1 %v15592_v36  ;;  %v2093_v36 = vld [vmem:[%s22968_s1 + $0x270] sm:$0xff] }
  0x9f   :  { %12611 = vmatmul.mubr.f32.gmra.mxu0 %v169_v52  ;;  %v15673_v52 = vld [vmem:[%s22969_s0 + $0x62] sm:$0xff] }
  0xa0   :  { %12739 = vmatmul.mubr.f32.gmra.mxu1 %v15602_v61  ;;  %12773 = vmatprep.mubr.f32.mxu0 %v956_v42  ;;  %v15632_v42 = vld [vmem:[%s22969_s0 + $0x32] sm:$0xff] }
  0xa1   :  { %12901 = vmatprep.mubr.f32.mxu1 %v14954_v38  ;;  %v15626_v38 = vld [vmem:[%s22969_s0 + $0x22] sm:$0xff] }
  0xa3   :  { %12774 = vmatmul.mubr.f32.vlgmr.msra.gmra.mxu0 %v957_v6  ;;  %v2620_v6 = vld [vmem:[%s22968_s1 + $0x2e0] sm:$0xff] }
  0xa4   :  { %12902 = vmatmul.mubr.f32.vlgmr.msra.gmra.mxu1 %v14965_v41  ;;  %12998 = vmatpush3.msra.mxu0 %v15311_v14  ;;  %v2092_v41 = vld [vmem:[%s22968_s1 + $0x268] sm:$0xff]  ;;  %v2622_v14 = vld [vmem:[%s22968_s1 + $0x2f0] sm:$0xff] }
  0xa5   :  { %12776 = vmatprep.mubr.f32.mxu0 %v15615_v22  ;;  %12904 = vmatprep.mubr.f32.mxu1 %v14974_v43  ;;  %v15647_v43 = vld [vmem:[%s22969_s0 + $0x3a] sm:$0xff] }
  0xa6   :  { %12999 = vmatprep.subr.mxu0 %v2093_v36  ;;  %13126 = vmatpush3.msra.mxu1 %v15493_v33  ;;  %v15653_v33 = vld [vmem:[%s22969_s0 + $0x4a] sm:$0xff] }
  0xa7   :  { %13000 = vmatpush3.msra.mxu0 %v2093_v36  ;;  %13127 = vmatprep.subr.mxu1 %v2622_v14  ;;  %v2621_v36 = vld [vmem:[%s22968_s1 + $0x2e8] sm:$0xff] }
  0xa8   :  { %12777 = vmatmul.mubr.f32.gmra.mxu0 %v15626_v38  ;;  %12905 = vmatmul.mubr.f32.gmra.mxu1 %v14987_v46  ;;  %v2091_v46 = vld [vmem:[%s22968_s1 + $0x260] sm:$0xff] }
  0xa9   :  { %12779 = vmatprep.mubr.f32.mxu0 %v15632_v42  ;;  %12907 = vmatprep.mubr.f32.mxu1 %v14995_v48  ;;  %v15667_v48 = vld [vmem:[%s22969_s0 + $0x52] sm:$0xff] }
  0xaa   :  { %13001 = vmatprep.subr.mxu0 %v2092_v41  ;;  %13128 = vmatpush3.msra.mxu1 %v2622_v14  ;;  %v2619_v14 = vld [vmem:[%s22968_s1 + $0x2d8] sm:$0xff] }
  0xab   :  { %13002 = vmatpush3.msra.mxu0 %v2092_v41  ;;  %13129 = vmatprep.subr.mxu1 %v2621_v36  ;;  %v15693_v41 = vld [vmem:[%s22969_s0 + $0x7a] sm:$0xff] }
  0xac   :  { %12780 = vmatmul.mubr.f32.gmra.mxu0 %v15647_v43  ;;  %12908 = vmatmul.mubr.f32.gmra.mxu1 %v15008_v51  ;;  %v2090_v51 = vld [vmem:[%s22968_s1 + $0x258] sm:$0xff] }
  0xad   :  { %12782 = vmatprep.mubr.f32.mxu0 %v15653_v33  ;;  %12910 = vmatprep.mubr.f32.mxu1 %v15016_v53  ;;  %v15687_v53 = vld [vmem:[%s22969_s0 + $0x6a] sm:$0xff] }
  0xae   :  { %13003 = vmatprep.subr.mxu0 %v2091_v46  ;;  %13130 = vmatpush3.msra.mxu1 %v2621_v36  ;;  %v2618_v36 = vld [vmem:[%s22968_s1 + $0x2d0] sm:$0xff] }
  0xaf   :  { %13004 = vmatpush3.msra.mxu0 %v2091_v46  ;;  %13131 = vmatprep.subr.mxu1 %v2620_v6  ;;  %v15713_v46 = vld [vmem:[%s22969_s0 + $0x92] sm:$0xff] }
  0xb0   :  { %12783 = vmatmul.mubr.f32.gmra.mxu0 %v15667_v48  ;;  %12911 = vmatmul.mubr.f32.gmra.mxu1 %v15029_v56  ;;  %v2089_v56 = vld [vmem:[%s22968_s1 + $0x250] sm:$0xff] }
  0xb1   :  { %12785 = vmatprep.mubr.f32.mxu0 %v15673_v52  ;;  %12913 = vmatprep.mubr.f32.mxu1 %v15037_v58  ;;  %v15707_v58 = vld [vmem:[%s22969_s0 + $0x82] sm:$0xff] }
  0xb2   :  { %13005 = vmatprep.subr.mxu0 %v2090_v51  ;;  %13132 = vmatpush3.msra.mxu1 %v2620_v6  ;;  %v2617_v6 = vld [vmem:[%s22968_s1 + $0x2c8] sm:$0xff] }
  0xb3   :  { %13006 = vmatpush3.msra.mxu0 %v2090_v51  ;;  %13133 = vmatprep.subr.mxu1 %v2619_v14  ;;  %v15733_v51 = vld [vmem:[%s22969_s0 + $0xaa] sm:$0xff] }
  0xb4   :  { %12786 = vmatmul.mubr.f32.gmra.mxu0 %v15687_v53  ;;  %12914 = vmatmul.mubr.f32.gmra.mxu1 %v15056_v63  ;;  %v2088_v63 = vld [vmem:[%s22968_s1 + $0x248] sm:$0xff] }
  0xb5   :  { %12788 = vmatprep.mubr.f32.mxu0 %v15693_v41  ;;  %12916 = vmatprep.mubr.f32.mxu1 %v15064_v1  ;;  %v15727_v1 = vld [vmem:[%s22969_s0 + $0x9a] sm:$0xff] }
  0xb6   :  { %13007 = vmatprep.subr.mxu0 %v2089_v56  ;;  %13134 = vmatpush3.msra.mxu1 %v2619_v14  ;;  %v2616_v14 = vld [vmem:[%s22968_s1 + $0x2c0] sm:$0xff] }
  0xb7   :  { %13008 = vmatpush3.msra.mxu0 %v2089_v56  ;;  %13135 = vmatprep.subr.mxu1 %v2618_v36  ;;  %v15753_v56 = vld [vmem:[%s22969_s0 + $0xc2] sm:$0xff] }
  0xb8   :  { %12789 = vmatmul.mubr.f32.gmra.mxu0 %v15707_v58  ;;  %12917 = vmatmul.mubr.f32.gmra.mxu1 %v15080_v5  ;;  %v2087_v5 = vld [vmem:[%s22968_s1 + $0x240] sm:$0xff] }
  0xb9   :  { %12791 = vmatprep.mubr.f32.mxu0 %v15713_v46  ;;  %12919 = vmatprep.mubr.f32.mxu1 %v15088_v7  ;;  %v15747_v7 = vld [vmem:[%s22969_s0 + $0xb2] sm:$0xff] }
  0xba   :  { %13009 = vmatprep.subr.mxu0 %v2088_v63  ;;  %13136 = vmatpush3.msra.mxu1 %v2618_v36  ;;  %v2615_v36 = vld [vmem:[%s22968_s1 + $0x2b8] sm:$0xff] }
  0xbb   :  { %13010 = vmatpush3.msra.mxu0 %v2088_v63  ;;  %13137 = vmatprep.subr.mxu1 %v2617_v6  ;;  %v15773_v63 = vld [vmem:[%s22969_s0 + $0xda] sm:$0xff] }
  0xbc   :  { %12792 = vmatmul.mubr.f32.gmra.mxu0 %v15727_v1  ;;  %12920 = vmatmul.mubr.f32.gmra.mxu1 %v15104_v11  ;;  %v2086_v11 = vld [vmem:[%s22968_s1 + $0x238] sm:$0xff] }
  0xbd   :  { %12794 = vmatprep.mubr.f32.mxu0 %v15733_v51  ;;  %12922 = vmatprep.mubr.f32.mxu1 %v15112_v13  ;;  %v15767_v13 = vld [vmem:[%s22969_s0 + $0xca] sm:$0xff] }
  0xbe   :  { %13011 = vmatprep.subr.mxu0 %v2087_v5  ;;  %13138 = vmatpush3.msra.mxu1 %v2617_v6  ;;  %v2614_v6 = vld [vmem:[%s22968_s1 + $0x2b0] sm:$0xff] }
  0xbf   :  { %13012 = vmatpush3.msra.mxu0 %v2087_v5  ;;  %13139 = vmatprep.subr.mxu1 %v2616_v14  ;;  %v15793_v5 = vld [vmem:[%s22969_s0 + $0xf2] sm:$0xff] }
  0xc0   :  { %12795 = vmatmul.mubr.f32.gmra.mxu0 %v15747_v7  ;;  %12923 = vmatmul.mubr.f32.gmra.mxu1 %v15128_v17  ;;  %v2085_v17 = vld [vmem:[%s22968_s1 + $0x230] sm:$0xff] }
  0xc1   :  { %12797 = vmatprep.mubr.f32.mxu0 %v15753_v56  ;;  %12925 = vmatprep.mubr.f32.mxu1 %v15136_v19  ;;  %v15787_v19 = vld [vmem:[%s22969_s0 + $0xe2] sm:$0xff] }
  0xc2   :  { %13013 = vmatprep.subr.mxu0 %v2086_v11  ;;  %13140 = vmatpush3.msra.mxu1 %v2616_v14  ;;  %v2613_v14 = vld [vmem:[%s22968_s1 + $0x2a8] sm:$0xff] }
  0xc3   :  { %13014 = vmatpush3.msra.mxu0 %v2086_v11  ;;  %13141 = vmatprep.subr.mxu1 %v2615_v36  ;;  %v15813_v11 = vld [vmem:[%s22969_s0 + $0x10a] sm:$0xff] }
  0xc4   :  { %12798 = vmatmul.mubr.f32.gmra.mxu0 %v15767_v13  ;;  %12926 = vmatmul.mubr.f32.gmra.mxu1 %v15152_v23  ;;  %v2084_v23 = vld [vmem:[%s22968_s1 + $0x228] sm:$0xff] }
  0xc5   :  { %12800 = vmatprep.mubr.f32.mxu0 %v15773_v63  ;;  %12928 = vmatprep.mubr.f32.mxu1 %v15160_v25  ;;  %v15807_v25 = vld [vmem:[%s22969_s0 + $0xfa] sm:$0xff] }
  0xc6   :  { %13015 = vmatprep.subr.mxu0 %v2085_v17  ;;  %13142 = vmatpush3.msra.mxu1 %v2615_v36  ;;  %v2612_v36 = vld [vmem:[%s22968_s1 + $0x2a0] sm:$0xff] }
  0xc7   :  { %13016 = vmatpush3.msra.mxu0 %v2085_v17  ;;  %13143 = vmatprep.subr.mxu1 %v2614_v6  ;;  %v980_v17 = vld [vmem:[%s22969_s0 + $0x122] sm:$0xff] }
  0xc8   :  { %12801 = vmatmul.mubr.f32.gmra.mxu0 %v15787_v19  ;;  %12929 = vmatmul.mubr.f32.gmra.mxu1 %v15176_v29  ;;  %v2083_v29 = vld [vmem:[%s22968_s1 + $0x220] sm:$0xff] }
  0xc9   :  { %12803 = vmatprep.mubr.f32.mxu0 %v15793_v5  ;;  %12931 = vmatprep.mubr.f32.mxu1 %v15184_v31  ;;  %v15827_v31 = vld [vmem:[%s22969_s0 + $0x112] sm:$0xff] }
  0xca   :  { %13017 = vmatprep.subr.mxu0 %v2084_v23  ;;  %13144 = vmatpush3.msra.mxu1 %v2614_v6  ;;  %v2081_v6 = vld [vmem:[%s22968_s1 + $0x210] sm:$0xff] }
  0xcb   :  { %13018 = vmatpush3.msra.mxu0 %v2084_v23  ;;  %13145 = vmatprep.subr.mxu1 %v2613_v14  ;;  %v982_v23 = vld [vmem:[%s22969_s0 + $0x13a] sm:$0xff] }
  0xcc   :  { %12804 = vmatmul.mubr.f32.gmra.mxu0 %v15807_v25  ;;  %12932 = vmatmul.mubr.f32.gmra.mxu1 %v15200_v35  ;;  %v2082_v35 = vld [vmem:[%s22968_s1 + $0x218] sm:$0xff] }
  0xcd   :  { %12806 = vmatprep.mubr.f32.mxu0 %v15813_v11  ;;  %12934 = vmatprep.mubr.f32.mxu1 %v15208_v37  ;;  %v981_v37 = vld [vmem:[%s22969_s0 + $0x12a] sm:$0xff] }
  0xce   :  { %13019 = vmatprep.subr.mxu0 %v2083_v29  ;;  %13146 = vmatpush3.msra.mxu1 %v2613_v14  ;;  %v2080_v14 = vld [vmem:[%s22968_s1 + $0x208] sm:$0xff] }
  0xcf   :  { %13020 = vmatpush3.msra.mxu0 %v2083_v29  ;;  %13147 = vmatprep.subr.mxu1 %v2612_v36  ;;  %v984_v29 = vld [vmem:[%s22969_s0 + $0x152] sm:$0xff] }
  0xd0   :  { %12807 = vmatmul.mubr.f32.gmra.mxu0 %v15827_v31  ;;  %12935 = vmatmul.mubr.f32.gmra.mxu1 %v15224_v44  ;;  %v2611_v44 = vld [vmem:[%s22968_s1 + $0x298] sm:$0xff] }
  0xd1   :  { %12809 = vmatprep.mubr.f32.mxu0 %v980_v17  ;;  %12937 = vmatprep.mubr.f32.mxu1 %v15232_v47  ;;  %v983_v47 = vld [vmem:[%s22969_s0 + $0x142] sm:$0xff]  ;;  %v986_v17 = vld [vmem:[%s22969_s0 + $0x16a] sm:$0xff] }
  0xd2   :  { %13021 = vmatprep.subr.mxu0 %v2082_v35  ;;  %13148 = vmatpush3.msra.mxu1 %v2612_v36  ;;  %v987_v36 = vld [vmem:[%s22969_s0 + $0x172] sm:$0xff] }
  0xd3   :  { %13022 = vmatpush3.msra.mxu0 %v2082_v35  ;;  %13149 = vmatprep.subr.mxu1 %v2611_v44  ;;  %v10625_v35 = vld [vmem:[%s22969_s0 + $0x180] sm:$0xff] }
  0xd4   :  { %12810 = vmatmul.mubr.f32.gmra.mxu0 %v981_v37  ;;  %12938 = vmatmul.mubr.f32.gmra.mxu1 %v15248_v54  ;;  %v2610_v54 = vld [vmem:[%s22968_s1 + $0x290] sm:$0xff]  ;;  %v10626_v37 = vld [vmem:[%s22969_s0 + $0x188] sm:$0xff] }
  0xd5   :  { %12812 = vmatprep.mubr.f32.mxu0 %v982_v23  ;;  %12940 = vmatprep.mubr.f32.mxu1 %v15256_v57  ;;  %v985_v57 = vld [vmem:[%s22969_s0 + $0x15a] sm:$0xff]  ;;  %v988_v23 = vld [vmem:[%s22969_s0 + $0x1b2] sm:$0xff] }
  0xd6   :  { %13023 = vmatprep.subr.mxu0 %v2081_v6  ;;  %13150 = vmatpush3.msra.mxu1 %v2611_v44  ;;  %v989_v44 = vld [vmem:[%s22969_s0 + $0x1ba] sm:$0xff] }
  0xd7   :  { %13024 = vmatpush3.msra.mxu0 %v2081_v6  ;;  %13151 = vmatprep.subr.mxu1 %v2610_v54  ;;  %v15901_v6 = vld [vmem:[%s22968_s1 + $0x378] sm:$0xff] }
  0xd8   :  { %12813 = vmatmul.mubr.f32.gmra.mxu0 %v983_v47  ;;  %12941 = vmatmul.mubr.f32.gmra.mxu1 %v15272_v62  ;;  %v2079_v62 = vld [vmem:[%s22968_s1 + $0x200] sm:$0xff]  ;;  %v990_v47 = vld [vmem:[%s22969_s0 + $0x1ca] sm:$0xff] }
  0xd9   :  { %12815 = vmatprep.mubr.f32.mxu0 %v984_v29  ;;  %12943 = vmatprep.mubr.f32.mxu1 %v15280_v2  ;;  %v2609_v2 = vld [vmem:[%s22968_s1 + $0x288] sm:$0xff] }
  0xda   :  { %13025 = vmatprep.subr.mxu0 %v2080_v14  ;;  %13152 = vmatpush3.msra.mxu1 %v2610_v54 }
  0xdb   :  { %13026 = vmatpush3.msra.mxu0 %v2080_v14  ;;  %13153 = vmatprep.subr.mxu1 %v2609_v2 }
  0xdc   :  { %12816 = vmatmul.mubr.f32.gmra.mxu0 %v985_v57  ;;  %12944 = vmatmul.mubr.f32.gmra.mxu1 %v15296_v8  ;;  %v2608_v8 = vld [vmem:[%s22968_s1 + $0x280] sm:$0xff] }
  0xdd   :  { %12818 = vmatprep.mubr.f32.mxu0 %v986_v17  ;;  %12946 = vmatprep.mubr.f32.mxu1 %v10625_v35  ;;  %v992_v35 = vld [vmem:[%s22969_s0 + $0x1e2] sm:$0xff] }
  0xde   :  { %13027 = vmatprep.subr.mxu0 %v2079_v62  ;;  %13154 = vmatpush3.msra.mxu1 %v2609_v2 }
  0xdf   :  { %13028 = vmatpush3.msra.mxu0 %v2079_v62  ;;  %13155 = vmatprep.subr.mxu1 %v2608_v8 }
  0xe0   :  { %12819 = vmatmul.mubr.f32.gmra.mxu0 %v987_v36  ;;  %12947 = vmatmul.mubr.f32.gmra.mxu1 %v10626_v37 }
  0xe1   :  { %12821 = vmatprep.mubr.f32.mxu0 %v988_v23  ;;  %12949 = vmatprep.mubr.f32.mxu1 %v15325_v20  ;;  %v991_v20 = vld [vmem:[%s22969_s0 + $0x1d2] sm:$0xff] }
  0xe2   :  { %13253 = vmatprep.subr.mxu0 %v15901_v6  ;;  %13156 = vmatpush3.msra.mxu1 %v2608_v8  ;;  %v994_v8 = vld [vmem:[%s22969_s0 + $0x1fa] sm:$0xff] }
  0xe3   :  { %v12519_v29 = vpop.f32.mrf.mxu0 }
  0xe4   :  { %v12647_v14 = vpop.f32.mrf.mxu1  ;;  %12822 = vmatmul.mubr.f32.gmra.mxu0 %v989_v44  ;;  %12950 = vmatmul.mubr.f32.gmra.mxu1 %v15338_v24 }
  0xe5   :  { %v15912_v54 = vadd.f32 %v12647_v14, %v12519_v29  ;;  %12824 = vmatprep.mubr.f32.mxu0 %v990_v47  ;;  %12952 = vmatprep.mubr.f32.mxu1 %v15346_v27  ;;  %v252_v57 = vpop.f32.mrf.mxu0  ;;  %v993_v27 = vld [vmem:[%s22969_s0 + $0x1ea] sm:$0xff] }
  0xe6   :  { %v637_v17 = vpop.f32.mrf.mxu1 }
  0xe7   :  { %v15921_v62 = vadd.f32 %v637_v17, %v252_v57  ;;  %v12522_v2 = vpop.f32.mrf.mxu0  ;;  %v996_v57 = vld [vmem:[%s22969_s0 + $0x212] sm:$0xff] }
  0xe8   :  { %v12650_v36 = vpop.f32.mrf.mxu1  ;;  %12825 = vmatmul.mubr.f32.gmra.mxu0 %v991_v20  ;;  %12953 = vmatmul.mubr.f32.gmra.mxu1 %v15359_v32 }
  0xe9   :  { %v15924_v24 = vadd.f32 %v12650_v36, %v12522_v2  ;;  %12827 = vmatprep.mubr.f32.mxu0 %v992_v35  ;;  %12955 = vmatprep.mubr.f32.mxu1 %v15367_v34  ;;  %v262_v37 = vpop.f32.mrf.mxu0  ;;  %v995_v34 = vld [vmem:[%s22969_s0 + $0x202] sm:$0xff] }
  0xea   :  { %v647_v23 = vpop.f32.mrf.mxu1 }
  0xeb   :  { %v15933_v44 = vadd.f32 %v647_v23, %v262_v37  ;;  %v12525_v47 = vpop.f32.mrf.mxu0  ;;  %v998_v37 = vld [vmem:[%s22969_s0 + $0x22a] sm:$0xff] }
  0xec   :  { %v12653_v29 = vpop.f32.mrf.mxu1  ;;  %12828 = vmatmul.mubr.f32.gmra.mxu0 %v993_v27  ;;  %12956 = vmatmul.mubr.f32.gmra.mxu1 %v15380_v40 }
  0xed   :  { %v15936_v32 = vadd.f32 %v12653_v29, %v12525_v47  ;;  %12830 = vmatprep.mubr.f32.mxu0 %v994_v8  ;;  %12958 = vmatprep.mubr.f32.mxu1 %v15388_v45  ;;  %v272_v14 = vpop.f32.mrf.mxu0  ;;  %v997_v45 = vld [vmem:[%s22969_s0 + $0x21a] sm:$0xff] }
  0xee   :  { %v657_v20 = vpop.f32.mrf.mxu1 }
  0xef   :  { %v15945_v17 = vadd.f32 %v657_v20, %v272_v14  ;;  %v12528_v35 = vpop.f32.mrf.mxu0  ;;  %v1000_v14 = vld [vmem:[%s22969_s0 + $0x242] sm:$0xff] }
  0xf0   :  { %v12656_v2 = vpop.f32.mrf.mxu1  ;;  %12831 = vmatmul.mubr.f32.gmra.mxu0 %v995_v34  ;;  %12959 = vmatmul.mubr.f32.gmra.mxu1 %v15398_v50 }
  0xf1   :  { %v15948_v40 = vadd.f32 %v12656_v2, %v12528_v35  ;;  %12833 = vmatprep.mubr.f32.mxu0 %v996_v57  ;;  %12961 = vmatprep.mubr.f32.mxu1 %v15406_v55  ;;  %v282_v36 = vpop.f32.mrf.mxu0  ;;  %v999_v55 = vld [vmem:[%s22969_s0 + $0x232] sm:$0xff] }
  0xf2   :  { %v667_v27 = vpop.f32.mrf.mxu1 }
  0xf3   :  { %v15957_v23 = vadd.f32 %v667_v27, %v282_v36  ;;  %v12531_v8 = vpop.f32.mrf.mxu0  ;;  %v1002_v36 = vld [vmem:[%s22969_s0 + $0x25a] sm:$0xff] }
  0xf4   :  { %v12659_v47 = vpop.f32.mrf.mxu1  ;;  %12834 = vmatmul.mubr.f32.gmra.mxu0 %v997_v45  ;;  %12962 = vmatmul.mubr.f32.gmra.mxu1 %v15416_v60 }
  0xf5   :  { %v15960_v50 = vadd.f32 %v12659_v47, %v12531_v8  ;;  %12836 = vmatprep.mubr.f32.mxu0 %v998_v37  ;;  %12964 = vmatprep.mubr.f32.mxu1 %v15424_v0  ;;  %v292_v29 = vpop.f32.mrf.mxu0  ;;  %v1001_v0 = vld [vmem:[%s22969_s0 + $0x24a] sm:$0xff] }
  0xf6   :  { %v677_v34 = vpop.f32.mrf.mxu1 }
  0xf7   :  { %v15969_v20 = vadd.f32 %v677_v34, %v292_v29  ;;  %v12534_v57 = vpop.f32.mrf.mxu0  ;;  %v1004_v29 = vld [vmem:[%s22969_s0 + $0x272] sm:$0xff] }
  0xf8   :  { %v12662_v35 = vpop.f32.mrf.mxu1  ;;  %12837 = vmatmul.mubr.f32.gmra.mxu0 %v999_v55  ;;  %12965 = vmatmul.mubr.f32.gmra.mxu1 %v15434_v4 }
  0xf9   :  { %v15972_v60 = vadd.f32 %v12662_v35, %v12534_v57  ;;  %12839 = vmatprep.mubr.f32.mxu0 %v1000_v14  ;;  %12967 = vmatprep.mubr.f32.mxu1 %v15442_v9  ;;  %v302_v2 = vpop.f32.mrf.mxu0  ;;  %v1003_v9 = vld [vmem:[%s22969_s0 + $0x262] sm:$0xff] }
  0xfa   :  { %v687_v45 = vpop.f32.mrf.mxu1 }
  0xfb   :  { %v15981_v27 = vadd.f32 %v687_v45, %v302_v2  ;;  %v12537_v37 = vpop.f32.mrf.mxu0  ;;  %v1006_v2 = vld [vmem:[%s22969_s0 + $0x28a] sm:$0xff] }
  0xfc   :  { %v12665_v8 = vpop.f32.mrf.mxu1  ;;  %12840 = vmatmul.mubr.f32.gmra.mxu0 %v1001_v0  ;;  %12968 = vmatmul.mubr.f32.gmra.mxu1 %v15452_v12 }
  0xfd   :  { %v15984_v4 = vadd.f32 %v12665_v8, %v12537_v37  ;;  %12842 = vmatprep.mubr.f32.mxu0 %v1002_v36  ;;  %12970 = vmatprep.mubr.f32.mxu1 %v15460_v16  ;;  %v312_v47 = vpop.f32.mrf.mxu0  ;;  %v1005_v16 = vld [vmem:[%s22969_s0 + $0x27a] sm:$0xff] }
  0xfe   :  { %v697_v55 = vpop.f32.mrf.mxu1  ;;  %v16017_v8 = vld [vmem:[%s22968_s1 + $0x3f8] sm:$0xff] }
  0xff   :  { %v15993_v34 = vadd.f32 %v697_v55, %v312_v47  ;;  %v12540_v14 = vpop.f32.mrf.mxu0  ;;  %13381 = vmatprep.subr.mxu1 %v16017_v8 }
 0x100   :  { %v12668_v57 = vpop.f32.mrf.mxu1  ;;  %12843 = vmatmul.mubr.f32.gmra.mxu0 %v1003_v9  ;;  %12971 = vmatmul.mubr.f32.gmra.mxu1 %v15470_v21 }
 0x101   :  { %v15996_v12 = vadd.f32 %v12668_v57, %v12540_v14  ;;  %12845 = vmatprep.mubr.f32.mxu0 %v1004_v29  ;;  %12973 = vmatprep.mubr.f32.mxu1 %v15478_v26  ;;  %v322_v35 = vpop.f32.mrf.mxu0  ;;  %v1007_v26 = vld [vmem:[%s22969_s0 + $0x292] sm:$0xff]  ;;  %v1009_v57 = vld [vmem:[%s22969_s0 + $0x2aa] sm:$0xff] }
 0x102   :  { %v707_v0 = vpop.f32.mrf.mxu1 }
 0x103   :  { %v16005_v45 = vadd.f32 %v707_v0, %v322_v35  ;;  %v12543_v36 = vpop.f32.mrf.mxu0  ;;  %v1010_v0 = vld [vmem:[%s22969_s0 + $0x2ba] sm:$0xff] }
 0x104   :  { %v12671_v37 = vpop.f32.mrf.mxu1  ;;  %12846 = vmatmul.mubr.f32.gmra.mxu0 %v1005_v16  ;;  %12974 = vmatmul.mubr.f32.gmra.mxu1 %v15488_v30  ;;  %v1008_v30 = vld [vmem:[%s22969_s0 + $0x2a2] sm:$0xff] }
 0x105   :  { %v16008_v21 = vadd.f32 %v12671_v37, %v12543_v36  ;;  %12848 = vmatprep.mubr.f32.mxu0 %v1006_v2  ;;  %12976 = vmatprep.mubr.f32.mxu1 %v15501_v39  ;;  %v332_v9 = vpop.f32.mrf.mxu0 }
 0x106   :  { %v717_v47 = vpop.f32.mrf.mxu1 }
 0x107   :  { %v16023_v55 = vadd.f32 %v717_v47, %v332_v9  ;;  %v12546_v29 = vpop.f32.mrf.mxu0  ;;  %v1012_v47 = vld [vmem:[%s22969_s0 + $0x2d2] sm:$0xff] }
 0x108   :  { %v12674_v14 = vpop.f32.mrf.mxu1  ;;  %12849 = vmatmul.mubr.f32.gmra.mxu0 %v1007_v26  ;;  %12977 = vmatmul.mubr.f32.gmra.mxu1 %v15512_v49 }
 0x109   :  { %v16026_v39 = vadd.f32 %v12674_v14, %v12546_v29  ;;  %12851 = vmatprep.mubr.f32.mxu0 %v1008_v30  ;;  %12979 = vmatprep.mubr.f32.mxu1 %v15520_v59  ;;  %v342_v16 = vpop.f32.mrf.mxu0  ;;  %v1011_v59 = vld [vmem:[%s22969_s0 + $0x2c2] sm:$0xff] }
 0x10a   :  { %v727_v35 = vpop.f32.mrf.mxu1 }
 0x10b   :  { %v16035_v2 = vadd.f32 %v727_v35, %v342_v16  ;;  %v12549_v36 = vpop.f32.mrf.mxu0  ;;  %v1014_v35 = vld [vmem:[%s22969_s0 + $0x2ea] sm:$0xff] }
 0x10c   :  { %v12677_v37 = vpop.f32.mrf.mxu1  ;;  %12852 = vmatmul.mubr.f32.gmra.mxu0 %v1009_v57  ;;  %12980 = vmatmul.mubr.f32.gmra.mxu1 %v15530_v3 }
 0x10d   :  { %v16038_v49 = vadd.f32 %v12677_v37, %v12549_v36  ;;  %12854 = vmatprep.mubr.f32.mxu0 %v1010_v0  ;;  %12982 = vmatprep.mubr.f32.mxu1 %v15538_v10  ;;  %v352_v26 = vpop.f32.mrf.mxu0  ;;  %v1013_v10 = vld [vmem:[%s22969_s0 + $0x2da] sm:$0xff] }
 0x10e   :  { %v737_v9 = vpop.f32.mrf.mxu1 }
 0x10f   :  { %v16047_v30 = vadd.f32 %v737_v9, %v352_v26  ;;  %v12552_v29 = vpop.f32.mrf.mxu0  ;;  %v23096_v26 = vld [vmem:[#allocation4_spill] sm:$0xff] }
 0x110   :  { %v12680_v14 = vpop.f32.mrf.mxu1  ;;  %12855 = vmatmul.mubr.f32.gmra.mxu0 %v1011_v59  ;;  %12983 = vmatmul.mubr.f32.gmra.mxu1 %v15548_v18  ;;  %v23095_v18 = vld [vmem:[#allocation3_spill] sm:$0xff] }
 0x111   :  { %v16050_v3 = vadd.f32 %v12680_v14, %v12552_v29  ;;  %12857 = vmatprep.mubr.f32.mxu0 %v1012_v47  ;;  %12985 = vmatprep.mubr.f32.mxu1 %v15556_v28  ;;  %v362_v57 = vpop.f32.mrf.mxu0  ;;  %v1015_v28 = vld [vmem:[%s22969_s0 + $0x2f2] sm:$0xff]  ;;  %v1016_v29 = vld [vmem:[%s22969_s0 + $0x302] sm:$0xff] }
 0x112   :  { %v747_v16 = vpop.f32.mrf.mxu1 }
 0x113   :  { %v16059_v0 = vadd.f32 %v747_v16, %v362_v57  ;;  %v12555_v36 = vpop.f32.mrf.mxu0 }
 0x114   :  { %v12683_v37 = vpop.f32.mrf.mxu1  ;;  %12858 = vmatmul.mubr.f32.gmra.mxu0 %v1013_v10  ;;  %12986 = vmatmul.mubr.f32.gmra.mxu1 %v23095_v18 }
 0x115   :  { %v16062_v59 = vadd.f32 %v12683_v37, %v12555_v36  ;;  %12860 = vmatprep.mubr.f32.mxu0 %v1014_v35  ;;  %12988 = vmatprep.mubr.f32.mxu1 %v23096_v26  ;;  %v372_v9 = vpop.f32.mrf.mxu0  ;;  %v1017_v35 = vld [vmem:[%s22969_s0 + $0x30a] sm:$0xff]  ;;  %v1018_v26 = vld [vmem:[%s22969_s0 + $0x31a] sm:$0xff] }
 0x116   :  { %v757_v47 = vpop.f32.mrf.mxu1  ;;  %v23097_v36 = vld [vmem:[#allocation5_spill] sm:$0xff] }
 0x117   :  { %v16071_v14 = vadd.f32 %v757_v47, %v372_v9  ;;  %v12558_v10 = vpop.f32.mrf.mxu0 }
 0x118   :  { %v12686_v57 = vpop.f32.mrf.mxu1  ;;  %12861 = vmatmul.mubr.f32.gmra.mxu0 %v1015_v28  ;;  %12989 = vmatmul.mubr.f32.gmra.mxu1 %v15584_v15  ;;  %v10657_v28 = vld [vmem:[%s22969_s0 + $0x330] sm:$0xff] }
 0x119   :  { %v16074_v16 = vadd.f32 %v12686_v57, %v12558_v10  ;;  %12863 = vmatprep.mubr.f32.mxu0 %v1016_v29  ;;  %12991 = vmatprep.mubr.f32.mxu1 %v23097_v36  ;;  %v382_v37 = vpop.f32.mrf.mxu0  ;;  %v1019_v10 = vld [vmem:[%s22969_s0 + $0x322] sm:$0xff]  ;;  %v10658_v57 = vld [vmem:[%s22969_s0 + $0x338] sm:$0xff] }
 0x11a   :  { %v767_v18 = vpop.f32.mrf.mxu1 }
 0x11b   :  { %v16086_v15 = vadd.f32 %v767_v18, %v382_v37  ;;  %v12561_v9 = vpop.f32.mrf.mxu0 }
 0x11c   :  { %v12689_v47 = vpop.f32.mrf.mxu1  ;;  %12864 = vmatmul.mubr.f32.gmra.mxu0 %v1017_v35  ;;  %12992 = vmatmul.mubr.f32.gmra.mxu1 %v15602_v61  ;;  %v10659_v35 = vld [vmem:[%s22969_s0 + $0x19] sm:$0xff] }
 0x11d   :  { %v16089_v29 = vadd.f32 %v12689_v47, %v12561_v9  ;;  %12866 = vmatprep.mubr.f32.mxu0 %v1018_v26  ;;  %12994 = vmatprep.mubr.f32.mxu1 %v10657_v28  ;;  %v392_v36 = vpop.f32.mrf.mxu0  ;;  %v10660_v28 = vld [vmem:[%s22969_s0 + $0x21] sm:$0xff] }
 0x11e   :  { %v777_v37 = vpop.f32.mrf.mxu1 }
 0x11f   :  { %23098 = vst [vmem:[#allocation3_spill] sm:$0xff] %v16089_v29  ;;  %v16100_v18 = vadd.f32 %v777_v37, %v392_v36  ;;  %v12564_v61 = vpop.f32.mrf.mxu0  ;;  %v10661_v36 = vld [vmem:[%s22969_s0 + $0x31] sm:$0xff] }
 0x120   :  { %v12692_v9 = vpop.f32.mrf.mxu1  ;;  %12867 = vmatmul.mubr.f32.gmra.mxu0 %v1019_v10  ;;  %12995 = vmatmul.mubr.f32.gmra.mxu1 %v10658_v57  ;;  %v3152_v10 = vld [vmem:[%s22968_s1 + $0x370] sm:$0xff] }
 0x121   :  { %v16102_v26 = vadd.f32 %v12692_v9, %v12564_v61  ;;  %13029 = vmatprep.mubr.f32.mxu0 %v10659_v35  ;;  %13157 = vmatprep.mubr.f32.mxu1 %v15615_v22  ;;  %v402_v47 = vpop.f32.mrf.mxu0  ;;  %v10662_v22 = vld [vmem:[%s22969_s0 + $0x39] sm:$0xff] }
 0x122   :  { %v787_v29 = vpop.f32.mrf.mxu1 }
 0x123   :  { %v16111_v37 = vadd.f32 %v787_v29, %v402_v47  ;;  %v12567_v57 = vpop.f32.mrf.mxu0  ;;  %v10663_v47 = vld [vmem:[%s22969_s0 + $0x49] sm:$0xff] }
 0x124   :  { %v12695_v35 = vpop.f32.mrf.mxu1  ;;  %13030 = vmatmul.mubr.f32.vlgmr.msra.gmra.mxu0 %v10660_v28  ;;  %13158 = vmatmul.mubr.f32.vlgmr.msra.gmra.mxu1 %v15626_v38  ;;  %v3151_v38 = vld [vmem:[%s22968_s1 + $0x368] sm:$0xff] }
 0x125   :  { %v16117_v61 = vadd.f32 %v12695_v35, %v12567_v57  ;;  %13254 = vmatpush3.msra.mxu0 %v15901_v6  ;;  %13032 = vmatprep.mubr.f32.mxu0 %v10661_v36  ;;  %v412_v29 = vpop.f32.mrf.mxu0  ;;  %v3681_v6 = vld [vmem:[%s22968_s1 + $0x3f0] sm:$0xff] }
 0x126   :  { %v797_v9 = vpop.f32.mrf.mxu1  ;;  %13160 = vmatprep.mubr.f32.mxu1 %v15632_v42  ;;  %13255 = vmatprep.subr.mxu0 %v3152_v10 }
 0x127   :  { %v16127_v28 = vadd.f32 %v797_v9, %v412_v29  ;;  %13256 = vmatpush3.msra.mxu0 %v3152_v10  ;;  %13382 = vmatpush3.msra.mxu1 %v16017_v8  ;;  %v12570_v36 = vpop.f32.mrf.mxu0  ;;  %v10664_v10 = vld [vmem:[%s22969_s0 + $0x51] sm:$0xff]  ;;  %v10665_v29 = vld [vmem:[%s22969_s0 + $0x61] sm:$0xff] }
 0x128   :  { %v12698_v42 = vpop.f32.mrf.mxu1  ;;  %13033 = vmatmul.mubr.f32.gmra.mxu0 %v10662_v22  ;;  %13161 = vmatmul.mubr.f32.gmra.mxu1 %v15647_v43  ;;  %v3150_v43 = vld [vmem:[%s22968_s1 + $0x360] sm:$0xff] }
 0x129   :  { %v16137_v57 = vadd.f32 %v12698_v42, %v12570_v36  ;;  %13035 = vmatprep.mubr.f32.mxu0 %v10663_v47  ;;  %13163 = vmatprep.mubr.f32.mxu1 %v15653_v33  ;;  %v422_v35 = vpop.f32.mrf.mxu0  ;;  %v3680_v33 = vld [vmem:[%s22968_s1 + $0x3e8] sm:$0xff] }
 0x12a   :  { %v807_v8 = vpop.f32.mrf.mxu1  ;;  %13257 = vmatprep.subr.mxu0 %v3151_v38  ;;  %13383 = vmatprep.subr.mxu1 %v3681_v6 }
 0x12b   :  { %v16146_v22 = vadd.f32 %v807_v8, %v422_v35  ;;  %13258 = vmatpush3.msra.mxu0 %v3151_v38  ;;  %13384 = vmatpush3.msra.mxu1 %v3681_v6  ;;  %v12573_v9 = vpop.f32.mrf.mxu0  ;;  %v10666_v38 = vld [vmem:[%s22969_s0 + $0x69] sm:$0xff]  ;;  %v10667_v35 = vld [vmem:[%s22969_s0 + $0x79] sm:$0xff] }
 0x12c   :  { %v12701_v47 = vpop.f32.mrf.mxu1  ;;  %13036 = vmatmul.mubr.f32.gmra.mxu0 %v10664_v10  ;;  %13164 = vmatmul.mubr.f32.gmra.mxu1 %v15667_v48  ;;  %v3149_v48 = vld [vmem:[%s22968_s1 + $0x358] sm:$0xff] }
 0x12d   :  { %v16155_v36 = vadd.f32 %v12701_v47, %v12573_v9  ;;  %13038 = vmatprep.mubr.f32.mxu0 %v10665_v29  ;;  %13166 = vmatprep.mubr.f32.mxu1 %v15673_v52  ;;  %v432_v42 = vpop.f32.mrf.mxu0  ;;  %v3679_v52 = vld [vmem:[%s22968_s1 + $0x3e0] sm:$0xff] }
 0x12e   :  { %v817_v6 = vpop.f32.mrf.mxu1  ;;  %13259 = vmatprep.subr.mxu0 %v3150_v43  ;;  %13385 = vmatprep.subr.mxu1 %v3680_v33 }
 0x12f   :  { %v16164_v10 = vadd.f32 %v817_v6, %v432_v42  ;;  %13260 = vmatpush3.msra.mxu0 %v3150_v43  ;;  %13386 = vmatpush3.msra.mxu1 %v3680_v33  ;;  %v12576_v8 = vpop.f32.mrf.mxu0  ;;  %v10668_v43 = vld [vmem:[%s22969_s0 + $0x81] sm:$0xff]  ;;  %v10669_v42 = vld [vmem:[%s22969_s0 + $0x91] sm:$0xff] }
 0x130   :  { %v12704_v29 = vpop.f32.mrf.mxu1  ;;  %13039 = vmatmul.mubr.f32.gmra.mxu0 %v10666_v38  ;;  %13167 = vmatmul.mubr.f32.gmra.mxu1 %v15687_v53  ;;  %v3148_v53 = vld [vmem:[%s22968_s1 + $0x350] sm:$0xff] }
 0x131   :  { %v16173_v9 = vadd.f32 %v12704_v29, %v12576_v8  ;;  %13041 = vmatprep.mubr.f32.mxu0 %v10667_v35  ;;  %13169 = vmatprep.mubr.f32.mxu1 %v15693_v41  ;;  %v442_v47 = vpop.f32.mrf.mxu0  ;;  %v3678_v41 = vld [vmem:[%s22968_s1 + $0x3d8] sm:$0xff] }
 0x132   :  { %v827_v33 = vpop.f32.mrf.mxu1  ;;  %13261 = vmatprep.subr.mxu0 %v3149_v48  ;;  %13387 = vmatprep.subr.mxu1 %v3679_v52 }
 0x133   :  { %v16182_v38 = vadd.f32 %v827_v33, %v442_v47  ;;  %13262 = vmatpush3.msra.mxu0 %v3149_v48  ;;  %13388 = vmatpush3.msra.mxu1 %v3679_v52  ;;  %v12579_v6 = vpop.f32.mrf.mxu0  ;;  %v10670_v48 = vld [vmem:[%s22969_s0 + $0x99] sm:$0xff]  ;;  %v10671_v47 = vld [vmem:[%s22969_s0 + $0xa9] sm:$0xff] }
 0x134   :  { %v12707_v35 = vpop.f32.mrf.mxu1  ;;  %13042 = vmatmul.mubr.f32.gmra.mxu0 %v10668_v43  ;;  %13170 = vmatmul.mubr.f32.gmra.mxu1 %v15707_v58  ;;  %v3147_v58 = vld [vmem:[%s22968_s1 + $0x348] sm:$0xff] }
 0x135   :  { %v16191_v8 = vadd.f32 %v12707_v35, %v12579_v6  ;;  %13044 = vmatprep.mubr.f32.mxu0 %v10669_v42  ;;  %13172 = vmatprep.mubr.f32.mxu1 %v15713_v46  ;;  %v452_v29 = vpop.f32.mrf.mxu0  ;;  %v3677_v46 = vld [vmem:[%s22968_s1 + $0x3d0] sm:$0xff] }
 0x136   :  { %v837_v52 = vpop.f32.mrf.mxu1  ;;  %13263 = vmatprep.subr.mxu0 %v3148_v53  ;;  %13389 = vmatprep.subr.mxu1 %v3678_v41 }
 0x137   :  { %v16200_v43 = vadd.f32 %v837_v52, %v452_v29  ;;  %13264 = vmatpush3.msra.mxu0 %v3148_v53  ;;  %13390 = vmatpush3.msra.mxu1 %v3678_v41  ;;  %v12582_v33 = vpop.f32.mrf.mxu0  ;;  %v10672_v53 = vld [vmem:[%s22969_s0 + $0xb1] sm:$0xff]  ;;  %v10673_v29 = vld [vmem:[%s22969_s0 + $0xc1] sm:$0xff] }
 0x138   :  { %v12710_v42 = vpop.f32.mrf.mxu1  ;;  %13045 = vmatmul.mubr.f32.gmra.mxu0 %v10670_v48  ;;  %13173 = vmatmul.mubr.f32.gmra.mxu1 %v15727_v1  ;;  %v3146_v1 = vld [vmem:[%s22968_s1 + $0x340] sm:$0xff] }
 0x139   :  { %v16209_v6 = vadd.f32 %v12710_v42, %v12582_v33  ;;  %13047 = vmatprep.mubr.f32.mxu0 %v10671_v47  ;;  %13175 = vmatprep.mubr.f32.mxu1 %v15733_v51  ;;  %v462_v35 = vpop.f32.mrf.mxu0  ;;  %v3676_v51 = vld [vmem:[%s22968_s1 + $0x3c8] sm:$0xff] }
 0x13a   :  { %v847_v41 = vpop.f32.mrf.mxu1  ;;  %13265 = vmatprep.subr.mxu0 %v3147_v58  ;;  %13391 = vmatprep.subr.mxu1 %v3677_v46 }
 0x13b   :  { %v16218_v48 = vadd.f32 %v847_v41, %v462_v35  ;;  %13266 = vmatpush3.msra.mxu0 %v3147_v58  ;;  %13392 = vmatpush3.msra.mxu1 %v3677_v46  ;;  %v12585_v52 = vpop.f32.mrf.mxu0  ;;  %v10674_v58 = vld [vmem:[%s22969_s0 + $0xc9] sm:$0xff]  ;;  %v10675_v35 = vld [vmem:[%s22969_s0 + $0xd9] sm:$0xff] }
 0x13c   :  { %v12713_v47 = vpop.f32.mrf.mxu1  ;;  %13048 = vmatmul.mubr.f32.gmra.mxu0 %v10672_v53  ;;  %13176 = vmatmul.mubr.f32.gmra.mxu1 %v15747_v7  ;;  %v3145_v7 = vld [vmem:[%s22968_s1 + $0x338] sm:$0xff] }
 0x13d   :  { %v16227_v33 = vadd.f32 %v12713_v47, %v12585_v52  ;;  %13050 = vmatprep.mubr.f32.mxu0 %v10673_v29  ;;  %13178 = vmatprep.mubr.f32.mxu1 %v15753_v56  ;;  %v472_v42 = vpop.f32.mrf.mxu0  ;;  %v3675_v56 = vld [vmem:[%s22968_s1 + $0x3c0] sm:$0xff] }
 0x13e   :  { %v857_v46 = vpop.f32.mrf.mxu1  ;;  %13267 = vmatprep.subr.mxu0 %v3146_v1  ;;  %13393 = vmatprep.subr.mxu1 %v3676_v51 }
 0x13f   :  { %v16236_v53 = vadd.f32 %v857_v46, %v472_v42  ;;  %13268 = vmatpush3.msra.mxu0 %v3146_v1  ;;  %13394 = vmatpush3.msra.mxu1 %v3676_v51  ;;  %v12588_v41 = vpop.f32.mrf.mxu0  ;;  %v10676_v1 = vld [vmem:[%s22969_s0 + $0xe1] sm:$0xff]  ;;  %v10677_v42 = vld [vmem:[%s22969_s0 + $0xf1] sm:$0xff] }
 0x140   :  { %v12716_v29 = vpop.f32.mrf.mxu1  ;;  %13051 = vmatmul.mubr.f32.gmra.mxu0 %v10674_v58  ;;  %13179 = vmatmul.mubr.f32.gmra.mxu1 %v15767_v13  ;;  %v3144_v13 = vld [vmem:[%s22968_s1 + $0x330] sm:$0xff] }
 0x141   :  { %v16245_v52 = vadd.f32 %v12716_v29, %v12588_v41  ;;  %13053 = vmatprep.mubr.f32.mxu0 %v10675_v35  ;;  %13181 = vmatprep.mubr.f32.mxu1 %v15773_v63  ;;  %v482_v47 = vpop.f32.mrf.mxu0  ;;  %v3674_v63 = vld [vmem:[%s22968_s1 + $0x3b8] sm:$0xff] }
 0x142   :  { %v867_v51 = vpop.f32.mrf.mxu1  ;;  %13269 = vmatprep.subr.mxu0 %v3145_v7  ;;  %13395 = vmatprep.subr.mxu1 %v3675_v56 }
 0x143   :  { %v16254_v58 = vadd.f32 %v867_v51, %v482_v47  ;;  %13270 = vmatpush3.msra.mxu0 %v3145_v7  ;;  %13396 = vmatpush3.msra.mxu1 %v3675_v56  ;;  %v12591_v46 = vpop.f32.mrf.mxu0  ;;  %v10678_v7 = vld [vmem:[%s22969_s0 + $0xf9] sm:$0xff]  ;;  %v10679_v47 = vld [vmem:[%s22969_s0 + $0x109] sm:$0xff] }
 0x144   :  { %v12719_v35 = vpop.f32.mrf.mxu1  ;;  %13054 = vmatmul.mubr.f32.gmra.mxu0 %v10676_v1  ;;  %13182 = vmatmul.mubr.f32.gmra.mxu1 %v15787_v19  ;;  %v3143_v19 = vld [vmem:[%s22968_s1 + $0x328] sm:$0xff] }
 0x145   :  { %v16263_v41 = vadd.f32 %v12719_v35, %v12591_v46  ;;  %13056 = vmatprep.mubr.f32.mxu0 %v10677_v42  ;;  %13184 = vmatprep.mubr.f32.mxu1 %v15793_v5  ;;  %v492_v29 = vpop.f32.mrf.mxu0  ;;  %v3673_v5 = vld [vmem:[%s22968_s1 + $0x3b0] sm:$0xff] }
 0x146   :  { %v877_v56 = vpop.f32.mrf.mxu1  ;;  %13271 = vmatprep.subr.mxu0 %v3144_v13  ;;  %13397 = vmatprep.subr.mxu1 %v3674_v63 }
 0x147   :  { %v16272_v1 = vadd.f32 %v877_v56, %v492_v29  ;;  %13272 = vmatpush3.msra.mxu0 %v3144_v13  ;;  %13398 = vmatpush3.msra.mxu1 %v3674_v63  ;;  %v12594_v51 = vpop.f32.mrf.mxu0  ;;  %v10680_v13 = vld [vmem:[%s22969_s0 + $0x111] sm:$0xff]  ;;  %v10681_v29 = vld [vmem:[%s22969_s0 + $0x121] sm:$0xff] }
 0x148   :  { %v12722_v42 = vpop.f32.mrf.mxu1  ;;  %13057 = vmatmul.mubr.f32.gmra.mxu0 %v10678_v7  ;;  %13185 = vmatmul.mubr.f32.gmra.mxu1 %v15807_v25  ;;  %v10745_v7 = vld [vmem:[%s22969_s0 + $0x122] sm:$0xff] }
 0x149   :  { %v16281_v46 = vadd.f32 %v12722_v42, %v12594_v51  ;;  %13059 = vmatprep.mubr.f32.mxu0 %v10679_v47  ;;  %13187 = vmatprep.mubr.f32.mxu1 %v15813_v11  ;;  %v502_v35 = vpop.f32.mrf.mxu0  ;;  %v3142_v56 = vld [vmem:[%s22968_s1 + $0x320] sm:$0xff]  ;;  %v3672_v11 = vld [vmem:[%s22968_s1 + $0x3a8] sm:$0xff] }
 0x14a   :  { %v887_v63 = vpop.f32.mrf.mxu1  ;;  %13273 = vmatprep.subr.mxu0 %v3143_v19  ;;  %13399 = vmatprep.subr.mxu1 %v3673_v5 }
 0x14b   :  { %23099 = vst [vmem:[#allocation4_spill] sm:$0xff] %v16281_v46  ;;  %v16293_v25 = vadd.f32 %v887_v63, %v502_v35  ;;  %13274 = vmatpush3.msra.mxu0 %v3143_v19  ;;  %13400 = vmatpush3.msra.mxu1 %v3673_v5  ;;  %v12597_v47 = vpop.f32.mrf.mxu0  ;;  %v10682_v19 = vld [vmem:[%s22969_s0 + $0x129] sm:$0xff] }
 0x14c   :  { %v12725_v51 = vpop.f32.mrf.mxu1  ;;  %13060 = vmatmul.mubr.f32.gmra.mxu0 %v10680_v13  ;;  %13188 = vmatmul.mubr.f32.gmra.mxu1 %v15827_v31  ;;  %v10746_v5 = vld [vmem:[%s22969_s0 + $0x12a] sm:$0xff]  ;;  %v10683_v13 = vld [vmem:[%s22969_s0 + $0x139] sm:$0xff] }
 0x14d   :  { %23100 = vst [vmem:[#allocation5_spill] sm:$0xff] %v16293_v25  ;;  %v16302_v42 = vadd.f32 %v12725_v51, %v12597_v47  ;;  %13062 = vmatprep.mubr.f32.mxu0 %v10681_v29  ;;  %13190 = vmatprep.mubr.f32.mxu1 %v10745_v7  ;;  %v512_v35 = vpop.f32.mrf.mxu0  ;;  %v10747_v31 = vld [vmem:[%s22969_s0 + $0x13a] sm:$0xff] }
 0x14e   :  { %v897_v63 = vpop.f32.mrf.mxu1  ;;  %13275 = vmatprep.subr.mxu0 %v3142_v56  ;;  %13401 = vmatprep.subr.mxu1 %v3672_v11  ;;  %v3141_v7 = vld [vmem:[%s22968_s1 + $0x318] sm:$0xff]  ;;  %v3671_v47 = vld [vmem:[%s22968_s1 + $0x3a0] sm:$0xff] }
 0x14f   :  { %23101 = vst [vmem:[#allocation6_spill] sm:$0xff] %v16302_v42  ;;  %v16316_v29 = vadd.f32 %v897_v63, %v512_v35  ;;  %13276 = vmatpush3.msra.mxu0 %v3142_v56  ;;  %13402 = vmatpush3.msra.mxu1 %v3672_v11  ;;  %v12600_v51 = vpop.f32.mrf.mxu0  ;;  %v10684_v56 = vld [vmem:[%s22969_s0 + $0x141] sm:$0xff] }
 0x150   :  { %v12728_v42 = vpop.f32.mrf.mxu1  ;;  %13063 = vmatmul.mubr.f32.gmra.mxu0 %v10682_v19  ;;  %13191 = vmatmul.mubr.f32.gmra.mxu1 %v10746_v5  ;;  %v10748_v11 = vld [vmem:[%s22969_s0 + $0x142] sm:$0xff]  ;;  %v3140_v5 = vld [vmem:[%s22968_s1 + $0x310] sm:$0xff] }
 0x151   :  { %23102 = vst [vmem:[#allocation7_spill] sm:$0xff] %v16316_v29  ;;  %v16324_v25 = vadd.f32 %v12728_v42, %v12600_v51  ;;  %13065 = vmatprep.mubr.f32.mxu0 %v10683_v13  ;;  %13193 = vmatprep.mubr.f32.mxu1 %v10747_v31  ;;  %v522_v35 = vpop.f32.mrf.mxu0  ;;  %v10685_v29 = vld [vmem:[%s22969_s0 + $0x151] sm:$0xff] }
 0x152   :  { %v907_v63 = vpop.f32.mrf.mxu1  ;;  %v10749_v42 = vld [vmem:[%s22969_s0 + $0x152] sm:$0xff]  ;;  %13277 = vmatprep.subr.mxu0 %v3141_v7  ;;  %13403 = vmatprep.subr.mxu1 %v3671_v47 }
 0x153   :  { %23103 = vst [vmem:[#allocation8_spill] sm:$0xff] %v16324_v25  ;;  %v16338_v19 = vadd.f32 %v907_v63, %v522_v35  ;;  %13278 = vmatpush3.msra.mxu0 %v3141_v7  ;;  %13404 = vmatpush3.msra.mxu1 %v3671_v47  ;;  %v3670_v13 = vld [vmem:[%s22968_s1 + $0x398] sm:$0xff]  ;;  %v12603_v31 = vpop.f32.mrf.mxu0 }
 0x154   :  { %v12731_v51 = vpop.f32.mrf.mxu1  ;;  %13066 = vmatmul.mubr.f32.gmra.mxu0 %v10684_v56  ;;  %13194 = vmatmul.mubr.f32.gmra.mxu1 %v10748_v11  ;;  %v10686_v7 = vld [vmem:[%s22969_s0 + $0x159] sm:$0xff]  ;;  %v10751_v56 = vld [vmem:[%s22969_s0 + $0x16a] sm:$0xff] }
 0x155   :  { %23104 = vst [vmem:[#allocation9_spill] sm:$0xff] %v16338_v19  ;;  %v16346_v25 = vadd.f32 %v12731_v51, %v12603_v31  ;;  %13068 = vmatprep.mubr.f32.mxu0 %v10685_v29  ;;  %13196 = vmatprep.mubr.f32.mxu1 %v10749_v42  ;;  %v10750_v47 = vld [vmem:[%s22969_s0 + $0x15a] sm:$0xff]  ;;  %v532_v35 = vpop.f32.mrf.mxu0  ;;  %v10687_v19 = vld [vmem:[%s22969_s0 + $0x169] sm:$0xff] }
 0x156   :  { %v917_v63 = vpop.f32.mrf.mxu1  ;;  %13279 = vmatprep.subr.mxu0 %v3140_v5  ;;  %13405 = vmatprep.subr.mxu1 %v3670_v13  ;;  %v3139_v11 = vld [vmem:[%s22968_s1 + $0x308] sm:$0xff]  ;;  %v3669_v42 = vld [vmem:[%s22968_s1 + $0x390] sm:$0xff] }
 0x157   :  { %23105 = vst [vmem:[#allocation10_spill] sm:$0xff] %v16346_v25  ;;  %v16360_v29 = vadd.f32 %v917_v63, %v532_v35  ;;  %13280 = vmatpush3.msra.mxu0 %v3140_v5  ;;  %13406 = vmatpush3.msra.mxu1 %v3670_v13  ;;  %v12606_v31 = vpop.f32.mrf.mxu0  ;;  %v10688_v5 = vld [vmem:[%s22969_s0 + $0x171] sm:$0xff] }
 0x158   :  { %v12734_v51 = vpop.f32.mrf.mxu1  ;;  %13069 = vmatmul.mubr.f32.gmra.mxu0 %v10686_v7  ;;  %13197 = vmatmul.mubr.f32.gmra.mxu1 %v10750_v47  ;;  %v10752_v13 = vld [vmem:[%s22969_s0 + $0x172] sm:$0xff]  ;;  %v10753_v7 = vld [vmem:[%s22969_s0 + $0x182] sm:$0xff] }
 0x159   :  { %23106 = vst [vmem:[#allocation11_spill] sm:$0xff] %v16360_v29  ;;  %v16368_v25 = vadd.f32 %v12734_v51, %v12606_v31  ;;  %13071 = vmatprep.mubr.f32.mxu0 %v10687_v19  ;;  %13199 = vmatprep.mubr.f32.mxu1 %v10751_v56  ;;  %v542_v35 = vpop.f32.mrf.mxu0  ;;  %v10689_v29 = vld [vmem:[%s22969_s0 + $0x181] sm:$0xff] }
 0x15a   :  { %v927_v63 = vpop.f32.mrf.mxu1  ;;  %13281 = vmatprep.subr.mxu0 %v3139_v11  ;;  %13407 = vmatprep.subr.mxu1 %v3669_v42  ;;  %v3138_v47 = vld [vmem:[%s22968_s1 + $0x300] sm:$0xff]  ;;  %v3668_v56 = vld [vmem:[%s22968_s1 + $0x388] sm:$0xff] }
 0x15b   :  { %23107 = vst [vmem:[#allocation12_spill] sm:$0xff] %v16368_v25  ;;  %v16382_v19 = vadd.f32 %v927_v63, %v542_v35  ;;  %13282 = vmatpush3.msra.mxu0 %v3139_v11  ;;  %13408 = vmatpush3.msra.mxu1 %v3669_v42  ;;  %v12609_v31 = vpop.f32.mrf.mxu0  ;;  %v10690_v11 = vld [vmem:[%s22969_s0 + $0x189] sm:$0xff] }
 0x15c   :  { %v12737_v51 = vpop.f32.mrf.mxu1  ;;  %13072 = vmatmul.mubr.f32.gmra.mxu0 %v10688_v5  ;;  %13200 = vmatmul.mubr.f32.gmra.mxu1 %v10752_v13  ;;  %v10754_v42 = vld [vmem:[%s22969_s0 + $0x18a] sm:$0xff]  ;;  %v3667_v13 = vld [vmem:[%s22968_s1 + $0x380] sm:$0xff] }
 0x15d   :  { %23108 = vst [vmem:[#allocation13_spill] sm:$0xff] %v16382_v19  ;;  %v16390_v25 = vadd.f32 %v12737_v51, %v12609_v31  ;;  %13074 = vmatprep.mubr.f32.mxu0 %v10689_v29  ;;  %13202 = vmatprep.mubr.f32.mxu1 %v10753_v7  ;;  %v552_v35 = vpop.f32.mrf.mxu0  ;;  %v10691_v19 = vld [vmem:[%s22969_s0 + $0x1c9] sm:$0xff]  ;;  %v16412_v7 = vld [vmem:[%s22968_s1 + $0x478] sm:$0xff] }
 0x15e   :  { %v937_v63 = vpop.f32.mrf.mxu1  ;;  %v10755_v5 = vld [vmem:[%s22969_s0 + $0x1ca] sm:$0xff]  ;;  %13283 = vmatprep.subr.mxu0 %v3138_v47  ;;  %13409 = vmatprep.subr.mxu1 %v3668_v56 }
 0x15f   :  { %23109 = vst [vmem:[#allocation14_spill] sm:$0xff] %v16390_v25  ;;  %v16404_v29 = vadd.f32 %v937_v63, %v552_v35  ;;  %13284 = vmatpush3.msra.mxu0 %v3138_v47  ;;  %13410 = vmatpush3.msra.mxu1 %v3668_v56  ;;  %v12612_v31 = vpop.f32.mrf.mxu0  ;;  %v10692_v47 = vld [vmem:[%s22969_s0 + $0x1d1] sm:$0xff] }
 0x160   :  { %v12740_v51 = vpop.f32.mrf.mxu1  ;;  %13075 = vmatmul.mubr.f32.gmra.mxu0 %v10690_v11  ;;  %13203 = vmatmul.mubr.f32.gmra.mxu1 %v10754_v42  ;;  %v10756_v56 = vld [vmem:[%s22969_s0 + $0x1d2] sm:$0xff]  ;;  %v10757_v11 = vld [vmem:[%s22969_s0 + $0x1e2] sm:$0xff] }
 0x161   :  { %23110 = vst [vmem:[#allocation15_spill] sm:$0xff] %v16404_v29  ;;  %v16414_v25 = vadd.f32 %v12740_v51, %v12612_v31  ;;  %13077 = vmatprep.mubr.f32.mxu0 %v10691_v19  ;;  %13205 = vmatprep.mubr.f32.mxu1 %v10755_v5  ;;  %v562_v35 = vpop.f32.mrf.mxu0  ;;  %v10693_v29 = vld [vmem:[%s22969_s0 + $0x1e1] sm:$0xff]  ;;  %v10694_v51 = vld [vmem:[%s22969_s0 + $0x1e9] sm:$0xff] }
 0x162   :  { %v947_v63 = vpop.f32.mrf.mxu1  ;;  %13411 = vmatprep.subr.mxu1 %v3667_v13  ;;  %13509 = vmatprep.subr.mxu0 %v16412_v7 }
 0x163   :  { %23111 = vst [vmem:[#allocation16_spill] sm:$0xff] %v16414_v25  ;;  %v16429_v19 = vadd.f32 %v947_v63, %v562_v35  ;;  %13412 = vmatpush3.msra.mxu1 %v3667_v13  ;;  %v12775_v42 = vpop.f32.mrf.mxu0  ;;  %v10758_v25 = vld [vmem:[%s22969_s0 + $0x1ea] sm:$0xff]  ;;  %v10695_v13 = vld [vmem:[%s22969_s0 + $0x1f9] sm:$0xff] }
 0x164   :  { %13078 = vmatmul.mubr.f32.gmra.mxu0 %v10692_v47  ;;  %v12903_v5 = vpop.f32.mrf.mxu1  ;;  %13206 = vmatmul.mubr.f32.gmra.mxu1 %v10756_v56  ;;  %v1422_v31 = vadd.f32 %v12775_v42, %v15912_v54  ;;  %v10759_v54 = vld [vmem:[%s22969_s0 + $0x1fa] sm:$0xff] }
 0x165   :  { %23112 = vst [vmem:[#allocation17_spill] sm:$0xff] %v16429_v19  ;;  %13080 = vmatprep.mubr.f32.mxu0 %v10693_v29  ;;  %13208 = vmatprep.mubr.f32.mxu1 %v10757_v11  ;;  %v1102_v46 = vpop.f32.mrf.mxu0  ;;  %v10696_v19 = vld [vmem:[%s22969_s0 + $0x201] sm:$0xff] }
 0x166   :  { %v1632_v35 = vpop.f32.mrf.mxu1  ;;  %v1421_v29 = vadd.f32 %v1102_v46, %v15921_v62  ;;  %v16445_v47 = vadd.f32 %v12903_v5, %v1422_v31  ;;  %v10760_v62 = vld [vmem:[%s22969_s0 + $0x202] sm:$0xff] }
 0x168   :  { %v12778_v56 = vpop.f32.mrf.mxu0  ;;  %13081 = vmatmul.mubr.f32.gmra.mxu0 %v10694_v51  ;;  %v12906_v63 = vpop.f32.mrf.mxu1  ;;  %13209 = vmatmul.mubr.f32.gmra.mxu1 %v10758_v25  ;;  %v16448_v42 = vadd.f32 %v1632_v35, %v1421_v29  ;;  %v10697_v25 = vld [vmem:[%s22969_s0 + $0x211] sm:$0xff] }
 0x169   :  { %v1424_v11 = vadd.f32 %v12778_v56, %v15924_v24  ;;  %13083 = vmatprep.mubr.f32.mxu0 %v10695_v13  ;;  %13211 = vmatprep.mubr.f32.mxu1 %v10759_v54  ;;  %v10761_v24 = vld [vmem:[%s22969_s0 + $0x212] sm:$0xff] }
 0x16a   :  { %v1112_v46 = vpop.f32.mrf.mxu0  ;;  %v1642_v5 = vpop.f32.mrf.mxu1  ;;  %v10698_v56 = vld [vmem:[%s22969_s0 + $0x219] sm:$0xff] }
 0x16b   :  { %v1423_v31 = vadd.f32 %v1112_v46, %v15933_v44  ;;  %v16463_v51 = vadd.f32 %v12906_v63, %v1424_v11  ;;  %v10762_v44 = vld [vmem:[%s22969_s0 + $0x21a] sm:$0xff] }
 0x16c   :  { %v12781_v35 = vpop.f32.mrf.mxu0  ;;  %13084 = vmatmul.mubr.f32.gmra.mxu0 %v10696_v19  ;;  %v12909_v13 = vpop.f32.mrf.mxu1  ;;  %13212 = vmatmul.mubr.f32.gmra.mxu1 %v10760_v62  ;;  %v10699_v19 = vld [vmem:[%s22969_s0 + $0x229] sm:$0xff] }
 0x16d   :  { %v1426_v54 = vadd.f32 %v12781_v35, %v15936_v32  ;;  %v16466_v29 = vadd.f32 %v1642_v5, %v1423_v31  ;;  %13086 = vmatprep.mubr.f32.mxu0 %v10697_v25  ;;  %13214 = vmatprep.mubr.f32.mxu1 %v10761_v24  ;;  %v10763_v32 = vld [vmem:[%s22969_s0 + $0x22a] sm:$0xff] }
 0x16e   :  { %v1122_v63 = vpop.f32.mrf.mxu0  ;;  %v1652_v11 = vpop.f32.mrf.mxu1  ;;  %v10700_v35 = vld [vmem:[%s22969_s0 + $0x231] sm:$0xff] }
 0x16f   :  { %v1425_v62 = vadd.f32 %v1122_v63, %v15945_v17  ;;  %v16481_v46 = vadd.f32 %v12909_v13, %v1426_v54  ;;  %v10764_v17 = vld [vmem:[%s22969_s0 + $0x232] sm:$0xff] }
 0x170   :  { %v12784_v5 = vpop.f32.mrf.mxu0  ;;  %13087 = vmatmul.mubr.f32.gmra.mxu0 %v10698_v56  ;;  %v12912_v25 = vpop.f32.mrf.mxu1  ;;  %13215 = vmatmul.mubr.f32.gmra.mxu1 %v10762_v44  ;;  %v10701_v56 = vld [vmem:[%s22969_s0 + $0x241] sm:$0xff] }
 0x171   :  { %v1428_v24 = vadd.f32 %v12784_v5, %v15948_v40  ;;  %v16484_v31 = vadd.f32 %v1652_v11, %v1425_v62  ;;  %13089 = vmatprep.mubr.f32.mxu0 %v10699_v19  ;;  %13217 = vmatprep.mubr.f32.mxu1 %v10763_v32  ;;  %v10765_v40 = vld [vmem:[%s22969_s0 + $0x242] sm:$0xff] }
 0x172   :  { %v1132_v13 = vpop.f32.mrf.mxu0  ;;  %v1662_v54 = vpop.f32.mrf.mxu1  ;;  %v10702_v5 = vld [vmem:[%s22969_s0 + $0x249] sm:$0xff] }
 0x173   :  { %v1427_v44 = vadd.f32 %v1132_v13, %v15957_v23  ;;  %v16499_v63 = vadd.f32 %v12912_v25, %v1428_v24  ;;  %v10766_v23 = vld [vmem:[%s22969_s0 + $0x24a] sm:$0xff] }
 0x174   :  { %v12787_v11 = vpop.f32.mrf.mxu0  ;;  %13090 = vmatmul.mubr.f32.gmra.mxu0 %v10700_v35  ;;  %v12915_v19 = vpop.f32.mrf.mxu1  ;;  %13218 = vmatmul.mubr.f32.gmra.mxu1 %v10764_v17  ;;  %v10703_v35 = vld [vmem:[%s22969_s0 + $0x259] sm:$0xff] }
 0x175   :  { %v1430_v32 = vadd.f32 %v12787_v11, %v15960_v50  ;;  %v16502_v62 = vadd.f32 %v1662_v54, %v1427_v44  ;;  %13092 = vmatprep.mubr.f32.mxu0 %v10701_v56  ;;  %13220 = vmatprep.mubr.f32.mxu1 %v10765_v40  ;;  %v10767_v50 = vld [vmem:[%s22969_s0 + $0x25a] sm:$0xff] }
 0x176   :  { %v1142_v25 = vpop.f32.mrf.mxu0  ;;  %v1672_v24 = vpop.f32.mrf.mxu1  ;;  %v10704_v11 = vld [vmem:[%s22969_s0 + $0x261] sm:$0xff] }
 0x177   :  { %v1429_v17 = vadd.f32 %v1142_v25, %v15969_v20  ;;  %v16517_v13 = vadd.f32 %v12915_v19, %v1430_v32  ;;  %v10768_v20 = vld [vmem:[%s22969_s0 + $0x262] sm:$0xff] }
 0x178   :  { %v12790_v54 = vpop.f32.mrf.mxu0  ;;  %13093 = vmatmul.mubr.f32.gmra.mxu0 %v10702_v5  ;;  %v12918_v56 = vpop.f32.mrf.mxu1  ;;  %13221 = vmatmul.mubr.f32.gmra.mxu1 %v10766_v23  ;;  %v10705_v5 = vld [vmem:[%s22969_s0 + $0x271] sm:$0xff] }
 0x179   :  { %v1432_v40 = vadd.f32 %v12790_v54, %v15972_v60  ;;  %v16520_v44 = vadd.f32 %v1672_v24, %v1429_v17  ;;  %13095 = vmatprep.mubr.f32.mxu0 %v10703_v35  ;;  %13223 = vmatprep.mubr.f32.mxu1 %v10767_v50  ;;  %v10769_v60 = vld [vmem:[%s22969_s0 + $0x272] sm:$0xff] }
 0x17a   :  { %v1152_v19 = vpop.f32.mrf.mxu0  ;;  %v1682_v32 = vpop.f32.mrf.mxu1  ;;  %v10706_v54 = vld [vmem:[%s22969_s0 + $0x279] sm:$0xff] }
 0x17b   :  { %v1431_v23 = vadd.f32 %v1152_v19, %v15981_v27  ;;  %v16535_v25 = vadd.f32 %v12918_v56, %v1432_v40  ;;  %v10770_v27 = vld [vmem:[%s22969_s0 + $0x27a] sm:$0xff] }
 0x17c   :  { %v12793_v24 = vpop.f32.mrf.mxu0  ;;  %13096 = vmatmul.mubr.f32.gmra.mxu0 %v10704_v11  ;;  %v12921_v35 = vpop.f32.mrf.mxu1  ;;  %13224 = vmatmul.mubr.f32.gmra.mxu1 %v10768_v20  ;;  %v10707_v11 = vld [vmem:[%s22969_s0 + $0x289] sm:$0xff] }
 0x17d   :  { %v1434_v50 = vadd.f32 %v12793_v24, %v15984_v4  ;;  %v16538_v17 = vadd.f32 %v1682_v32, %v1431_v23  ;;  %13098 = vmatprep.mubr.f32.mxu0 %v10705_v5  ;;  %13226 = vmatprep.mubr.f32.mxu1 %v10769_v60  ;;  %v10771_v4 = vld [vmem:[%s22969_s0 + $0x28a] sm:$0xff] }
 0x17e   :  { %v1162_v56 = vpop.f32.mrf.mxu0  ;;  %v1692_v40 = vpop.f32.mrf.mxu1  ;;  %v10708_v24 = vld [vmem:[%s22969_s0 + $0x291] sm:$0xff] }
 0x17f   :  { %v1433_v20 = vadd.f32 %v1162_v56, %v15993_v34  ;;  %v16553_v19 = vadd.f32 %v12921_v35, %v1434_v50  ;;  %v10772_v34 = vld [vmem:[%s22969_s0 + $0x292] sm:$0xff] }
 0x180   :  { %v12796_v32 = vpop.f32.mrf.mxu0  ;;  %13099 = vmatmul.mubr.f32.gmra.mxu0 %v10706_v54  ;;  %v12924_v5 = vpop.f32.mrf.mxu1  ;;  %13227 = vmatmul.mubr.f32.gmra.mxu1 %v10770_v27  ;;  %v10709_v54 = vld [vmem:[%s22969_s0 + $0x2a1] sm:$0xff] }
 0x181   :  { %v1436_v60 = vadd.f32 %v12796_v32, %v15996_v12  ;;  %v16556_v23 = vadd.f32 %v1692_v40, %v1433_v20  ;;  %13101 = vmatprep.mubr.f32.mxu0 %v10707_v11  ;;  %13229 = vmatprep.mubr.f32.mxu1 %v10771_v4  ;;  %v10773_v12 = vld [vmem:[%s22969_s0 + $0x2a2] sm:$0xff] }
 0x182   :  { %v1172_v35 = vpop.f32.mrf.mxu0  ;;  %v1702_v50 = vpop.f32.mrf.mxu1  ;;  %v10710_v32 = vld [vmem:[%s22969_s0 + $0x2a9] sm:$0xff] }
 0x183   :  { %v1435_v27 = vadd.f32 %v1172_v35, %v16005_v45  ;;  %v16571_v56 = vadd.f32 %v12924_v5, %v1436_v60  ;;  %v10774_v45 = vld [vmem:[%s22969_s0 + $0x2aa] sm:$0xff] }
 0x184   :  { %v12799_v40 = vpop.f32.mrf.mxu0  ;;  %13102 = vmatmul.mubr.f32.gmra.mxu0 %v10708_v24  ;;  %v12927_v11 = vpop.f32.mrf.mxu1  ;;  %13230 = vmatmul.mubr.f32.gmra.mxu1 %v10772_v34  ;;  %v10711_v24 = vld [vmem:[%s22969_s0 + $0x2b9] sm:$0xff] }
 0x185   :  { %v1438_v4 = vadd.f32 %v12799_v40, %v16008_v21  ;;  %v16574_v20 = vadd.f32 %v1702_v50, %v1435_v27  ;;  %13104 = vmatprep.mubr.f32.mxu0 %v10709_v54  ;;  %13232 = vmatprep.mubr.f32.mxu1 %v10773_v12  ;;  %v10775_v21 = vld [vmem:[%s22969_s0 + $0x2ba] sm:$0xff] }
 0x186   :  { %v1182_v5 = vpop.f32.mrf.mxu0  ;;  %v1712_v60 = vpop.f32.mrf.mxu1  ;;  %v10712_v40 = vld [vmem:[%s22969_s0 + $0x2c1] sm:$0xff] }
 0x187   :  { %v1437_v34 = vadd.f32 %v1182_v5, %v16023_v55  ;;  %v16589_v35 = vadd.f32 %v12927_v11, %v1438_v4  ;;  %v10776_v55 = vld [vmem:[%s22969_s0 + $0x2c2] sm:$0xff] }
 0x188   :  { %v12802_v50 = vpop.f32.mrf.mxu0  ;;  %13105 = vmatmul.mubr.f32.gmra.mxu0 %v10710_v32  ;;  %v12930_v54 = vpop.f32.mrf.mxu1  ;;  %13233 = vmatmul.mubr.f32.gmra.mxu1 %v10774_v45  ;;  %v10713_v32 = vld [vmem:[%s22969_s0 + $0x2d1] sm:$0xff] }
 0x189   :  { %v1440_v12 = vadd.f32 %v12802_v50, %v16026_v39  ;;  %v16592_v27 = vadd.f32 %v1712_v60, %v1437_v34  ;;  %13107 = vmatprep.mubr.f32.mxu0 %v10711_v24  ;;  %13235 = vmatprep.mubr.f32.mxu1 %v10775_v21  ;;  %v10777_v39 = vld [vmem:[%s22969_s0 + $0x2d2] sm:$0xff] }
 0x18a   :  { %v1192_v11 = vpop.f32.mrf.mxu0  ;;  %v1722_v4 = vpop.f32.mrf.mxu1  ;;  %v10714_v50 = vld [vmem:[%s22969_s0 + $0x2d9] sm:$0xff] }
 0x18b   :  { %v1439_v45 = vadd.f32 %v1192_v11, %v16035_v2  ;;  %v16607_v5 = vadd.f32 %v12930_v54, %v1440_v12  ;;  %v10778_v2 = vld [vmem:[%s22969_s0 + $0x2da] sm:$0xff] }
 0x18c   :  { %v12805_v60 = vpop.f32.mrf.mxu0  ;;  %13108 = vmatmul.mubr.f32.gmra.mxu0 %v10712_v40  ;;  %v12933_v24 = vpop.f32.mrf.mxu1  ;;  %13236 = vmatmul.mubr.f32.gmra.mxu1 %v10776_v55  ;;  %v10715_v40 = vld [vmem:[%s22969_s0 + $0x2e9] sm:$0xff] }
 0x18d   :  { %v1442_v21 = vadd.f32 %v12805_v60, %v16038_v49  ;;  %v16610_v34 = vadd.f32 %v1722_v4, %v1439_v45  ;;  %13110 = vmatprep.mubr.f32.mxu0 %v10713_v32  ;;  %13238 = vmatprep.mubr.f32.mxu1 %v10777_v39  ;;  %v10779_v49 = vld [vmem:[%s22969_s0 + $0x2ea] sm:$0xff] }
 0x18e   :  { %v1202_v54 = vpop.f32.mrf.mxu0  ;;  %v1732_v12 = vpop.f32.mrf.mxu1  ;;  %v10716_v60 = vld [vmem:[%s22969_s0 + $0x2f1] sm:$0xff] }
 0x18f   :  { %v1441_v55 = vadd.f32 %v1202_v54, %v16047_v30  ;;  %v16625_v11 = vadd.f32 %v12933_v24, %v1442_v21  ;;  %v10780_v30 = vld [vmem:[%s22969_s0 + $0x2f2] sm:$0xff] }
 0x190   :  { %v12808_v4 = vpop.f32.mrf.mxu0  ;;  %13111 = vmatmul.mubr.f32.gmra.mxu0 %v10714_v50  ;;  %v12936_v32 = vpop.f32.mrf.mxu1  ;;  %13239 = vmatmul.mubr.f32.gmra.mxu1 %v10778_v2  ;;  %v10717_v50 = vld [vmem:[%s22969_s0 + $0x301] sm:$0xff] }
 0x191   :  { %v1444_v39 = vadd.f32 %v12808_v4, %v16050_v3  ;;  %v16628_v45 = vadd.f32 %v1732_v12, %v1441_v55  ;;  %13113 = vmatprep.mubr.f32.mxu0 %v10715_v40  ;;  %13241 = vmatprep.mubr.f32.mxu1 %v10779_v49  ;;  %v10781_v3 = vld [vmem:[%s22969_s0 + $0x302] sm:$0xff] }
 0x192   :  { %v1212_v24 = vpop.f32.mrf.mxu0  ;;  %v1742_v21 = vpop.f32.mrf.mxu1  ;;  %v10718_v4 = vld [vmem:[%s22969_s0 + $0x309] sm:$0xff] }
 0x193   :  { %v1443_v2 = vadd.f32 %v1212_v24, %v16059_v0  ;;  %v16643_v54 = vadd.f32 %v12936_v32, %v1444_v39  ;;  %v10782_v0 = vld [vmem:[%s22969_s0 + $0x30a] sm:$0xff] }
 0x194   :  { %v12811_v12 = vpop.f32.mrf.mxu0  ;;  %13114 = vmatmul.mubr.f32.gmra.mxu0 %v10716_v60  ;;  %v12939_v40 = vpop.f32.mrf.mxu1  ;;  %13242 = vmatmul.mubr.f32.gmra.mxu1 %v10780_v30  ;;  %v10719_v60 = vld [vmem:[%s22969_s0 + $0x319] sm:$0xff] }
 0x195   :  { %v1446_v49 = vadd.f32 %v12811_v12, %v16062_v59  ;;  %v16646_v55 = vadd.f32 %v1742_v21, %v1443_v2  ;;  %13116 = vmatprep.mubr.f32.mxu0 %v10717_v50  ;;  %13244 = vmatprep.mubr.f32.mxu1 %v10781_v3  ;;  %v10783_v59 = vld [vmem:[%s22969_s0 + $0x31a] sm:$0xff] }
 0x196   :  { %v1222_v32 = vpop.f32.mrf.mxu0  ;;  %v1752_v39 = vpop.f32.mrf.mxu1  ;;  %v10720_v12 = vld [vmem:[%s22969_s0 + $0x321] sm:$0xff] }
 0x197   :  { %v1445_v30 = vadd.f32 %v1222_v32, %v16071_v14  ;;  %v16661_v24 = vadd.f32 %v12939_v40, %v1446_v49  ;;  %v10784_v14 = vld [vmem:[%s22969_s0 + $0x322] sm:$0xff] }
 0x198   :  { %v12814_v21 = vpop.f32.mrf.mxu0  ;;  %13117 = vmatmul.mubr.f32.gmra.mxu0 %v10718_v4  ;;  %v12942_v50 = vpop.f32.mrf.mxu1  ;;  %13245 = vmatmul.mubr.f32.gmra.mxu1 %v10782_v0  ;;  %v10721_v4 = vld [vmem:[%s22969_s0 + $0x331] sm:$0xff] }
 0x199   :  { %v1448_v3 = vadd.f32 %v12814_v21, %v16074_v16  ;;  %v16664_v2 = vadd.f32 %v1752_v39, %v1445_v30  ;;  %13119 = vmatprep.mubr.f32.mxu0 %v10719_v60  ;;  %13247 = vmatprep.mubr.f32.mxu1 %v10783_v59  ;;  %v10785_v16 = vld [vmem:[%s22969_s0 + $0x332] sm:$0xff]  ;;  %v23114_v59 = vld [vmem:[#allocation3_spill] sm:$0xff] }
 0x19a   :  { %v1232_v40 = vpop.f32.mrf.mxu0  ;;  %v1762_v49 = vpop.f32.mrf.mxu1 }
 0x19b   :  { %23113 = vst [vmem:[#allocation18_spill] sm:$0xff] %v16664_v2  ;;  %v1447_v0 = vadd.f32 %v1232_v40, %v16086_v15  ;;  %v16679_v32 = vadd.f32 %v12942_v50, %v1448_v3  ;;  %v10722_v2 = vld [vmem:[%s22969_s0 + $0x339] sm:$0xff] }
 0x19c   :  { %v12817_v39 = vpop.f32.mrf.mxu0  ;;  %13120 = vmatmul.mubr.f32.gmra.mxu0 %v10720_v12  ;;  %v12945_v60 = vpop.f32.mrf.mxu1  ;;  %13248 = vmatmul.mubr.f32.gmra.mxu1 %v10784_v14  ;;  %v10786_v15 = vld [vmem:[%s22969_s0 + $0x33a] sm:$0xff]  ;;  %v10787_v12 = vld [vmem:[%s22969_s0 + $0x30] sm:$0xff] }
 0x19d   :  { %v1450_v30 = vadd.f32 %v12817_v39, %v23114_v59  ;;  %v16682_v21 = vadd.f32 %v1762_v49, %v1447_v0  ;;  %13122 = vmatprep.mubr.f32.mxu0 %v10721_v4  ;;  %13250 = vmatprep.mubr.f32.mxu1 %v10785_v16  ;;  %v10851_v14 = vld [vmem:[%s22969_s0 + $0x31] sm:$0xff] }
 0x19e   :  { %v1242_v50 = vpop.f32.mrf.mxu0  ;;  %v1772_v3 = vpop.f32.mrf.mxu1  ;;  %v10788_v59 = vld [vmem:[%s22969_s0 + $0x38] sm:$0xff] }
 0x19f   :  { %v1449_v40 = vadd.f32 %v1242_v50, %v16100_v18  ;;  %v16697_v49 = vadd.f32 %v12945_v60, %v1450_v30  ;;  %v10852_v18 = vld [vmem:[%s22969_s0 + $0x39] sm:$0xff]  ;;  %v10853_v50 = vld [vmem:[%s22969_s0 + $0x49] sm:$0xff] }
 0x1a0   :  { %v12820_v4 = vpop.f32.mrf.mxu0  ;;  %13123 = vmatmul.mubr.f32.gmra.mxu0 %v10722_v2  ;;  %v12948_v16 = vpop.f32.mrf.mxu1  ;;  %13251 = vmatmul.mubr.f32.gmra.mxu1 %v10786_v15  ;;  %v10789_v2 = vld [vmem:[%s22969_s0 + $0x48] sm:$0xff] }
 0x1a1   :  { %v1452_v0 = vadd.f32 %v12820_v4, %v16102_v26  ;;  %v16700_v39 = vadd.f32 %v1772_v3, %v1449_v40  ;;  %13285 = vmatprep.mubr.f32.mxu0 %v10787_v12  ;;  %13413 = vmatprep.mubr.f32.mxu1 %v10851_v14  ;;  %v4210_v3 = vld [vmem:[%s22968_s1 + $0x470] sm:$0xff] }
 0x1a2   :  { %v1252_v60 = vpop.f32.mrf.mxu0  ;;  %v1782_v30 = vpop.f32.mrf.mxu1 }
 0x1a3   :  { %v1451_v26 = vadd.f32 %v1252_v60, %v16111_v37  ;;  %v16712_v15 = vadd.f32 %v12948_v16, %v1452_v0  ;;  %v10790_v37 = vld [vmem:[%s22969_s0 + $0x50] sm:$0xff] }
 0x1a4   :  { %v12823_v12 = vpop.f32.mrf.mxu0  ;;  %13286 = vmatmul.mubr.f32.vlgmr.msra.gmra.mxu0 %v10788_v59  ;;  %v12951_v14 = vpop.f32.mrf.mxu1  ;;  %13414 = vmatmul.mubr.f32.vlgmr.msra.gmra.mxu1 %v10852_v18  ;;  %v10854_v16 = vld [vmem:[%s22969_s0 + $0x51] sm:$0xff] }
 0x1a5   :  { %v1454_v40 = vadd.f32 %v12823_v12, %v16117_v61  ;;  %v16721_v4 = vadd.f32 %v1782_v30, %v1451_v26  ;;  %13510 = vmatpush3.msra.mxu0 %v16412_v7  ;;  %13288 = vmatprep.mubr.f32.mxu0 %v10789_v2  ;;  %v10791_v61 = vld [vmem:[%s22969_s0 + $0x60] sm:$0xff]  ;;  %v4209_v30 = vld [vmem:[%s22968_s1 + $0x468] sm:$0xff] }
 0x1a6   :  { %v1262_v0 = vpop.f32.mrf.mxu0  ;;  %v1792_v60 = vpop.f32.mrf.mxu1  ;;  %13416 = vmatprep.mubr.f32.mxu1 %v10853_v50  ;;  %13511 = vmatprep.subr.mxu0 %v4210_v3  ;;  %v10855_v7 = vld [vmem:[%s22969_s0 + $0x61] sm:$0xff] }
 0x1a7   :  { %v1453_v59 = vadd.f32 %v1262_v0, %v16127_v28  ;;  %v16737_v18 = vadd.f32 %v12951_v14, %v1454_v40  ;;  %13512 = vmatpush3.msra.mxu0 %v4210_v3  ;;  %v10792_v28 = vld [vmem:[%s22969_s0 + $0x68] sm:$0xff] }
 0x1a8   :  { %v12826_v2 = vpop.f32.mrf.mxu0  ;;  %13289 = vmatmul.mubr.f32.gmra.mxu0 %v10790_v37  ;;  %v12954_v26 = vpop.f32.mrf.mxu1  ;;  %13417 = vmatmul.mubr.f32.gmra.mxu1 %v10854_v16  ;;  %v10856_v3 = vld [vmem:[%s22969_s0 + $0x69] sm:$0xff]  ;;  %v10793_v37 = vld [vmem:[%s22969_s0 + $0x78] sm:$0xff] }
 0x1a9   :  { %v1456_v50 = vadd.f32 %v12826_v2, %v16137_v57  ;;  %v16743_v12 = vadd.f32 %v1792_v60, %v1453_v59  ;;  %13291 = vmatprep.mubr.f32.mxu0 %v10791_v61  ;;  %13419 = vmatprep.mubr.f32.mxu1 %v10855_v7  ;;  %v10857_v57 = vld [vmem:[%s22969_s0 + $0x79] sm:$0xff] }
 0x1aa   :  { %v1272_v14 = vpop.f32.mrf.mxu0  ;;  %v1802_v40 = vpop.f32.mrf.mxu1  ;;  %13513 = vmatprep.subr.mxu0 %v4209_v30  ;;  %v4208_v60 = vld [vmem:[%s22968_s1 + $0x460] sm:$0xff] }
 0x1ab   :  { %v1455_v16 = vadd.f32 %v1272_v14, %v16146_v22  ;;  %v16758_v0 = vadd.f32 %v12954_v26, %v1456_v50  ;;  %13514 = vmatpush3.msra.mxu0 %v4209_v30  ;;  %v10794_v22 = vld [vmem:[%s22969_s0 + $0x80] sm:$0xff] }
 0x1ac   :  { %v12829_v61 = vpop.f32.mrf.mxu0  ;;  %13292 = vmatmul.mubr.f32.gmra.mxu0 %v10792_v28  ;;  %v12957_v7 = vpop.f32.mrf.mxu1  ;;  %13420 = vmatmul.mubr.f32.gmra.mxu1 %v10856_v3  ;;  %v10858_v30 = vld [vmem:[%s22969_s0 + $0x81] sm:$0xff]  ;;  %v10795_v28 = vld [vmem:[%s22969_s0 + $0x90] sm:$0xff] }
 0x1ad   :  { %v1458_v59 = vadd.f32 %v12829_v61, %v16155_v36  ;;  %v16764_v2 = vadd.f32 %v1802_v40, %v1455_v16  ;;  %13294 = vmatprep.mubr.f32.mxu0 %v10793_v37  ;;  %13422 = vmatprep.mubr.f32.mxu1 %v10857_v57  ;;  %v10859_v36 = vld [vmem:[%s22969_s0 + $0x91] sm:$0xff] }
 0x1ae   :  { %v1282_v26 = vpop.f32.mrf.mxu0  ;;  %v1812_v50 = vpop.f32.mrf.mxu1  ;;  %13515 = vmatprep.subr.mxu0 %v4208_v60  ;;  %v4207_v40 = vld [vmem:[%s22968_s1 + $0x458] sm:$0xff] }
 0x1af   :  { %v1457_v3 = vadd.f32 %v1282_v26, %v16164_v10  ;;  %v16779_v14 = vadd.f32 %v12957_v7, %v1458_v59  ;;  %13516 = vmatpush3.msra.mxu0 %v4208_v60  ;;  %v10796_v10 = vld [vmem:[%s22969_s0 + $0x98] sm:$0xff] }
 0x1b0   :  { %v12832_v37 = vpop.f32.mrf.mxu0  ;;  %13295 = vmatmul.mubr.f32.gmra.mxu0 %v10794_v22  ;;  %v12960_v57 = vpop.f32.mrf.mxu1  ;;  %13423 = vmatmul.mubr.f32.gmra.mxu1 %v10858_v30  ;;  %v10860_v60 = vld [vmem:[%s22969_s0 + $0x99] sm:$0xff]  ;;  %v10797_v22 = vld [vmem:[%s22969_s0 + $0xa8] sm:$0xff] }
 0x1b1   :  { %v1460_v16 = vadd.f32 %v12832_v37, %v16173_v9  ;;  %v16785_v61 = vadd.f32 %v1812_v50, %v1457_v3  ;;  %13297 = vmatprep.mubr.f32.mxu0 %v10795_v28  ;;  %13425 = vmatprep.mubr.f32.mxu1 %v10859_v36  ;;  %v10861_v9 = vld [vmem:[%s22969_s0 + $0xa9] sm:$0xff] }
 0x1b2   :  { %v1292_v7 = vpop.f32.mrf.mxu0  ;;  %v1822_v59 = vpop.f32.mrf.mxu1  ;;  %13517 = vmatprep.subr.mxu0 %v4207_v40  ;;  %v4206_v50 = vld [vmem:[%s22968_s1 + $0x450] sm:$0xff] }
 0x1b3   :  { %v1459_v30 = vadd.f32 %v1292_v7, %v16182_v38  ;;  %v16800_v26 = vadd.f32 %v12960_v57, %v1460_v16  ;;  %13518 = vmatpush3.msra.mxu0 %v4207_v40  ;;  %v10798_v38 = vld [vmem:[%s22969_s0 + $0xb0] sm:$0xff] }
 0x1b4   :  { %v12835_v28 = vpop.f32.mrf.mxu0  ;;  %13298 = vmatmul.mubr.f32.gmra.mxu0 %v10796_v10  ;;  %v12963_v36 = vpop.f32.mrf.mxu1  ;;  %13426 = vmatmul.mubr.f32.gmra.mxu1 %v10860_v60  ;;  %v10862_v40 = vld [vmem:[%s22969_s0 + $0xb1] sm:$0xff]  ;;  %v10799_v10 = vld [vmem:[%s22969_s0 + $0xc0] sm:$0xff] }
 0x1b5   :  { %v1462_v3 = vadd.f32 %v12835_v28, %v16191_v8  ;;  %v16806_v37 = vadd.f32 %v1822_v59, %v1459_v30  ;;  %13300 = vmatprep.mubr.f32.mxu0 %v10797_v22  ;;  %13428 = vmatprep.mubr.f32.mxu1 %v10861_v9  ;;  %v10863_v8 = vld [vmem:[%s22969_s0 + $0xc1] sm:$0xff] }
 0x1b6   :  { %v1302_v57 = vpop.f32.mrf.mxu0  ;;  %v1832_v16 = vpop.f32.mrf.mxu1  ;;  %13519 = vmatprep.subr.mxu0 %v4206_v50  ;;  %v4205_v59 = vld [vmem:[%s22968_s1 + $0x448] sm:$0xff] }
 0x1b7   :  { %v1461_v60 = vadd.f32 %v1302_v57, %v16200_v43  ;;  %v16821_v7 = vadd.f32 %v12963_v36, %v1462_v3  ;;  %13520 = vmatpush3.msra.mxu0 %v4206_v50  ;;  %v10800_v43 = vld [vmem:[%s22969_s0 + $0xc8] sm:$0xff] }
 0x1b8   :  { %v12838_v22 = vpop.f32.mrf.mxu0  ;;  %13301 = vmatmul.mubr.f32.gmra.mxu0 %v10798_v38  ;;  %v12966_v9 = vpop.f32.mrf.mxu1  ;;  %13429 = vmatmul.mubr.f32.gmra.mxu1 %v10862_v40  ;;  %v10864_v50 = vld [vmem:[%s22969_s0 + $0xc9] sm:$0xff]  ;;  %v10801_v38 = vld [vmem:[%s22969_s0 + $0xd8] sm:$0xff] }
 0x1b9   :  { %v1464_v30 = vadd.f32 %v12838_v22, %v16209_v6  ;;  %v16827_v28 = vadd.f32 %v1832_v16, %v1461_v60  ;;  %13303 = vmatprep.mubr.f32.mxu0 %v10799_v10  ;;  %13431 = vmatprep.mubr.f32.mxu1 %v10863_v8  ;;  %v10865_v6 = vld [vmem:[%s22969_s0 + $0xd9] sm:$0xff] }
 0x1ba   :  { %v1312_v36 = vpop.f32.mrf.mxu0  ;;  %v1842_v3 = vpop.f32.mrf.mxu1  ;;  %13521 = vmatprep.subr.mxu0 %v4205_v59  ;;  %v4204_v16 = vld [vmem:[%s22968_s1 + $0x440] sm:$0xff] }
 0x1bb   :  { %v1463_v40 = vadd.f32 %v1312_v36, %v16218_v48  ;;  %v16842_v57 = vadd.f32 %v12966_v9, %v1464_v30  ;;  %13522 = vmatpush3.msra.mxu0 %v4205_v59  ;;  %v10802_v48 = vld [vmem:[%s22969_s0 + $0xe0] sm:$0xff] }
 0x1bc   :  { %v12841_v10 = vpop.f32.mrf.mxu0  ;;  %13304 = vmatmul.mubr.f32.gmra.mxu0 %v10800_v43  ;;  %v12969_v8 = vpop.f32.mrf.mxu1  ;;  %13432 = vmatmul.mubr.f32.gmra.mxu1 %v10864_v50  ;;  %v10866_v59 = vld [vmem:[%s22969_s0 + $0xe1] sm:$0xff]  ;;  %v10803_v43 = vld [vmem:[%s22969_s0 + $0xf0] sm:$0xff] }
 0x1bd   :  { %v1466_v60 = vadd.f32 %v12841_v10, %v16227_v33  ;;  %v16848_v22 = vadd.f32 %v1842_v3, %v1463_v40  ;;  %13306 = vmatprep.mubr.f32.mxu0 %v10801_v38  ;;  %13434 = vmatprep.mubr.f32.mxu1 %v10865_v6  ;;  %v10867_v33 = vld [vmem:[%s22969_s0 + $0xf1] sm:$0xff] }
 0x1be   :  { %v1322_v9 = vpop.f32.mrf.mxu0  ;;  %v1852_v30 = vpop.f32.mrf.mxu1  ;;  %13523 = vmatprep.subr.mxu0 %v4204_v16  ;;  %v4203_v3 = vld [vmem:[%s22968_s1 + $0x438] sm:$0xff] }
 0x1bf   :  { %v1465_v50 = vadd.f32 %v1322_v9, %v16236_v53  ;;  %v16863_v36 = vadd.f32 %v12969_v8, %v1466_v60  ;;  %13524 = vmatpush3.msra.mxu0 %v4204_v16  ;;  %v10804_v53 = vld [vmem:[%s22969_s0 + $0xf8] sm:$0xff] }
 0x1c0   :  { %v12844_v38 = vpop.f32.mrf.mxu0  ;;  %13307 = vmatmul.mubr.f32.gmra.mxu0 %v10802_v48  ;;  %v12972_v6 = vpop.f32.mrf.mxu1  ;;  %13435 = vmatmul.mubr.f32.gmra.mxu1 %v10866_v59  ;;  %v10868_v16 = vld [vmem:[%s22969_s0 + $0xf9] sm:$0xff]  ;;  %v10805_v48 = vld [vmem:[%s22969_s0 + $0x108] sm:$0xff] }
 0x1c1   :  { %v1468_v40 = vadd.f32 %v12844_v38, %v16245_v52  ;;  %v16869_v10 = vadd.f32 %v1852_v30, %v1465_v50  ;;  %13309 = vmatprep.mubr.f32.mxu0 %v10803_v43  ;;  %13437 = vmatprep.mubr.f32.mxu1 %v10867_v33  ;;  %v10869_v52 = vld [vmem:[%s22969_s0 + $0x109] sm:$0xff] }
 0x1c2   :  { %v1332_v8 = vpop.f32.mrf.mxu0  ;;  %v1862_v60 = vpop.f32.mrf.mxu1  ;;  %13525 = vmatprep.subr.mxu0 %v4203_v3  ;;  %v4202_v30 = vld [vmem:[%s22968_s1 + $0x430] sm:$0xff] }
 0x1c3   :  { %v1467_v59 = vadd.f32 %v1332_v8, %v16254_v58  ;;  %v16884_v9 = vadd.f32 %v12972_v6, %v1468_v40  ;;  %13526 = vmatpush3.msra.mxu0 %v4203_v3  ;;  %v10806_v58 = vld [vmem:[%s22969_s0 + $0x110] sm:$0xff] }
 0x1c4   :  { %v12847_v43 = vpop.f32.mrf.mxu0  ;;  %13310 = vmatmul.mubr.f32.gmra.mxu0 %v10804_v53  ;;  %v12975_v33 = vpop.f32.mrf.mxu1  ;;  %13438 = vmatmul.mubr.f32.gmra.mxu1 %v10868_v16  ;;  %v10870_v3 = vld [vmem:[%s22969_s0 + $0x111] sm:$0xff]  ;;  %v10807_v53 = vld [vmem:[%s22969_s0 + $0x120] sm:$0xff] }
 0x1c5   :  { %v1470_v50 = vadd.f32 %v12847_v43, %v16263_v41  ;;  %v16890_v38 = vadd.f32 %v1862_v60, %v1467_v59  ;;  %13312 = vmatprep.mubr.f32.mxu0 %v10805_v48  ;;  %13440 = vmatprep.mubr.f32.mxu1 %v10869_v52  ;;  %v10871_v41 = vld [vmem:[%s22969_s0 + $0x121] sm:$0xff] }
 0x1c6   :  { %v1342_v6 = vpop.f32.mrf.mxu0  ;;  %v1872_v40 = vpop.f32.mrf.mxu1  ;;  %13527 = vmatprep.subr.mxu0 %v4202_v30  ;;  %v4201_v60 = vld [vmem:[%s22968_s1 + $0x428] sm:$0xff] }
 0x1c7   :  { %23115 = vst [vmem:[#allocation3_spill] sm:$0xff] %v16890_v38  ;;  %v1469_v16 = vadd.f32 %v1342_v6, %v16272_v1  ;;  %v16905_v8 = vadd.f32 %v12975_v33, %v1470_v50  ;;  %13528 = vmatpush3.msra.mxu0 %v4202_v30  ;;  %v23117_v59 = vld [vmem:[#allocation4_spill] sm:$0xff]  ;;  %v23119_v6 = vld [vmem:[#allocation5_spill] sm:$0xff] }
 0x1c8   :  { %v12850_v48 = vpop.f32.mrf.mxu0  ;;  %13313 = vmatmul.mubr.f32.gmra.mxu0 %v10806_v58  ;;  %v12978_v52 = vpop.f32.mrf.mxu1  ;;  %13441 = vmatmul.mubr.f32.gmra.mxu1 %v10870_v3  ;;  %v10808_v1 = vld [vmem:[%s22969_s0 + $0x128] sm:$0xff]  ;;  %v10809_v58 = vld [vmem:[%s22969_s0 + $0x138] sm:$0xff] }
 0x1c9   :  { %23116 = vst [vmem:[#allocation19_spill] sm:$0xff] %v16905_v8  ;;  %v1472_v43 = vadd.f32 %v12850_v48, %v23117_v59  ;;  %v16911_v38 = vadd.f32 %v1872_v40, %v1469_v16  ;;  %13315 = vmatprep.mubr.f32.mxu0 %v10807_v53  ;;  %13443 = vmatprep.mubr.f32.mxu1 %v10871_v41  ;;  %v10872_v30 = vld [vmem:[%s22969_s0 + $0x129] sm:$0xff]  ;;  %v10873_v3 = vld [vmem:[%s22969_s0 + $0x139] sm:$0xff] }
 0x1ca   :  { %v1352_v33 = vpop.f32.mrf.mxu0  ;;  %v1882_v50 = vpop.f32.mrf.mxu1  ;;  %13529 = vmatprep.subr.mxu0 %v4201_v60  ;;  %v4200_v41 = vld [vmem:[%s22968_s1 + $0x420] sm:$0xff]  ;;  %v23121_v59 = vld [vmem:[#allocation6_spill] sm:$0xff] }
 0x1cb   :  { %23118 = vst [vmem:[#allocation4_spill] sm:$0xff] %v16911_v38  ;;  %v1471_v40 = vadd.f32 %v1352_v33, %v23119_v6  ;;  %v16926_v53 = vadd.f32 %v12978_v52, %v1472_v43  ;;  %13530 = vmatpush3.msra.mxu0 %v4201_v60  ;;  %v10810_v33 = vld [vmem:[%s22969_s0 + $0x140] sm:$0xff] }
 0x1cc   :  { %v12853_v16 = vpop.f32.mrf.mxu0  ;;  %13316 = vmatmul.mubr.f32.gmra.mxu0 %v10808_v1  ;;  %v12981_v48 = vpop.f32.mrf.mxu1  ;;  %13444 = vmatmul.mubr.f32.gmra.mxu1 %v10872_v30  ;;  %v10874_v60 = vld [vmem:[%s22969_s0 + $0x141] sm:$0xff]  ;;  %v10811_v1 = vld [vmem:[%s22969_s0 + $0x150] sm:$0xff] }
 0x1cd   :  { %23120 = vst [vmem:[#allocation5_spill] sm:$0xff] %v16926_v53  ;;  %v1474_v38 = vadd.f32 %v12853_v16, %v23121_v59  ;;  %v16932_v8 = vadd.f32 %v1882_v50, %v1471_v40  ;;  %13318 = vmatprep.mubr.f32.mxu0 %v10809_v58  ;;  %13446 = vmatprep.mubr.f32.mxu1 %v10873_v3  ;;  %v10875_v30 = vld [vmem:[%s22969_s0 + $0x151] sm:$0xff]  ;;  %v23123_v50 = vld [vmem:[#allocation7_spill] sm:$0xff]  ;;  %v23125_v59 = vld [vmem:[#allocation8_spill] sm:$0xff] }
 0x1ce   :  { %v1362_v52 = vpop.f32.mrf.mxu0  ;;  %v1892_v43 = vpop.f32.mrf.mxu1  ;;  %13531 = vmatprep.subr.mxu0 %v4200_v41  ;;  %v4199_v3 = vld [vmem:[%s22968_s1 + $0x418] sm:$0xff] }
 0x1cf   :  { %23122 = vst [vmem:[#allocation6_spill] sm:$0xff] %v16932_v8  ;;  %v1473_v58 = vadd.f32 %v1362_v52, %v23123_v50  ;;  %v16947_v6 = vadd.f32 %v12981_v48, %v1474_v38  ;;  %13532 = vmatpush3.msra.mxu0 %v4200_v41  ;;  %v10812_v52 = vld [vmem:[%s22969_s0 + $0x158] sm:$0xff] }
 0x1d0   :  { %v12856_v40 = vpop.f32.mrf.mxu0  ;;  %13319 = vmatmul.mubr.f32.gmra.mxu0 %v10810_v33  ;;  %v12984_v16 = vpop.f32.mrf.mxu1  ;;  %13447 = vmatmul.mubr.f32.gmra.mxu1 %v10874_v60  ;;  %v10876_v38 = vld [vmem:[%s22969_s0 + $0x159] sm:$0xff]  ;;  %v10813_v33 = vld [vmem:[%s22969_s0 + $0x168] sm:$0xff] }
 0x1d1   :  { %23124 = vst [vmem:[#allocation7_spill] sm:$0xff] %v16947_v6  ;;  %v1476_v8 = vadd.f32 %v12856_v40, %v23125_v59  ;;  %v16953_v53 = vadd.f32 %v1892_v43, %v1473_v58  ;;  %13321 = vmatprep.mubr.f32.mxu0 %v10811_v1  ;;  %13449 = vmatprep.mubr.f32.mxu1 %v10875_v30  ;;  %v10877_v60 = vld [vmem:[%s22969_s0 + $0x169] sm:$0xff]  ;;  %v23129_v59 = vld [vmem:[#allocation10_spill] sm:$0xff] }
 0x1d2   :  { %v1372_v41 = vpop.f32.mrf.mxu0  ;;  %v1902_v48 = vpop.f32.mrf.mxu1  ;;  %13533 = vmatprep.subr.mxu0 %v4199_v3  ;;  %v23127_v43 = vld [vmem:[#allocation9_spill] sm:$0xff] }
 0x1d3   :  { %23126 = vst [vmem:[#allocation8_spill] sm:$0xff] %v16953_v53  ;;  %v1475_v1 = vadd.f32 %v1372_v41, %v23127_v43  ;;  %v16968_v50 = vadd.f32 %v12984_v16, %v1476_v8  ;;  %13534 = vmatpush3.msra.mxu0 %v4199_v3  ;;  %v4198_v30 = vld [vmem:[%s22968_s1 + $0x410] sm:$0xff] }
 0x1d4   :  { %v12859_v58 = vpop.f32.mrf.mxu0  ;;  %13322 = vmatmul.mubr.f32.gmra.mxu0 %v10812_v52  ;;  %v12987_v40 = vpop.f32.mrf.mxu1  ;;  %13450 = vmatmul.mubr.f32.gmra.mxu1 %v10876_v38  ;;  %v10814_v41 = vld [vmem:[%s22969_s0 + $0x170] sm:$0xff]  ;;  %v10815_v52 = vld [vmem:[%s22969_s0 + $0x180] sm:$0xff] }
 0x1d5   :  { %23128 = vst [vmem:[#allocation9_spill] sm:$0xff] %v16968_v50  ;;  %v1478_v53 = vadd.f32 %v12859_v58, %v23129_v59  ;;  %v16974_v6 = vadd.f32 %v1902_v48, %v1475_v1  ;;  %13324 = vmatprep.mubr.f32.mxu0 %v10813_v33  ;;  %13452 = vmatprep.mubr.f32.mxu1 %v10877_v60  ;;  %v10878_v8 = vld [vmem:[%s22969_s0 + $0x171] sm:$0xff]  ;;  %v10879_v38 = vld [vmem:[%s22969_s0 + $0x181] sm:$0xff] }
 0x1d6   :  { %v1382_v3 = vpop.f32.mrf.mxu0  ;;  %v1912_v16 = vpop.f32.mrf.mxu1  ;;  %13535 = vmatprep.subr.mxu0 %v4198_v30  ;;  %v23131_v48 = vld [vmem:[#allocation11_spill] sm:$0xff]  ;;  %v4197_v60 = vld [vmem:[%s22968_s1 + $0x408] sm:$0xff] }
 0x1d7   :  { %23130 = vst [vmem:[#allocation10_spill] sm:$0xff] %v16974_v6  ;;  %v1477_v33 = vadd.f32 %v1382_v3, %v23131_v48  ;;  %v16989_v43 = vadd.f32 %v12987_v40, %v1478_v53  ;;  %13536 = vmatpush3.msra.mxu0 %v4198_v30  ;;  %v23133_v59 = vld [vmem:[#allocation12_spill] sm:$0xff] }
 0x1d8   :  { %v12862_v1 = vpop.f32.mrf.mxu0  ;;  %13325 = vmatmul.mubr.f32.gmra.mxu0 %v10814_v41  ;;  %v12990_v58 = vpop.f32.mrf.mxu1  ;;  %13453 = vmatmul.mubr.f32.gmra.mxu1 %v10878_v8  ;;  %v10816_v3 = vld [vmem:[%s22969_s0 + $0x188] sm:$0xff]  ;;  %v10817_v41 = vld [vmem:[%s22969_s0 + $0x198] sm:$0xff] }
 0x1d9   :  { %23132 = vst [vmem:[#allocation11_spill] sm:$0xff] %v16989_v43  ;;  %v1480_v6 = vadd.f32 %v12862_v1, %v23133_v59  ;;  %v16995_v50 = vadd.f32 %v1912_v16, %v1477_v33  ;;  %13327 = vmatprep.mubr.f32.mxu0 %v10815_v52  ;;  %13455 = vmatprep.mubr.f32.mxu1 %v10879_v38  ;;  %v10880_v53 = vld [vmem:[%s22969_s0 + $0x189] sm:$0xff]  ;;  %v10881_v8 = vld [vmem:[%s22969_s0 + $0x199] sm:$0xff] }
 0x1da   :  { %v1392_v30 = vpop.f32.mrf.mxu0  ;;  %v1922_v40 = vpop.f32.mrf.mxu1  ;;  %13537 = vmatprep.subr.mxu0 %v4197_v60  ;;  %v23135_v16 = vld [vmem:[#allocation13_spill] sm:$0xff]  ;;  %v4196_v38 = vld [vmem:[%s22968_s1 + $0x400] sm:$0xff]  ;;  %v23137_v59 = vld [vmem:[#allocation14_spill] sm:$0xff] }
 0x1db   :  { %23134 = vst [vmem:[#allocation12_spill] sm:$0xff] %v16995_v50  ;;  %v1479_v52 = vadd.f32 %v1392_v30, %v23135_v16  ;;  %v17010_v48 = vadd.f32 %v12990_v58, %v1480_v6  ;;  %13538 = vmatpush3.msra.mxu0 %v4197_v60  ;;  %v10818_v30 = vld [vmem:[%s22969_s0 + $0x1a0] sm:$0xff] }
 0x1dc   :  { %v12865_v33 = vpop.f32.mrf.mxu0  ;;  %13328 = vmatmul.mubr.f32.gmra.mxu0 %v10816_v3  ;;  %v12993_v1 = vpop.f32.mrf.mxu1  ;;  %13456 = vmatmul.mubr.f32.gmra.mxu1 %v10880_v53  ;;  %v10882_v6 = vld [vmem:[%s22969_s0 + $0x1a1] sm:$0xff] }
 0x1dd   :  { %23136 = vst [vmem:[#allocation13_spill] sm:$0xff] %v17010_v48  ;;  %v1482_v50 = vadd.f32 %v12865_v33, %v23137_v59  ;;  %v17016_v43 = vadd.f32 %v1922_v40, %v1479_v52  ;;  %13330 = vmatprep.mubr.f32.mxu0 %v10817_v41  ;;  %13458 = vmatprep.mubr.f32.mxu1 %v10881_v8  ;;  %v10819_v3 = vld [vmem:[%s22969_s0 + $0x1e0] sm:$0xff]  ;;  %v23140_v33 = vld [vmem:[#allocation16_spill] sm:$0xff] }
 0x1de   :  { %v1402_v60 = vpop.f32.mrf.mxu0  ;;  %v1932_v58 = vpop.f32.mrf.mxu1  ;;  %v10883_v53 = vld [vmem:[%s22969_s0 + $0x1e1] sm:$0xff]  ;;  %13539 = vmatprep.subr.mxu0 %v4196_v38 }
 0x1df   :  { %23138 = vst [vmem:[#allocation14_spill] sm:$0xff] %v17016_v43  ;;  %v23139_v40 = vld [vmem:[#allocation15_spill] sm:$0xff]  ;;  %v17031_v16 = vadd.f32 %v12993_v1, %v1482_v50  ;;  %13540 = vmatpush3.msra.mxu0 %v4196_v38  ;;  %v10820_v48 = vld [vmem:[%s22969_s0 + $0x1e8] sm:$0xff] }
 0x1e0   :  { %v1481_v41 = vadd.f32 %v1402_v60, %v23139_v40  ;;  %v12868_v8 = vpop.f32.mrf.mxu0  ;;  %13331 = vmatmul.mubr.f32.gmra.mxu0 %v10818_v30  ;;  %v12996_v52 = vpop.f32.mrf.mxu1  ;;  %13459 = vmatmul.mubr.f32.gmra.mxu1 %v10882_v6  ;;  %v10884_v50 = vld [vmem:[%s22969_s0 + $0x1e9] sm:$0xff]  ;;  %v10821_v30 = vld [vmem:[%s22969_s0 + $0x1f8] sm:$0xff] }
 0x1e1   :  { %v1484_v59 = vadd.f32 %v12868_v8, %v23140_v33  ;;  %13333 = vmatprep.mubr.f32.mxu0 %v10819_v3  ;;  %13461 = vmatprep.mubr.f32.mxu1 %v10883_v53  ;;  %v10885_v6 = vld [vmem:[%s22969_s0 + $0x1f9] sm:$0xff]  ;;  %v23141_v60 = vld [vmem:[#allocation17_spill] sm:$0xff] }
 0x1e2   :  { %v17034_v43 = vadd.f32 %v1932_v58, %v1481_v41  ;;  %v1412_v1 = vpop.f32.mrf.mxu0  ;;  %v1942_v38 = vpop.f32.mrf.mxu1  ;;  %v10822_v33 = vld [vmem:[%s22969_s0 + $0x200] sm:$0xff] }
 0x1e3   :  { %v1483_v58 = vadd.f32 %v1412_v1, %v23141_v60  ;;  %v17049_v3 = vadd.f32 %v12996_v52, %v1484_v59  ;;  %v10886_v1 = vld [vmem:[%s22969_s0 + $0x201] sm:$0xff] }
 0x1e4   :  { %v13031_v40 = vpop.f32.mrf.mxu0  ;;  %13334 = vmatmul.mubr.f32.gmra.mxu0 %v10820_v48  ;;  %v13159_v53 = vpop.f32.mrf.mxu1  ;;  %13462 = vmatmul.mubr.f32.gmra.mxu1 %v10884_v50  ;;  %v10823_v48 = vld [vmem:[%s22969_s0 + $0x210] sm:$0xff] }
 0x1e5   :  { %v17051_v41 = vadd.f32 %v1942_v38, %v1483_v58  ;;  %v2481_v8 = vadd.f32 %v13031_v40, %v16445_v47  ;;  %13336 = vmatprep.mubr.f32.mxu0 %v10821_v30  ;;  %13464 = vmatprep.mubr.f32.mxu1 %v10885_v6  ;;  %v10887_v47 = vld [vmem:[%s22969_s0 + $0x211] sm:$0xff] }
 0x1e6   :  { %v2161_v52 = vpop.f32.mrf.mxu0  ;;  %v2690_v59 = vpop.f32.mrf.mxu1  ;;  %v10824_v40 = vld [vmem:[%s22969_s0 + $0x218] sm:$0xff] }
 0x1e7   :  { %v2480_v50 = vadd.f32 %v2161_v52, %v16448_v42  ;;  %v17067_v38 = vadd.f32 %v13159_v53, %v2481_v8  ;;  %v10888_v42 = vld [vmem:[%s22969_s0 + $0x219] sm:$0xff] }
 0x1e8   :  { %v13034_v30 = vpop.f32.mrf.mxu0  ;;  %13337 = vmatmul.mubr.f32.gmra.mxu0 %v10822_v33  ;;  %v13162_v6 = vpop.f32.mrf.mxu1  ;;  %13465 = vmatmul.mubr.f32.gmra.mxu1 %v10886_v1  ;;  %v10825_v33 = vld [vmem:[%s22969_s0 + $0x228] sm:$0xff] }
 0x1e9   :  { %v2483_v60 = vadd.f32 %v13034_v30, %v16463_v51  ;;  %v17070_v58 = vadd.f32 %v2690_v59, %v2480_v50  ;;  %13339 = vmatprep.mubr.f32.mxu0 %v10823_v48  ;;  %13467 = vmatprep.mubr.f32.mxu1 %v10887_v47  ;;  %v10889_v51 = vld [vmem:[%s22969_s0 + $0x229] sm:$0xff] }
 0x1ea   :  { %v2171_v53 = vpop.f32.mrf.mxu0  ;;  %v2700_v8 = vpop.f32.mrf.mxu1  ;;  %v10826_v30 = vld [vmem:[%s22969_s0 + $0x230] sm:$0xff] }
 0x1eb   :  { %v2482_v1 = vadd.f32 %v2171_v53, %v16466_v29  ;;  %v17085_v52 = vadd.f32 %v13162_v6, %v2483_v60  ;;  %v10890_v29 = vld [vmem:[%s22969_s0 + $0x231] sm:$0xff] }
 0x1ec   :  { %v13037_v59 = vpop.f32.mrf.mxu0  ;;  %13340 = vmatmul.mubr.f32.gmra.mxu0 %v10824_v40  ;;  %v13165_v48 = vpop.f32.mrf.mxu1  ;;  %13468 = vmatmul.mubr.f32.gmra.mxu1 %v10888_v42  ;;  %v10827_v40 = vld [vmem:[%s22969_s0 + $0x240] sm:$0xff] }
 0x1ed   :  { %v2485_v47 = vadd.f32 %v13037_v59, %v16481_v46  ;;  %v17088_v50 = vadd.f32 %v2700_v8, %v2482_v1  ;;  %13342 = vmatprep.mubr.f32.mxu0 %v10825_v33  ;;  %13470 = vmatprep.mubr.f32.mxu1 %v10889_v51  ;;  %v10891_v46 = vld [vmem:[%s22969_s0 + $0x241] sm:$0xff] }
 0x1ee   :  { %v2181_v6 = vpop.f32.mrf.mxu0  ;;  %v2710_v60 = vpop.f32.mrf.mxu1  ;;  %v10828_v59 = vld [vmem:[%s22969_s0 + $0x248] sm:$0xff] }
 0x1ef   :  { %v2484_v42 = vadd.f32 %v2181_v6, %v16484_v31  ;;  %v17103_v53 = vadd.f32 %v13165_v48, %v2485_v47  ;;  %v10892_v31 = vld [vmem:[%s22969_s0 + $0x249] sm:$0xff] }
 0x1f0   :  { %v13040_v8 = vpop.f32.mrf.mxu0  ;;  %13343 = vmatmul.mubr.f32.gmra.mxu0 %v10826_v30  ;;  %v13168_v33 = vpop.f32.mrf.mxu1  ;;  %13471 = vmatmul.mubr.f32.gmra.mxu1 %v10890_v29  ;;  %v10829_v30 = vld [vmem:[%s22969_s0 + $0x258] sm:$0xff] }
 0x1f1   :  { %v2487_v51 = vadd.f32 %v13040_v8, %v16499_v63  ;;  %v17106_v1 = vadd.f32 %v2710_v60, %v2484_v42  ;;  %13345 = vmatprep.mubr.f32.mxu0 %v10827_v40  ;;  %13473 = vmatprep.mubr.f32.mxu1 %v10891_v46  ;;  %v10893_v63 = vld [vmem:[%s22969_s0 + $0x259] sm:$0xff] }
 0x1f2   :  { %v2191_v48 = vpop.f32.mrf.mxu0  ;;  %v2720_v47 = vpop.f32.mrf.mxu1  ;;  %v10830_v8 = vld [vmem:[%s22969_s0 + $0x260] sm:$0xff] }
 0x1f3   :  { %v2486_v29 = vadd.f32 %v2191_v48, %v16502_v62  ;;  %v17121_v6 = vadd.f32 %v13168_v33, %v2487_v51  ;;  %v10894_v62 = vld [vmem:[%s22969_s0 + $0x261] sm:$0xff] }
 0x1f4   :  { %v13043_v60 = vpop.f32.mrf.mxu0  ;;  %13346 = vmatmul.mubr.f32.gmra.mxu0 %v10828_v59  ;;  %v13171_v40 = vpop.f32.mrf.mxu1  ;;  %13474 = vmatmul.mubr.f32.gmra.mxu1 %v10892_v31  ;;  %v10831_v59 = vld [vmem:[%s22969_s0 + $0x270] sm:$0xff] }
 0x1f5   :  { %v2489_v46 = vadd.f32 %v13043_v60, %v16517_v13  ;;  %v17124_v42 = vadd.f32 %v2720_v47, %v2486_v29  ;;  %13348 = vmatprep.mubr.f32.mxu0 %v10829_v30  ;;  %13476 = vmatprep.mubr.f32.mxu1 %v10893_v63  ;;  %v10895_v13 = vld [vmem:[%s22969_s0 + $0x271] sm:$0xff] }
 0x1f6   :  { %v2201_v33 = vpop.f32.mrf.mxu0  ;;  %v2730_v51 = vpop.f32.mrf.mxu1  ;;  %v10832_v60 = vld [vmem:[%s22969_s0 + $0x278] sm:$0xff] }
 0x1f7   :  { %v2488_v31 = vadd.f32 %v2201_v33, %v16520_v44  ;;  %v17139_v48 = vadd.f32 %v13171_v40, %v2489_v46  ;;  %v10896_v44 = vld [vmem:[%s22969_s0 + $0x279] sm:$0xff] }
 0x1f8   :  { %v13046_v47 = vpop.f32.mrf.mxu0  ;;  %13349 = vmatmul.mubr.f32.gmra.mxu0 %v10830_v8  ;;  %v13174_v30 = vpop.f32.mrf.mxu1  ;;  %13477 = vmatmul.mubr.f32.gmra.mxu1 %v10894_v62  ;;  %v10833_v8 = vld [vmem:[%s22969_s0 + $0x288] sm:$0xff] }
 0x1f9   :  { %v2491_v63 = vadd.f32 %v13046_v47, %v16535_v25  ;;  %v17142_v29 = vadd.f32 %v2730_v51, %v2488_v31  ;;  %13351 = vmatprep.mubr.f32.mxu0 %v10831_v59  ;;  %13479 = vmatprep.mubr.f32.mxu1 %v10895_v13  ;;  %v10897_v25 = vld [vmem:[%s22969_s0 + $0x289] sm:$0xff] }
 0x1fa   :  { %v2211_v40 = vpop.f32.mrf.mxu0  ;;  %v2740_v46 = vpop.f32.mrf.mxu1  ;;  %v10834_v47 = vld [vmem:[%s22969_s0 + $0x290] sm:$0xff] }
 0x1fb   :  { %v2490_v62 = vadd.f32 %v2211_v40, %v16538_v17  ;;  %v17157_v33 = vadd.f32 %v13174_v30, %v2491_v63  ;;  %v10898_v17 = vld [vmem:[%s22969_s0 + $0x291] sm:$0xff] }
 0x1fc   :  { %v13049_v51 = vpop.f32.mrf.mxu0  ;;  %13352 = vmatmul.mubr.f32.gmra.mxu0 %v10832_v60  ;;  %v13177_v59 = vpop.f32.mrf.mxu1  ;;  %13480 = vmatmul.mubr.f32.gmra.mxu1 %v10896_v44  ;;  %v10835_v60 = vld [vmem:[%s22969_s0 + $0x2a0] sm:$0xff] }
 0x1fd   :  { %v2493_v13 = vadd.f32 %v13049_v51, %v16553_v19  ;;  %v17160_v31 = vadd.f32 %v2740_v46, %v2490_v62  ;;  %13354 = vmatprep.mubr.f32.mxu0 %v10833_v8  ;;  %13482 = vmatprep.mubr.f32.mxu1 %v10897_v25  ;;  %v10899_v19 = vld [vmem:[%s22969_s0 + $0x2a1] sm:$0xff] }
 0x1fe   :  { %v2221_v30 = vpop.f32.mrf.mxu0  ;;  %v2750_v63 = vpop.f32.mrf.mxu1  ;;  %v10836_v51 = vld [vmem:[%s22969_s0 + $0x2a8] sm:$0xff] }
 0x1ff   :  { %v2492_v44 = vadd.f32 %v2221_v30, %v16556_v23  ;;  %v17175_v40 = vadd.f32 %v13177_v59, %v2493_v13  ;;  %v10900_v23 = vld [vmem:[%s22969_s0 + $0x2a9] sm:$0xff] }
 0x200   :  { %v13052_v46 = vpop.f32.mrf.mxu0  ;;  %13355 = vmatmul.mubr.f32.gmra.mxu0 %v10834_v47  ;;  %v13180_v8 = vpop.f32.mrf.mxu1  ;;  %13483 = vmatmul.mubr.f32.gmra.mxu1 %v10898_v17  ;;  %v10837_v47 = vld [vmem:[%s22969_s0 + $0x2b8] sm:$0xff] }
 0x201   :  { %v2495_v25 = vadd.f32 %v13052_v46, %v16571_v56  ;;  %v17178_v62 = vadd.f32 %v2750_v63, %v2492_v44  ;;  %13357 = vmatprep.mubr.f32.mxu0 %v10835_v60  ;;  %13485 = vmatprep.mubr.f32.mxu1 %v10899_v19  ;;  %v10901_v56 = vld [vmem:[%s22969_s0 + $0x2b9] sm:$0xff] }
 0x202   :  { %v2231_v59 = vpop.f32.mrf.mxu0  ;;  %v2760_v13 = vpop.f32.mrf.mxu1  ;;  %v10838_v46 = vld [vmem:[%s22969_s0 + $0x2c0] sm:$0xff] }
 0x203   :  { %v2494_v17 = vadd.f32 %v2231_v59, %v16574_v20  ;;  %v17193_v30 = vadd.f32 %v13180_v8, %v2495_v25  ;;  %v10902_v20 = vld [vmem:[%s22969_s0 + $0x2c1] sm:$0xff] }
 0x204   :  { %v13055_v63 = vpop.f32.mrf.mxu0  ;;  %13358 = vmatmul.mubr.f32.gmra.mxu0 %v10836_v51  ;;  %v13183_v60 = vpop.f32.mrf.mxu1  ;;  %13486 = vmatmul.mubr.f32.gmra.mxu1 %v10900_v23  ;;  %v10839_v51 = vld [vmem:[%s22969_s0 + $0x2d0] sm:$0xff] }
 0x205   :  { %v2497_v19 = vadd.f32 %v13055_v63, %v16589_v35  ;;  %v17196_v44 = vadd.f32 %v2760_v13, %v2494_v17  ;;  %13360 = vmatprep.mubr.f32.mxu0 %v10837_v47  ;;  %13488 = vmatprep.mubr.f32.mxu1 %v10901_v56  ;;  %v10903_v35 = vld [vmem:[%s22969_s0 + $0x2d1] sm:$0xff]  ;;  %v10904_v63 = vld [vmem:[%s22969_s0 + $0x2d9] sm:$0xff] }
 0x206   :  { %v2241_v8 = vpop.f32.mrf.mxu0  ;;  %v17204_v25 = vpop.f32.mrf.mxu1  ;;  %v10840_v17 = vld [vmem:[%s22969_s0 + $0x2d8] sm:$0xff] }
 0x207   :  { %v17213_v23 = vadd.f32 %v2241_v8, %v16592_v27  ;;  %v17215_v59 = vadd.f32 %v13183_v60, %v2497_v19  ;;  %v10841_v60 = vld [vmem:[%s22969_s0 + $0x2e8] sm:$0xff] }
 0x208   :  { %v13058_v13 = vpop.f32.mrf.mxu0  ;;  %13361 = vmatmul.mubr.f32.gmra.mxu0 %v10838_v46  ;;  %v13186_v47 = vpop.f32.mrf.mxu1  ;;  %13489 = vmatmul.mubr.f32.gmra.mxu1 %v10902_v20 }
 0x209   :  { %v2499_v56 = vadd.f32 %v13058_v13, %v16607_v5  ;;  %13363 = vmatprep.mubr.f32.mxu0 %v10839_v51  ;;  %13491 = vmatprep.mubr.f32.mxu1 %v10903_v35  ;;  %v10905_v5 = vld [vmem:[%s22969_s0 + $0x2e9] sm:$0xff] }
 0x20a   :  { %v2251_v27 = vpop.f32.mrf.mxu0  ;;  %v17224_v8 = vpop.f32.mrf.mxu1  ;;  %v10842_v13 = vld [vmem:[%s22969_s0 + $0x2f0] sm:$0xff] }
 0x20b   :  { %23142 = vst [vmem:[#allocation15_spill] sm:$0xff] %v17224_v8  ;;  %v17233_v19 = vadd.f32 %v2251_v27, %v16610_v34  ;;  %v17235_v46 = vadd.f32 %v13186_v47, %v2499_v56  ;;  %v10906_v8 = vld [vmem:[%s22969_s0 + $0x2f1] sm:$0xff]  ;;  %v10843_v47 = vld [vmem:[%s22969_s0 + $0x300] sm:$0xff] }
 0x20c   :  { %v13061_v20 = vpop.f32.mrf.mxu0  ;;  %13364 = vmatmul.mubr.f32.gmra.mxu0 %v10840_v17  ;;  %v13189_v51 = vpop.f32.mrf.mxu1  ;;  %13492 = vmatmul.mubr.f32.gmra.mxu1 %v10904_v63 }
 0x20d   :  { %v2501_v35 = vadd.f32 %v13061_v20, %v16625_v11  ;;  %13366 = vmatprep.mubr.f32.mxu0 %v10841_v60  ;;  %13494 = vmatprep.mubr.f32.mxu1 %v10905_v5  ;;  %v10907_v11 = vld [vmem:[%s22969_s0 + $0x301] sm:$0xff] }
 0x20e   :  { %v2261_v34 = vpop.f32.mrf.mxu0  ;;  %v17244_v27 = vpop.f32.mrf.mxu1  ;;  %v10844_v20 = vld [vmem:[%s22969_s0 + $0x308] sm:$0xff] }
 0x20f   :  { %23143 = vst [vmem:[#allocation16_spill] sm:$0xff] %v17244_v27  ;;  %v17253_v56 = vadd.f32 %v2261_v34, %v16628_v45  ;;  %v17255_v17 = vadd.f32 %v13189_v51, %v2501_v35  ;;  %v10908_v27 = vld [vmem:[%s22969_s0 + $0x309] sm:$0xff]  ;;  %v10845_v51 = vld [vmem:[%s22969_s0 + $0x318] sm:$0xff] }
 0x210   :  { %v13064_v63 = vpop.f32.mrf.mxu0  ;;  %13367 = vmatmul.mubr.f32.gmra.mxu0 %v10842_v13  ;;  %v13192_v60 = vpop.f32.mrf.mxu1  ;;  %13495 = vmatmul.mubr.f32.gmra.mxu1 %v10906_v8 }
 0x211   :  { %23144 = vst [vmem:[#allocation17_spill] sm:$0xff] %v17253_v56  ;;  %v2503_v5 = vadd.f32 %v13064_v63, %v16643_v54  ;;  %13369 = vmatprep.mubr.f32.mxu0 %v10843_v47  ;;  %13497 = vmatprep.mubr.f32.mxu1 %v10907_v11  ;;  %v10909_v54 = vld [vmem:[%s22969_s0 + $0x319] sm:$0xff] }
 0x212   :  { %v2271_v45 = vpop.f32.mrf.mxu0  ;;  %v17264_v34 = vpop.f32.mrf.mxu1  ;;  %v10846_v63 = vld [vmem:[%s22969_s0 + $0x320] sm:$0xff] }
 0x213   :  { %23145 = vst [vmem:[#allocation20_spill] sm:$0xff] %v17264_v34  ;;  %v17273_v8 = vadd.f32 %v2271_v45, %v16646_v55  ;;  %v17275_v35 = vadd.f32 %v13192_v60, %v2503_v5  ;;  %v10910_v34 = vld [vmem:[%s22969_s0 + $0x321] sm:$0xff]  ;;  %v10847_v60 = vld [vmem:[%s22969_s0 + $0x330] sm:$0xff] }
 0x214   :  { %v13067_v13 = vpop.f32.mrf.mxu0  ;;  %13370 = vmatmul.mubr.f32.gmra.mxu0 %v10844_v20  ;;  %v13195_v47 = vpop.f32.mrf.mxu1  ;;  %13498 = vmatmul.mubr.f32.gmra.mxu1 %v10908_v27  ;;  %v23148_v27 = vld [vmem:[#allocation18_spill] sm:$0xff] }
 0x215   :  { %23146 = vst [vmem:[#allocation21_spill] sm:$0xff] %v17273_v8  ;;  %v2505_v11 = vadd.f32 %v13067_v13, %v16661_v24  ;;  %13372 = vmatprep.mubr.f32.mxu0 %v10845_v51  ;;  %13500 = vmatprep.mubr.f32.mxu1 %v10909_v54  ;;  %v10911_v24 = vld [vmem:[%s22969_s0 + $0x331] sm:$0xff]  ;;  %v10912_v8 = vld [vmem:[%s22969_s0 + $0x339] sm:$0xff] }
 0x216   :  { %v2281_v55 = vpop.f32.mrf.mxu0  ;;  %v17284_v45 = vpop.f32.mrf.mxu1 }
 0x217   :  { %23147 = vst [vmem:[#allocation22_spill] sm:$0xff] %v17284_v45  ;;  %v17293_v5 = vadd.f32 %v2281_v55, %v23148_v27  ;;  %v17295_v20 = vadd.f32 %v13195_v47, %v2505_v11  ;;  %v10848_v45 = vld [vmem:[%s22969_s0 + $0x338] sm:$0xff]  ;;  %v10849_v47 = vld [vmem:[%s22969_s0 + $0x348] sm:$0xff] }
 0x218   :  { %v13070_v51 = vpop.f32.mrf.mxu0  ;;  %13373 = vmatmul.mubr.f32.gmra.mxu0 %v10846_v63  ;;  %v13198_v54 = vpop.f32.mrf.mxu1  ;;  %13501 = vmatmul.mubr.f32.gmra.mxu1 %v10910_v34 }
 0x219   :  { %23149 = vst [vmem:[#allocation18_spill] sm:$0xff] %v17293_v5  ;;  %v2507_v13 = vadd.f32 %v13070_v51, %v16679_v32  ;;  %13375 = vmatprep.mubr.f32.mxu0 %v10847_v60  ;;  %13503 = vmatprep.mubr.f32.mxu1 %v10911_v24  ;;  %v10913_v32 = vld [vmem:[%s22969_s0 + $0x349] sm:$0xff] }
 0x21a   :  { %v2291_v55 = vpop.f32.mrf.mxu0  ;;  %v17304_v27 = vpop.f32.mrf.mxu1  ;;  %v10850_v51 = vld [vmem:[%s22969_s0 + $0x350] sm:$0xff] }
 0x21b   :  { %23150 = vst [vmem:[#allocation23_spill] sm:$0xff] %v17304_v27  ;;  %v17313_v34 = vadd.f32 %v2291_v55, %v16682_v21  ;;  %v17315_v11 = vadd.f32 %v13198_v54, %v2507_v13  ;;  %v10914_v27 = vld [vmem:[%s22969_s0 + $0x351] sm:$0xff] }
 0x21c   :  { %v13073_v63 = vpop.f32.mrf.mxu0  ;;  %13376 = vmatmul.mubr.f32.gmra.mxu0 %v10848_v45  ;;  %v13201_v60 = vpop.f32.mrf.mxu1  ;;  %13504 = vmatmul.mubr.f32.gmra.mxu1 %v10912_v8  ;;  %v10915_v45 = vld [vmem:[%s22969_s0 + $0x32] sm:$0xff] }
 0x21d   :  { %23151 = vst [vmem:[#allocation24_spill] sm:$0xff] %v17313_v34  ;;  %v2509_v24 = vadd.f32 %v13073_v63, %v16697_v49  ;;  %13378 = vmatprep.mubr.f32.mxu0 %v10849_v47  ;;  %13506 = vmatprep.mubr.f32.mxu1 %v10913_v32  ;;  %v10916_v32 = vld [vmem:[%s22969_s0 + $0x3a] sm:$0xff]  ;;  %v10967_v34 = vld [vmem:[%s22969_s0 + $0x2d2] sm:$0xff] }
 0x21e   :  { %v2301_v21 = vpop.f32.mrf.mxu0  ;;  %v17324_v55 = vpop.f32.mrf.mxu1 }
 0x21f   :  { %23152 = vst [vmem:[#allocation25_spill] sm:$0xff] %v17324_v55  ;;  %v17330_v8 = vadd.f32 %v2301_v21, %v16700_v39  ;;  %v17332_v49 = vadd.f32 %v13201_v60, %v2509_v24  ;;  %v10917_v39 = vld [vmem:[%s22969_s0 + $0x4a] sm:$0xff]  ;;  %v10918_v21 = vld [vmem:[%s22969_s0 + $0x52] sm:$0xff] }
 0x220   :  { %v13076_v54 = vpop.f32.mrf.mxu0  ;;  %13379 = vmatmul.mubr.f32.gmra.mxu0 %v10850_v51  ;;  %v13204_v13 = vpop.f32.mrf.mxu1  ;;  %13507 = vmatmul.mubr.f32.gmra.mxu1 %v10914_v27 }
 0x221   :  { %23153 = vst [vmem:[#allocation26_spill] sm:$0xff] %v17330_v8  ;;  %v2511_v47 = vadd.f32 %v13076_v54, %v16712_v15  ;;  %13541 = vmatprep.mubr.f32.mxu0 %v10915_v45  ;;  %v10965_v8 = vld [vmem:[%s22969_s0 + $0x2ba] sm:$0xff] }
 0x222   :  { %v2311_v63 = vpop.f32.mrf.mxu0  ;;  %v17338_v55 = vpop.f32.mrf.mxu1 }
 0x223   :  { %23154 = vst [vmem:[#allocation27_spill] sm:$0xff] %v17338_v55  ;;  %v17344_v60 = vadd.f32 %v2311_v63, %v16721_v4  ;;  %v17346_v24 = vadd.f32 %v13204_v13, %v2511_v47  ;;  %v10919_v4 = vld [vmem:[%s22969_s0 + $0x62] sm:$0xff]  ;;  %v10961_v55 = vld [vmem:[%s22969_s0 + $0x28a] sm:$0xff] }
 0x224   :  { %v13079_v27 = vpop.f32.mrf.mxu0  ;;  %13542 = vmatmul.mubr.f32.vlgmr.msra.gmra.mxu0 %v10916_v32  ;;  %v13207_v15 = vpop.f32.mrf.mxu1 }
 0x225   :  { %23155 = vst [vmem:[#allocation28_spill] sm:$0xff] %v17344_v60  ;;  %v2513_v51 = vadd.f32 %v13079_v27, %v16737_v18  ;;  %13544 = vmatprep.mubr.f32.mxu0 %v10917_v39  ;;  %v10920_v39 = vld [vmem:[%s22969_s0 + $0x6a] sm:$0xff]  ;;  %v10963_v60 = vld [vmem:[%s22969_s0 + $0x2a2] sm:$0xff] }
 0x226   :  { %v2321_v45 = vpop.f32.mrf.mxu0  ;;  %v17352_v54 = vpop.f32.mrf.mxu1 }
 0x227   :  { %23156 = vst [vmem:[#allocation29_spill] sm:$0xff] %v17352_v54  ;;  %v17358_v13 = vadd.f32 %v2321_v45, %v16743_v12  ;;  %v17360_v47 = vadd.f32 %v13207_v15, %v2513_v51  ;;  %v10921_v12 = vld [vmem:[%s22969_s0 + $0x7a] sm:$0xff] }
 0x228   :  { %v13082_v32 = vpop.f32.mrf.mxu0  ;;  %13545 = vmatmul.mubr.f32.gmra.mxu0 %v10918_v21  ;;  %v13210_v18 = vpop.f32.mrf.mxu1 }
 0x229   :  { %23157 = vst [vmem:[#allocation30_spill] sm:$0xff] %v17358_v13  ;;  %v2515_v63 = vadd.f32 %v13082_v32, %v16758_v0  ;;  %13547 = vmatprep.mubr.f32.mxu0 %v10919_v4  ;;  %v10922_v4 = vld [vmem:[%s22969_s0 + $0x82] sm:$0xff] }
 0x22a   :  { %v2331_v27 = vpop.f32.mrf.mxu0  ;;  %v17366_v54 = vpop.f32.mrf.mxu1 }
 0x22b   :  { %23158 = vst [vmem:[#allocation31_spill] sm:$0xff] %v17366_v54  ;;  %v17372_v15 = vadd.f32 %v2331_v27, %v16764_v2  ;;  %v17374_v51 = vadd.f32 %v13210_v18, %v2515_v63  ;;  %v10923_v2 = vld [vmem:[%s22969_s0 + $0x92] sm:$0xff] }
 0x22c   :  { %v13085_v21 = vpop.f32.mrf.mxu0  ;;  %13548 = vmatmul.mubr.f32.gmra.mxu0 %v10920_v39  ;;  %v13213_v0 = vpop.f32.mrf.mxu1 }
 0x22d   :  { %23159 = vst [vmem:[#allocation32_spill] sm:$0xff] %v17372_v15  ;;  %v2517_v45 = vadd.f32 %v13085_v21, %v16779_v14  ;;  %13550 = vmatprep.mubr.f32.mxu0 %v10921_v12  ;;  %v10924_v12 = vld [vmem:[%s22969_s0 + $0x9a] sm:$0xff] }
 0x22e   :  { %v2341_v32 = vpop.f32.mrf.mxu0  ;;  %v17380_v54 = vpop.f32.mrf.mxu1 }
 0x22f   :  { %23160 = vst [vmem:[#allocation33_spill] sm:$0xff] %v17380_v54  ;;  %v17386_v18 = vadd.f32 %v2341_v32, %v16785_v61  ;;  %v17388_v63 = vadd.f32 %v13213_v0, %v2517_v45  ;;  %v10925_v61 = vld [vmem:[%s22969_s0 + $0xaa] sm:$0xff] }
 0x230   :  { %v13088_v39 = vpop.f32.mrf.mxu0  ;;  %13551 = vmatmul.mubr.f32.gmra.mxu0 %v10922_v4  ;;  %v13216_v14 = vpop.f32.mrf.mxu1 }
 0x231   :  { %23161 = vst [vmem:[#allocation34_spill] sm:$0xff] %v17386_v18  ;;  %v2519_v27 = vadd.f32 %v13088_v39, %v16800_v26  ;;  %13553 = vmatprep.mubr.f32.mxu0 %v10923_v2  ;;  %v10926_v2 = vld [vmem:[%s22969_s0 + $0xb2] sm:$0xff] }
 0x232   :  { %v2351_v21 = vpop.f32.mrf.mxu0  ;;  %v17394_v54 = vpop.f32.mrf.mxu1 }
 0x233   :  { %23162 = vst [vmem:[#allocation35_spill] sm:$0xff] %v17394_v54  ;;  %v17400_v0 = vadd.f32 %v2351_v21, %v16806_v37  ;;  %v17402_v45 = vadd.f32 %v13216_v14, %v2519_v27  ;;  %v10927_v37 = vld [vmem:[%s22969_s0 + $0xc2] sm:$0xff] }
 0x234   :  { %v13091_v4 = vpop.f32.mrf.mxu0  ;;  %13554 = vmatmul.mubr.f32.gmra.mxu0 %v10924_v12  ;;  %v13219_v26 = vpop.f32.mrf.mxu1 }
 0x235   :  { %23163 = vst [vmem:[#allocation36_spill] sm:$0xff] %v17400_v0  ;;  %v2521_v32 = vadd.f32 %v13091_v4, %v16821_v7  ;;  %13556 = vmatprep.mubr.f32.mxu0 %v10925_v61  ;;  %v10928_v61 = vld [vmem:[%s22969_s0 + $0xca] sm:$0xff] }
 0x236   :  { %v2361_v39 = vpop.f32.mrf.mxu0  ;;  %v17408_v54 = vpop.f32.mrf.mxu1 }
 0x237   :  { %23164 = vst [vmem:[#allocation37_spill] sm:$0xff] %v17408_v54  ;;  %v17414_v14 = vadd.f32 %v2361_v39, %v16827_v28  ;;  %v17416_v27 = vadd.f32 %v13219_v26, %v2521_v32  ;;  %v10929_v28 = vld [vmem:[%s22969_s0 + $0xda] sm:$0xff] }
 0x238   :  { %v13094_v12 = vpop.f32.mrf.mxu0  ;;  %13557 = vmatmul.mubr.f32.gmra.mxu0 %v10926_v2  ;;  %v13222_v7 = vpop.f32.mrf.mxu1 }
 0x239   :  { %23165 = vst [vmem:[#allocation38_spill] sm:$0xff] %v17414_v14  ;;  %v2523_v21 = vadd.f32 %v13094_v12, %v16842_v57  ;;  %13559 = vmatprep.mubr.f32.mxu0 %v10927_v37  ;;  %v10930_v37 = vld [vmem:[%s22969_s0 + $0xe2] sm:$0xff] }
 0x23a   :  { %v2371_v4 = vpop.f32.mrf.mxu0  ;;  %v17422_v54 = vpop.f32.mrf.mxu1 }
 0x23b   :  { %23166 = vst [vmem:[#allocation39_spill] sm:$0xff] %v17422_v54  ;;  %v17428_v26 = vadd.f32 %v2371_v4, %v16848_v22  ;;  %v17430_v32 = vadd.f32 %v13222_v7, %v2523_v21  ;;  %v10931_v22 = vld [vmem:[%s22969_s0 + $0xf2] sm:$0xff] }
 0x23c   :  { %v13097_v2 = vpop.f32.mrf.mxu0  ;;  %13560 = vmatmul.mubr.f32.gmra.mxu0 %v10928_v61  ;;  %v13225_v57 = vpop.f32.mrf.mxu1 }
 0x23d   :  { %23167 = vst [vmem:[#allocation40_spill] sm:$0xff] %v17428_v26  ;;  %v2525_v39 = vadd.f32 %v13097_v2, %v16863_v36  ;;  %13562 = vmatprep.mubr.f32.mxu0 %v10929_v28  ;;  %v10932_v28 = vld [vmem:[%s22969_s0 + $0xfa] sm:$0xff] }
 0x23e   :  { %v2381_v12 = vpop.f32.mrf.mxu0  ;;  %v17436_v54 = vpop.f32.mrf.mxu1 }
 0x23f   :  { %23168 = vst [vmem:[#allocation41_spill] sm:$0xff] %v17436_v54  ;;  %v17442_v7 = vadd.f32 %v2381_v12, %v16869_v10  ;;  %v17444_v21 = vadd.f32 %v13225_v57, %v2525_v39  ;;  %v10933_v10 = vld [vmem:[%s22969_s0 + $0x10a] sm:$0xff]  ;;  %v23171_v12 = vld [vmem:[#allocation3_spill] sm:$0xff] }
 0x240   :  { %v13100_v61 = vpop.f32.mrf.mxu0  ;;  %13563 = vmatmul.mubr.f32.gmra.mxu0 %v10930_v37  ;;  %v13228_v36 = vpop.f32.mrf.mxu1 }
 0x241   :  { %23169 = vst [vmem:[#allocation42_spill] sm:$0xff] %v17442_v7  ;;  %v2527_v4 = vadd.f32 %v13100_v61, %v16884_v9  ;;  %13565 = vmatprep.mubr.f32.mxu0 %v10931_v22  ;;  %v23173_v22 = vld [vmem:[#allocation19_spill] sm:$0xff]  ;;  %v10934_v7 = vld [vmem:[%s22969_s0 + $0x112] sm:$0xff] }
 0x242   :  { %v2391_v2 = vpop.f32.mrf.mxu0  ;;  %v17450_v54 = vpop.f32.mrf.mxu1 }
 0x243   :  { %23170 = vst [vmem:[#allocation43_spill] sm:$0xff] %v17450_v54  ;;  %v17456_v57 = vadd.f32 %v2391_v2, %v23171_v12  ;;  %v17458_v39 = vadd.f32 %v13228_v36, %v2527_v4  ;;  %v10935_v2 = vld [vmem:[%s22969_s0 + $0x122] sm:$0xff] }
 0x244   :  { %v13103_v37 = vpop.f32.mrf.mxu0  ;;  %13566 = vmatmul.mubr.f32.gmra.mxu0 %v10932_v28  ;;  %v13231_v9 = vpop.f32.mrf.mxu1  ;;  %v23175_v12 = vld [vmem:[#allocation4_spill] sm:$0xff] }
 0x245   :  { %23172 = vst [vmem:[#allocation3_spill] sm:$0xff] %v17456_v57  ;;  %v2529_v61 = vadd.f32 %v13103_v37, %v23173_v22  ;;  %13568 = vmatprep.mubr.f32.mxu0 %v10933_v10  ;;  %v23177_v10 = vld [vmem:[#allocation5_spill] sm:$0xff] }
 0x246   :  { %v2401_v54 = vpop.f32.mrf.mxu0  ;;  %v17464_v26 = vpop.f32.mrf.mxu1  ;;  %v10936_v57 = vld [vmem:[%s22969_s0 + $0x12a] sm:$0xff] }
 0x247   :  { %23174 = vst [vmem:[#allocation19_spill] sm:$0xff] %v17464_v26  ;;  %v17470_v36 = vadd.f32 %v2401_v54, %v23175_v12  ;;  %v17472_v4 = vadd.f32 %v13231_v9, %v2529_v61  ;;  %v10937_v54 = vld [vmem:[%s22969_s0 + $0x13a] sm:$0xff] }
 0x248   :  { %v13106_v28 = vpop.f32.mrf.mxu0  ;;  %13569 = vmatmul.mubr.f32.gmra.mxu0 %v10934_v7  ;;  %v13234_v37 = vpop.f32.mrf.mxu1  ;;  %v23179_v12 = vld [vmem:[#allocation6_spill] sm:$0xff] }
 0x249   :  { %23176 = vst [vmem:[#allocation4_spill] sm:$0xff] %v17470_v36  ;;  %v2531_v22 = vadd.f32 %v13106_v28, %v23177_v10  ;;  %13571 = vmatprep.mubr.f32.mxu0 %v10935_v2  ;;  %v23181_v2 = vld [vmem:[#allocation7_spill] sm:$0xff] }
 0x24a   :  { %v2411_v26 = vpop.f32.mrf.mxu0  ;;  %v17478_v14 = vpop.f32.mrf.mxu1  ;;  %v10938_v36 = vld [vmem:[%s22969_s0 + $0x142] sm:$0xff] }
 0x24b   :  { %23178 = vst [vmem:[#allocation5_spill] sm:$0xff] %v17478_v14  ;;  %v17484_v9 = vadd.f32 %v2411_v26, %v23179_v12  ;;  %v17486_v61 = vadd.f32 %v13234_v37, %v2531_v22  ;;  %v10939_v26 = vld [vmem:[%s22969_s0 + $0x152] sm:$0xff]  ;;  %v23183_v12 = vld [vmem:[#allocation8_spill] sm:$0xff] }
 0x24c   :  { %v13109_v7 = vpop.f32.mrf.mxu0  ;;  %13572 = vmatmul.mubr.f32.gmra.mxu0 %v10936_v57  ;;  %v13237_v28 = vpop.f32.mrf.mxu1 }
 0x24d   :  { %23180 = vst [vmem:[#allocation6_spill] sm:$0xff] %v17484_v9  ;;  %v2533_v10 = vadd.f32 %v13109_v7, %v23181_v2  ;;  %13574 = vmatprep.mubr.f32.mxu0 %v10937_v54  ;;  %v23185_v54 = vld [vmem:[#allocation9_spill] sm:$0xff]  ;;  %v10940_v9 = vld [vmem:[%s22969_s0 + $0x15a] sm:$0xff] }
 0x24e   :  { %v2421_v14 = vpop.f32.mrf.mxu0  ;;  %v17492_v0 = vpop.f32.mrf.mxu1 }
 0x24f   :  { %23182 = vst [vmem:[#allocation7_spill] sm:$0xff] %v17492_v0  ;;  %v17498_v37 = vadd.f32 %v2421_v14, %v23183_v12  ;;  %v17500_v22 = vadd.f32 %v13237_v28, %v2533_v10  ;;  %v10941_v14 = vld [vmem:[%s22969_s0 + $0x16a] sm:$0xff]  ;;  %v23187_v12 = vld [vmem:[#allocation10_spill] sm:$0xff] }
 0x250   :  { %v13112_v57 = vpop.f32.mrf.mxu0  ;;  %13575 = vmatmul.mubr.f32.gmra.mxu0 %v10938_v36  ;;  %v13240_v7 = vpop.f32.mrf.mxu1 }
 0x251   :  { %23184 = vst [vmem:[#allocation8_spill] sm:$0xff] %v17498_v37  ;;  %v2535_v2 = vadd.f32 %v13112_v57, %v23185_v54  ;;  %13577 = vmatprep.mubr.f32.mxu0 %v10939_v26  ;;  %v23189_v26 = vld [vmem:[#allocation11_spill] sm:$0xff]  ;;  %v10942_v37 = vld [vmem:[%s22969_s0 + $0x172] sm:$0xff] }
 0x252   :  { %v2431_v0 = vpop.f32.mrf.mxu0  ;;  %v17506_v18 = vpop.f32.mrf.mxu1 }
 0x253   :  { %23186 = vst [vmem:[#allocation9_spill] sm:$0xff] %v17506_v18  ;;  %v17512_v28 = vadd.f32 %v2431_v0, %v23187_v12  ;;  %v17514_v10 = vadd.f32 %v13240_v7, %v2535_v2  ;;  %v10943_v0 = vld [vmem:[%s22969_s0 + $0x182] sm:$0xff] }
 0x254   :  { %v13115_v36 = vpop.f32.mrf.mxu0  ;;  %13578 = vmatmul.mubr.f32.gmra.mxu0 %v10940_v9  ;;  %v13243_v57 = vpop.f32.mrf.mxu1  ;;  %v23191_v12 = vld [vmem:[#allocation12_spill] sm:$0xff] }
 0x255   :  { %23188 = vst [vmem:[#allocation10_spill] sm:$0xff] %v17512_v28  ;;  %v2537_v54 = vadd.f32 %v13115_v36, %v23189_v26  ;;  %13580 = vmatprep.mubr.f32.mxu0 %v10941_v14  ;;  %v23193_v14 = vld [vmem:[#allocation13_spill] sm:$0xff] }
 0x256   :  { %v2441_v18 = vpop.f32.mrf.mxu0  ;;  %v17520_v15 = vpop.f32.mrf.mxu1  ;;  %v10944_v28 = vld [vmem:[%s22969_s0 + $0x18a] sm:$0xff] }
 0x257   :  { %23190 = vst [vmem:[#allocation11_spill] sm:$0xff] %v17520_v15  ;;  %v17526_v7 = vadd.f32 %v2441_v18, %v23191_v12  ;;  %v17528_v2 = vadd.f32 %v13243_v57, %v2537_v54  ;;  %v10945_v18 = vld [vmem:[%s22969_s0 + $0x19a] sm:$0xff] }
 0x258   :  { %v13118_v9 = vpop.f32.mrf.mxu0  ;;  %13581 = vmatmul.mubr.f32.gmra.mxu0 %v10942_v37  ;;  %v13246_v36 = vpop.f32.mrf.mxu1  ;;  %v23195_v12 = vld [vmem:[#allocation14_spill] sm:$0xff] }
 0x259   :  { %23192 = vst [vmem:[#allocation12_spill] sm:$0xff] %v17526_v7  ;;  %v2539_v26 = vadd.f32 %v13118_v9, %v23193_v14  ;;  %13583 = vmatprep.mubr.f32.mxu0 %v10943_v0  ;;  %v10946_v14 = vld [vmem:[%s22969_s0 + $0x1a2] sm:$0xff] }
 0x25a   :  { %v2451_v15 = vpop.f32.mrf.mxu0  ;;  %v17534_v13 = vpop.f32.mrf.mxu1 }
 0x25b   :  { %23194 = vst [vmem:[#allocation13_spill] sm:$0xff] %v17534_v13  ;;  %v17540_v57 = vadd.f32 %v2451_v15, %v23195_v12  ;;  %v17542_v54 = vadd.f32 %v13246_v36, %v2539_v26  ;;  %v10947_v15 = vld [vmem:[%s22969_s0 + $0x1e2] sm:$0xff]  ;;  %v10948_v12 = vld [vmem:[%s22969_s0 + $0x1ea] sm:$0xff] }
 0x25c   :  { %v13121_v37 = vpop.f32.mrf.mxu0  ;;  %13584 = vmatmul.mubr.f32.gmra.mxu0 %v10944_v28  ;;  %v13249_v9 = vpop.f32.mrf.mxu1 }
 0x25d   :  { %23196 = vst [vmem:[#allocation14_spill] sm:$0xff] %v17540_v57  ;;  %v2541_v0 = vadd.f32 %v13121_v37, %v17031_v16  ;;  %13586 = vmatprep.mubr.f32.mxu0 %v10945_v18  ;;  %v10959_v57 = vld [vmem:[%s22969_s0 + $0x272] sm:$0xff] }
 0x25e   :  { %v2461_v13 = vpop.f32.mrf.mxu0  ;;  %v17548_v7 = vpop.f32.mrf.mxu1 }
 0x25f   :  { %23197 = vst [vmem:[#allocation44_spill] sm:$0xff] %v17548_v7  ;;  %v17554_v36 = vadd.f32 %v2461_v13, %v17034_v43  ;;  %v17556_v26 = vadd.f32 %v13249_v9, %v2541_v0  ;;  %v10949_v43 = vld [vmem:[%s22969_s0 + $0x1fa] sm:$0xff] }
 0x260   :  { %v13124_v28 = vpop.f32.mrf.mxu0  ;;  %13587 = vmatmul.mubr.f32.gmra.mxu0 %v10946_v14  ;;  %v13252_v16 = vpop.f32.mrf.mxu1 }
 0x261   :  { %23198 = vst [vmem:[#allocation45_spill] sm:$0xff] %v17554_v36  ;;  %v2543_v18 = vadd.f32 %v13124_v28, %v17049_v3  ;;  %13589 = vmatprep.mubr.f32.mxu0 %v10947_v15  ;;  %v10950_v15 = vld [vmem:[%s22969_s0 + $0x202] sm:$0xff]  ;;  %v10957_v36 = vld [vmem:[%s22969_s0 + $0x25a] sm:$0xff] }
 0x262   :  { %v2471_v37 = vpop.f32.mrf.mxu0  ;;  %v17562_v7 = vpop.f32.mrf.mxu1 }
 0x263   :  { %23199 = vst [vmem:[#allocation46_spill] sm:$0xff] %v17562_v7  ;;  %v17568_v13 = vadd.f32 %v2471_v37, %v17051_v41  ;;  %v17570_v9 = vadd.f32 %v13252_v16, %v2543_v18  ;;  %v10951_v41 = vld [vmem:[%s22969_s0 + $0x212] sm:$0xff] }
 0x264   :  { %v13287_v0 = vpop.f32.mrf.mxu0  ;;  %13590 = vmatmul.mubr.f32.gmra.mxu0 %v10948_v12  ;;  %v17572_v3 = vpop.f32.mrf.mxu1  ;;  %v10952_v12 = vld [vmem:[%s22969_s0 + $0x21a] sm:$0xff] }
 0x265   :  { %23200 = vst [vmem:[#allocation47_spill] sm:$0xff] %v17568_v13  ;;  %v17575_v14 = vadd.f32 %v13287_v0, %v17067_v38  ;;  %13592 = vmatprep.mubr.f32.mxu0 %v10949_v43  ;;  %v10953_v0 = vld [vmem:[%s22969_s0 + $0x22a] sm:$0xff]  ;;  %v10955_v13 = vld [vmem:[%s22969_s0 + $0x242] sm:$0xff] }
 0x266   :  { %v3220_v28 = vpop.f32.mrf.mxu0  ;;  %v17580_v7 = vpop.f32.mrf.mxu1 }
 0x267   :  { %v17586_v16 = vadd.f32 %v3220_v28, %v17070_v58 }
 0x268   :  { %v13290_v18 = vpop.f32.mrf.mxu0  ;;  %13593 = vmatmul.mubr.f32.gmra.mxu0 %v10950_v15  ;;  %v17594_v43 = vpop.f32.mrf.mxu1  ;;  %v10954_v15 = vld [vmem:[%s22969_s0 + $0x232] sm:$0xff] }
 0x269   :  { %v17589_v38 = vadd.f32 %v13290_v18, %v17085_v52  ;;  %13595 = vmatprep.mubr.f32.mxu0 %v10951_v41 }
 0x26a   :  { %v3230_v37 = vpop.f32.mrf.mxu0  ;;  %v17608_v41 = vpop.f32.mrf.mxu1 }
 0x26b   :  { %v17600_v58 = vadd.f32 %v3230_v37, %v17088_v50 }
 0x26c   :  { %v13293_v28 = vpop.f32.mrf.mxu0  ;;  %13596 = vmatmul.mubr.f32.gmra.mxu0 %v10952_v12  ;;  %v10956_v12 = vld [vmem:[%s22969_s0 + $0x24a] sm:$0xff] }
 0x26d   :  { %v17603_v52 = vadd.f32 %v13293_v28, %v17103_v53  ;;  %13598 = vmatprep.mubr.f32.mxu0 %v10953_v0  ;;  %v17622_v0 = vpop.f32.mrf.mxu1 }
 0x26e   :  { %v3240_v18 = vpop.f32.mrf.mxu0 }
 0x26f   :  { %v17614_v50 = vadd.f32 %v3240_v18, %v17106_v1 }
 0x270   :  { %v13296_v37 = vpop.f32.mrf.mxu0  ;;  %13599 = vmatmul.mubr.f32.gmra.mxu0 %v10954_v15  ;;  %v17636_v15 = vpop.f32.mrf.mxu1 }
 0x271   :  { %v17617_v53 = vadd.f32 %v13296_v37, %v17121_v6  ;;  %13601 = vmatprep.mubr.f32.mxu0 %v10955_v13  ;;  %v10958_v13 = vld [vmem:[%s22969_s0 + $0x262] sm:$0xff] }
 0x272   :  { %v3250_v28 = vpop.f32.mrf.mxu0 }
 0x273   :  { %v17628_v1 = vadd.f32 %v3250_v28, %v17124_v42 }
 0x274   :  { %v13299_v18 = vpop.f32.mrf.mxu0  ;;  %13602 = vmatmul.mubr.f32.gmra.mxu0 %v10956_v12  ;;  %v17650_v12 = vpop.f32.mrf.mxu1 }
 0x275   :  { %v17631_v6 = vadd.f32 %v13299_v18, %v17139_v48  ;;  %13604 = vmatprep.mubr.f32.mxu0 %v10957_v36  ;;  %v10960_v36 = vld [vmem:[%s22969_s0 + $0x27a] sm:$0xff] }
 0x276   :  { %v3260_v37 = vpop.f32.mrf.mxu0 }
 0x277   :  { %v17642_v42 = vadd.f32 %v3260_v37, %v17142_v29 }
 0x278   :  { %v13302_v28 = vpop.f32.mrf.mxu0  ;;  %13605 = vmatmul.mubr.f32.gmra.mxu0 %v10958_v13  ;;  %v17664_v13 = vpop.f32.mrf.mxu1 }
 0x279   :  { %v17645_v48 = vadd.f32 %v13302_v28, %v17157_v33  ;;  %13607 = vmatprep.mubr.f32.mxu0 %v10959_v57  ;;  %v10962_v57 = vld [vmem:[%s22969_s0 + $0x292] sm:$0xff] }
 0x27a   :  { %v3270_v18 = vpop.f32.mrf.mxu0 }
 0x27b   :  { %v17656_v29 = vadd.f32 %v3270_v18, %v17160_v31 }
 0x27c   :  { %v13305_v37 = vpop.f32.mrf.mxu0  ;;  %13608 = vmatmul.mubr.f32.gmra.mxu0 %v10960_v36  ;;  %v17678_v36 = vpop.f32.mrf.mxu1 }
 0x27d   :  { %v17659_v33 = vadd.f32 %v13305_v37, %v17175_v40  ;;  %13610 = vmatprep.mubr.f32.mxu0 %v10961_v55  ;;  %v10964_v55 = vld [vmem:[%s22969_s0 + $0x2aa] sm:$0xff] }
 0x27e   :  { %v3280_v28 = vpop.f32.mrf.mxu0 }
 0x27f   :  { %v17670_v31 = vadd.f32 %v3280_v28, %v17178_v62 }
 0x280   :  { %v13308_v18 = vpop.f32.mrf.mxu0  ;;  %13611 = vmatmul.mubr.f32.gmra.mxu0 %v10962_v57  ;;  %v17692_v57 = vpop.f32.mrf.mxu1 }
 0x281   :  { %v17673_v40 = vadd.f32 %v13308_v18, %v17193_v30  ;;  %13613 = vmatprep.mubr.f32.mxu0 %v10963_v60  ;;  %v10966_v60 = vld [vmem:[%s22969_s0 + $0x2c2] sm:$0xff] }
 0x282   :  { %v3290_v37 = vpop.f32.mrf.mxu0 }
 0x283   :  { %v17684_v62 = vadd.f32 %v3290_v37, %v17196_v44 }
 0x284   :  { %v13311_v28 = vpop.f32.mrf.mxu0  ;;  %13614 = vmatmul.mubr.f32.gmra.mxu0 %v10964_v55 }
 0x285   :  { %v17687_v30 = vadd.f32 %v13311_v28, %v17215_v59  ;;  %13616 = vmatprep.mubr.f32.mxu0 %v10965_v8  ;;  %v10968_v59 = vld [vmem:[%s22969_s0 + $0x2da] sm:$0xff]  ;;  %v17705_v8 = vpop.f32.mrf.mxu1  ;;  %v10969_v28 = vld [vmem:[%s22969_s0 + $0x2ea] sm:$0xff] }
 0x286   :  { %v17694_v18 = vpop.f32.mrf.mxu0 }
 0x287   :  { %23201 = vst [vmem:[#allocation48_spill] sm:$0xff] %v17687_v30 }
 0x288   :  { %v13314_v44 = vpop.f32.mrf.mxu0  ;;  %13617 = vmatmul.mubr.f32.gmra.mxu0 %v10966_v60 }
 0x289   :  { %v17700_v55 = vadd.f32 %v13314_v44, %v17235_v46  ;;  %13619 = vmatprep.mubr.f32.mxu0 %v10967_v34  ;;  %v10970_v46 = vld [vmem:[%s22969_s0 + $0x2f2] sm:$0xff]  ;;  %v17718_v34 = vpop.f32.mrf.mxu1 }
 0x28a   :  { %v17707_v37 = vpop.f32.mrf.mxu0 }
 0x28b   :  { %23202 = vst [vmem:[#allocation49_spill] sm:$0xff] %v17700_v55  ;;  %23203 = vst [vmem:[#allocation50_spill] sm:$0xff] %v17707_v37  ;;  %v10971_v55 = vld [vmem:[%s22969_s0 + $0x302] sm:$0xff] }
 0x28c   :  { %v13317_v5 = vpop.f32.mrf.mxu0  ;;  %13620 = vmatmul.mubr.f32.gmra.mxu0 %v10968_v59 }
 0x28d   :  { %v17713_v60 = vadd.f32 %v13317_v5, %v17255_v17  ;;  %13622 = vmatprep.mubr.f32.mxu0 %v10969_v28  ;;  %v10972_v17 = vld [vmem:[%s22969_s0 + $0x30a] sm:$0xff]  ;;  %v17731_v5 = vpop.f32.mrf.mxu1 }
 0x28e   :  { %v17720_v44 = vpop.f32.mrf.mxu0 }
 0x28f   :  { %23204 = vst [vmem:[#allocation51_spill] sm:$0xff] %v17713_v60  ;;  %23205 = vst [vmem:[#allocation52_spill] sm:$0xff] %v17720_v44  ;;  %v10973_v60 = vld [vmem:[%s22969_s0 + $0x31a] sm:$0xff] }
 0x290   :  { %v13320_v30 = vpop.f32.mrf.mxu0  ;;  %13623 = vmatmul.mubr.f32.gmra.mxu0 %v10970_v46 }
 0x291   :  { %v17726_v59 = vadd.f32 %v13320_v30, %v17275_v35  ;;  %13625 = vmatprep.mubr.f32.mxu0 %v10971_v55  ;;  %v10974_v35 = vld [vmem:[%s22969_s0 + $0x322] sm:$0xff]  ;;  %v17744_v30 = vpop.f32.mrf.mxu1 }
 0x292   :  { %v17733_v28 = vpop.f32.mrf.mxu0 }
 0x293   :  { %23206 = vst [vmem:[#allocation53_spill] sm:$0xff] %v17726_v59  ;;  %23207 = vst [vmem:[#allocation54_spill] sm:$0xff] %v17733_v28  ;;  %v10975_v59 = vld [vmem:[%s22969_s0 + $0x332] sm:$0xff] }
 0x294   :  { %v13323_v44 = vpop.f32.mrf.mxu0  ;;  %13626 = vmatmul.mubr.f32.gmra.mxu0 %v10972_v17 }
 0x295   :  { %v17739_v46 = vadd.f32 %v13323_v44, %v17295_v20  ;;  %13628 = vmatprep.mubr.f32.mxu0 %v10973_v60  ;;  %v10976_v20 = vld [vmem:[%s22969_s0 + $0x33a] sm:$0xff]  ;;  %v17757_v60 = vpop.f32.mrf.mxu1 }
 0x296   :  { %v17746_v55 = vpop.f32.mrf.mxu0 }
 0x297   :  { %23208 = vst [vmem:[#allocation55_spill] sm:$0xff] %v17739_v46  ;;  %23209 = vst [vmem:[#allocation56_spill] sm:$0xff] %v17746_v55  ;;  %v10977_v46 = vld [vmem:[%s22969_s0 + $0x34a] sm:$0xff] }
 0x298   :  { %v13326_v28 = vpop.f32.mrf.mxu0  ;;  %13629 = vmatmul.mubr.f32.gmra.mxu0 %v10974_v35 }
 0x299   :  { %v17752_v17 = vadd.f32 %v13326_v28, %v17315_v11  ;;  %13631 = vmatprep.mubr.f32.mxu0 %v10975_v59  ;;  %v10978_v11 = vld [vmem:[%s22969_s0 + $0x352] sm:$0xff]  ;;  %v17770_v59 = vpop.f32.mrf.mxu1 }
 0x29a   :  { %v17759_v44 = vpop.f32.mrf.mxu0 }
 0x29b   :  { %23210 = vst [vmem:[#allocation57_spill] sm:$0xff] %v17752_v17  ;;  %23211 = vst [vmem:[#allocation58_spill] sm:$0xff] %v17759_v44  ;;  %v17777_v56 = vpop.f32.mrf.mxu1 }
 0x29c   :  { %v13329_v55 = vpop.f32.mrf.mxu0  ;;  %13632 = vmatmul.mubr.f32.gmra.mxu0 %v10976_v20 }
 0x29d   :  { %v17765_v35 = vadd.f32 %v13329_v55, %v17332_v49  ;;  %13634 = vmatprep.mubr.f32.mxu0 %v10977_v46  ;;  %v17784_v55 = vpop.f32.mrf.mxu1 }
 0x29e   :  { %v17772_v28 = vpop.f32.mrf.mxu0 }
 0x29f   :  { %23212 = vst [vmem:[#allocation59_spill] sm:$0xff] %v17765_v35  ;;  %23213 = vst [vmem:[#allocation60_spill] sm:$0xff] %v17772_v28 }
 0x2a0   :  { %v13332_v17 = vpop.f32.mrf.mxu0  ;;  %13635 = vmatmul.mubr.f32.gmra.mxu0 %v10978_v11  ;;  %v17791_v11 = vpop.f32.mrf.mxu1 }
 0x2a1   :  { %v17775_v44 = vadd.f32 %v13332_v17, %v17346_v24 }
 0x2a2   :  { %v17779_v20 = vpop.f32.mrf.mxu0 }
 0x2a3   :  { %23214 = vst [vmem:[#allocation61_spill] sm:$0xff] %v17775_v44  ;;  %23215 = vst [vmem:[#allocation62_spill] sm:$0xff] %v17779_v20  ;;  %v17798_v20 = vpop.f32.mrf.mxu1 }
 0x2a4   :  { %v13335_v49 = vpop.f32.mrf.mxu0 }
 0x2a5   :  { %v17782_v46 = vadd.f32 %v13335_v49, %v17360_v47 }
 0x2a6   :  { %v17786_v35 = vpop.f32.mrf.mxu0 }
 0x2a7   :  { %23216 = vst [vmem:[#allocation63_spill] sm:$0xff] %v17782_v46  ;;  %23217 = vst [vmem:[#allocation64_spill] sm:$0xff] %v17786_v35  ;;  %v17805_v35 = vpop.f32.mrf.mxu1 }
 0x2a8   :  { %v13338_v37 = vpop.f32.mrf.mxu0 }
 0x2a9   :  { %v17789_v28 = vadd.f32 %v13338_v37, %v17374_v51 }
 0x2aa   :  { %v17793_v24 = vpop.f32.mrf.mxu0 }
 0x2ab   :  { %23218 = vst [vmem:[#allocation65_spill] sm:$0xff] %v17789_v28  ;;  %23219 = vst [vmem:[#allocation66_spill] sm:$0xff] %v17793_v24  ;;  %v17812_v24 = vpop.f32.mrf.mxu1 }
 0x2ac   :  { %v13341_v17 = vpop.f32.mrf.mxu0 }
 0x2ad   :  { %v17796_v44 = vadd.f32 %v13341_v17, %v17388_v63 }
 0x2ae   :  { %v17800_v47 = vpop.f32.mrf.mxu0 }
 0x2af   :  { %23220 = vst [vmem:[#allocation67_spill] sm:$0xff] %v17796_v44  ;;  %23221 = vst [vmem:[#allocation68_spill] sm:$0xff] %v17800_v47  ;;  %v17819_v47 = vpop.f32.mrf.mxu1 }
 0x2b0   :  { %v13344_v49 = vpop.f32.mrf.mxu0 }
 0x2b1   :  { %v17803_v46 = vadd.f32 %v13344_v49, %v17402_v45 }
 0x2b2   :  { %v17807_v51 = vpop.f32.mrf.mxu0 }
 0x2b3   :  { %23222 = vst [vmem:[#allocation69_spill] sm:$0xff] %v17803_v46  ;;  %23223 = vst [vmem:[#allocation70_spill] sm:$0xff] %v17807_v51  ;;  %v17826_v51 = vpop.f32.mrf.mxu1 }
 0x2b4   :  { %v13347_v37 = vpop.f32.mrf.mxu0 }
 0x2b5   :  { %v17810_v28 = vadd.f32 %v13347_v37, %v17416_v27 }
 0x2b6   :  { %v17814_v63 = vpop.f32.mrf.mxu0 }
 0x2b7   :  { %23224 = vst [vmem:[#allocation71_spill] sm:$0xff] %v17810_v28  ;;  %23225 = vst [vmem:[#allocation72_spill] sm:$0xff] %v17814_v63  ;;  %v17833_v63 = vpop.f32.mrf.mxu1 }
 0x2b8   :  { %v13350_v17 = vpop.f32.mrf.mxu0 }
 0x2b9   :  { %v17817_v44 = vadd.f32 %v13350_v17, %v17430_v32 }
 0x2ba   :  { %v17821_v45 = vpop.f32.mrf.mxu0 }
 0x2bb   :  { %23226 = vst [vmem:[#allocation73_spill] sm:$0xff] %v17817_v44  ;;  %23227 = vst [vmem:[#allocation74_spill] sm:$0xff] %v17821_v45  ;;  %v17840_v45 = vpop.f32.mrf.mxu1 }
 0x2bc   :  { %v13353_v49 = vpop.f32.mrf.mxu0 }
 0x2bd   :  { %v17824_v46 = vadd.f32 %v13353_v49, %v17444_v21 }
 0x2be   :  { %v17828_v27 = vpop.f32.mrf.mxu0 }
 0x2bf   :  { %23228 = vst [vmem:[#allocation75_spill] sm:$0xff] %v17824_v46  ;;  %23229 = vst [vmem:[#allocation76_spill] sm:$0xff] %v17828_v27  ;;  %v17847_v27 = vpop.f32.mrf.mxu1 }
 0x2c0   :  { %v13356_v37 = vpop.f32.mrf.mxu0 }
 0x2c1   :  { %v17831_v28 = vadd.f32 %v13356_v37, %v17458_v39 }
 0x2c2   :  { %v17835_v32 = vpop.f32.mrf.mxu0 }
 0x2c3   :  { %23230 = vst [vmem:[#allocation77_spill] sm:$0xff] %v17831_v28  ;;  %23231 = vst [vmem:[#allocation78_spill] sm:$0xff] %v17835_v32  ;;  %v17854_v32 = vpop.f32.mrf.mxu1 }
 0x2c4   :  { %v13359_v17 = vpop.f32.mrf.mxu0 }
 0x2c5   :  { %v17838_v44 = vadd.f32 %v13359_v17, %v17472_v4 }
 0x2c6   :  { %v17842_v21 = vpop.f32.mrf.mxu0 }
 0x2c7   :  { %23232 = vst [vmem:[#allocation79_spill] sm:$0xff] %v17838_v44  ;;  %23233 = vst [vmem:[#allocation80_spill] sm:$0xff] %v17842_v21  ;;  %v17861_v21 = vpop.f32.mrf.mxu1 }
 0x2c8   :  { %v13362_v49 = vpop.f32.mrf.mxu0 }
 0x2c9   :  { %v17845_v46 = vadd.f32 %v13362_v49, %v17486_v61 }
 0x2ca   :  { %v17849_v39 = vpop.f32.mrf.mxu0 }
 0x2cb   :  { %23234 = vst [vmem:[#allocation81_spill] sm:$0xff] %v17845_v46  ;;  %23235 = vst [vmem:[#allocation82_spill] sm:$0xff] %v17849_v39  ;;  %v17868_v39 = vpop.f32.mrf.mxu1 }
 0x2cc   :  { %v13365_v37 = vpop.f32.mrf.mxu0 }
 0x2cd   :  { %v17852_v28 = vadd.f32 %v13365_v37, %v17500_v22 }
 0x2ce   :  { %v17856_v4 = vpop.f32.mrf.mxu0 }
 0x2cf   :  { %23236 = vst [vmem:[#allocation83_spill] sm:$0xff] %v17852_v28  ;;  %23237 = vst [vmem:[#allocation84_spill] sm:$0xff] %v17856_v4  ;;  %v17875_v4 = vpop.f32.mrf.mxu1 }
 0x2d0   :  { %v13368_v17 = vpop.f32.mrf.mxu0 }
 0x2d1   :  { %v17859_v44 = vadd.f32 %v13368_v17, %v17514_v10 }
 0x2d2   :  { %v17863_v61 = vpop.f32.mrf.mxu0 }
 0x2d3   :  { %23238 = vst [vmem:[#allocation85_spill] sm:$0xff] %v17859_v44  ;;  %23239 = vst [vmem:[#allocation86_spill] sm:$0xff] %v17863_v61  ;;  %v17882_v61 = vpop.f32.mrf.mxu1 }
 0x2d4   :  { %v13371_v49 = vpop.f32.mrf.mxu0 }
 0x2d5   :  { %v17866_v46 = vadd.f32 %v13371_v49, %v17528_v2 }
 0x2d6   :  { %v17870_v22 = vpop.f32.mrf.mxu0 }
 0x2d7   :  { %23240 = vst [vmem:[#allocation87_spill] sm:$0xff] %v17866_v46  ;;  %23241 = vst [vmem:[#allocation88_spill] sm:$0xff] %v17870_v22  ;;  %v17889_v22 = vpop.f32.mrf.mxu1 }
 0x2d8   :  { %v13374_v37 = vpop.f32.mrf.mxu0  ;;  %23247 = vst [vmem:[#allocation94_spill] sm:$0xff] %v17889_v22 }
 0x2d9   :  { %v17873_v28 = vadd.f32 %v13374_v37, %v17542_v54 }
 0x2da   :  { %v17877_v10 = vpop.f32.mrf.mxu0 }
 0x2db   :  { %23242 = vst [vmem:[#allocation89_spill] sm:$0xff] %v17873_v28  ;;  %23243 = vst [vmem:[#allocation90_spill] sm:$0xff] %v17877_v10  ;;  %v4068_v28 = vadd.f32 %v17580_v7, %v17586_v16  ;;  %v17895_v10 = vpop.f32.mrf.mxu1  ;;  %v4071_v7 = vadd.f32 %v17594_v43, %v17589_v38 }
 0x2dc   :  { %v13377_v17 = vpop.f32.mrf.mxu0 }
 0x2dd   :  { %v17880_v44 = vadd.f32 %v13377_v17, %v17556_v26  ;;  %v4069_v17 = vadd.f32 %v17572_v3, %v17575_v14  ;;  %v4072_v14 = vadd.f32 %v17636_v15, %v17614_v50 }
 0x2de   :  { %v17884_v2 = vpop.f32.mrf.mxu0 }
 0x2df   :  { %23244 = vst [vmem:[#allocation91_spill] sm:$0xff] %v17880_v44  ;;  %23245 = vst [vmem:[#allocation92_spill] sm:$0xff] %v17884_v2 }
 0x2e0   :  { %v13380_v49 = vpop.f32.mrf.mxu0 }
 0x2e1   :  { %v17887_v46 = vadd.f32 %v13380_v49, %v17570_v9  ;;  %v4070_v9 = vadd.f32 %v17608_v41, %v17600_v58 }
 0x2e2   :  { %v17891_v54 = vpop.f32.mrf.mxu0 }
 0x2e3   :  { %23246 = vst [vmem:[#allocation93_spill] sm:$0xff] %v17887_v46  ;;  %23248 = vst [vmem:[#allocation95_spill] sm:$0xff] %v17891_v54  ;;  %v17905_v46 = vpop.f32.mrf.mxu1 }
 0x2e4   :  { %v13543_v37 = vpop.f32.mrf.mxu0 }
 0x2e5   :  { %v17903_v49 = vadd.f32 %v13543_v37, %v4069_v17  ;;  %v17918_v41 = vpop.f32.mrf.mxu1  ;;  %v4074_v17 = vadd.f32 %v17664_v13, %v17628_v1 }
 0x2e6   :  { %v4278_v26 = vpop.f32.mrf.mxu0 }
 0x2e7   :  { %v17899_v44 = vadd.f32 %v4278_v26, %v4068_v28  ;;  %v4073_v26 = vadd.f32 %v17622_v0, %v17603_v52  ;;  %v17930_v15 = vpop.f32.mrf.mxu1 }
 0x2e8   :  { %v13546_v2 = vpop.f32.mrf.mxu0 }
 0x2e9   :  { %v4663_v16 = vadd.f32 %v17903_v49, %v17899_v44  ;;  %v17915_v28 = vadd.f32 %v13546_v2, %v4071_v7  ;;  %v4075_v7 = vadd.f32 %v17650_v12, %v17617_v53  ;;  %v17942_v13 = vpop.f32.mrf.mxu1 }
 0x2ea   :  { %v4288_v54 = vpop.f32.mrf.mxu0 }
 0x2eb   :  { %v17911_v22 = vadd.f32 %v4288_v54, %v4070_v9 }
 0x2ec   :  { %v13549_v3 = vpop.f32.mrf.mxu0 }
 0x2ed   :  { %v4664_v58 = vadd.f32 %v4663_v16, %v17911_v22  ;;  %v17927_v9 = vadd.f32 %v13549_v3, %v4073_v26 }
 0x2ee   :  { %v4298_v37 = vpop.f32.mrf.mxu0 }
 0x2ef   :  { %v4665_v38 = vadd.f32 %v4664_v58, %v17915_v28  ;;  %v17923_v43 = vadd.f32 %v4298_v37, %v4072_v14  ;;  %v4076_v14 = vadd.f32 %v17692_v57, %v17642_v42  ;;  %v4077_v37 = vadd.f32 %v17678_v36, %v17631_v6  ;;  %v17954_v57 = vpop.f32.mrf.mxu1 }
 0x2f0   :  { %v13552_v54 = vpop.f32.mrf.mxu0 }
 0x2f1   :  { %v4666_v50 = vadd.f32 %v4665_v38, %v17923_v43  ;;  %v17939_v58 = vadd.f32 %v13552_v54, %v4075_v7  ;;  %v4078_v38 = vadd.f32 %v17718_v34, %v17656_v29  ;;  %v4080_v7 = vadd.f32 %v17744_v30, %v17670_v31  ;;  %v17966_v34 = vpop.f32.mrf.mxu1 }
 0x2f2   :  { %v4308_v2 = vpop.f32.mrf.mxu0  ;;  %v4082_v31 = vadd.f32 %v17770_v59, %v17684_v62  ;;  %v23250_v59 = vld [vmem:[#allocation50_spill] sm:$0xff] }
 0x2f3   :  { %v17934_v16 = vadd.f32 %v4308_v2, %v4074_v17  ;;  %v4667_v52 = vadd.f32 %v4666_v50, %v17927_v9  ;;  %v4079_v50 = vadd.f32 %v17705_v8, %v17645_v48  ;;  %v4081_v48 = vadd.f32 %v17731_v5, %v17659_v33 }
 0x2f4   :  { %v13555_v0 = vpop.f32.mrf.mxu0  ;;  %v4083_v5 = vadd.f32 %v17757_v60, %v17673_v40  ;;  %v23253_v40 = vld [vmem:[#allocation48_spill] sm:$0xff] }
 0x2f5   :  { %v4668_v1 = vadd.f32 %v4667_v52, %v17934_v16  ;;  %v17951_v17 = vadd.f32 %v13555_v0, %v4077_v37  ;;  %v4085_v60 = vadd.f32 %v17777_v56, %v23253_v40  ;;  %v23257_v56 = vld [vmem:[#allocation49_spill] sm:$0xff] }
 0x2f6   :  { %v4318_v3 = vpop.f32.mrf.mxu0 }
 0x2f7   :  { %v17946_v26 = vadd.f32 %v4318_v3, %v4076_v14  ;;  %v4669_v53 = vadd.f32 %v4668_v1, %v17939_v58  ;;  %v3025_v14 = vadd.f32 %v17204_v25, %v17213_v23  ;;  %v23249_v23 = vld [vmem:[#allocation15_spill] sm:$0xff] }
 0x2f8   :  { %v13558_v12 = vpop.f32.mrf.mxu0  ;;  %v3027_v33 = vadd.f32 %v23249_v23, %v17233_v19  ;;  %v23251_v19 = vld [vmem:[#allocation17_spill] sm:$0xff] }
 0x2f9   :  { %v4670_v42 = vadd.f32 %v4669_v53, %v17946_v26  ;;  %v17963_v52 = vadd.f32 %v13558_v12, %v4079_v50  ;;  %v3555_v30 = vadd.f32 %v17694_v18, %v3025_v14  ;;  %v17981_v12 = vpop.f32.mrf.mxu1 }
 0x2fa   :  { %v4328_v54 = vpop.f32.mrf.mxu0 }
 0x2fb   :  { %v17958_v2 = vadd.f32 %v4328_v54, %v4078_v38  ;;  %v4671_v6 = vadd.f32 %v4670_v42, %v17951_v17  ;;  %v4084_v18 = vadd.f32 %v17784_v55, %v3555_v30  ;;  %v3557_v54 = vadd.f32 %v23250_v59, %v3027_v33  ;;  %v23255_v33 = vld [vmem:[#allocation21_spill] sm:$0xff] }
 0x2fc   :  { %v13561_v36 = vpop.f32.mrf.mxu0 }
 0x2fd   :  { %v4672_v29 = vadd.f32 %v4671_v6, %v17958_v2  ;;  %v17978_v37 = vadd.f32 %v13561_v36, %v4081_v48  ;;  %v17995_v36 = vpop.f32.mrf.mxu1 }
 0x2fe   :  { %v4338_v0 = vpop.f32.mrf.mxu0 }
 0x2ff   :  { %v17972_v8 = vadd.f32 %v4338_v0, %v4080_v7  ;;  %v4673_v1 = vadd.f32 %v4672_v29, %v17963_v52  ;;  %v23252_v29 = vld [vmem:[#allocation16_spill] sm:$0xff] }
 0x300   :  { %v13564_v3 = vpop.f32.mrf.mxu0  ;;  %v3029_v0 = vadd.f32 %v23252_v29, %v23251_v19 }
 0x301   :  { %v4674_v53 = vadd.f32 %v4673_v1, %v17972_v8  ;;  %v17992_v50 = vadd.f32 %v13564_v3, %v4083_v5  ;;  %v4086_v1 = vadd.f32 %v17798_v20, %v3557_v54  ;;  %v23254_v3 = vld [vmem:[#allocation52_spill] sm:$0xff] }
 0x302   :  { %v4348_v25 = vpop.f32.mrf.mxu0  ;;  %v23256_v5 = vld [vmem:[#allocation20_spill] sm:$0xff] }
 0x303   :  { %v17987_v38 = vadd.f32 %v4348_v25, %v4082_v31  ;;  %v4675_v42 = vadd.f32 %v4674_v53, %v17978_v37  ;;  %v3559_v31 = vadd.f32 %v23254_v3, %v3029_v0  ;;  %v18009_v25 = vpop.f32.mrf.mxu1 }
 0x304   :  { %v13567_v62 = vpop.f32.mrf.mxu0 }
 0x305   :  { %v4676_v6 = vadd.f32 %v4675_v42, %v17987_v38  ;;  %v18006_v30 = vadd.f32 %v13567_v62, %v4085_v60  ;;  %v3031_v42 = vadd.f32 %v23256_v5, %v23255_v33  ;;  %v4088_v54 = vadd.f32 %v17812_v24, %v3559_v31  ;;  %v23258_v62 = vld [vmem:[#allocation54_spill] sm:$0xff]  ;;  %v18023_v0 = vpop.f32.mrf.mxu1 }
 0x306   :  { %v4358_v7 = vpop.f32.mrf.mxu0  ;;  %v23259_v60 = vld [vmem:[#allocation18_spill] sm:$0xff] }
 0x307   :  { %v18001_v14 = vadd.f32 %v4358_v7, %v4084_v18  ;;  %v4677_v48 = vadd.f32 %v4676_v6, %v17992_v50  ;;  %v4087_v18 = vadd.f32 %v17791_v11, %v23257_v56  ;;  %v3561_v7 = vadd.f32 %v23258_v62, %v3031_v42  ;;  %v23261_v11 = vld [vmem:[#allocation51_spill] sm:$0xff]  ;;  %v18037_v56 = vpop.f32.mrf.mxu1 }
 0x308   :  { %v13570_v55 = vpop.f32.mrf.mxu0  ;;  %v23266_v62 = vld [vmem:[#allocation23_spill] sm:$0xff] }
 0x309   :  { %v4678_v53 = vadd.f32 %v4677_v48, %v18001_v14  ;;  %v18020_v19 = vadd.f32 %v13570_v55, %v4087_v18  ;;  %v23260_v48 = vld [vmem:[#allocation22_spill] sm:$0xff]  ;;  %v4090_v31 = vadd.f32 %v17826_v51, %v3561_v7  ;;  %v23263_v55 = vld [vmem:[#allocation56_spill] sm:$0xff] }
 0x30a   :  { %v4368_v23 = vpop.f32.mrf.mxu0  ;;  %v3033_v3 = vadd.f32 %v23260_v48, %v23259_v60 }
 0x30b   :  { %v18015_v59 = vadd.f32 %v4368_v23, %v4086_v1  ;;  %v4679_v6 = vadd.f32 %v4678_v53, %v18006_v30  ;;  %v4089_v1 = vadd.f32 %v17805_v35, %v23261_v11  ;;  %v23267_v35 = vld [vmem:[#allocation53_spill] sm:$0xff] }
 0x30c   :  { %v13573_v20 = vpop.f32.mrf.mxu0  ;;  %v3563_v33 = vadd.f32 %v23263_v55, %v3033_v3  ;;  %v23271_v55 = vld [vmem:[#allocation26_spill] sm:$0xff] }
 0x30d   :  { %v4680_v29 = vadd.f32 %v4679_v6, %v18015_v59  ;;  %v18034_v5 = vadd.f32 %v13573_v20, %v4089_v1  ;;  %v23265_v6 = vld [vmem:[#allocation24_spill] sm:$0xff]  ;;  %v23269_v20 = vld [vmem:[#allocation58_spill] sm:$0xff]  ;;  %v18051_v1 = vpop.f32.mrf.mxu1 }
 0x30e   :  { %v4378_v40 = vpop.f32.mrf.mxu0  ;;  %v3035_v60 = vadd.f32 %v23266_v62, %v23265_v6  ;;  %v4092_v7 = vadd.f32 %v17840_v45, %v3563_v33  ;;  %v23272_v6 = vld [vmem:[#allocation25_spill] sm:$0xff] }
 0x30f   :  { %v18029_v23 = vadd.f32 %v4378_v40, %v4088_v54  ;;  %v4681_v53 = vadd.f32 %v4680_v29, %v18020_v19  ;;  %23264 = vst [vmem:[#allocation50_spill] sm:$0xff] %v18034_v5  ;;  %v4091_v54 = vadd.f32 %v17819_v47, %v23267_v35  ;;  %v3037_v62 = vadd.f32 %v23272_v6, %v23271_v55  ;;  %v23273_v47 = vld [vmem:[#allocation55_spill] sm:$0xff]  ;;  %v23277_v55 = vld [vmem:[#allocation28_spill] sm:$0xff] }
 0x310   :  { %v13576_v24 = vpop.f32.mrf.mxu0  ;;  %v3565_v48 = vadd.f32 %v23269_v20, %v3035_v60  ;;  %v23278_v6 = vld [vmem:[#allocation27_spill] sm:$0xff] }
 0x311   :  { %23262 = vst [vmem:[#allocation15_spill] sm:$0xff] %v18029_v23  ;;  %v4682_v42 = vadd.f32 %v4681_v53, %v18029_v23  ;;  %v18048_v3 = vadd.f32 %v13576_v24, %v4091_v54  ;;  %v23275_v24 = vld [vmem:[#allocation60_spill] sm:$0xff] }
 0x312   :  { %v4388_v18 = vpop.f32.mrf.mxu0  ;;  %v4094_v33 = vadd.f32 %v17854_v32, %v3565_v48  ;;  %v3567_v60 = vadd.f32 %v23275_v24, %v3037_v62 }
 0x313   :  { %v18043_v40 = vadd.f32 %v4388_v18, %v4090_v31  ;;  %v4683_v29 = vadd.f32 %v4682_v42, %v18034_v5  ;;  %23270 = vst [vmem:[#allocation16_spill] sm:$0xff] %v18048_v3  ;;  %v4093_v31 = vadd.f32 %v17833_v63, %v23273_v47  ;;  %v23279_v63 = vld [vmem:[#allocation57_spill] sm:$0xff] }
 0x314   :  { %v13579_v51 = vpop.f32.mrf.mxu0  ;;  %v4096_v48 = vadd.f32 %v17868_v39, %v3567_v60 }
 0x315   :  { %23268 = vst [vmem:[#allocation17_spill] sm:$0xff] %v18043_v40  ;;  %v4684_v11 = vadd.f32 %v4683_v29, %v18043_v40  ;;  %v18062_v35 = vadd.f32 %v13579_v51, %v4093_v31  ;;  %v18065_v29 = vpop.f32.mrf.mxu1  ;;  %v3039_v40 = vadd.f32 %v23278_v6, %v23277_v55  ;;  %v23281_v51 = vld [vmem:[#allocation62_spill] sm:$0xff]  ;;  %v23284_v6 = vld [vmem:[#allocation29_spill] sm:$0xff] }
 0x316   :  { %v4398_v53 = vpop.f32.mrf.mxu0  ;;  %v23283_v55 = vld [vmem:[#allocation30_spill] sm:$0xff] }
 0x317   :  { %v18057_v18 = vadd.f32 %v4398_v53, %v4092_v7  ;;  %v4685_v42 = vadd.f32 %v4684_v11, %v18048_v3  ;;  %23276 = vst [vmem:[#allocation52_spill] sm:$0xff] %v18062_v35  ;;  %v4095_v7 = vadd.f32 %v17847_v27, %v23279_v63  ;;  %v3569_v62 = vadd.f32 %v23281_v51, %v3039_v40  ;;  %v23285_v27 = vld [vmem:[#allocation59_spill] sm:$0xff] }
 0x318   :  { %v13582_v45 = vpop.f32.mrf.mxu0 }
 0x319   :  { %23274 = vst [vmem:[#allocation48_spill] sm:$0xff] %v18057_v18  ;;  %v4686_v54 = vadd.f32 %v4685_v42, %v18057_v18  ;;  %v18076_v47 = vadd.f32 %v13582_v45, %v4095_v7  ;;  %v18079_v42 = vpop.f32.mrf.mxu1  ;;  %v3041_v18 = vadd.f32 %v23284_v6, %v23283_v55  ;;  %v4098_v40 = vadd.f32 %v17882_v61, %v3569_v62  ;;  %v23287_v45 = vld [vmem:[#allocation64_spill] sm:$0xff]  ;;  %v23290_v6 = vld [vmem:[#allocation31_spill] sm:$0xff] }
 0x31a   :  { %v4408_v20 = vpop.f32.mrf.mxu0  ;;  %v23289_v55 = vld [vmem:[#allocation32_spill] sm:$0xff] }
 0x31b   :  { %v18071_v53 = vadd.f32 %v4408_v20, %v4094_v33  ;;  %v4687_v11 = vadd.f32 %v4686_v54, %v18062_v35  ;;  %23282 = vst [vmem:[#allocation20_spill] sm:$0xff] %v18076_v47  ;;  %v4097_v33 = vadd.f32 %v17861_v21, %v23285_v27  ;;  %v3571_v60 = vadd.f32 %v23287_v45, %v3041_v18  ;;  %v23291_v21 = vld [vmem:[#allocation61_spill] sm:$0xff] }
 0x31c   :  { %v13585_v32 = vpop.f32.mrf.mxu0 }
 0x31d   :  { %23280 = vst [vmem:[#allocation21_spill] sm:$0xff] %v18071_v53  ;;  %v4688_v31 = vadd.f32 %v4687_v11, %v18071_v53  ;;  %v18090_v63 = vadd.f32 %v13585_v32, %v4097_v33  ;;  %v18093_v11 = vpop.f32.mrf.mxu1  ;;  %v3043_v53 = vadd.f32 %v23290_v6, %v23289_v55  ;;  %v4100_v18 = vadd.f32 %v17895_v10, %v3571_v60  ;;  %v23293_v32 = vld [vmem:[#allocation66_spill] sm:$0xff]  ;;  %v23296_v6 = vld [vmem:[#allocation33_spill] sm:$0xff] }
 0x31e   :  { %v4418_v24 = vpop.f32.mrf.mxu0  ;;  %v23295_v55 = vld [vmem:[#allocation34_spill] sm:$0xff] }
 0x31f   :  { %v18085_v20 = vadd.f32 %v4418_v24, %v4096_v48  ;;  %v4689_v54 = vadd.f32 %v4688_v31, %v18076_v47  ;;  %23288 = vst [vmem:[#allocation54_spill] sm:$0xff] %v18090_v63  ;;  %v4099_v48 = vadd.f32 %v17875_v4, %v23291_v21  ;;  %v3573_v62 = vadd.f32 %v23293_v32, %v3043_v53  ;;  %v23297_v4 = vld [vmem:[#allocation63_spill] sm:$0xff] }
 0x320   :  { %v13588_v39 = vpop.f32.mrf.mxu0 }
 0x321   :  { %23286 = vst [vmem:[#allocation49_spill] sm:$0xff] %v18085_v20  ;;  %v4690_v7 = vadd.f32 %v4689_v54, %v18085_v20  ;;  %v18104_v27 = vadd.f32 %v13588_v39, %v4099_v48  ;;  %v18107_v54 = vpop.f32.mrf.mxu1  ;;  %v3045_v20 = vadd.f32 %v23296_v6, %v23295_v55  ;;  %v4102_v53 = vadd.f32 %v17918_v41, %v3573_v62  ;;  %v23300_v39 = vld [vmem:[#allocation68_spill] sm:$0xff]  ;;  %v23303_v6 = vld [vmem:[#allocation35_spill] sm:$0xff] }
 0x322   :  { %v4428_v51 = vpop.f32.mrf.mxu0  ;;  %v23302_v55 = vld [vmem:[#allocation36_spill] sm:$0xff] }
 0x323   :  { %v18099_v24 = vadd.f32 %v4428_v51, %v4098_v40  ;;  %v4691_v31 = vadd.f32 %v4690_v7, %v18090_v63  ;;  %23294 = vst [vmem:[#allocation22_spill] sm:$0xff] %v18104_v27  ;;  %v23298_v40 = vld [vmem:[#allocation94_spill] sm:$0xff]  ;;  %v3575_v60 = vadd.f32 %v23300_v39, %v3045_v20  ;;  %v18121_v32 = vpop.f32.mrf.mxu1  ;;  %v3047_v63 = vadd.f32 %v23303_v6, %v23302_v55  ;;  %v23309_v6 = vld [vmem:[#allocation37_spill] sm:$0xff] }
 0x324   :  { %v13591_v61 = vpop.f32.mrf.mxu0  ;;  %v4101_v51 = vadd.f32 %v23298_v40, %v23297_v4  ;;  %v23304_v4 = vld [vmem:[#allocation65_spill] sm:$0xff]  ;;  %v23308_v55 = vld [vmem:[#allocation38_spill] sm:$0xff] }
 0x325   :  { %23292 = vst [vmem:[#allocation18_spill] sm:$0xff] %v18099_v24  ;;  %v4692_v33 = vadd.f32 %v4691_v31, %v18099_v24  ;;  %v4104_v20 = vadd.f32 %v17942_v13, %v3575_v60 }
 0x326   :  { %v4438_v45 = vpop.f32.mrf.mxu0  ;;  %v18118_v48 = vadd.f32 %v13591_v61, %v4101_v51  ;;  %v23306_v61 = vld [vmem:[#allocation70_spill] sm:$0xff] }
 0x327   :  { %v18113_v21 = vadd.f32 %v4438_v45, %v4100_v18  ;;  %v4693_v7 = vadd.f32 %v4692_v33, %v18104_v27  ;;  %v4103_v18 = vadd.f32 %v17905_v46, %v23304_v4  ;;  %v3577_v62 = vadd.f32 %v23306_v61, %v3047_v63  ;;  %v23310_v46 = vld [vmem:[#allocation67_spill] sm:$0xff] }
 0x328   :  { %v13594_v10 = vpop.f32.mrf.mxu0  ;;  %23301 = vst [vmem:[#allocation56_spill] sm:$0xff] %v18118_v48  ;;  %v23359_v27 = vld [vmem:[#allocation87_spill] sm:$0xff] }
 0x329   :  { %23299 = vst [vmem:[#allocation51_spill] sm:$0xff] %v18113_v21  ;;  %v4694_v31 = vadd.f32 %v4693_v7, %v18113_v21  ;;  %v18132_v40 = vadd.f32 %v13594_v10, %v4103_v18  ;;  %v18135_v7 = vpop.f32.mrf.mxu1  ;;  %v3049_v21 = vadd.f32 %v23309_v6, %v23308_v55  ;;  %v4106_v63 = vadd.f32 %v17966_v34, %v3577_v62  ;;  %v23312_v10 = vld [vmem:[#allocation72_spill] sm:$0xff]  ;;  %v23315_v6 = vld [vmem:[#allocation39_spill] sm:$0xff] }
 0x32a   :  { %v4448_v24 = vpop.f32.mrf.mxu0  ;;  %v23314_v55 = vld [vmem:[#allocation40_spill] sm:$0xff] }
 0x32b   :  { %v18127_v45 = vadd.f32 %v4448_v24, %v4102_v53  ;;  %v4695_v33 = vadd.f32 %v4694_v31, %v18118_v48  ;;  %23307 = vst [vmem:[#allocation23_spill] sm:$0xff] %v18132_v40  ;;  %v4105_v24 = vadd.f32 %v17930_v15, %v23310_v46  ;;  %v3579_v60 = vadd.f32 %v23312_v10, %v3049_v21  ;;  %v23316_v15 = vld [vmem:[#allocation69_spill] sm:$0xff] }
 0x32c   :  { %v13597_v41 = vpop.f32.mrf.mxu0 }
 0x32d   :  { %23305 = vst [vmem:[#allocation24_spill] sm:$0xff] %v18127_v45  ;;  %v4696_v51 = vadd.f32 %v4695_v33, %v18127_v45  ;;  %v18146_v4 = vadd.f32 %v13597_v41, %v4105_v24  ;;  %v18149_v33 = vpop.f32.mrf.mxu1  ;;  %v3051_v45 = vadd.f32 %v23315_v6, %v23314_v55  ;;  %v4108_v21 = vadd.f32 %v17995_v36, %v3579_v60  ;;  %v23318_v41 = vld [vmem:[#allocation74_spill] sm:$0xff]  ;;  %v23321_v55 = vld [vmem:[#allocation41_spill] sm:$0xff] }
 0x32e   :  { %v4458_v39 = vpop.f32.mrf.mxu0 }
 0x32f   :  { %v18141_v53 = vadd.f32 %v4458_v39, %v4104_v20  ;;  %v4697_v31 = vadd.f32 %v4696_v51, %v18132_v40  ;;  %23313 = vst [vmem:[#allocation58_spill] sm:$0xff] %v18146_v4  ;;  %v4107_v20 = vadd.f32 %v17954_v57, %v23316_v15  ;;  %v3581_v62 = vadd.f32 %v23318_v41, %v3051_v45  ;;  %v23322_v40 = vld [vmem:[#allocation71_spill] sm:$0xff]  ;;  %v23324_v45 = vld [vmem:[#allocation76_spill] sm:$0xff] }
 0x330   :  { %v13600_v13 = vpop.f32.mrf.mxu0  ;;  %v4109_v57 = vadd.f32 %v17981_v12, %v23322_v40  ;;  %v23327_v41 = vld [vmem:[#allocation43_spill] sm:$0xff]  ;;  %v23328_v12 = vld [vmem:[#allocation73_spill] sm:$0xff] }
 0x331   :  { %23311 = vst [vmem:[#allocation53_spill] sm:$0xff] %v18141_v53  ;;  %v4698_v18 = vadd.f32 %v4697_v31, %v18141_v53  ;;  %v18160_v46 = vadd.f32 %v13600_v13, %v4107_v20  ;;  %v4009_v31 = vpop.f32.mrf.mxu1  ;;  %v23320_v53 = vld [vmem:[#allocation42_spill] sm:$0xff]  ;;  %v4110_v36 = vadd.f32 %v18023_v0, %v3581_v62  ;;  %v4111_v40 = vadd.f32 %v18009_v25, %v23328_v12 }
 0x332   :  { %v4468_v61 = vpop.f32.mrf.mxu0  ;;  %v3053_v6 = vadd.f32 %v23321_v55, %v23320_v53  ;;  %v23326_v53 = vld [vmem:[#allocation3_spill] sm:$0xff] }
 0x333   :  { %v18155_v39 = vadd.f32 %v4468_v61, %v4106_v63  ;;  %v4699_v51 = vadd.f32 %v4698_v18, %v18146_v4  ;;  %23319 = vst [vmem:[#allocation25_spill] sm:$0xff] %v18160_v46  ;;  %v18175_v20 = vpop.f32.mrf.mxu1  ;;  %v3055_v55 = vadd.f32 %v23327_v41, %v23326_v53  ;;  %v23333_v53 = vld [vmem:[#allocation19_spill] sm:$0xff]  ;;  %v23358_v4 = vld [vmem:[#allocation44_spill] sm:$0xff] }
 0x334   :  { %v13603_v34 = vpop.f32.mrf.mxu0  ;;  %v3583_v13 = vadd.f32 %v23324_v45, %v3053_v6 }
 0x335   :  { %23317 = vst [vmem:[#allocation26_spill] sm:$0xff] %v18155_v39  ;;  %v4700_v24 = vadd.f32 %v4699_v51, %v18155_v39  ;;  %v18172_v60 = vadd.f32 %v13603_v34, %v4109_v57  ;;  %v23330_v34 = vld [vmem:[#allocation78_spill] sm:$0xff]  ;;  %v23354_v39 = vld [vmem:[#allocation13_spill] sm:$0xff] }
 0x336   :  { %v4478_v10 = vpop.f32.mrf.mxu0  ;;  %v4112_v62 = vadd.f32 %v18051_v1, %v3583_v13  ;;  %v23336_v13 = vld [vmem:[#allocation80_spill] sm:$0xff] }
 0x337   :  { %v18167_v63 = vadd.f32 %v4478_v10, %v4108_v21  ;;  %v4701_v18 = vadd.f32 %v4700_v24, %v18160_v46  ;;  %23325 = vst [vmem:[#allocation60_spill] sm:$0xff] %v18172_v60  ;;  %v3585_v10 = vadd.f32 %v23330_v34, %v3055_v55  ;;  %v23334_v46 = vld [vmem:[#allocation75_spill] sm:$0xff]  ;;  %v23337_v34 = vld [vmem:[#allocation6_spill] sm:$0xff] }
 0x338   :  { %v13606_v61 = vpop.f32.mrf.mxu0  ;;  %v4113_v25 = vadd.f32 %v18037_v56, %v23334_v46 }
 0x339   :  { %23323 = vst [vmem:[#allocation55_spill] sm:$0xff] %v18167_v63  ;;  %v4702_v15 = vadd.f32 %v4701_v18, %v18167_v63  ;;  %v18186_v6 = vadd.f32 %v13606_v61, %v4111_v40  ;;  %v4019_v18 = vpop.f32.mrf.mxu1  ;;  %v23332_v63 = vld [vmem:[#allocation4_spill] sm:$0xff]  ;;  %v4114_v1 = vadd.f32 %v18079_v42, %v3585_v10  ;;  %v23340_v10 = vld [vmem:[#allocation82_spill] sm:$0xff] }
 0x33a   :  { %v4488_v51 = vpop.f32.mrf.mxu0  ;;  %v3057_v41 = vadd.f32 %v23333_v53, %v23332_v63  ;;  %v23338_v63 = vld [vmem:[#allocation5_spill] sm:$0xff] }
 0x33b   :  { %v18181_v21 = vadd.f32 %v4488_v51, %v4110_v36  ;;  %v4703_v24 = vadd.f32 %v4702_v15, %v18172_v60  ;;  %23331 = vst [vmem:[#allocation27_spill] sm:$0xff] %v18186_v6  ;;  %v13499_v40 = vpop.f32.mrf.mxu1  ;;  %v3059_v53 = vadd.f32 %v23338_v63, %v23337_v34  ;;  %v23342_v34 = vld [vmem:[#allocation7_spill] sm:$0xff] }
 0x33c   :  { %v13609_v0 = vpop.f32.mrf.mxu0  ;;  %v3587_v61 = vadd.f32 %v23336_v13, %v3057_v41  ;;  %v23341_v13 = vld [vmem:[#allocation8_spill] sm:$0xff]  ;;  %v23350_v60 = vld [vmem:[#allocation11_spill] sm:$0xff]  ;;  %v4125_v47 = vadd.f32 %v13499_v40, %v23359_v27 }
 0x33d   :  { %23329 = vst [vmem:[#allocation28_spill] sm:$0xff] %v18181_v21  ;;  %v4704_v57 = vadd.f32 %v4703_v24, %v18181_v21  ;;  %v18198_v55 = vadd.f32 %v13609_v0, %v4113_v25  ;;  %v23339_v21 = vld [vmem:[#allocation77_spill] sm:$0xff]  ;;  %v3589_v0 = vadd.f32 %v23340_v10, %v3059_v53  ;;  %v4029_v25 = vpop.f32.mrf.mxu1  ;;  %v3061_v63 = vadd.f32 %v23342_v34, %v23341_v13  ;;  %v23345_v10 = vld [vmem:[#allocation10_spill] sm:$0xff]  ;;  %v23364_v27 = vld [vmem:[#allocation95_spill] sm:$0xff] }
 0x33e   :  { %v4498_v45 = vpop.f32.mrf.mxu0  ;;  %v4115_v56 = vadd.f32 %v18065_v29, %v23339_v21  ;;  %v4116_v42 = vadd.f32 %v18107_v54, %v3587_v61  ;;  %v23344_v61 = vld [vmem:[#allocation84_spill] sm:$0xff]  ;;  %v23346_v13 = vld [vmem:[#allocation9_spill] sm:$0xff] }
 0x33f   :  { %v18193_v36 = vadd.f32 %v4498_v45, %v4112_v62  ;;  %v4705_v15 = vadd.f32 %v4704_v57, %v18186_v6  ;;  %v4118_v54 = vadd.f32 %v18135_v7, %v3589_v0  ;;  %v3063_v34 = vadd.f32 %v23346_v13, %v23345_v10  ;;  %v23347_v6 = vld [vmem:[#allocation81_spill] sm:$0xff]  ;;  %v23348_v0 = vld [vmem:[#allocation86_spill] sm:$0xff]  ;;  %v23351_v13 = vld [vmem:[#allocation83_spill] sm:$0xff] }
 0x340   :  { %v13612_v51 = vpop.f32.mrf.mxu0 }
 0x341   :  { %23335 = vst [vmem:[#allocation57_spill] sm:$0xff] %v18193_v36  ;;  %v4706_v12 = vadd.f32 %v4705_v15, %v18193_v36  ;;  %v18210_v45 = vadd.f32 %v13612_v51, %v4115_v56  ;;  %v23343_v36 = vld [vmem:[#allocation79_spill] sm:$0xff]  ;;  %v3591_v51 = vadd.f32 %v23344_v61, %v3061_v63  ;;  %v13502_v56 = vpop.f32.mrf.mxu1  ;;  %v23349_v61 = vld [vmem:[#allocation12_spill] sm:$0xff] }
 0x342   :  { %v4508_v24 = vpop.f32.mrf.mxu0  ;;  %v4117_v29 = vadd.f32 %v18093_v11, %v23343_v36  ;;  %v4119_v11 = vadd.f32 %v18121_v32, %v23347_v6  ;;  %v3065_v10 = vadd.f32 %v23350_v60, %v23349_v61  ;;  %v4121_v32 = vadd.f32 %v18149_v33, %v23351_v13  ;;  %v23355_v61 = vld [vmem:[#allocation85_spill] sm:$0xff] }
 0x343   :  { %v18205_v46 = vadd.f32 %v4508_v24, %v4114_v1  ;;  %v4707_v62 = vadd.f32 %v4706_v12, %v18198_v55  ;;  %v4120_v7 = vadd.f32 %v4009_v31, %v3591_v51  ;;  %v23352_v51 = vld [vmem:[#allocation88_spill] sm:$0xff]  ;;  %v4123_v33 = vadd.f32 %v18175_v20, %v23355_v61 }
 0x344   :  { %v13615_v57 = vpop.f32.mrf.mxu0 }
 0x345   :  { %v4708_v41 = vadd.f32 %v4707_v62, %v18205_v46  ;;  %v18222_v24 = vadd.f32 %v13615_v57, %v4117_v29  ;;  %v4039_v29 = vpop.f32.mrf.mxu1 }
 0x346   :  { %v4518_v15 = vpop.f32.mrf.mxu0 }
 0x347   :  { %v18217_v21 = vadd.f32 %v4518_v15, %v4116_v42  ;;  %v4709_v1 = vadd.f32 %v4708_v41, %v18210_v45  ;;  %v3593_v15 = vadd.f32 %v23348_v0, %v3063_v34  ;;  %v23353_v0 = vld [vmem:[#allocation14_spill] sm:$0xff] }
 0x348   :  { %v13618_v12 = vpop.f32.mrf.mxu0  ;;  %v3067_v60 = vadd.f32 %v23354_v39, %v23353_v0 }
 0x349   :  { %v4710_v53 = vadd.f32 %v4709_v1, %v18217_v21  ;;  %v18233_v57 = vadd.f32 %v13618_v12, %v4119_v11  ;;  %v4122_v31 = vadd.f32 %v4019_v18, %v3593_v15  ;;  %v13505_v11 = vpop.f32.mrf.mxu1  ;;  %v23356_v18 = vld [vmem:[#allocation90_spill] sm:$0xff] }
 0x34a   :  { %v4528_v62 = vpop.f32.mrf.mxu0  ;;  %v3597_v15 = vadd.f32 %v23356_v18, %v3067_v60  ;;  %v23361_v60 = vld [vmem:[#allocation47_spill] sm:$0xff] }
 0x34b   :  { %v18229_v36 = vadd.f32 %v4528_v62, %v4118_v54  ;;  %v4711_v42 = vadd.f32 %v4710_v53, %v18222_v24  ;;  %v3595_v62 = vadd.f32 %v23352_v51, %v3065_v10 }
 0x34c   :  { %v13621_v41 = vpop.f32.mrf.mxu0  ;;  %v4126_v20 = vadd.f32 %v4039_v29, %v3597_v15 }
 0x34d   :  { %v4712_v63 = vadd.f32 %v4711_v42, %v18229_v36  ;;  %v18244_v12 = vadd.f32 %v13621_v41, %v4121_v32  ;;  %v4124_v13 = vadd.f32 %v4029_v25, %v3595_v62  ;;  %v4049_v32 = vpop.f32.mrf.mxu1 }
 0x34e   :  { %v4538_v1 = vpop.f32.mrf.mxu0 }
 0x34f   :  { %v18240_v6 = vadd.f32 %v4538_v1, %v4120_v7  ;;  %v4713_v54 = vadd.f32 %v4712_v63, %v18233_v57  ;;  %v13508_v25 = vpop.f32.mrf.mxu1 }
 0x350   :  { %v13624_v53 = vpop.f32.mrf.mxu0 }
 0x351   :  { %v4714_v34 = vadd.f32 %v4713_v54, %v18240_v6  ;;  %v4652_v10 = vadd.f32 %v13624_v53, %v4123_v33  ;;  %v23357_v54 = vld [vmem:[#allocation45_spill] sm:$0xff]  ;;  %v23362_v53 = vld [vmem:[#allocation46_spill] sm:$0xff]  ;;  %v4059_v29 = vpop.f32.mrf.mxu1 }
 0x352   :  { %v4548_v42 = vpop.f32.mrf.mxu0  ;;  %v3069_v48 = vadd.f32 %v23358_v4, %v23357_v54  ;;  %v3071_v33 = vadd.f32 %v23362_v53, %v23361_v60 }
 0x353   :  { %v4651_v7 = vadd.f32 %v4548_v42, %v4122_v31  ;;  %v4715_v1 = vadd.f32 %v4714_v34, %v18244_v12  ;;  %v23360_v31 = vld [vmem:[#allocation92_spill] sm:$0xff] }
 0x354   :  { %v13627_v63 = vpop.f32.mrf.mxu0  ;;  %v3599_v42 = vadd.f32 %v23360_v31, %v3069_v48  ;;  %v3601_v40 = vadd.f32 %v23364_v27, %v3071_v33  ;;  %v23365_v48 = vld [vmem:[#allocation91_spill] sm:$0xff] }
 0x355   :  { %v4716_v41 = vadd.f32 %v4715_v1, %v4651_v7  ;;  %v4654_v34 = vadd.f32 %v13627_v63, %v4125_v47  ;;  %v23363_v1 = vld [vmem:[#allocation89_spill] sm:$0xff]  ;;  %v4129_v47 = vadd.f32 %v13505_v11, %v23365_v48 }
 0x356   :  { %v4558_v51 = vpop.f32.mrf.mxu0  ;;  %v4127_v18 = vadd.f32 %v13502_v56, %v23363_v1  ;;  %v4128_v54 = vadd.f32 %v4049_v32, %v3599_v42  ;;  %v4130_v31 = vadd.f32 %v4059_v29, %v3601_v40  ;;  %v23366_v56 = vld [vmem:[#allocation93_spill] sm:$0xff] }
 0x357   :  { %v4653_v39 = vadd.f32 %v4558_v51, %v4124_v13  ;;  %v4717_v0 = vadd.f32 %v4716_v41, %v4652_v10 }
 0x358   :  { %v13630_v35 = vpop.f32.mrf.mxu0 }
 0x359   :  { %v4718_v61 = vadd.f32 %v4717_v0, %v4653_v39  ;;  %v4656_v13 = vadd.f32 %v13630_v35, %v4127_v18 }
 0x35a   :  { %v4568_v62 = vpop.f32.mrf.mxu0 }
 0x35b   :  { %v4655_v3 = vadd.f32 %v4568_v62, %v4126_v20  ;;  %v4719_v5 = vadd.f32 %v4718_v61, %v4654_v34  ;;  %v4131_v20 = vadd.f32 %v13508_v25, %v23366_v56 }
 0x35c   :  { %v13633_v4 = vpop.f32.mrf.mxu0 }
 0x35d   :  { %v4720_v41 = vadd.f32 %v4719_v5, %v4655_v3  ;;  %v4658_v23 = vadd.f32 %v13633_v4, %v4129_v47 }
 0x35e   :  { %v4578_v15 = vpop.f32.mrf.mxu0 }
 0x35f   :  { %v4657_v63 = vadd.f32 %v4578_v15, %v4128_v54  ;;  %v4721_v51 = vadd.f32 %v4720_v41, %v4656_v13 }
 0x360   :  { %v13636_v0 = vpop.f32.mrf.mxu0 }
 0x361   :  { %v4722_v60 = vadd.f32 %v4721_v51, %v4657_v63  ;;  %v4660_v32 = vadd.f32 %v13636_v0, %v4131_v20 }
 0x362   :  { %v4588_v53 = vpop.f32.mrf.mxu0 }
 0x363   :  { %v4659_v61 = vadd.f32 %v4588_v53, %v4130_v31  ;;  %v4723_v62 = vadd.f32 %v4722_v60, %v4658_v23 }
 0x365   :  { %v4724_v42 = vadd.f32 %v4723_v62, %v4659_v61 }
 0x367   :  { %v4725_v33 = vadd.f32 %v4724_v42, %v4660_v32 }
 0x369   :  { %v4726_v35 = vrot.slane %v4725_v33, 4 }
 0x36b   :  { %v4727_v5 = vadd.f32 %v4726_v35, %v4725_v33 }
 0x36d   :  { %v4728_v1 = vrot.slane %v4727_v5, 2 }
 0x36f   :  { %v4729_v18 = vadd.f32 %v4728_v1, %v4727_v5 }
 0x371   :  { %v4730_v27 = vrot.slane %v4729_v18, 1 }
 0x373   :  { %v4731_v11 = vadd.f32 %v4730_v27, %v4729_v18 }
 0x375   :  { %v18263_v54 = vmul.f32 0.001953125, %v4731_v11 }
 0x377   :  { %v18267_v4 = vsub.f32 %v18198_v55, %v18263_v54  ;;  %v18271_v25 = vsub.f32 %v18205_v46, %v18263_v54  ;;  %v18275_v40 = vsub.f32 %v18210_v45, %v18263_v54  ;;  %v18279_v41 = vsub.f32 %v18217_v21, %v18263_v54 }
 0x378   :  { %v18283_v29 = vsub.f32 %v18222_v24, %v18263_v54  ;;  %v18287_v55 = vsub.f32 %v18229_v36, %v18263_v54  ;;  %v18291_v46 = vsub.f32 %v18233_v57, %v18263_v54  ;;  %v18295_v45 = vsub.f32 %v18240_v6, %v18263_v54 }
 0x379   :  { %v18299_v21 = vsub.f32 %v18244_v12, %v18263_v54  ;;  %v18302_v15 = vsub.f32 %v4651_v7, %v18263_v54  ;;  %v18305_v24 = vsub.f32 %v4652_v10, %v18263_v54  ;;  %v18308_v36 = vsub.f32 %v4653_v39, %v18263_v54 }
 0x37a   :  { %v18311_v57 = vsub.f32 %v4654_v34, %v18263_v54  ;;  %v18314_v48 = vsub.f32 %v4655_v3, %v18263_v54  ;;  %v18317_v6 = vsub.f32 %v4656_v13, %v18263_v54  ;;  %v18320_v12 = vsub.f32 %v4657_v63, %v18263_v54 }
 0x37b   :  { %v18323_v7 = vsub.f32 %v4658_v23, %v18263_v54  ;;  %v18326_v10 = vsub.f32 %v4659_v61, %v18263_v54  ;;  %v18329_v39 = vsub.f32 %v4660_v32, %v18263_v54  ;;  %v18333_v34 = vsub.f32 %v17899_v44, %v18263_v54 }
 0x37c   :  { %v18337_v3 = vsub.f32 %v17903_v49, %v18263_v54  ;;  %v18341_v13 = vsub.f32 %v17911_v22, %v18263_v54  ;;  %v18349_v63 = vsub.f32 %v17915_v28, %v18263_v54  ;;  %v18353_v44 = vsub.f32 %v17923_v43, %v18263_v54 }
 0x37d   :  { %23367 = vst [vmem:[#allocation62_spill] sm:$0xff] %v18323_v7  ;;  %v4797_v23 = vmul.f32 %v18333_v34, %v18333_v34  ;;  %v18359_v22 = vsub.f32 %v17927_v9, %v18263_v54  ;;  %v18365_v28 = vsub.f32 %v17934_v16, %v18263_v54  ;;  %v18371_v53 = vsub.f32 %v17939_v58, %v18263_v54 }
 0x37e   :  { %v4798_v47 = vmul.f32 %v18337_v3, %v18337_v3  ;;  %v4799_v49 = vmul.f32 %v18341_v13, %v18341_v13  ;;  %v4800_v0 = vmul.f32 %v18349_v63, %v18349_v63  ;;  %v4801_v43 = vmul.f32 %v18353_v44, %v18353_v44 }
 0x37f   :  { %v4802_v9 = vmul.f32 %v18359_v22, %v18359_v22  ;;  %v18377_v20 = vsub.f32 %v17946_v26, %v18263_v54  ;;  %v4803_v16 = vmul.f32 %v18365_v28, %v18365_v28  ;;  %v18383_v62 = vsub.f32 %v17951_v17, %v18263_v54 }
 0x380   :  { %v4861_v51 = vadd.f32 %v4798_v47, %v4797_v23  ;;  %v4804_v58 = vmul.f32 %v18371_v53, %v18371_v53  ;;  %v18389_v42 = vsub.f32 %v17958_v2, %v18263_v54  ;;  %v18395_v35 = vsub.f32 %v17963_v52, %v18263_v54 }
 0x381   :  { %v4805_v26 = vmul.f32 %v18377_v20, %v18377_v20  ;;  %v4806_v17 = vmul.f32 %v18383_v62, %v18383_v62  ;;  %v18401_v1 = vsub.f32 %v17972_v8, %v18263_v54  ;;  %v18407_v27 = vsub.f32 %v17978_v37, %v18263_v54 }
 0x382   :  { %v4862_v31 = vadd.f32 %v4861_v51, %v4799_v49  ;;  %v4807_v2 = vmul.f32 %v18389_v42, %v18389_v42  ;;  %v4808_v52 = vmul.f32 %v18395_v35, %v18395_v35  ;;  %v18413_v23 = vsub.f32 %v17987_v38, %v18263_v54 }
 0x383   :  { %v4809_v8 = vmul.f32 %v18401_v1, %v18401_v1  ;;  %v18419_v49 = vsub.f32 %v17992_v50, %v18263_v54  ;;  %v4810_v37 = vmul.f32 %v18407_v27, %v18407_v27 }
 0x384   :  { %v4863_v60 = vadd.f32 %v4862_v31, %v4800_v0  ;;  %v18425_v0 = vsub.f32 %v18001_v14, %v18263_v54  ;;  %v4811_v38 = vmul.f32 %v18413_v23, %v18413_v23 }
 0x385   :  { %v4812_v50 = vmul.f32 %v18419_v49, %v18419_v49 }
 0x386   :  { %v4864_v56 = vadd.f32 %v4863_v60, %v4801_v43  ;;  %v18431_v43 = vsub.f32 %v18006_v30, %v18263_v54  ;;  %v4813_v14 = vmul.f32 %v18425_v0, %v18425_v0 }
 0x388   :  { %v4865_v61 = vadd.f32 %v4864_v56, %v4802_v9  ;;  %v18437_v9 = vsub.f32 %v18015_v59, %v18263_v54  ;;  %v4814_v30 = vmul.f32 %v18431_v43, %v18431_v43 }
 0x38a   :  { %v4866_v32 = vadd.f32 %v4865_v61, %v4803_v16  ;;  %v18443_v16 = vsub.f32 %v18020_v19, %v18263_v54  ;;  %v4815_v59 = vmul.f32 %v18437_v9, %v18437_v9 }
 0x38c   :  { %v4867_v33 = vadd.f32 %v4866_v32, %v4804_v58  ;;  %v23368_v58 = vld [vmem:[#allocation15_spill] sm:$0xff]  ;;  %v4816_v19 = vmul.f32 %v18443_v16, %v18443_v16 }
 0x38d   :  { %v18449_v32 = vsub.f32 %v23368_v58, %v18263_v54  ;;  %v5447_v58 = vld [vmem:[%s22970_s2 + $0xf8] sm:$0xff] }
 0x38e   :  { %v4868_v5 = vadd.f32 %v4867_v33, %v4805_v26  ;;  %v23369_v33 = vld [vmem:[#allocation50_spill] sm:$0xff]  ;;  %13637 = vmatprep.subr.mxu1 %v5447_v58 }
 0x38f   :  { %13638 = vmatpush3.msra.mxu1 %v5447_v58  ;;  %v5444_v58 = vld [vmem:[%s22970_s2 + $0xe0] sm:$0xff] }
 0x390   :  { %v4869_v18 = vadd.f32 %v4868_v5, %v4806_v17  ;;  %v18455_v17 = vsub.f32 %v23369_v33, %v18263_v54 }
 0x392   :  { %v4870_v11 = vadd.f32 %v4869_v18, %v4807_v2  ;;  %v23370_v2 = vld [vmem:[#allocation17_spill] sm:$0xff] }
 0x393   :  { %v18461_v18 = vsub.f32 %v23370_v2, %v18263_v54  ;;  %v5446_v2 = vld [vmem:[%s22970_s2 + $0xf0] sm:$0xff] }
 0x394   :  { %v4871_v47 = vadd.f32 %v4870_v11, %v4808_v52  ;;  %v4817_v52 = vmul.f32 %v18449_v32, %v18449_v32  ;;  %13639 = vmatprep.subr.mxu1 %v5446_v2 }
 0x395   :  { %13640 = vmatpush3.msra.mxu1 %v5446_v2 }
 0x396   :  { %v4872_v51 = vadd.f32 %v4871_v47, %v4809_v8  ;;  %v23371_v8 = vld [vmem:[#allocation16_spill] sm:$0xff] }
 0x397   :  { %v18467_v47 = vsub.f32 %v23371_v8, %v18263_v54 }
 0x398   :  { %v4873_v31 = vadd.f32 %v4872_v51, %v4810_v37  ;;  %v4818_v37 = vmul.f32 %v18455_v17, %v18455_v17 }
 0x39a   :  { %v4874_v60 = vadd.f32 %v4873_v31, %v4811_v38  ;;  %v23372_v38 = vld [vmem:[#allocation48_spill] sm:$0xff] }
 0x39b   :  { %v18473_v31 = vsub.f32 %v23372_v38, %v18263_v54  ;;  %v5445_v38 = vld [vmem:[%s22970_s2 + $0xe8] sm:$0xff] }
 0x39c   :  { %v4875_v56 = vadd.f32 %v4874_v60, %v4812_v50  ;;  %v4819_v50 = vmul.f32 %v18461_v18, %v18461_v18  ;;  %13641 = vmatprep.subr.mxu1 %v5445_v38 }
 0x39d   :  { %13642 = vmatpush3.msra.mxu1 %v5445_v38 }
 0x39e   :  { %v4876_v61 = vadd.f32 %v4875_v56, %v4813_v14  ;;  %v23373_v14 = vld [vmem:[#allocation52_spill] sm:$0xff]  ;;  %13643 = vmatprep.subr.mxu1 %v5444_v58 }
 0x39f   :  { %v18479_v56 = vsub.f32 %v23373_v14, %v18263_v54  ;;  %13644 = vmatpush3.msra.mxu1 %v5444_v58 }
 0x3a0   :  { %v4877_v26 = vadd.f32 %v4876_v61, %v4814_v30  ;;  %v4820_v30 = vmul.f32 %v18467_v47, %v18467_v47 }
 0x3a2   :  { %v4878_v5 = vadd.f32 %v4877_v26, %v4815_v59  ;;  %v5367_v59 = vld [vmem:[%s22970_s2 + $0x78] sm:$0xff]  ;;  %v23374_v26 = vld [vmem:[#allocation21_spill] sm:$0xff] }
 0x3a3   :  { %v18491_v33 = vsub.f32 %v23374_v26, %v18263_v54  ;;  %13765 = vmatprep.subr.mxu0 %v5367_v59  ;;  %v23379_v26 = vld [vmem:[#allocation54_spill] sm:$0xff] }
 0x3a4   :  { %v4879_v11 = vadd.f32 %v4878_v5, %v4816_v19  ;;  %v4821_v19 = vmul.f32 %v18473_v31, %v18473_v31  ;;  %13766 = vmatpush3.msra.mxu0 %v5367_v59  ;;  %v5364_v59 = vld [vmem:[%s22970_s2 + $0x60] sm:$0xff] }
 0x3a6   :  { %v4880_v51 = vadd.f32 %v4879_v11, %v4817_v52  ;;  %v5366_v52 = vld [vmem:[%s22970_s2 + $0x70] sm:$0xff]  ;;  %v23375_v11 = vld [vmem:[#allocation20_spill] sm:$0xff] }
 0x3a7   :  { %v18503_v8 = vsub.f32 %v23375_v11, %v18263_v54  ;;  %13767 = vmatprep.subr.mxu0 %v5366_v52  ;;  %v5363_v11 = vld [vmem:[%s22970_s2 + $0x58] sm:$0xff] }
 0x3a8   :  { %v4881_v60 = vadd.f32 %v4880_v51, %v4818_v37  ;;  %v4822_v37 = vmul.f32 %v18479_v56, %v18479_v56  ;;  %13768 = vmatpush3.msra.mxu0 %v5366_v52  ;;  %v5443_v52 = vld [vmem:[%s22970_s2 + $0xd8] sm:$0xff] }
 0x3a9   :  { %23376 = vst [vmem:[#allocation30_spill] sm:$0xff] %v18503_v8  ;;  %13645 = vmatprep.subr.mxu1 %v5443_v52 }
 0x3aa   :  { %v4882_v61 = vadd.f32 %v4881_v60, %v4819_v50  ;;  %v5365_v50 = vld [vmem:[%s22970_s2 + $0x68] sm:$0xff]  ;;  %v23377_v60 = vld [vmem:[#allocation49_spill] sm:$0xff]  ;;  %13646 = vmatpush3.msra.mxu1 %v5443_v52  ;;  %v23385_v52 = vld [vmem:[#allocation51_spill] sm:$0xff] }
 0x3ab   :  { %v18515_v14 = vsub.f32 %v23377_v60, %v18263_v54  ;;  %13769 = vmatprep.subr.mxu0 %v5365_v50  ;;  %v5442_v60 = vld [vmem:[%s22970_s2 + $0xd0] sm:$0xff] }
 0x3ac   :  { %v4883_v5 = vadd.f32 %v4882_v61, %v4820_v30  ;;  %v4823_v30 = vmul.f32 %v18491_v33, %v18491_v33  ;;  %13770 = vmatpush3.msra.mxu0 %v5365_v50  ;;  %13647 = vmatprep.subr.mxu1 %v5442_v60 }
 0x3ad   :  { %23378 = vst [vmem:[#allocation29_spill] sm:$0xff] %v18515_v14  ;;  %13771 = vmatprep.subr.mxu0 %v5364_v59  ;;  %v4825_v38 = vmul.f32 %v18515_v14, %v18515_v14  ;;  %13648 = vmatpush3.msra.mxu1 %v5442_v60  ;;  %v5360_v60 = vld [vmem:[%s22970_s2 + $0x40] sm:$0xff] }
 0x3ae   :  { %v4884_v51 = vadd.f32 %v4883_v5, %v4821_v19  ;;  %v18527_v19 = vsub.f32 %v23379_v26, %v18263_v54  ;;  %v4824_v5 = vmul.f32 %v18503_v8, %v18503_v8  ;;  %13772 = vmatpush3.msra.mxu0 %v5364_v59 }
 0x3af   :  { %13773 = vmatprep.subr.mxu0 %v5363_v11 }
 0x3b0   :  { %v4885_v61 = vadd.f32 %v4884_v51, %v4822_v37  ;;  %23380 = vst [vmem:[#allocation59_spill] sm:$0xff] %v18527_v19  ;;  %v23381_v37 = vld [vmem:[#allocation18_spill] sm:$0xff]  ;;  %13774 = vmatpush3.msra.mxu0 %v5363_v11  ;;  %v4826_v59 = vmul.f32 %v18527_v19, %v18527_v19  ;;  %v18563_v11 = vsub.f32 %v23385_v52, %v18263_v54 }
 0x3b1   :  { %v18539_v51 = vsub.f32 %v23381_v37, %v18263_v54 }
 0x3b2   :  { %v4886_v2 = vadd.f32 %v4885_v61, %v4823_v30  ;;  %v5362_v30 = vld [vmem:[%s22970_s2 + $0x50] sm:$0xff]  ;;  %v23383_v61 = vld [vmem:[#allocation22_spill] sm:$0xff]  ;;  %23386 = vst [vmem:[#allocation31_spill] sm:$0xff] %v18563_v11 }
 0x3b3   :  { %23382 = vst [vmem:[#allocation64_spill] sm:$0xff] %v18539_v51  ;;  %v18551_v58 = vsub.f32 %v23383_v61, %v18263_v54  ;;  %13775 = vmatprep.subr.mxu0 %v5362_v30  ;;  %v4827_v37 = vmul.f32 %v18539_v51, %v18539_v51 }
 0x3b4   :  { %v4887_v50 = vadd.f32 %v4886_v2, %v4824_v5  ;;  %v5441_v5 = vld [vmem:[%s22970_s2 + $0xc8] sm:$0xff]  ;;  %13776 = vmatpush3.msra.mxu0 %v5362_v30 }
 0x3b5   :  { %23384 = vst [vmem:[#allocation32_spill] sm:$0xff] %v18551_v58  ;;  %v5361_v2 = vld [vmem:[%s22970_s2 + $0x48] sm:$0xff]  ;;  %13649 = vmatprep.subr.mxu1 %v5441_v5  ;;  %v4828_v52 = vmul.f32 %v18551_v58, %v18551_v58  ;;  %v4829_v58 = vmul.f32 %v18563_v11, %v18563_v11 }
 0x3b6   :  { %v4888_v26 = vadd.f32 %v4887_v50, %v4825_v38  ;;  %13777 = vmatprep.subr.mxu0 %v5361_v2  ;;  %13650 = vmatpush3.msra.mxu1 %v5441_v5  ;;  %v5440_v50 = vld [vmem:[%s22970_s2 + $0xc0] sm:$0xff]  ;;  %v23387_v30 = vld [vmem:[#allocation56_spill] sm:$0xff]  ;;  %v5359_v5 = vld [vmem:[%s22970_s2 + $0x38] sm:$0xff] }
 0x3b7   :  { %13778 = vmatpush3.msra.mxu0 %v5361_v2  ;;  %v18575_v61 = vsub.f32 %v23387_v30, %v18263_v54  ;;  %13651 = vmatprep.subr.mxu1 %v5440_v50  ;;  %v23389_v2 = vld [vmem:[#allocation24_spill] sm:$0xff] }
 0x3b8   :  { %v4889_v38 = vadd.f32 %v4888_v26, %v4826_v59  ;;  %13779 = vmatprep.subr.mxu0 %v5360_v60  ;;  %13652 = vmatpush3.msra.mxu1 %v5440_v50  ;;  %v5439_v26 = vld [vmem:[%s22970_s2 + $0xb8] sm:$0xff]  ;;  %v18587_v30 = vsub.f32 %v23389_v2, %v18263_v54  ;;  %v5358_v50 = vld [vmem:[%s22970_s2 + $0x30] sm:$0xff] }
 0x3b9   :  { %23388 = vst [vmem:[#allocation61_spill] sm:$0xff] %v18575_v61  ;;  %13780 = vmatpush3.msra.mxu0 %v5360_v60  ;;  %13653 = vmatprep.subr.mxu1 %v5439_v26  ;;  %v23391_v60 = vld [vmem:[#allocation23_spill] sm:$0xff]  ;;  %v4830_v11 = vmul.f32 %v18575_v61, %v18575_v61 }
 0x3ba   :  { %v4890_v59 = vadd.f32 %v4889_v38, %v4827_v37  ;;  %23390 = vst [vmem:[#allocation66_spill] sm:$0xff] %v18587_v30  ;;  %13781 = vmatprep.subr.mxu0 %v5359_v5  ;;  %13654 = vmatpush3.msra.mxu1 %v5439_v26  ;;  %v5438_v38 = vld [vmem:[%s22970_s2 + $0xb0] sm:$0xff]  ;;  %v18599_v2 = vsub.f32 %v23391_v60, %v18263_v54  ;;  %v5357_v26 = vld [vmem:[%s22970_s2 + $0x28] sm:$0xff] }
 0x3bb   :  { %13782 = vmatpush3.msra.mxu0 %v5359_v5  ;;  %13655 = vmatprep.subr.mxu1 %v5438_v38  ;;  %v23393_v5 = vld [vmem:[#allocation53_spill] sm:$0xff]  ;;  %v4831_v61 = vmul.f32 %v18587_v30, %v18587_v30 }
 0x3bc   :  { %v4891_v37 = vadd.f32 %v4890_v59, %v4828_v52  ;;  %23392 = vst [vmem:[#allocation34_spill] sm:$0xff] %v18599_v2  ;;  %13783 = vmatprep.subr.mxu0 %v5358_v50  ;;  %13656 = vmatpush3.msra.mxu1 %v5438_v38  ;;  %v5437_v59 = vld [vmem:[%s22970_s2 + $0xa8] sm:$0xff]  ;;  %v18611_v60 = vsub.f32 %v23393_v5, %v18263_v54  ;;  %v18623_v38 = vld [vmem:[%s22970_s2 + $0x20] sm:$0xff] }
 0x3bd   :  { %13784 = vmatpush3.msra.mxu0 %v5358_v50  ;;  %13657 = vmatprep.subr.mxu1 %v5437_v59  ;;  %v23395_v50 = vld [vmem:[#allocation58_spill] sm:$0xff] }
 0x3be   :  { %v4892_v52 = vadd.f32 %v4891_v37, %v4829_v58  ;;  %23394 = vst [vmem:[#allocation33_spill] sm:$0xff] %v18611_v60  ;;  %13785 = vmatprep.subr.mxu0 %v5357_v26  ;;  %13658 = vmatpush3.msra.mxu1 %v5437_v59  ;;  %v18618_v37 = vld [vmem:[%s22970_s2 + $0xa0] sm:$0xff]  ;;  %v18627_v5 = vsub.f32 %v23395_v50, %v18263_v54  ;;  %v23008_v59 = vmov 0.0  }
 0x3bf   :  { %13786 = vmatpush3.msra.mxu0 %v5357_v26  ;;  %13659 = vmatprep.subr.mxu1 %v18618_v37  ;;  %5138 = vst [vmem:[#allocation2] sm:$0xff] %v23008_v59  ;;  %5139 = vst [vmem:[#allocation2 + $0x8] sm:$0xff] %v23008_v59  ;;  %v5355_v26 = vld [vmem:[%s22970_s2 + $0x18] sm:$0xff] }
 0x3c0   :  { %v4893_v58 = vadd.f32 %v4892_v52, %v4830_v11  ;;  %23396 = vst [vmem:[#allocation63_spill] sm:$0xff] %v18627_v5  ;;  %v18631_v11 = vmul.f32 %v18599_v2, %v18599_v2  ;;  %13787 = vmatprep.subr.mxu0 %v18623_v38  ;;  %5140 = vst [vmem:[#allocation2 + $0x10] sm:$0x3] %v23008_v59  ;;  %13660 = vmatpush3.msra.mxu1 %v18618_v37  ;;  %v5434_v2 = vld [vmem:[%s22970_s2 + $0x90] sm:$0xff] }
 0x3c1   :  { %5141 = vst [vmem:[#allocation2 + $0x1b0] sm:$0xff] %v23008_v59  ;;  %5142 = vst [vmem:[#allocation2 + $0x1b8] sm:$0xff] %v23008_v59  ;;  %13788 = vmatpush3.msra.mxu0 %v18623_v38  ;;  %v4833_v38 = vmul.f32 %v18611_v60, %v18611_v60  ;;  %v4834_v60 = vmul.f32 %v18627_v5, %v18627_v5 }
 0x3c2   :  { %v18633_v52 = vadd.f32 %v4893_v58, %v4831_v61  ;;  %5143 = vst [vmem:[#allocation2 + $0x1c0] sm:$0x3] %v23008_v59  ;;  %5145 = vst [vmem:[#allocation2 + $0x198] sm:$0xff] %v23008_v59  ;;  %v5435_v61 = vld [vmem:[%s22970_s2 + $0x98] sm:$0xff]  ;;  %13789 = vmatprep.subr.mxu0 %v5355_v26 }
 0x3c3   :  { %5146 = vst [vmem:[#allocation2 + $0x1a0] sm:$0xff] %v23008_v59  ;;  %5147 = vst [vmem:[#allocation2 + $0x1a8] sm:$0x3] %v23008_v59  ;;  %v23397_v58 = vld [vmem:[#allocation26_spill] sm:$0xff]  ;;  %13661 = vmatprep.subr.mxu1 %v5435_v61  ;;  %13790 = vmatpush3.msra.mxu0 %v5355_v26  ;;  %v23401_v26 = vld [vmem:[#allocation55_spill] sm:$0xff] }
 0x3c4   :  { %5148 = vst [vmem:[#allocation2 + $0x348] sm:$0xff] %v23008_v59  ;;  %5149 = vst [vmem:[#allocation2 + $0x350] sm:$0xff] %v23008_v59  ;;  %v18731_v37 = vsub.f32 %v23397_v58, %v18263_v54  ;;  %v4895_v50 = vadd.f32 %v18633_v52, %v18631_v11  ;;  %13662 = vmatpush3.msra.mxu1 %v5435_v61  ;;  %v23399_v58 = vld [vmem:[#allocation25_spill] sm:$0xff]  ;;  %v5433_v52 = vld [vmem:[%s22970_s2 + $0x88] sm:$0xff] }
 0x3c5   :  { %5150 = vst [vmem:[#allocation2 + $0x358] sm:$0x3] %v23008_v59  ;;  %5152 = vst [vmem:[#allocation2 + $0x18] sm:$0x1] %v23008_v59  ;;  %v18745_v30 = vsub.f32 %v23399_v58, %v18263_v54  ;;  %13663 = vmatprep.subr.mxu1 %v5434_v2  ;;  %v5353_v61 = vld [vmem:[%s22970_s2 + $0x8] sm:$0xff]  ;;  %v18757_v58 = vsub.f32 %v23401_v26, %v18263_v54 }
 0x3c6   :  { %5153 = vst [vmem:[#allocation2 + $0x30] sm:$0x1] %v23008_v59  ;;  %5154 = vst [vmem:[#allocation2 + $0x48] sm:$0x1] %v23008_v59  ;;  %v4896_v11 = vadd.f32 %v4895_v50, %v4833_v38  ;;  %13664 = vmatpush3.msra.mxu1 %v5434_v2  ;;  %v4835_v5 = vmul.f32 %v18731_v37, %v18731_v37  ;;  %v5432_v2 = vld [vmem:[%s22970_s2 + $0x80] sm:$0xff]  ;;  %v23402_v50 = vld [vmem:[#allocation60_spill] sm:$0xff] }
 0x3c7   :  { %5155 = vst [vmem:[#allocation2 + $0x60] sm:$0x1] %v23008_v59  ;;  %5156 = vst [vmem:[#allocation2 + $0x78] sm:$0x1] %v23008_v59  ;;  %13665 = vmatprep.subr.mxu1 %v5433_v52  ;;  %v18769_v26 = vsub.f32 %v23402_v50, %v18263_v54  ;;  %v5369_v51 = vld [vmem:[#allocation2 + $0x9] sm:$0xff]  ;;  %v4837_v14 = vmul.f32 %v18757_v58, %v18757_v58 }
 0x3c8   :  { %5157 = vst [vmem:[#allocation2 + $0x90] sm:$0x1] %v23008_v59  ;;  %5158 = vst [vmem:[#allocation2 + $0xa8] sm:$0x1] %v23008_v59  ;;  %v4897_v38 = vadd.f32 %v4896_v11, %v4834_v60  ;;  %13666 = vmatpush3.msra.mxu1 %v5433_v52  ;;  %v5368_v11 = vld [vmem:[#allocation2 + $0x1] sm:$0xff] }
 0x3c9   :  { %5159 = vst [vmem:[#allocation2 + $0xc0] sm:$0x1] %v23008_v59  ;;  %5160 = vst [vmem:[#allocation2 + $0xd8] sm:$0x1] %v23008_v59  ;;  %13667 = vmatprep.subr.mxu1 %v5432_v2  ;;  %13669 = vmatprep.mubr.f32.mxu1 %v5368_v11 }
 0x3ca   :  { %5161 = vst [vmem:[#allocation2 + $0xf0] sm:$0x1] %v23008_v59  ;;  %5162 = vst [vmem:[#allocation2 + $0x108] sm:$0x1] %v23008_v59  ;;  %v4898_v60 = vadd.f32 %v4897_v38, %v4835_v5  ;;  %13668 = vmatpush3.msra.mxu1 %v5432_v2  ;;  %v23405_v5 = vld [vmem:[#allocation27_spill] sm:$0xff]  ;;  %v4838_v2 = vmul.f32 %v18769_v26, %v18769_v26 }
 0x3cb   :  { %5163 = vst [vmem:[#allocation2 + $0x120] sm:$0x1] %v23008_v59  ;;  %5164 = vst [vmem:[#allocation2 + $0x138] sm:$0x1] %v23008_v59  ;;  %13670 = vmatmul.mubr.f32.vlgmr.msra.gmra.mxu1 %v5369_v51  ;;  %v18782_v38 = vsub.f32 %v23405_v5, %v18263_v54  ;;  %v6297_v51 = vld [vmem:[%s22970_s2 + $0x178] sm:$0xff] }
 0x3cc   :  { %5165 = vst [vmem:[#allocation2 + $0x150] sm:$0x1] %v23008_v59  ;;  %5166 = vst [vmem:[#allocation2 + $0x168] sm:$0x1] %v23008_v59  ;;  %13893 = vmatprep.subr.mxu1 %v6297_v51 }
 0x3cd   :  { %5167 = vst [vmem:[#allocation2 + $0x180] sm:$0x1] %v23008_v59  ;;  %5170 = vst [vmem:[#allocation2 + $0x1c8] sm:$0x1] %v23008_v59  ;;  %13894 = vmatpush3.msra.mxu1 %v6297_v51  ;;  %v4845_v51 = vmul.f32 %v18279_v41, %v18279_v41 }
 0x3ce   :  { %5171 = vst [vmem:[#allocation2 + $0x1e0] sm:$0x1] %v23008_v59  ;;  %5172 = vst [vmem:[#allocation2 + $0x1f8] sm:$0x1] %v23008_v59 }
 0x3cf   :  { %5173 = vst [vmem:[#allocation2 + $0x210] sm:$0x1] %v23008_v59  ;;  %5174 = vst [vmem:[#allocation2 + $0x228] sm:$0x1] %v23008_v59 }
 0x3d0   :  { %5175 = vst [vmem:[#allocation2 + $0x240] sm:$0x1] %v23008_v59  ;;  %5176 = vst [vmem:[#allocation2 + $0x258] sm:$0x1] %v23008_v59 }
 0x3d1   :  { %5177 = vst [vmem:[#allocation2 + $0x270] sm:$0x1] %v23008_v59  ;;  %5178 = vst [vmem:[#allocation2 + $0x288] sm:$0x1] %v23008_v59 }
 0x3d2   :  { %5179 = vst [vmem:[#allocation2 + $0x2a0] sm:$0x1] %v23008_v59  ;;  %5180 = vst [vmem:[#allocation2 + $0x2b8] sm:$0x1] %v23008_v59 }
 0x3d3   :  { %5181 = vst [vmem:[#allocation2 + $0x2d0] sm:$0x1] %v23008_v59  ;;  %5182 = vst [vmem:[#allocation2 + $0x2e8] sm:$0x1] %v23008_v59 }
 0x3d4   :  { %5183 = vst [vmem:[#allocation2 + $0x300] sm:$0x1] %v23008_v59  ;;  %5184 = vst [vmem:[#allocation2 + $0x318] sm:$0x1] %v23008_v59 }
 0x3d5   :  { %5185 = vst [vmem:[#allocation2 + $0x330] sm:$0x1] %v23008_v59  ;;  %5188 = vst [vmem:[#allocation2 + $0x29] sm:$0x1] %v23008_v59 }
 0x3d6   :  { %5189 = vst [vmem:[#allocation2 + $0x41] sm:$0x1] %v23008_v59  ;;  %5190 = vst [vmem:[#allocation2 + $0x59] sm:$0x1] %v23008_v59 }
 0x3d7   :  { %5191 = vst [vmem:[#allocation2 + $0x71] sm:$0x1] %v23008_v59  ;;  %5192 = vst [vmem:[#allocation2 + $0x89] sm:$0x1] %v23008_v59 }
 0x3d8   :  { %5193 = vst [vmem:[#allocation2 + $0xa1] sm:$0x1] %v23008_v59  ;;  %5194 = vst [vmem:[#allocation2 + $0xb9] sm:$0x1] %v23008_v59 }
 0x3d9   :  { %5195 = vst [vmem:[#allocation2 + $0xd1] sm:$0x1] %v23008_v59  ;;  %5196 = vst [vmem:[#allocation2 + $0xe9] sm:$0x1] %v23008_v59 }
 0x3da   :  { %5197 = vst [vmem:[#allocation2 + $0x101] sm:$0x1] %v23008_v59  ;;  %5198 = vst [vmem:[#allocation2 + $0x119] sm:$0x1] %v23008_v59 }
 0x3db   :  { %5199 = vst [vmem:[#allocation2 + $0x131] sm:$0x1] %v23008_v59  ;;  %5200 = vst [vmem:[#allocation2 + $0x149] sm:$0x1] %v23008_v59 }
 0x3dc   :  { %5201 = vst [vmem:[#allocation2 + $0x161] sm:$0x1] %v23008_v59  ;;  %5202 = vst [vmem:[#allocation2 + $0x179] sm:$0x1] %v23008_v59 }
 0x3dd   :  { %5203 = vst [vmem:[#allocation2 + $0x191] sm:$0x1] %v23008_v59  ;;  %5206 = vst [vmem:[#allocation2 + $0x1d9] sm:$0x1] %v23008_v59 }
 0x3de   :  { %5207 = vst [vmem:[#allocation2 + $0x1f1] sm:$0x1] %v23008_v59  ;;  %5208 = vst [vmem:[#allocation2 + $0x209] sm:$0x1] %v23008_v59 }
 0x3df   :  { %5209 = vst [vmem:[#allocation2 + $0x221] sm:$0x1] %v23008_v59  ;;  %5210 = vst [vmem:[#allocation2 + $0x239] sm:$0x1] %v23008_v59 }
 0x3e0   :  { %5211 = vst [vmem:[#allocation2 + $0x251] sm:$0x1] %v23008_v59  ;;  %5212 = vst [vmem:[#allocation2 + $0x269] sm:$0x1] %v23008_v59 }
 0x3e1   :  { %5213 = vst [vmem:[#allocation2 + $0x281] sm:$0x1] %v23008_v59  ;;  %5214 = vst [vmem:[#allocation2 + $0x299] sm:$0x1] %v23008_v59 }
 0x3e2   :  { %5215 = vst [vmem:[#allocation2 + $0x2b1] sm:$0x1] %v23008_v59  ;;  %5216 = vst [vmem:[#allocation2 + $0x2c9] sm:$0x1] %v23008_v59 }
 0x3e3   :  { %5217 = vst [vmem:[#allocation2 + $0x2e1] sm:$0x1] %v23008_v59  ;;  %5218 = vst [vmem:[#allocation2 + $0x2f9] sm:$0x1] %v23008_v59 }
 0x3e4   :  { %5219 = vst [vmem:[#allocation2 + $0x311] sm:$0x1] %v23008_v59  ;;  %5220 = vst [vmem:[#allocation2 + $0x329] sm:$0x1] %v23008_v59 }
 0x3e5   :  { %5221 = vst [vmem:[#allocation2 + $0x341] sm:$0x1] %v23008_v59  ;;  %5151 = vst [vmem:[#allocation2] sm:$0x1] %v23008_v59 }
 0x3e6   :  { %5168 = vst [vmem:[#allocation2 + $0x198] sm:$0x1] %v23008_v59  ;;  %5169 = vst [vmem:[#allocation2 + $0x1b0] sm:$0x1] %v23008_v59 }
 0x3e7   :  { %5186 = vst [vmem:[#allocation2 + $0x348] sm:$0x1] %v23008_v59  ;;  %5187 = vst [vmem:[#allocation2 + $0x11] sm:$0x1] %v23008_v59 }
 0x3e8   :  { %5204 = vst [vmem:[#allocation2 + $0x1a9] sm:$0x1] %v23008_v59  ;;  %5205 = vst [vmem:[#allocation2 + $0x1c1] sm:$0x1] %v23008_v59 }
 0x3e9   :  { %5222 = vst [vmem:[#allocation2 + $0x359] sm:$0x1] %v23008_v59  ;;  %23398 = vst [vmem:[#allocation94_spill] sm:$0xff] %v18731_v37  ;;  %v5354_v59 = vld [vmem:[%s22970_s2 + $0x10] sm:$0xff]  ;;  %v4836_v37 = vmul.f32 %v18745_v30, %v18745_v30 }
 0x3ea   :  { %23400 = vst [vmem:[#allocation68_spill] sm:$0xff] %v18745_v30  ;;  %13791 = vmatprep.subr.mxu0 %v5354_v59  ;;  %v23404_v30 = vmov 0.0  }
 0x3eb   :  { %13792 = vmatpush3.msra.mxu0 %v5354_v59  ;;  %v5352_v59 = vld [vmem:[%s22970_s2] sm:$0xff]  ;;  %v4899_v50 = vadd.f32 %v4898_v60, %v4836_v37  ;;  %v4840_v60 = vmul.f32 %v18782_v38, %v18782_v38 }
 0x3ec   :  { %13793 = vmatprep.subr.mxu0 %v5353_v61  ;;  %v5288_v52 = vld [vmem:[#allocation2] sm:$0xff] }
 0x3ed   :  { %13794 = vmatpush3.msra.mxu0 %v5353_v61  ;;  %v23403_v61 = vld [vmem:[#allocation28_spill] sm:$0xff]  ;;  %13797 = vmatprep.mubr.f32.mxu0 %v5288_v52  ;;  %v4900_v11 = vadd.f32 %v4899_v50, %v4837_v14  ;;  %v4842_v50 = vmul.f32 %v18267_v4, %v18267_v4 }
 0x3ee   :  { %13795 = vmatprep.subr.mxu0 %v5352_v59  ;;  %v18775_v19 = vsub.f32 %v23403_v61, %v18263_v54  ;;  %v23406_v61 = vld [vmem:[#allocation57_spill] sm:$0xff] }
 0x3ef   :  { %13796 = vmatpush3.msra.mxu0 %v5352_v59  ;;  %v18788_v8 = vsub.f32 %v23406_v61, %v18263_v54  ;;  %v4901_v59 = vadd.f32 %v4900_v11, %v4838_v2  ;;  %v6295_v2 = vld [vmem:[%s22970_s2 + $0x168] sm:$0xff]  ;;  %v4843_v11 = vmul.f32 %v18271_v25, %v18271_v25 }
 0x3f0   :  { %13798 = vmatmul.mubr.f32.vlgmr.msra.gmra.mxu0 %v23404_v30  ;;  %v4839_v37 = vmul.f32 %v18775_v19, %v18775_v19  ;;  %v6296_v30 = vld [vmem:[%s22970_s2 + $0x170] sm:$0xff] }
 0x3f1   :  { %v4841_v54 = vmul.f32 %v18788_v8, %v18788_v8  ;;  %13895 = vmatprep.subr.mxu1 %v6296_v30 }
 0x3f2   :  { %v4902_v14 = vadd.f32 %v4901_v59, %v4839_v37  ;;  %13896 = vmatpush3.msra.mxu1 %v6296_v30  ;;  %v4844_v37 = vmul.f32 %v18275_v40, %v18275_v40 }
 0x3f3   :  { %13897 = vmatprep.subr.mxu1 %v6295_v2 }
 0x3f4   :  { %v4903_v52 = vadd.f32 %v4902_v14, %v4840_v60  ;;  %13898 = vmatpush3.msra.mxu1 %v6295_v2  ;;  %v4846_v60 = vmul.f32 %v18283_v29, %v18283_v29 }
 0x3f6   :  { %v4904_v5 = vadd.f32 %v4903_v52, %v4841_v54  ;;  %v6294_v54 = vld [vmem:[%s22970_s2 + $0x160] sm:$0xff]  ;;  %v4847_v52 = vmul.f32 %v18287_v55, %v18287_v55 }
 0x3f7   :  { %13899 = vmatprep.subr.mxu1 %v6294_v54 }
 0x3f8   :  { %v4905_v61 = vadd.f32 %v4904_v5, %v4842_v50  ;;  %13900 = vmatpush3.msra.mxu1 %v6294_v54  ;;  %v4848_v5 = vmul.f32 %v18291_v46, %v18291_v46 }
 0x3fa   :  { %v4906_v59 = vadd.f32 %v4905_v61, %v4843_v11  ;;  %v4849_v11 = vmul.f32 %v18295_v45, %v18295_v45 }
 0x3fc   :  { %v4907_v30 = vadd.f32 %v4906_v59, %v4844_v37  ;;  %v4850_v37 = vmul.f32 %v18299_v21, %v18299_v21 }
 0x3fe   :  { %v4908_v14 = vadd.f32 %v4907_v30, %v4845_v51  ;;  %v6293_v51 = vld [vmem:[%s22970_s2 + $0x158] sm:$0xff]  ;;  %v4851_v30 = vmul.f32 %v18302_v15, %v18302_v15 }
 0x3ff   :  { %13901 = vmatprep.subr.mxu1 %v6293_v51 }
 0x400   :  { %v4909_v50 = vadd.f32 %v4908_v14, %v4846_v60  ;;  %13902 = vmatpush3.msra.mxu1 %v6293_v51  ;;  %v4852_v14 = vmul.f32 %v18305_v24, %v18305_v24 }
 0x402   :  { %v4910_v2 = vadd.f32 %v4909_v50, %v4847_v52  ;;  %v4853_v52 = vmul.f32 %v18308_v36, %v18308_v36 }
 0x404   :  { %v4911_v61 = vadd.f32 %v4910_v2, %v4848_v5  ;;  %v4854_v5 = vmul.f32 %v18311_v57, %v18311_v57 }
 0x406   :  { %v4912_v59 = vadd.f32 %v4911_v61, %v4849_v11  ;;  %v6292_v11 = vld [vmem:[%s22970_s2 + $0x150] sm:$0xff]  ;;  %v4855_v61 = vmul.f32 %v18314_v48, %v18314_v48 }
 0x407   :  { %13903 = vmatprep.subr.mxu1 %v6292_v11 }
 0x408   :  { %v4913_v60 = vadd.f32 %v4912_v59, %v4850_v37  ;;  %13904 = vmatpush3.msra.mxu1 %v6292_v11  ;;  %v4856_v59 = vmul.f32 %v18317_v6, %v18317_v6 }
 0x40a   :  { %v4914_v54 = vadd.f32 %v4913_v60, %v4851_v30  ;;  %v4857_v30 = vmul.f32 %v18320_v12, %v18320_v12 }
 0x40c   :  { %v4915_v50 = vadd.f32 %v4914_v54, %v4852_v14  ;;  %v4858_v14 = vmul.f32 %v18323_v7, %v18323_v7 }
 0x40e   :  { %v4916_v2 = vadd.f32 %v4915_v50, %v4853_v52  ;;  %v6291_v52 = vld [vmem:[%s22970_s2 + $0x148] sm:$0xff]  ;;  %v4859_v50 = vmul.f32 %v18326_v10, %v18326_v10 }
 0x40f   :  { %13905 = vmatprep.subr.mxu1 %v6291_v52 }
 0x410   :  { %v4917_v37 = vadd.f32 %v4916_v2, %v4854_v5  ;;  %13906 = vmatpush3.msra.mxu1 %v6291_v52  ;;  %v4860_v2 = vmul.f32 %v18329_v39, %v18329_v39 }
 0x412   :  { %v4918_v51 = vadd.f32 %v4917_v37, %v4855_v61 }
 0x414   :  { %v4919_v60 = vadd.f32 %v4918_v51, %v4856_v59  ;;  %v6290_v59 = vld [vmem:[%s22970_s2 + $0x140] sm:$0xff] }
 0x415   :  { %13907 = vmatprep.subr.mxu1 %v6290_v59 }
 0x416   :  { %v4920_v54 = vadd.f32 %v4919_v60, %v4857_v30  ;;  %13908 = vmatpush3.msra.mxu1 %v6290_v59 }
 0x418   :  { %v4921_v5 = vadd.f32 %v4920_v54, %v4858_v14  ;;  %v6289_v14 = vld [vmem:[%s22970_s2 + $0x138] sm:$0xff] }
 0x419   :  { %13909 = vmatprep.subr.mxu1 %v6289_v14 }
 0x41a   :  { %v4922_v11 = vadd.f32 %v4921_v5, %v4859_v50  ;;  %13910 = vmatpush3.msra.mxu1 %v6289_v14  ;;  %v6288_v5 = vld [vmem:[%s22970_s2 + $0x130] sm:$0xff]  ;;  %v6286_v14 = vld [vmem:[%s22970_s2 + $0x120] sm:$0xff] }
 0x41b   :  { %13911 = vmatprep.subr.mxu1 %v6288_v5 }
 0x41c   :  { %v4923_v61 = vadd.f32 %v4922_v11, %v4860_v2  ;;  %13912 = vmatpush3.msra.mxu1 %v6288_v5  ;;  %v4935_v2 = vlaneseq }
 0x41e   :  { %v4924_v37 = vrot.slane %v4923_v61, 4  ;;  %v18864_v11 = vshrl.u32 %v4935_v2, 7 }
 0x420   :  { %v4925_v51 = vadd.f32 %v4924_v37, %v4923_v61  ;;  %23407 = vst [vmem:[#allocation36_spill] sm:$0xff] %v18864_v11  ;;  %v6287_v61 = vld [vmem:[%s22970_s2 + $0x128] sm:$0xff]  ;;  %v23019_v37 = vsub.s32 0, %v18864_v11  ;;  %v23419_v11 = vld [vmem:[#allocation61_spill] sm:$0xff] }
 0x421   :  { %13913 = vmatprep.subr.mxu1 %v6287_v61 }
 0x422   :  { %v4926_v30 = vrot.slane %v4925_v51, 2  ;;  %13914 = vmatpush3.msra.mxu1 %v6287_v61 }
 0x423   :  { %13915 = vmatprep.subr.mxu1 %v6286_v14 }
 0x424   :  { %v4927_v60 = vadd.f32 %v4926_v30, %v4925_v51  ;;  %13916 = vmatpush3.msra.mxu1 %v6286_v14  ;;  %v23412_v14 = vld [vmem:[#allocation59_spill] sm:$0xff] }
 0x426   :  { %v4928_v7 = vrot.slane %v4927_v60, 1 }
 0x428   :  { %v4929_v54 = vadd.f32 %v4928_v7, %v4927_v60  ;;  %v4661_v7 = vld [vmem:[%s22971_s3] sm:$0x1] }
 0x429   :  { %v18880_v60 = vld [vmem:[%s22972_s4] ss:$0 sm:$0xff] }
 0x42a   :  { %v4930_v52 = vmul.f32 0.001953125, %v4929_v54 }
 0x42c   :  { %v4931_v50 = vadd.f32 1e-05, %v4930_v52 }
 0x42e   :  { %14790 = vrsqrt.f32 %v4931_v50 }
 0x43b   :  { %v14791_v59 = vpop.eup %14790 }
 0x43c   :  { %v4933_v51 = vmul.f32 %v14791_v59, %v4661_v7  ;;  %v23408_v59 = vld [vmem:[#allocation30_spill] sm:$0xff] }
 0x43e   :  { %v18875_v30 = vrot.slane %v4933_v51, %v23019_v37  ;;  %v23410_v51 = vld [vmem:[#allocation29_spill] sm:$0xff] }
 0x440   :  { %v5002_v54 = vmul.f32 %v18875_v30, %v18326_v10  ;;  %v18889_v52 = vmul.f32 %v18875_v30, %v18333_v34  ;;  %v18893_v50 = vmul.f32 %v18875_v30, %v18337_v3  ;;  %v18897_v5 = vmul.f32 %v18875_v30, %v18341_v13 }
 0x441   :  { %v18901_v2 = vmul.f32 %v18875_v30, %v18349_v63  ;;  %v18905_v10 = vmul.f32 %v18875_v30, %v18353_v44  ;;  %v18909_v34 = vmul.f32 %v18875_v30, %v18359_v22  ;;  %v18913_v3 = vmul.f32 %v18875_v30, %v18365_v28 }
 0x442   :  { %v5072_v13 = vadd.f32 %v18880_v60, %v5002_v54  ;;  %v18918_v61 = vmul.f32 %v18875_v30, %v18371_v53  ;;  %v18922_v63 = vmul.f32 %v18875_v30, %v18377_v20  ;;  %v18926_v44 = vmul.f32 %v18875_v30, %v18383_v62  ;;  %v23414_v54 = vld [vmem:[#allocation64_spill] sm:$0xff] }
 0x443   :  { %v18930_v22 = vmul.f32 %v18875_v30, %v18389_v42  ;;  %v18934_v28 = vmul.f32 %v18875_v30, %v18395_v35  ;;  %v18938_v53 = vmul.f32 %v18875_v30, %v18401_v1  ;;  %v18942_v20 = vmul.f32 %v18875_v30, %v18407_v27 }
 0x444   :  { %v5136_v7 = vmax.f32 %v5072_v13, 0.0  ;;  %v18946_v62 = vmul.f32 %v18875_v30, %v18413_v23  ;;  %v18950_v42 = vmul.f32 %v18875_v30, %v18419_v49  ;;  %v18954_v35 = vmul.f32 %v18875_v30, %v18425_v0 }
 0x445   :  { %v18958_v1 = vmul.f32 %v18875_v30, %v18431_v43  ;;  %v18962_v27 = vmul.f32 %v18875_v30, %v18437_v9  ;;  %v18966_v23 = vmul.f32 %v18875_v30, %v18443_v16  ;;  %v18970_v49 = vmul.f32 %v18875_v30, %v18449_v32 }
 0x446   :  { %5286 = vst [vmem:[#allocation2 + $0x331] sm:$0xff] %v5136_v7  ;;  %v18974_v0 = vmul.f32 %v18875_v30, %v18455_v17  ;;  %v18978_v43 = vmul.f32 %v18875_v30, %v18461_v18  ;;  %v18982_v9 = vmul.f32 %v18875_v30, %v18467_v47  ;;  %v18986_v16 = vmul.f32 %v18875_v30, %v18473_v31  ;;  %v6285_v31 = vld [vmem:[%s22970_s2 + $0x118] sm:$0xff]  ;;  %v23416_v7 = vld [vmem:[#allocation32_spill] sm:$0xff] }
 0x447   :  { %v18990_v32 = vmul.f32 %v18875_v30, %v18479_v56  ;;  %v18994_v17 = vmul.f32 %v18875_v30, %v18491_v33  ;;  %v18998_v18 = vmul.f32 %v18875_v30, %v23408_v59  ;;  %v19002_v47 = vmul.f32 %v18875_v30, %v23410_v51  ;;  %v6826_v56 = vld [vmem:[%s22970_s2 + $0x1f8] sm:$0xff]  ;;  %v23417_v51 = vld [vmem:[#allocation31_spill] sm:$0xff]  ;;  %13917 = vmatprep.subr.mxu1 %v6285_v31 }
 0x448   :  { %v19012_v33 = vmul.f32 %v18875_v30, %v23412_v14  ;;  %v19016_v13 = vmul.f32 %v18875_v30, %v23414_v54  ;;  %v19020_v59 = vmul.f32 %v18875_v30, %v23416_v7  ;;  %v19024_v37 = vmul.f32 %v18875_v30, %v23417_v51  ;;  %14021 = vmatprep.subr.mxu0 %v6826_v56  ;;  %v6825_v51 = vld [vmem:[%s22970_s2 + $0x1f0] sm:$0xff] }
 0x449   :  { %23409 = vst [vmem:[#allocation35_spill] sm:$0xff] %v18998_v18  ;;  %23411 = vst [vmem:[#allocation65_spill] sm:$0xff] %v19002_v47  ;;  %v19028_v47 = vmul.f32 %v18875_v30, %v23419_v11  ;;  %v23421_v18 = vld [vmem:[#allocation66_spill] sm:$0xff]  ;;  %13918 = vmatpush3.msra.mxu1 %v6285_v31  ;;  %14022 = vmatpush3.msra.mxu0 %v6826_v56  ;;  %v19098_v31 = vmul.f32 %v18875_v30, %v18283_v29 }
 0x44a   :  { %23413 = vst [vmem:[#allocation70_spill] sm:$0xff] %v19012_v33  ;;  %23415 = vst [vmem:[#allocation38_spill] sm:$0xff] %v19016_v13  ;;  %v19032_v14 = vmul.f32 %v18875_v30, %v23421_v18  ;;  %v23423_v33 = vld [vmem:[#allocation34_spill] sm:$0xff]  ;;  %v23424_v13 = vld [vmem:[#allocation33_spill] sm:$0xff]  ;;  %14023 = vmatprep.subr.mxu0 %v6825_v51  ;;  %v19117_v29 = vmul.f32 %v18875_v30, %v18299_v21  ;;  %v19133_v56 = vmul.f32 %v18875_v30, %v18311_v57 }
 0x44b   :  { %23418 = vst [vmem:[#allocation37_spill] sm:$0xff] %v19024_v37  ;;  %23420 = vst [vmem:[#allocation67_spill] sm:$0xff] %v19028_v47  ;;  %v19036_v54 = vmul.f32 %v18875_v30, %v23423_v33  ;;  %v19040_v7 = vmul.f32 %v18875_v30, %v23424_v13  ;;  %v23426_v37 = vld [vmem:[#allocation63_spill] sm:$0xff]  ;;  %v23427_v47 = vld [vmem:[#allocation94_spill] sm:$0xff]  ;;  %v19059_v13 = vmul.f32 %v18875_v30, %v18757_v58  ;;  %14024 = vmatpush3.msra.mxu0 %v6825_v51 }
 0x44c   :  { %23422 = vst [vmem:[#allocation72_spill] sm:$0xff] %v19032_v14  ;;  %v19047_v11 = vmul.f32 %v18875_v30, %v23426_v37  ;;  %v19051_v18 = vmul.f32 %v18875_v30, %v23427_v47  ;;  %v23428_v14 = vld [vmem:[#allocation68_spill] sm:$0xff]  ;;  %v19067_v37 = vmul.f32 %v18875_v30, %v18775_v19  ;;  %v19071_v47 = vmul.f32 %v18875_v30, %v18782_v38  ;;  %v23429_v51 = vld [vmem:[#allocation62_spill] sm:$0xff] }
 0x44d   :  { %23425 = vst [vmem:[#allocation40_spill] sm:$0xff] %v19040_v7  ;;  %v19055_v33 = vmul.f32 %v18875_v30, %v23428_v14  ;;  %v19063_v7 = vmul.f32 %v18875_v30, %v18769_v26  ;;  %v19075_v14 = vmul.f32 %v18875_v30, %v18788_v8  ;;  %v6824_v58 = vld [vmem:[%s22970_s2 + $0x1e8] sm:$0xff]  ;;  %v19082_v26 = vmul.f32 %v18875_v30, %v18267_v4 }
 0x44e   :  { %v19086_v19 = vmul.f32 %v18875_v30, %v18271_v25  ;;  %v19090_v38 = vmul.f32 %v18875_v30, %v18275_v40  ;;  %v19094_v8 = vmul.f32 %v18875_v30, %v18279_v41  ;;  %v19102_v4 = vmul.f32 %v18875_v30, %v18287_v55  ;;  %v6823_v41 = vld [vmem:[%s22970_s2 + $0x1e0] sm:$0xff]  ;;  %14025 = vmatprep.subr.mxu0 %v6824_v58 }
 0x44f   :  { %v19106_v25 = vmul.f32 %v18875_v30, %v18291_v46  ;;  %v19110_v40 = vmul.f32 %v18875_v30, %v18295_v45  ;;  %v19121_v55 = vmul.f32 %v18875_v30, %v18302_v15  ;;  %v19125_v46 = vmul.f32 %v18875_v30, %v18305_v24  ;;  %14026 = vmatpush3.msra.mxu0 %v6824_v58  ;;  %v6822_v58 = vld [vmem:[%s22970_s2 + $0x1d8] sm:$0xff] }
 0x450   :  { %v19129_v45 = vmul.f32 %v18875_v30, %v18308_v36  ;;  %v19137_v21 = vmul.f32 %v18875_v30, %v18314_v48  ;;  %v19141_v15 = vmul.f32 %v18875_v30, %v18317_v6  ;;  %v19145_v24 = vmul.f32 %v18875_v30, %v18320_v12  ;;  %v6284_v36 = vld [vmem:[%s22970_s2 + $0x110] sm:$0xff]  ;;  %14027 = vmatprep.subr.mxu0 %v6823_v41 }
 0x451   :  { %v19152_v57 = vmul.f32 %v18875_v30, %v23429_v51  ;;  %v19156_v48 = vmul.f32 %v18875_v30, %v18329_v39  ;;  %v19160_v6 = vadd.f32 %v18880_v60, %v18889_v52  ;;  %v19164_v12 = vadd.f32 %v18880_v60, %v18893_v50  ;;  %14028 = vmatpush3.msra.mxu0 %v6823_v41 }
 0x452   :  { %v19171_v51 = vadd.f32 %v18880_v60, %v18897_v5  ;;  %v19175_v39 = vadd.f32 %v18880_v60, %v18901_v2  ;;  %v19179_v30 = vadd.f32 %v18880_v60, %v18905_v10  ;;  %v19183_v52 = vadd.f32 %v18880_v60, %v18909_v34  ;;  %13919 = vmatprep.subr.mxu1 %v6284_v36 }
 0x453   :  { %v19187_v50 = vadd.f32 %v18880_v60, %v18913_v3  ;;  %v19191_v5 = vadd.f32 %v18880_v60, %v18918_v61  ;;  %v19195_v2 = vadd.f32 %v18880_v60, %v18922_v63  ;;  %v19199_v10 = vadd.f32 %v18880_v60, %v18926_v44  ;;  %14029 = vmatprep.subr.mxu0 %v6822_v58  ;;  %v6821_v44 = vld [vmem:[%s22970_s2 + $0x1d0] sm:$0xff] }
 0x454   :  { %v19203_v34 = vadd.f32 %v18880_v60, %v18930_v22  ;;  %v19207_v3 = vadd.f32 %v18880_v60, %v18934_v28  ;;  %v19211_v61 = vadd.f32 %v18880_v60, %v18938_v53  ;;  %v19215_v63 = vadd.f32 %v18880_v60, %v18942_v20  ;;  %13920 = vmatpush3.msra.mxu1 %v6284_v36 }
 0x455   :  { %v19222_v22 = vadd.f32 %v18880_v60, %v18946_v62  ;;  %v19226_v28 = vadd.f32 %v18880_v60, %v18950_v42  ;;  %v19230_v53 = vadd.f32 %v18880_v60, %v18954_v35  ;;  %v19234_v20 = vadd.f32 %v18880_v60, %v18958_v1  ;;  %14030 = vmatpush3.msra.mxu0 %v6822_v58  ;;  %v6820_v1 = vld [vmem:[%s22970_s2 + $0x1c8] sm:$0xff]  ;;  %v23435_v58 = vld [vmem:[#allocation35_spill] sm:$0xff] }
 0x456   :  { %23430 = vst [vmem:[#allocation39_spill] sm:$0xff] %v19215_v63  ;;  %v19238_v41 = vadd.f32 %v18880_v60, %v18962_v27  ;;  %v19242_v62 = vadd.f32 %v18880_v60, %v18966_v23  ;;  %v19246_v42 = vadd.f32 %v18880_v60, %v18970_v49  ;;  %v19250_v35 = vadd.f32 %v18880_v60, %v18974_v0 }
 0x457   :  { %23431 = vst [vmem:[#allocation69_spill] sm:$0xff] %v19222_v22  ;;  %v19257_v27 = vadd.f32 %v18880_v60, %v18978_v43  ;;  %v19261_v23 = vadd.f32 %v18880_v60, %v18982_v9  ;;  %v19265_v49 = vadd.f32 %v18880_v60, %v18986_v16  ;;  %v19269_v0 = vadd.f32 %v18880_v60, %v18990_v32  ;;  %v6819_v32 = vld [vmem:[%s22970_s2 + $0x1c0] sm:$0xff] }
 0x458   :  { %14031 = vmatprep.subr.mxu0 %v6821_v44  ;;  %v19273_v36 = vadd.f32 %v18880_v60, %v18994_v17  ;;  %v19277_v43 = vadd.f32 %v18880_v60, %v23435_v58  ;;  %v19296_v58 = vadd.f32 %v18880_v60, %v19020_v59 }
 0x459   :  { %23432 = vst [vmem:[#allocation74_spill] sm:$0xff] %v19257_v27  ;;  %23433 = vst [vmem:[#allocation42_spill] sm:$0xff] %v19261_v23  ;;  %v23437_v27 = vld [vmem:[#allocation65_spill] sm:$0xff]  ;;  %v23439_v23 = vld [vmem:[#allocation70_spill] sm:$0xff]  ;;  %14032 = vmatpush3.msra.mxu0 %v6821_v44 }
 0x45a   :  { %23434 = vst [vmem:[#allocation41_spill] sm:$0xff] %v19269_v0  ;;  %23436 = vst [vmem:[#allocation71_spill] sm:$0xff] %v19277_v43  ;;  %v19281_v9 = vadd.f32 %v18880_v60, %v23437_v27  ;;  %v19285_v16 = vadd.f32 %v18880_v60, %v23439_v23  ;;  %v23441_v0 = vld [vmem:[#allocation38_spill] sm:$0xff]  ;;  %v23443_v43 = vld [vmem:[#allocation37_spill] sm:$0xff]  ;;  %14033 = vmatprep.subr.mxu0 %v6820_v1 }
 0x45b   :  { %v19292_v17 = vadd.f32 %v18880_v60, %v23441_v0  ;;  %v19300_v27 = vadd.f32 %v18880_v60, %v23443_v43  ;;  %v23445_v44 = vld [vmem:[#allocation72_spill] sm:$0xff]  ;;  %v19312_v0 = vadd.f32 %v18880_v60, %v19036_v54  ;;  %v19320_v43 = vadd.f32 %v18880_v60, %v19047_v11  ;;  %14034 = vmatpush3.msra.mxu0 %v6820_v1  ;;  %v6818_v1 = vld [vmem:[%s22970_s2 + $0x1b8] sm:$0xff] }
 0x45c   :  { %23438 = vst [vmem:[#allocation76_spill] sm:$0xff] %v19281_v9  ;;  %23440 = vst [vmem:[#allocation3_spill] sm:$0xff] %v19285_v16  ;;  %v23444_v9 = vld [vmem:[#allocation67_spill] sm:$0xff]  ;;  %v19308_v16 = vadd.f32 %v18880_v60, %v23445_v44  ;;  %v19327_v44 = vadd.f32 %v18880_v60, %v19051_v18  ;;  %v19331_v54 = vadd.f32 %v18880_v60, %v19055_v33  ;;  %14035 = vmatprep.subr.mxu0 %v6819_v32 }
 0x45d   :  { %23442 = vst [vmem:[#allocation43_spill] sm:$0xff] %v19292_v17  ;;  %v19304_v23 = vadd.f32 %v18880_v60, %v23444_v9  ;;  %v23446_v17 = vld [vmem:[#allocation40_spill] sm:$0xff]  ;;  %v19339_v11 = vadd.f32 %v18880_v60, %v19063_v7  ;;  %v19346_v18 = vadd.f32 %v18880_v60, %v19067_v37  ;;  %v19350_v33 = vadd.f32 %v18880_v60, %v19071_v47 }
 0x45e   :  { %v19316_v59 = vadd.f32 %v18880_v60, %v23446_v17  ;;  %v6283_v9 = vld [vmem:[%s22970_s2 + $0x108] sm:$0xff]  ;;  %v19335_v17 = vadd.f32 %v18880_v60, %v19059_v13  ;;  %v19354_v13 = vadd.f32 %v18880_v60, %v19075_v14  ;;  %v19358_v7 = vadd.f32 %v18880_v60, %v19082_v26  ;;  %14036 = vmatpush3.msra.mxu0 %v6819_v32 }
 0x45f   :  { %23447 = vst [vmem:[#allocation73_spill] sm:$0xff] %v19339_v11  ;;  %v19362_v11 = vadd.f32 %v18880_v60, %v19086_v19  ;;  %v19366_v37 = vadd.f32 %v18880_v60, %v19090_v38  ;;  %v19370_v47 = vadd.f32 %v18880_v60, %v19094_v8  ;;  %v19374_v14 = vadd.f32 %v18880_v60, %v19098_v31  ;;  %v6817_v31 = vld [vmem:[%s22970_s2 + $0x1b0] sm:$0xff] }
 0x460   :  { %13921 = vmatprep.subr.mxu1 %v6283_v9  ;;  %v19378_v26 = vadd.f32 %v18880_v60, %v19102_v4  ;;  %v19382_v19 = vadd.f32 %v18880_v60, %v19106_v25  ;;  %v19386_v38 = vadd.f32 %v18880_v60, %v19110_v40  ;;  %v19390_v8 = vadd.f32 %v18880_v60, %v19117_v29 }
 0x461   :  { %14037 = vmatprep.subr.mxu0 %v6818_v1  ;;  %v19397_v4 = vadd.f32 %v18880_v60, %v19121_v55  ;;  %v19401_v25 = vadd.f32 %v18880_v60, %v19125_v46  ;;  %v19405_v40 = vadd.f32 %v18880_v60, %v19129_v45  ;;  %v19409_v29 = vadd.f32 %v18880_v60, %v19133_v56  ;;  %v6816_v56 = vld [vmem:[%s22970_s2 + $0x1a8] sm:$0xff] }
 0x462   :  { %13922 = vmatpush3.msra.mxu1 %v6283_v9  ;;  %v19413_v32 = vadd.f32 %v18880_v60, %v19137_v21  ;;  %v19417_v55 = vadd.f32 %v18880_v60, %v19141_v15  ;;  %v19421_v46 = vadd.f32 %v18880_v60, %v19145_v24  ;;  %v19425_v45 = vadd.f32 %v18880_v60, %v19152_v57  ;;  %v6282_v21 = vld [vmem:[%s22970_s2 + $0x100] sm:$0xff] }
 0x463   :  { %14038 = vmatpush3.msra.mxu0 %v6818_v1  ;;  %v19435_v15 = vadd.f32 %v18880_v60, %v19156_v48  ;;  %v5074_v24 = vmax.f32 %v19160_v6, 0.0  ;;  %v5075_v9 = vmax.f32 %v19164_v12, 0.0  ;;  %v5076_v57 = vmax.f32 %v19171_v51, 0.0  ;;  %13923 = vmatprep.subr.mxu1 %v6282_v21  ;;  %v6815_v60 = vld [vmem:[%s22970_s2 + $0x1a0] sm:$0xff] }
 0x464   :  { %23448 = vst [vmem:[#allocation78_spill] sm:$0xff] %v19417_v55  ;;  %23449 = vst [vmem:[#allocation4_spill] sm:$0xff] %v19421_v46  ;;  %14039 = vmatprep.subr.mxu0 %v6817_v31  ;;  %v23029_v1 = vmax.f32 %v19175_v39, 0.0  ;;  %13924 = vmatpush3.msra.mxu1 %v6282_v21  ;;  %v23033_v48 = vmax.f32 %v19191_v5, 0.0  ;;  %v23031_v6 = vmax.f32 %v19195_v2, 0.0  ;;  %v23032_v12 = vmax.f32 %v19199_v10, 0.0 }
 0x465   :  { %23450 = vst [vmem:[#allocation19_spill] sm:$0xff] %v19425_v45  ;;  %v23030_v45 = vmax.f32 %v19179_v30, 0.0  ;;  %14040 = vmatpush3.msra.mxu0 %v6817_v31  ;;  %5224 = vst [vmem:[#allocation2 + $0x19] sm:$0xff] %v5074_v24  ;;  %13672 = vmatprep.mubr.f32.mxu1 %v5074_v24  ;;  %v23034_v31 = vmax.f32 %v19207_v3, 0.0  ;;  %v23451_v51 = vmax.f32 %v19183_v52, 0.0  ;;  %v23452_v24 = vmax.f32 %v19187_v50, 0.0 }
 0x466   :  { %5225 = vst [vmem:[#allocation2 + $0x21] sm:$0xff] %v5075_v9  ;;  %5226 = vst [vmem:[#allocation2 + $0x31] sm:$0xff] %v5076_v57  ;;  %14041 = vmatprep.subr.mxu0 %v6816_v56  ;;  %13673 = vmatmul.mubr.f32.gmra.mxu1 %v5075_v9  ;;  %v6814_v46 = vld [vmem:[%s22970_s2 + $0x198] sm:$0xff]  ;;  %v23037_v21 = vmax.f32 %v19226_v28, 0.0  ;;  %v23038_v55 = vmax.f32 %v19230_v53, 0.0  ;;  %v23465_v9 = vld [vmem:[#allocation43_spill] sm:$0xff] }
 0x467   :  { %5227 = vst [vmem:[#allocation2 + $0x39] sm:$0xff] %v23029_v1  ;;  %5228 = vst [vmem:[#allocation2 + $0x49] sm:$0xff] %v23030_v45  ;;  %14042 = vmatpush3.msra.mxu0 %v6816_v56  ;;  %v23453_v56 = vmax.f32 %v19203_v34, 0.0  ;;  %13675 = vmatprep.mubr.f32.mxu1 %v5076_v57  ;;  %v23454_v45 = vld [vmem:[#allocation74_spill] sm:$0xff]  ;;  %v23457_v57 = vmax.f32 %v19222_v22, 0.0  ;;  %v23463_v1 = vld [vmem:[#allocation76_spill] sm:$0xff] }
 0x468   :  { %5229 = vst [vmem:[#allocation2 + $0x51] sm:$0xff] %v23451_v51  ;;  %5230 = vst [vmem:[#allocation2 + $0x61] sm:$0xff] %v23452_v24  ;;  %14043 = vmatprep.subr.mxu0 %v6815_v60  ;;  %v23459_v51 = vld [vmem:[#allocation41_spill] sm:$0xff]  ;;  %v23474_v24 = vmax.f32 %v19273_v36, 0.0 }
 0x469   :  { %5231 = vst [vmem:[#allocation2 + $0x69] sm:$0xff] %v23033_v48  ;;  %5232 = vst [vmem:[#allocation2 + $0x79] sm:$0xff] %v23031_v6  ;;  %v23455_v6 = vmax.f32 %v19211_v61, 0.0  ;;  %14044 = vmatpush3.msra.mxu0 %v6815_v60  ;;  %v23458_v48 = vld [vmem:[#allocation42_spill] sm:$0xff]  ;;  %v23460_v60 = vmax.f32 %v19234_v20, 0.0  ;;  %v23473_v22 = vmax.f32 %v23459_v51, 0.0 }
 0x46a   :  { %5233 = vst [vmem:[#allocation2 + $0x81] sm:$0xff] %v23032_v12  ;;  %5234 = vst [vmem:[#allocation2 + $0x91] sm:$0xff] %v23453_v56  ;;  %v23456_v12 = vmax.f32 %v19215_v63, 0.0  ;;  %v6813_v56 = vld [vmem:[%s22970_s2 + $0x190] sm:$0xff]  ;;  %14045 = vmatprep.subr.mxu0 %v6814_v46  ;;  %v5104_v63 = vmax.f32 %v23465_v9, 0.0  ;;  %v19522_v9 = vld [vmem:[%s22970_s2 + $0x188] sm:$0xff] }
 0x46b   :  { %5235 = vst [vmem:[#allocation2 + $0x99] sm:$0xff] %v23034_v31  ;;  %5236 = vst [vmem:[#allocation2 + $0xa9] sm:$0xff] %v23455_v6  ;;  %v23461_v6 = vmax.f32 %v19238_v41, 0.0  ;;  %v23464_v31 = vld [vmem:[#allocation3_spill] sm:$0xff]  ;;  %14046 = vmatpush3.msra.mxu0 %v6814_v46  ;;  %v23471_v46 = vmax.f32 %v23458_v48, 0.0 }
 0x46c   :  { %5237 = vst [vmem:[#allocation2 + $0xb1] sm:$0xff] %v23456_v12  ;;  %5238 = vst [vmem:[#allocation2 + $0xc1] sm:$0xff] %v23457_v57  ;;  %v23462_v12 = vld [vmem:[#allocation71_spill] sm:$0xff]  ;;  %v23470_v57 = vmax.f32 %v19175_v39, 0.0  ;;  %14047 = vmatprep.subr.mxu0 %v6813_v56  ;;  %v23480_v39 = vld [vmem:[#allocation73_spill] sm:$0xff] }
 0x46d   :  { %5239 = vst [vmem:[#allocation2 + $0xc9] sm:$0xff] %v23037_v21  ;;  %5240 = vst [vmem:[#allocation2 + $0xd9] sm:$0xff] %v23038_v55  ;;  %v23466_v21 = vmax.f32 %v19242_v62, 0.0  ;;  %v23467_v55 = vmax.f32 %v19246_v42, 0.0  ;;  %14048 = vmatpush3.msra.mxu0 %v6813_v56  ;;  %v19583_v56 = vld [vmem:[#allocation2 + $0x30] sm:$0xff] }
 0x46e   :  { %5241 = vst [vmem:[#allocation2 + $0xe1] sm:$0xff] %v23460_v60  ;;  %5242 = vst [vmem:[#allocation2 + $0xf1] sm:$0xff] %v23461_v6  ;;  %v23468_v60 = vmax.f32 %v19250_v35, 0.0  ;;  %v23469_v6 = vmax.f32 %v23454_v45, 0.0  ;;  %13676 = vmatmul.mubr.f32.gmra.mxu1 %v23470_v57  ;;  %v23472_v57 = vmax.f32 %v19265_v49, 0.0  ;;  %14049 = vmatprep.subr.mxu0 %v19522_v9 }
 0x46f   :  { %5243 = vst [vmem:[#allocation2 + $0xf9] sm:$0xff] %v23466_v21  ;;  %5244 = vst [vmem:[#allocation2 + $0x109] sm:$0xff] %v23467_v55  ;;  %v19527_v21 = vld [vmem:[%s22970_s2 + $0x278] sm:$0xff]  ;;  %v5105_v55 = vmax.f32 %v19296_v58, 0.0  ;;  %v23475_v58 = vmax.f32 %v19179_v30, 0.0  ;;  %14050 = vmatpush3.msra.mxu0 %v19522_v9 }
 0x470   :  { %5245 = vst [vmem:[#allocation2 + $0x111] sm:$0xff] %v23468_v60  ;;  %5246 = vst [vmem:[#allocation2 + $0x121] sm:$0xff] %v23469_v6  ;;  %v19553_v30 = vld [vmem:[#allocation2 + $0x18] sm:$0xff]  ;;  %14149 = vmatprep.subr.mxu1 %v19527_v21  ;;  %v23039_v60 = vmax.f32 %v19331_v54, 0.0  ;;  %v23489_v6 = vmax.f32 %v19183_v52, 0.0  ;;  %v23491_v52 = vmax.f32 %v23480_v39, 0.0 }
 0x471   :  { %5247 = vst [vmem:[#allocation2 + $0x129] sm:$0xff] %v23471_v46  ;;  %5248 = vst [vmem:[#allocation2 + $0x139] sm:$0xff] %v23472_v57  ;;  %13678 = vmatprep.mubr.f32.mxu1 %v23475_v58  ;;  %v23476_v57 = vmax.f32 %v23462_v12, 0.0  ;;  %v19555_v58 = vld [vmem:[#allocation2 + $0x20] sm:$0xff]  ;;  %13800 = vmatprep.mubr.f32.mxu0 %v19553_v30  ;;  %v23487_v46 = vmax.f32 %v19327_v44, 0.0  ;;  %v19630_v9 = vld [vmem:[#allocation2 + $0x38] sm:$0xff] }
 0x472   :  { %5249 = vst [vmem:[#allocation2 + $0x141] sm:$0xff] %v23473_v22  ;;  %5250 = vst [vmem:[#allocation2 + $0x151] sm:$0xff] %v23474_v24  ;;  %v23477_v22 = vmax.f32 %v23463_v1, 0.0  ;;  %v23478_v24 = vmax.f32 %v23464_v31, 0.0  ;;  %13801 = vmatmul.mubr.f32.gmra.mxu0 %v19555_v58  ;;  %13679 = vmatmul.mubr.f32.gmra.mxu1 %v23489_v6  ;;  %v23492_v6 = vmax.f32 %v19346_v18, 0.0 }
 0x473   :  { %5251 = vst [vmem:[#allocation2 + $0x159] sm:$0xff] %v23476_v57  ;;  %5254 = vst [vmem:[#allocation2 + $0x181] sm:$0xff] %v5104_v63  ;;  %v23482_v63 = vmax.f32 %v19304_v23, 0.0  ;;  %13803 = vmatprep.mubr.f32.mxu0 %v19583_v56  ;;  %v23504_v57 = vld [vmem:[#allocation19_spill] sm:$0xff] }
 0x474   :  { %5252 = vst [vmem:[#allocation2 + $0x169] sm:$0xff] %v23477_v22  ;;  %5253 = vst [vmem:[#allocation2 + $0x171] sm:$0xff] %v23478_v24  ;;  %v23481_v22 = vmax.f32 %v19300_v27, 0.0  ;;  %v23483_v24 = vmax.f32 %v19308_v16, 0.0 }
 0x475   :  { %23479 = vst [vmem:[#allocation75_spill] sm:$0xff] %v19555_v58  ;;  %5255 = vst [vmem:[#allocation2 + $0x189] sm:$0xff] %v5105_v55  ;;  %v23503_v55 = vld [vmem:[#allocation4_spill] sm:$0xff]  ;;  %v23505_v58 = vmax.f32 %v19382_v19, 0.0 }
 0x476   :  { %5256 = vst [vmem:[#allocation2 + $0x1c9] sm:$0xff] %v23481_v22  ;;  %5257 = vst [vmem:[#allocation2 + $0x1d1] sm:$0xff] %v23482_v63  ;;  %v23484_v22 = vmax.f32 %v19312_v0, 0.0  ;;  %v23485_v63 = vmax.f32 %v19316_v59, 0.0  ;;  %13804 = vmatmul.mubr.f32.gmra.mxu0 %v19630_v9 }
 0x477   :  { %5258 = vst [vmem:[#allocation2 + $0x1e1] sm:$0xff] %v23483_v24  ;;  %v23486_v24 = vmax.f32 %v19320_v43, 0.0  ;;  %5262 = vst [vmem:[#allocation2 + $0x211] sm:$0xff] %v23487_v46  ;;  %v23490_v46 = vmax.f32 %v19335_v17, 0.0 }
 0x478   :  { %5259 = vst [vmem:[#allocation2 + $0x1e9] sm:$0xff] %v23484_v22  ;;  %5260 = vst [vmem:[#allocation2 + $0x1f9] sm:$0xff] %v23485_v63  ;;  %v6811_v22 = vld [vmem:[%s22970_s2 + $0x180] sm:$0xff]  ;;  %v23493_v63 = vmax.f32 %v19187_v50, 0.0  ;;  %v23497_v50 = vmax.f32 %v19362_v11, 0.0 }
 0x479   :  { %5261 = vst [vmem:[#allocation2 + $0x201] sm:$0xff] %v23486_v24  ;;  %23488 = vst [vmem:[#allocation80_spill] sm:$0xff] %v19583_v56  ;;  %14051 = vmatprep.subr.mxu0 %v6811_v22  ;;  %v5134_v24 = vmax.f32 %v23503_v55, 0.0  ;;  %v5135_v56 = vmax.f32 %v23504_v57, 0.0  ;;  %v23509_v57 = vmax.f32 %v19191_v5, 0.0  ;;  %v23512_v55 = vmax.f32 %v19409_v29, 0.0 }
 0x47a   :  { %5263 = vst [vmem:[#allocation2 + $0x219] sm:$0xff] %v23039_v60  ;;  %5264 = vst [vmem:[#allocation2 + $0x229] sm:$0xff] %v23490_v46  ;;  %13681 = vmatprep.mubr.f32.mxu1 %v23493_v63  ;;  %v23494_v46 = vmax.f32 %v19350_v33, 0.0  ;;  %v23502_v60 = vld [vmem:[#allocation78_spill] sm:$0xff]  ;;  %v19645_v63 = vld [vmem:[#allocation2 + $0x48] sm:$0xff]  ;;  %14052 = vmatpush3.msra.mxu0 %v6811_v22  ;;  %v23518_v22 = vmax.f32 %v19207_v3, 0.0 }
 0x47b   :  { %5265 = vst [vmem:[#allocation2 + $0x231] sm:$0xff] %v23491_v52  ;;  %5266 = vst [vmem:[#allocation2 + $0x241] sm:$0xff] %v23492_v6  ;;  %v23495_v52 = vmax.f32 %v19354_v13, 0.0  ;;  %v23496_v6 = vmax.f32 %v19358_v7, 0.0  ;;  %13682 = vmatmul.mubr.f32.gmra.mxu1 %v23509_v57  ;;  %13806 = vmatprep.mubr.f32.mxu0 %v19645_v63  ;;  %v23515_v5 = vmax.f32 %v23502_v60, 0.0  ;;  %v19665_v57 = vld [vmem:[#allocation2 + $0x60] sm:$0xff] }
 0x47c   :  { %5267 = vst [vmem:[#allocation2 + $0x249] sm:$0xff] %v23494_v46  ;;  %5270 = vst [vmem:[#allocation2 + $0x271] sm:$0xff] %v23497_v50  ;;  %v23498_v46 = vmax.f32 %v19366_v37, 0.0  ;;  %v23501_v50 = vmax.f32 %v19378_v26, 0.0  ;;  %v19692_v3 = vld [vmem:[#allocation2 + $0x98] sm:$0xff] }
 0x47d   :  { %5268 = vst [vmem:[#allocation2 + $0x259] sm:$0xff] %v23495_v52  ;;  %5269 = vst [vmem:[#allocation2 + $0x261] sm:$0xff] %v23496_v6  ;;  %v23499_v52 = vmax.f32 %v19370_v47, 0.0  ;;  %v23500_v6 = vmax.f32 %v19374_v14, 0.0 }
 0x47e   :  { %5271 = vst [vmem:[#allocation2 + $0x279] sm:$0xff] %v23498_v46  ;;  %5274 = vst [vmem:[#allocation2 + $0x2a1] sm:$0xff] %v23501_v50  ;;  %v5137_v46 = vmax.f32 %v19435_v15, 0.0  ;;  %v23508_v50 = vmax.f32 %v19397_v4, 0.0  ;;  %v23510_v15 = vmax.f32 %v19401_v25, 0.0 }
 0x47f   :  { %5272 = vst [vmem:[#allocation2 + $0x289] sm:$0xff] %v23499_v52  ;;  %5273 = vst [vmem:[#allocation2 + $0x291] sm:$0xff] %v23500_v6  ;;  %v23506_v52 = vmax.f32 %v19386_v38, 0.0  ;;  %v23507_v6 = vmax.f32 %v19390_v8, 0.0 }
 0x480   :  { %5275 = vst [vmem:[#allocation2 + $0x2a9] sm:$0xff] %v23505_v58  ;;  %5278 = vst [vmem:[#allocation2 + $0x2d1] sm:$0xff] %v23508_v50  ;;  %v23511_v58 = vmax.f32 %v19405_v40, 0.0  ;;  %v19662_v50 = vld [vmem:[#allocation2 + $0x50] sm:$0xff] }
 0x481   :  { %5276 = vst [vmem:[#allocation2 + $0x2b9] sm:$0xff] %v23506_v52  ;;  %5277 = vst [vmem:[#allocation2 + $0x2c1] sm:$0xff] %v23507_v6  ;;  %v23513_v52 = vmax.f32 %v19413_v32, 0.0  ;;  %v23514_v6 = vmax.f32 %v19195_v2, 0.0  ;;  %13807 = vmatmul.mubr.f32.gmra.mxu0 %v19662_v50  ;;  %v23517_v2 = vmax.f32 %v19203_v34, 0.0  ;;  %v19685_v34 = vld [vmem:[#allocation2 + $0x90] sm:$0xff] }
 0x482   :  { %5279 = vst [vmem:[#allocation2 + $0x2d9] sm:$0xff] %v23510_v15  ;;  %5280 = vst [vmem:[#allocation2 + $0x2e9] sm:$0xff] %v23511_v58  ;;  %v23516_v15 = vmax.f32 %v19199_v10, 0.0  ;;  %13809 = vmatprep.mubr.f32.mxu0 %v19665_v57  ;;  %v19672_v58 = vld [vmem:[#allocation2 + $0x68] sm:$0xff]  ;;  %v19682_v10 = vld [vmem:[#allocation2 + $0x80] sm:$0xff] }
 0x483   :  { %5281 = vst [vmem:[#allocation2 + $0x2f1] sm:$0xff] %v23512_v55  ;;  %5282 = vst [vmem:[#allocation2 + $0x301] sm:$0xff] %v23513_v52  ;;  %13684 = vmatprep.mubr.f32.mxu1 %v23514_v6  ;;  %v23522_v52 = vld [vmem:[#allocation69_spill] sm:$0xff] }
 0x484   :  { %5283 = vst [vmem:[#allocation2 + $0x309] sm:$0xff] %v23515_v5  ;;  %5284 = vst [vmem:[#allocation2 + $0x319] sm:$0xff] %v5134_v24  ;;  %13685 = vmatmul.mubr.f32.gmra.mxu1 %v23516_v15  ;;  %v23519_v24 = vmax.f32 %v19211_v61, 0.0  ;;  %v23523_v6 = vmax.f32 %v23522_v52, 0.0  ;;  %v19695_v61 = vld [vmem:[#allocation2 + $0xa8] sm:$0xff]  ;;  %v23524_v5 = vmax.f32 %v19226_v28, 0.0 }
 0x485   :  { %5285 = vst [vmem:[#allocation2 + $0x321] sm:$0xff] %v5135_v56  ;;  %5287 = vst [vmem:[#allocation2 + $0x339] sm:$0xff] %v5137_v46  ;;  %13687 = vmatprep.mubr.f32.mxu1 %v23517_v2  ;;  %13810 = vmatmul.mubr.f32.gmra.mxu0 %v19672_v58  ;;  %v19675_v56 = vld [vmem:[#allocation2 + $0x78] sm:$0xff]  ;;  %v23520_v46 = vld [vmem:[#allocation39_spill] sm:$0xff]  ;;  %v23525_v15 = vmax.f32 %v19230_v53, 0.0  ;;  %v23529_v52 = vmax.f32 %v19246_v42, 0.0 }
 0x486   :  { %13812 = vmatprep.mubr.f32.mxu0 %v19675_v56  ;;  %v23521_v55 = vmax.f32 %v23520_v46, 0.0  ;;  %v19702_v2 = vld [vmem:[#allocation2 + $0xb0] sm:$0xff]  ;;  %v23527_v46 = vmax.f32 %v19238_v41, 0.0  ;;  %v19712_v28 = vld [vmem:[#allocation2 + $0xc8] sm:$0xff]  ;;  %v19715_v53 = vld [vmem:[#allocation2 + $0xd8] sm:$0xff] }
 0x487   :  { %v19725_v41 = vld [vmem:[#allocation2 + $0xf0] sm:$0xff]  ;;  %v19735_v42 = vld [vmem:[#allocation2 + $0x108] sm:$0xff] }
 0x488   :  { %13688 = vmatmul.mubr.f32.gmra.mxu1 %v23518_v22  ;;  %v19705_v22 = vld [vmem:[#allocation2 + $0xc0] sm:$0xff] }
 0x489   :  { %13690 = vmatprep.mubr.f32.mxu1 %v23519_v24  ;;  %13813 = vmatmul.mubr.f32.gmra.mxu0 %v19682_v10  ;;  %v23526_v24 = vmax.f32 %v19234_v20, 0.0  ;;  %v19722_v20 = vld [vmem:[#allocation2 + $0xe0] sm:$0xff] }
 0x48a   :  { %13815 = vmatprep.mubr.f32.mxu0 %v19685_v34 }
 0x48c   :  { %13691 = vmatmul.mubr.f32.gmra.mxu1 %v23521_v55  ;;  %v23528_v55 = vmax.f32 %v19242_v62, 0.0  ;;  %v19732_v62 = vld [vmem:[#allocation2 + $0xf8] sm:$0xff] }
 0x48d   :  { %13693 = vmatprep.mubr.f32.mxu1 %v23523_v6  ;;  %13816 = vmatmul.mubr.f32.gmra.mxu0 %v19692_v3  ;;  %v23530_v6 = vmax.f32 %v19250_v35, 0.0  ;;  %v19742_v35 = vld [vmem:[#allocation2 + $0x110] sm:$0xff] }
 0x48e   :  { %13818 = vmatprep.mubr.f32.mxu0 %v19695_v61 }
 0x490   :  { %13694 = vmatmul.mubr.f32.gmra.mxu1 %v23524_v5  ;;  %v23531_v5 = vmax.f32 %v23454_v45, 0.0  ;;  %v19745_v45 = vld [vmem:[#allocation2 + $0x120] sm:$0xff] }
 0x491   :  { %13696 = vmatprep.mubr.f32.mxu1 %v23525_v15  ;;  %13819 = vmatmul.mubr.f32.gmra.mxu0 %v19702_v2  ;;  %v23532_v15 = vmax.f32 %v23458_v48, 0.0  ;;  %v19752_v48 = vld [vmem:[#allocation2 + $0x128] sm:$0xff] }
 0x492   :  { %13821 = vmatprep.mubr.f32.mxu0 %v19705_v22 }
 0x494   :  { %13697 = vmatmul.mubr.f32.gmra.mxu1 %v23526_v24  ;;  %v23533_v24 = vmax.f32 %v19265_v49, 0.0  ;;  %v19755_v49 = vld [vmem:[#allocation2 + $0x138] sm:$0xff] }
 0x495   :  { %13699 = vmatprep.mubr.f32.mxu1 %v23527_v46  ;;  %13822 = vmatmul.mubr.f32.gmra.mxu0 %v19712_v28  ;;  %v23534_v46 = vmax.f32 %v23459_v51, 0.0  ;;  %v5400_v51 = vld [vmem:[#allocation2 + $0x1b1] sm:$0xff] }
 0x496   :  { %13824 = vmatprep.mubr.f32.mxu0 %v19715_v53 }
 0x498   :  { %13700 = vmatmul.mubr.f32.gmra.mxu1 %v23528_v55  ;;  %v23535_v55 = vmax.f32 %v19273_v36, 0.0  ;;  %v19765_v36 = vld [vmem:[#allocation2 + $0x150] sm:$0xff] }
 0x499   :  { %13702 = vmatprep.mubr.f32.mxu1 %v23529_v52  ;;  %13825 = vmatmul.mubr.f32.gmra.mxu0 %v19722_v20  ;;  %v23536_v52 = vmax.f32 %v23462_v12, 0.0  ;;  %v5401_v12 = vld [vmem:[#allocation2 + $0x1b9] sm:$0xff] }
 0x49a   :  { %13827 = vmatprep.mubr.f32.mxu0 %v19725_v41 }
 0x49c   :  { %13703 = vmatmul.mubr.f32.gmra.mxu1 %v23530_v6  ;;  %v23537_v6 = vmax.f32 %v23463_v1, 0.0  ;;  %v19773_v1 = vld [vmem:[#allocation2 + $0x168] sm:$0xff] }
 0x49d   :  { %13705 = vmatprep.mubr.f32.mxu1 %v23531_v5  ;;  %13828 = vmatmul.mubr.f32.gmra.mxu0 %v19732_v62  ;;  %v19762_v5 = vld [vmem:[#allocation2 + $0x140] sm:$0xff] }
 0x49e   :  { %13830 = vmatprep.mubr.f32.mxu0 %v19735_v42 }
 0x4a0   :  { %13706 = vmatmul.mubr.f32.gmra.mxu1 %v23532_v15  ;;  %v23538_v15 = vmax.f32 %v23464_v31, 0.0  ;;  %v23540_v31 = vmax.f32 %v19304_v23, 0.0  ;;  %v19795_v23 = vld [vmem:[#allocation2 + $0x1e0] sm:$0xff] }
 0x4a1   :  { %13708 = vmatprep.mubr.f32.mxu1 %v23533_v24  ;;  %13831 = vmatmul.mubr.f32.gmra.mxu0 %v19742_v35  ;;  %v19770_v24 = vld [vmem:[#allocation2 + $0x158] sm:$0xff] }
 0x4a2   :  { %13833 = vmatprep.mubr.f32.mxu0 %v19745_v45 }
 0x4a4   :  { %13709 = vmatmul.mubr.f32.gmra.mxu1 %v23534_v46  ;;  %v23539_v46 = vmax.f32 %v19300_v27, 0.0  ;;  %v23543_v27 = vmax.f32 %v19316_v59, 0.0 }
 0x4a5   :  { %13711 = vmatprep.mubr.f32.mxu1 %v23535_v55  ;;  %13834 = vmatmul.mubr.f32.gmra.mxu0 %v19752_v48  ;;  %v5320_v55 = vld [vmem:[#allocation2 + $0x1b0] sm:$0xff] }
 0x4a6   :  { %13836 = vmatprep.mubr.f32.mxu0 %v19755_v49 }
 0x4a8   :  { %13712 = vmatmul.mubr.f32.gmra.mxu1 %v23536_v52  ;;  %v19778_v52 = vld [vmem:[#allocation2 + $0x170] sm:$0xff] }
 0x4a9   :  { %13714 = vmatprep.mubr.f32.mxu1 %v23537_v6  ;;  %13837 = vmatmul.mubr.f32.gmra.mxu0 %v19762_v5  ;;  %v23541_v6 = vmax.f32 %v19308_v16, 0.0  ;;  %v23544_v16 = vmax.f32 %v19320_v43, 0.0  ;;  %v23548_v43 = vmax.f32 %v19335_v17, 0.0  ;;  %v19827_v17 = vld [vmem:[#allocation2 + $0x228] sm:$0xff] }
 0x4aa   :  { %13839 = vmatprep.mubr.f32.mxu0 %v19765_v36 }
 0x4ac   :  { %13715 = vmatmul.mubr.f32.gmra.mxu1 %v23538_v15  ;;  %v19785_v15 = vld [vmem:[#allocation2 + $0x1c8] sm:$0xff] }
 0x4ad   :  { %13717 = vmatprep.mubr.f32.mxu1 %v5400_v51  ;;  %13840 = vmatmul.mubr.f32.gmra.mxu0 %v19770_v24  ;;  %v14794_v51 = vld [vmem:[#allocation2 + $0x8] sm:$0xff] }
 0x4ae   :  { %13842 = vmatprep.mubr.f32.mxu0 %v19773_v1 }
 0x4b0   :  { %13718 = vmatmul.mubr.f32.gmra.mxu1 %v5401_v12  ;;  %v23542_v12 = vmax.f32 %v19312_v0, 0.0  ;;  %v13671_v0 = vpop.f32.mrf.mxu1 }
 0x4b1   :  { %13720 = vmatprep.mubr.f32.mxu1 %v23539_v46  ;;  %13843 = vmatmul.mubr.f32.gmra.mxu0 %v19778_v52  ;;  %v19792_v46 = vld [vmem:[#allocation2 + $0x1d0] sm:$0xff] }
 0x4b2   :  { %13845 = vmatprep.mubr.f32.mxu0 %v5320_v55  ;;  %v23545_v55 = vmax.f32 %v19327_v44, 0.0  ;;  %v19814_v44 = vld [vmem:[#allocation2 + $0x200] sm:$0xff] }
 0x4b4   :  { %13721 = vmatmul.mubr.f32.gmra.mxu1 %v23540_v31  ;;  %v13799_v31 = vpop.f32.mrf.mxu0 }
 0x4b5   :  { %13723 = vmatprep.mubr.f32.mxu1 %v23541_v6  ;;  %13846 = vmatmul.mubr.f32.gmra.mxu0 %v14794_v51  ;;  %v19802_v6 = vld [vmem:[#allocation2 + $0x1e8] sm:$0xff]  ;;  %v19804_v59 = vadd.f32 %v13799_v31, %v13671_v0  ;;  %v19807_v51 = vld [vmem:[#allocation2 + $0x1f8] sm:$0xff]  ;;  %v23551_v0 = vmax.f32 %v19350_v33, 0.0  ;;  %v23552_v31 = vmax.f32 %v19354_v13, 0.0 }
 0x4b6   :  { %13848 = vmatprep.mubr.f32.mxu0 %v19785_v15  ;;  %v19844_v33 = vld [vmem:[#allocation2 + $0x248] sm:$0xff]  ;;  %v19847_v13 = vld [vmem:[#allocation2 + $0x258] sm:$0xff] }
 0x4b7   :  { %23546 = vst [vmem:[#allocation6_spill] sm:$0xff] %v19804_v59  ;;  %v19924_v59 = vld [vmem:[#allocation2 + $0x308] sm:$0xff] }
 0x4b8   :  { %13724 = vmatmul.mubr.f32.gmra.mxu1 %v23542_v12  ;;  %v23547_v12 = vmax.f32 %v19331_v54, 0.0  ;;  %v19824_v54 = vld [vmem:[#allocation2 + $0x218] sm:$0xff]  ;;  %23568 = vst [vmem:[#allocation5_spill] sm:$0xff] %v19924_v59 }
 0x4b9   :  { %13726 = vmatprep.mubr.f32.mxu1 %v23543_v27  ;;  %13849 = vmatmul.mubr.f32.gmra.mxu0 %v19792_v46  ;;  %v19817_v27 = vld [vmem:[#allocation2 + $0x210] sm:$0xff] }
 0x4ba   :  { %13851 = vmatprep.mubr.f32.mxu0 %v19795_v23 }
 0x4bc   :  { %13727 = vmatmul.mubr.f32.gmra.mxu1 %v23544_v16  ;;  %v23549_v16 = vmax.f32 %v23480_v39, 0.0  ;;  %v19834_v39 = vld [vmem:[#allocation2 + $0x230] sm:$0xff] }
 0x4bd   :  { %13729 = vmatprep.mubr.f32.mxu1 %v23545_v55  ;;  %13852 = vmatmul.mubr.f32.gmra.mxu0 %v19802_v6  ;;  %v23550_v55 = vmax.f32 %v19346_v18, 0.0  ;;  %v19837_v18 = vld [vmem:[#allocation2 + $0x240] sm:$0xff] }
 0x4be   :  { %13854 = vmatprep.mubr.f32.mxu0 %v19807_v51 }
 0x4c0   :  { %13730 = vmatmul.mubr.f32.gmra.mxu1 %v23547_v12  ;;  %v23553_v12 = vmax.f32 %v19358_v7, 0.0  ;;  %v19854_v7 = vld [vmem:[#allocation2 + $0x260] sm:$0xff] }
 0x4c1   :  { %13732 = vmatprep.mubr.f32.mxu1 %v23548_v43  ;;  %13855 = vmatmul.mubr.f32.gmra.mxu0 %v19814_v44  ;;  %v23554_v43 = vmax.f32 %v19362_v11, 0.0  ;;  %v19857_v11 = vld [vmem:[#allocation2 + $0x270] sm:$0xff] }
 0x4c2   :  { %13857 = vmatprep.mubr.f32.mxu0 %v19817_v27 }
 0x4c4   :  { %13733 = vmatmul.mubr.f32.gmra.mxu1 %v23549_v16  ;;  %v23555_v16 = vmax.f32 %v19366_v37, 0.0  ;;  %v19864_v37 = vld [vmem:[#allocation2 + $0x278] sm:$0xff] }
 0x4c5   :  { %13735 = vmatprep.mubr.f32.mxu1 %v23550_v55  ;;  %13858 = vmatmul.mubr.f32.gmra.mxu0 %v19824_v54  ;;  %v23556_v55 = vmax.f32 %v19370_v47, 0.0  ;;  %v19867_v47 = vld [vmem:[#allocation2 + $0x288] sm:$0xff] }
 0x4c6   :  { %13860 = vmatprep.mubr.f32.mxu0 %v19827_v17 }
 0x4c8   :  { %13736 = vmatmul.mubr.f32.gmra.mxu1 %v23551_v0  ;;  %v23557_v0 = vmax.f32 %v19374_v14, 0.0  ;;  %v19877_v14 = vld [vmem:[%s22970_s2 + $0x2f8] sm:$0xff] }
 0x4c9   :  { %13738 = vmatprep.mubr.f32.mxu1 %v23552_v31  ;;  %13861 = vmatmul.mubr.f32.gmra.mxu0 %v19834_v39  ;;  %v23558_v31 = vmax.f32 %v19378_v26, 0.0  ;;  %v19880_v26 = vld [vmem:[#allocation2 + $0x290] sm:$0xff] }
 0x4ca   :  { %13863 = vmatprep.mubr.f32.mxu0 %v19837_v18  ;;  %14277 = vmatprep.subr.mxu0 %v19877_v14 }
 0x4cc   :  { %13739 = vmatmul.mubr.f32.gmra.mxu1 %v23553_v12  ;;  %v23559_v12 = vmax.f32 %v19382_v19, 0.0  ;;  %v23561_v19 = vmax.f32 %v19390_v8, 0.0  ;;  %v19900_v8 = vld [vmem:[#allocation2 + $0x2c0] sm:$0xff] }
 0x4cd   :  { %13741 = vmatprep.mubr.f32.mxu1 %v23554_v43  ;;  %13864 = vmatmul.mubr.f32.gmra.mxu0 %v19844_v33  ;;  %v23560_v43 = vmax.f32 %v19386_v38, 0.0  ;;  %v23562_v38 = vmax.f32 %v19397_v4, 0.0  ;;  %v19903_v4 = vld [vmem:[#allocation2 + $0x2d0] sm:$0xff] }
 0x4ce   :  { %13866 = vmatprep.mubr.f32.mxu0 %v19847_v13 }
 0x4d0   :  { %13742 = vmatmul.mubr.f32.gmra.mxu1 %v23555_v16  ;;  %v19883_v16 = vld [vmem:[#allocation2 + $0x2a0] sm:$0xff] }
 0x4d1   :  { %13744 = vmatprep.mubr.f32.mxu1 %v23556_v55  ;;  %13867 = vmatmul.mubr.f32.gmra.mxu0 %v19854_v7  ;;  %v19890_v55 = vld [vmem:[#allocation2 + $0x2a8] sm:$0xff] }
 0x4d2   :  { %13869 = vmatprep.mubr.f32.mxu0 %v19857_v11 }
 0x4d4   :  { %13745 = vmatmul.mubr.f32.gmra.mxu1 %v23557_v0  ;;  %v19893_v0 = vld [vmem:[#allocation2 + $0x2b8] sm:$0xff] }
 0x4d5   :  { %13747 = vmatprep.mubr.f32.mxu1 %v23558_v31  ;;  %13870 = vmatmul.mubr.f32.gmra.mxu0 %v19864_v37  ;;  %v23563_v31 = vmax.f32 %v19401_v25, 0.0  ;;  %v19910_v25 = vld [vmem:[#allocation2 + $0x2d8] sm:$0xff] }
 0x4d6   :  { %13872 = vmatprep.mubr.f32.mxu0 %v19867_v47 }
 0x4d8   :  { %13748 = vmatmul.mubr.f32.gmra.mxu1 %v23559_v12  ;;  %v23564_v12 = vmax.f32 %v19405_v40, 0.0  ;;  %v19913_v40 = vld [vmem:[#allocation2 + $0x2e8] sm:$0xff] }
 0x4d9   :  { %13750 = vmatprep.mubr.f32.mxu1 %v23560_v43  ;;  %13873 = vmatmul.mubr.f32.gmra.mxu0 %v19880_v26  ;;  %v23565_v43 = vmax.f32 %v19409_v29, 0.0  ;;  %v6218_v29 = vld [vmem:[#allocation2 + $0x2] sm:$0xff] }
 0x4da   :  { %13875 = vmatprep.mubr.f32.mxu0 %v19883_v16 }
 0x4dc   :  { %13751 = vmatmul.mubr.f32.gmra.mxu1 %v23561_v19  ;;  %v23566_v19 = vmax.f32 %v19413_v32, 0.0  ;;  %v19921_v32 = vld [vmem:[#allocation2 + $0x300] sm:$0xff] }
 0x4dd   :  { %13753 = vmatprep.mubr.f32.mxu1 %v23562_v38  ;;  %13876 = vmatmul.mubr.f32.gmra.mxu0 %v19890_v55  ;;  %v23567_v38 = vmax.f32 %v23502_v60, 0.0  ;;  %v19927_v60 = vld [vmem:[#allocation2 + $0x318] sm:$0xff] }
 0x4de   :  { %13878 = vmatprep.mubr.f32.mxu0 %v19893_v0  ;;  %23569 = vst [vmem:[#allocation77_spill] sm:$0xff] %v19927_v60 }
 0x4e0   :  { %13754 = vmatmul.mubr.f32.gmra.mxu1 %v23563_v31  ;;  %v5430_v31 = vld [vmem:[#allocation2 + $0x319] sm:$0xff] }
 0x4e1   :  { %13756 = vmatprep.mubr.f32.mxu1 %v23564_v12  ;;  %13879 = vmatmul.mubr.f32.gmra.mxu0 %v19900_v8  ;;  %v19918_v12 = vld [vmem:[#allocation2 + $0x2f0] sm:$0xff] }
 0x4e2   :  { %13881 = vmatprep.mubr.f32.mxu0 %v19903_v4 }
 0x4e4   :  { %13757 = vmatmul.mubr.f32.gmra.mxu1 %v23565_v43  ;;  %v5431_v43 = vld [vmem:[#allocation2 + $0x321] sm:$0xff] }
 0x4e5   :  { %13759 = vmatprep.mubr.f32.mxu1 %v23566_v19  ;;  %13882 = vmatmul.mubr.f32.gmra.mxu0 %v19910_v25  ;;  %v6219_v19 = vld [vmem:[#allocation2 + $0xa] sm:$0xff] }
 0x4e6   :  { %13884 = vmatprep.mubr.f32.mxu0 %v19913_v40 }
 0x4e8   :  { %13760 = vmatmul.mubr.f32.gmra.mxu1 %v23567_v38  ;;  %v19929_v38 = vld [vmem:[#allocation2 + $0x1a] sm:$0xff] }
 0x4e9   :  { %13762 = vmatprep.mubr.f32.mxu1 %v5430_v31  ;;  %13885 = vmatmul.mubr.f32.gmra.mxu0 %v19918_v12  ;;  %23570 = vst [vmem:[#allocation82_spill] sm:$0xff] %v19929_v38  ;;  %v7354_v31 = vld [vmem:[%s22970_s2 + $0x270] sm:$0xff] }
 0x4ea   :  { %13887 = vmatprep.mubr.f32.mxu0 %v19921_v32 }
 0x4ec   :  { %13763 = vmatmul.mubr.f32.gmra.mxu1 %v5431_v43  ;;  %v19939_v43 = vld [vmem:[#allocation2 + $0x22] sm:$0xff] }
 0x4ed   :  { %13925 = vmatprep.mubr.f32.mxu1 %v6218_v29  ;;  %13888 = vmatmul.mubr.f32.gmra.mxu0 %v19924_v59  ;;  %v19937_v29 = vld [vmem:[#allocation2 + $0x320] sm:$0xff]  ;;  %23572 = vst [vmem:[#allocation7_spill] sm:$0xff] %v19939_v43  ;;  %v7353_v59 = vld [vmem:[%s22970_s2 + $0x268] sm:$0xff] }
 0x4ee   :  { %13890 = vmatprep.mubr.f32.mxu0 %v19927_v60  ;;  %23571 = vst [vmem:[#allocation8_spill] sm:$0xff] %v19937_v29  ;;  %v23575_v60 = vld [vmem:[#allocation80_spill] sm:$0xff] }
 0x4f0   :  { %13926 = vmatmul.mubr.f32.vlgmr.msra.gmra.mxu1 %v6219_v19  ;;  %v19943_v19 = vld [vmem:[#allocation2 + $0x32] sm:$0xff] }
 0x4f1   :  { %13928 = vmatprep.mubr.f32.mxu1 %v19929_v38  ;;  %14150 = vmatpush3.msra.mxu1 %v19527_v21  ;;  %v19950_v21 = vld [vmem:[#allocation2 + $0x3a] sm:$0xff] }
 0x4f2   :  { %14151 = vmatprep.subr.mxu1 %v7354_v31  ;;  %13891 = vmatmul.mubr.f32.gmra.mxu0 %v19937_v29  ;;  %23573 = vst [vmem:[#allocation79_spill] sm:$0xff] %v19950_v21  ;;  %v23574_v38 = vld [vmem:[#allocation75_spill] sm:$0xff]  ;;  %v19954_v29 = vld [vmem:[#allocation2 + $0x4a] sm:$0xff] }
 0x4f3   :  { %14053 = vmatprep.mubr.f32.mxu0 %v19553_v30  ;;  %14152 = vmatpush3.msra.mxu1 %v7354_v31  ;;  %v7883_v30 = vld [vmem:[%s22970_s2 + $0x2f0] sm:$0xff]  ;;  %v19969_v31 = vld [vmem:[#allocation2 + $0x62] sm:$0xff] }
 0x4f4   :  { %13929 = vmatmul.mubr.f32.gmra.mxu1 %v19939_v43  ;;  %14153 = vmatprep.subr.mxu1 %v7353_v59  ;;  %v7352_v43 = vld [vmem:[%s22970_s2 + $0x260] sm:$0xff] }
 0x4f5   :  { %13931 = vmatprep.mubr.f32.mxu1 %v19943_v19  ;;  %14154 = vmatpush3.msra.mxu1 %v7353_v59  ;;  %v7882_v59 = vld [vmem:[%s22970_s2 + $0x2e8] sm:$0xff] }
 0x4f6   :  { %14054 = vmatmul.mubr.f32.vlgmr.msra.gmra.mxu0 %v23574_v38  ;;  %v19965_v38 = vld [vmem:[#allocation2 + $0x52] sm:$0xff]  ;;  %14155 = vmatprep.subr.mxu1 %v7352_v43 }
 0x4f7   :  { %14056 = vmatprep.mubr.f32.mxu0 %v23575_v60  ;;  %14278 = vmatpush3.msra.mxu0 %v19877_v14  ;;  %v19979_v14 = vld [vmem:[#allocation2 + $0x6a] sm:$0xff] }
 0x4f8   :  { %13932 = vmatmul.mubr.f32.gmra.mxu1 %v19950_v21  ;;  %14279 = vmatprep.subr.mxu0 %v7883_v30  ;;  %v7351_v21 = vld [vmem:[%s22970_s2 + $0x258] sm:$0xff]  ;;  %v7350_v60 = vld [vmem:[%s22970_s2 + $0x250] sm:$0xff] }
 0x4f9   :  { %13934 = vmatprep.mubr.f32.mxu1 %v19954_v29  ;;  %14156 = vmatpush3.msra.mxu1 %v7352_v43  ;;  %v19993_v43 = vld [vmem:[#allocation2 + $0x82] sm:$0xff] }
 0x4fa   :  { %14057 = vmatmul.mubr.f32.gmra.mxu0 %v19630_v9  ;;  %14157 = vmatprep.subr.mxu1 %v7351_v21  ;;  %v19983_v9 = vld [vmem:[#allocation2 + $0x7a] sm:$0xff] }
 0x4fb   :  { %14059 = vmatprep.mubr.f32.mxu0 %v19645_v63  ;;  %14280 = vmatpush3.msra.mxu0 %v7883_v30  ;;  %v7881_v63 = vld [vmem:[%s22970_s2 + $0x2e0] sm:$0xff]  ;;  %v7349_v30 = vld [vmem:[%s22970_s2 + $0x248] sm:$0xff] }
 0x4fc   :  { %13935 = vmatmul.mubr.f32.gmra.mxu1 %v19965_v38  ;;  %14281 = vmatprep.subr.mxu0 %v7882_v59 }
 0x4fd   :  { %13937 = vmatprep.mubr.f32.mxu1 %v19969_v31  ;;  %14158 = vmatpush3.msra.mxu1 %v7351_v21  ;;  %v20007_v21 = vld [vmem:[#allocation2 + $0x9a] sm:$0xff] }
 0x4fe   :  { %14060 = vmatmul.mubr.f32.gmra.mxu0 %v19662_v50  ;;  %14159 = vmatprep.subr.mxu1 %v7350_v60  ;;  %v19997_v50 = vld [vmem:[#allocation2 + $0x92] sm:$0xff] }
 0x4ff   :  { %14062 = vmatprep.mubr.f32.mxu0 %v19665_v57  ;;  %14282 = vmatpush3.msra.mxu0 %v7882_v59  ;;  %v7880_v57 = vld [vmem:[%s22970_s2 + $0x2d8] sm:$0xff]  ;;  %v7348_v59 = vld [vmem:[%s22970_s2 + $0x240] sm:$0xff] }
 0x500   :  { %13938 = vmatmul.mubr.f32.gmra.mxu1 %v19979_v14  ;;  %14283 = vmatprep.subr.mxu0 %v7881_v63 }
 0x501   :  { %13940 = vmatprep.mubr.f32.mxu1 %v19983_v9  ;;  %14160 = vmatpush3.msra.mxu1 %v7350_v60  ;;  %v20021_v60 = vld [vmem:[#allocation2 + $0xb2] sm:$0xff] }
 0x502   :  { %14063 = vmatmul.mubr.f32.gmra.mxu0 %v19672_v58  ;;  %14161 = vmatprep.subr.mxu1 %v7349_v30  ;;  %v20011_v58 = vld [vmem:[#allocation2 + $0xaa] sm:$0xff] }
 0x503   :  { %14065 = vmatprep.mubr.f32.mxu0 %v19675_v56  ;;  %14284 = vmatpush3.msra.mxu0 %v7881_v63  ;;  %v7879_v56 = vld [vmem:[%s22970_s2 + $0x2d0] sm:$0xff]  ;;  %v7347_v63 = vld [vmem:[%s22970_s2 + $0x238] sm:$0xff] }
 0x504   :  { %13941 = vmatmul.mubr.f32.gmra.mxu1 %v19993_v43  ;;  %14285 = vmatprep.subr.mxu0 %v7880_v57 }
 0x505   :  { %13943 = vmatprep.mubr.f32.mxu1 %v19997_v50  ;;  %14162 = vmatpush3.msra.mxu1 %v7349_v30  ;;  %v20035_v30 = vld [vmem:[#allocation2 + $0xca] sm:$0xff] }
 0x506   :  { %14066 = vmatmul.mubr.f32.gmra.mxu0 %v19682_v10  ;;  %14163 = vmatprep.subr.mxu1 %v7348_v59  ;;  %v20025_v10 = vld [vmem:[#allocation2 + $0xc2] sm:$0xff] }
 0x507   :  { %14068 = vmatprep.mubr.f32.mxu0 %v19685_v34  ;;  %14286 = vmatpush3.msra.mxu0 %v7880_v57  ;;  %v7878_v34 = vld [vmem:[%s22970_s2 + $0x2c8] sm:$0xff]  ;;  %v7346_v57 = vld [vmem:[%s22970_s2 + $0x230] sm:$0xff] }
 0x508   :  { %13944 = vmatmul.mubr.f32.gmra.mxu1 %v20007_v21  ;;  %14287 = vmatprep.subr.mxu0 %v7879_v56 }
 0x509   :  { %13946 = vmatprep.mubr.f32.mxu1 %v20011_v58  ;;  %14164 = vmatpush3.msra.mxu1 %v7348_v59  ;;  %v20049_v59 = vld [vmem:[#allocation2 + $0xe2] sm:$0xff] }
 0x50a   :  { %14069 = vmatmul.mubr.f32.gmra.mxu0 %v19692_v3  ;;  %14165 = vmatprep.subr.mxu1 %v7347_v63  ;;  %v20039_v3 = vld [vmem:[#allocation2 + $0xda] sm:$0xff] }
 0x50b   :  { %14071 = vmatprep.mubr.f32.mxu0 %v19695_v61  ;;  %14288 = vmatpush3.msra.mxu0 %v7879_v56  ;;  %v7877_v61 = vld [vmem:[%s22970_s2 + $0x2c0] sm:$0xff]  ;;  %v7345_v56 = vld [vmem:[%s22970_s2 + $0x228] sm:$0xff] }
 0x50c   :  { %13947 = vmatmul.mubr.f32.gmra.mxu1 %v20021_v60  ;;  %14289 = vmatprep.subr.mxu0 %v7878_v34 }
 0x50d   :  { %13949 = vmatprep.mubr.f32.mxu1 %v20025_v10  ;;  %14166 = vmatpush3.msra.mxu1 %v7347_v63  ;;  %v20063_v63 = vld [vmem:[#allocation2 + $0xfa] sm:$0xff] }
 0x50e   :  { %14072 = vmatmul.mubr.f32.gmra.mxu0 %v19702_v2  ;;  %14167 = vmatprep.subr.mxu1 %v7346_v57  ;;  %v20053_v2 = vld [vmem:[#allocation2 + $0xf2] sm:$0xff] }
 0x50f   :  { %14074 = vmatprep.mubr.f32.mxu0 %v19705_v22  ;;  %14290 = vmatpush3.msra.mxu0 %v7878_v34  ;;  %v7876_v22 = vld [vmem:[%s22970_s2 + $0x2b8] sm:$0xff]  ;;  %v7344_v34 = vld [vmem:[%s22970_s2 + $0x220] sm:$0xff] }
 0x510   :  { %13950 = vmatmul.mubr.f32.gmra.mxu1 %v20035_v30  ;;  %14291 = vmatprep.subr.mxu0 %v7877_v61 }
 0x511   :  { %13952 = vmatprep.mubr.f32.mxu1 %v20039_v3  ;;  %14168 = vmatpush3.msra.mxu1 %v7346_v57  ;;  %v20077_v57 = vld [vmem:[#allocation2 + $0x112] sm:$0xff] }
 0x512   :  { %14075 = vmatmul.mubr.f32.gmra.mxu0 %v19712_v28  ;;  %14169 = vmatprep.subr.mxu1 %v7345_v56  ;;  %v20067_v28 = vld [vmem:[#allocation2 + $0x10a] sm:$0xff] }
 0x513   :  { %14077 = vmatprep.mubr.f32.mxu0 %v19715_v53  ;;  %14292 = vmatpush3.msra.mxu0 %v7877_v61  ;;  %v7875_v53 = vld [vmem:[%s22970_s2 + $0x2b0] sm:$0xff]  ;;  %v7343_v61 = vld [vmem:[%s22970_s2 + $0x218] sm:$0xff] }
 0x514   :  { %13953 = vmatmul.mubr.f32.gmra.mxu1 %v20049_v59  ;;  %14293 = vmatprep.subr.mxu0 %v7876_v22 }
 0x515   :  { %13955 = vmatprep.mubr.f32.mxu1 %v20053_v2  ;;  %14170 = vmatpush3.msra.mxu1 %v7345_v56  ;;  %v20091_v56 = vld [vmem:[#allocation2 + $0x12a] sm:$0xff] }
 0x516   :  { %14078 = vmatmul.mubr.f32.gmra.mxu0 %v19722_v20  ;;  %14171 = vmatprep.subr.mxu1 %v7344_v34  ;;  %v20081_v20 = vld [vmem:[#allocation2 + $0x122] sm:$0xff]  ;;  %23576 = vst [vmem:[#allocation84_spill] sm:$0xff] %v20091_v56 }
 0x517   :  { %14080 = vmatprep.mubr.f32.mxu0 %v19725_v41  ;;  %14294 = vmatpush3.msra.mxu0 %v7876_v22  ;;  %v7874_v41 = vld [vmem:[%s22970_s2 + $0x2a8] sm:$0xff]  ;;  %v7342_v22 = vld [vmem:[%s22970_s2 + $0x210] sm:$0xff] }
 0x518   :  { %13956 = vmatmul.mubr.f32.gmra.mxu1 %v20063_v63  ;;  %14295 = vmatprep.subr.mxu0 %v7875_v53 }
 0x519   :  { %13958 = vmatprep.mubr.f32.mxu1 %v20067_v28  ;;  %14172 = vmatpush3.msra.mxu1 %v7344_v34  ;;  %v6245_v34 = vld [vmem:[#allocation2 + $0x142] sm:$0xff] }
 0x51a   :  { %14081 = vmatmul.mubr.f32.gmra.mxu0 %v19732_v62  ;;  %14173 = vmatprep.subr.mxu1 %v7343_v61  ;;  %v20095_v62 = vld [vmem:[#allocation2 + $0x13a] sm:$0xff] }
 0x51b   :  { %14083 = vmatprep.mubr.f32.mxu0 %v19735_v42  ;;  %14296 = vmatpush3.msra.mxu0 %v7875_v53  ;;  %v7873_v42 = vld [vmem:[%s22970_s2 + $0x2a0] sm:$0xff]  ;;  %v7341_v53 = vld [vmem:[%s22970_s2 + $0x208] sm:$0xff] }
 0x51c   :  { %13959 = vmatmul.mubr.f32.gmra.mxu1 %v20077_v57  ;;  %14297 = vmatprep.subr.mxu0 %v7874_v41 }
 0x51d   :  { %13961 = vmatprep.mubr.f32.mxu1 %v20081_v20  ;;  %14174 = vmatpush3.msra.mxu1 %v7343_v61  ;;  %v7340_v61 = vld [vmem:[%s22970_s2 + $0x200] sm:$0xff] }
 0x51e   :  { %14084 = vmatmul.mubr.f32.gmra.mxu0 %v19742_v35  ;;  %14175 = vmatprep.subr.mxu1 %v7342_v22  ;;  %v6246_v35 = vld [vmem:[#allocation2 + $0x152] sm:$0xff] }
 0x51f   :  { %14086 = vmatprep.mubr.f32.mxu0 %v19745_v45  ;;  %14298 = vmatpush3.msra.mxu0 %v7874_v41  ;;  %v6247_v45 = vld [vmem:[#allocation2 + $0x15a] sm:$0xff]  ;;  %v7871_v41 = vld [vmem:[%s22970_s2 + $0x290] sm:$0xff] }
 0x520   :  { %13962 = vmatmul.mubr.f32.gmra.mxu1 %v20091_v56  ;;  %14299 = vmatprep.subr.mxu0 %v7873_v42  ;;  %v7872_v56 = vld [vmem:[%s22970_s2 + $0x298] sm:$0xff] }
 0x521   :  { %13964 = vmatprep.mubr.f32.mxu1 %v20095_v62  ;;  %14176 = vmatpush3.msra.mxu1 %v7342_v22  ;;  %v6249_v22 = vld [vmem:[#allocation2 + $0x172] sm:$0xff] }
 0x522   :  { %14087 = vmatmul.mubr.f32.gmra.mxu0 %v19752_v48  ;;  %14177 = vmatprep.subr.mxu1 %v7341_v53  ;;  %v6248_v48 = vld [vmem:[#allocation2 + $0x16a] sm:$0xff] }
 0x523   :  { %14089 = vmatprep.mubr.f32.mxu0 %v19755_v49  ;;  %14300 = vmatpush3.msra.mxu0 %v7873_v42  ;;  %v6250_v49 = vld [vmem:[#allocation2 + $0x1b2] sm:$0xff] }
 0x524   :  { %13965 = vmatmul.mubr.f32.gmra.mxu1 %v6245_v34  ;;  %14301 = vmatprep.subr.mxu0 %v7872_v56  ;;  %v20128_v42 = vld [vmem:[%s22970_s2 + $0x378] sm:$0xff]  ;;  %v7869_v34 = vld [vmem:[%s22970_s2 + $0x280] sm:$0xff] }
 0x525   :  { %13967 = vmatprep.mubr.f32.mxu1 %v6246_v35  ;;  %14178 = vmatpush3.msra.mxu1 %v7341_v53  ;;  %v20136_v35 = vpop.f32.mrf.mxu1  ;;  %v6253_v53 = vld [vmem:[#allocation2 + $0x1d2] sm:$0xff] }
 0x526   :  { %14090 = vmatmul.mubr.f32.gmra.mxu0 %v19762_v5  ;;  %14179 = vmatprep.subr.mxu1 %v7340_v61  ;;  %v7870_v5 = vld [vmem:[%s22970_s2 + $0x288] sm:$0xff] }
 0x527   :  { %14092 = vmatprep.mubr.f32.mxu0 %v19765_v36  ;;  %14302 = vmatpush3.msra.mxu0 %v7872_v56  ;;  %v6251_v36 = vld [vmem:[#allocation2 + $0x1ba] sm:$0xff]  ;;  %v6252_v56 = vld [vmem:[#allocation2 + $0x1ca] sm:$0xff] }
 0x528   :  { %13968 = vmatmul.mubr.f32.gmra.mxu1 %v6247_v45  ;;  %14303 = vmatprep.subr.mxu0 %v7871_v41  ;;  %v13674_v45 = vpop.f32.mrf.mxu1 }
 0x529   :  { %13970 = vmatprep.mubr.f32.mxu1 %v6248_v48  ;;  %14180 = vmatpush3.msra.mxu1 %v7340_v61  ;;  %v6254_v48 = vld [vmem:[#allocation2 + $0x1e2] sm:$0xff]  ;;  %v6255_v61 = vld [vmem:[#allocation2 + $0x1ea] sm:$0xff] }
 0x52a   :  { %14093 = vmatmul.mubr.f32.gmra.mxu0 %v19770_v24  ;;  %14405 = vmatprep.subr.mxu1 %v20128_v42  ;;  %v6777_v24 = vld [vmem:[#allocation2 + $0x180] sm:$0xff] }
 0x52b   :  { %14095 = vmatprep.mubr.f32.mxu0 %v19773_v1  ;;  %14304 = vmatpush3.msra.mxu0 %v7871_v41  ;;  %v6778_v1 = vld [vmem:[#allocation2 + $0x188] sm:$0xff] }
 0x52c   :  { %13971 = vmatmul.mubr.f32.gmra.mxu1 %v6249_v22  ;;  %14305 = vmatprep.subr.mxu0 %v7870_v5  ;;  %v20141_v22 = vpop.f32.mrf.mxu0 }
 0x52d   :  { %13973 = vmatprep.mubr.f32.mxu1 %v6250_v49  ;;  %14306 = vmatpush3.msra.mxu0 %v7870_v5  ;;  %v6256_v49 = vld [vmem:[#allocation2 + $0x1fa] sm:$0xff] }
 0x52e   :  { %14096 = vmatmul.mubr.f32.gmra.mxu0 %v19778_v52  ;;  %14307 = vmatprep.subr.mxu0 %v7869_v34  ;;  %v5524_v52 = vpop.f32.mrf.mxu1 }
 0x52f   :  { %14098 = vmatprep.mubr.f32.mxu0 %v6777_v24  ;;  %14308 = vmatpush3.msra.mxu0 %v7869_v34 }
 0x530   :  { %13974 = vmatmul.mubr.f32.gmra.mxu1 %v6251_v36  ;;  %v13677_v41 = vpop.f32.mrf.mxu1  ;;  %v6257_v36 = vld [vmem:[#allocation2 + $0x202] sm:$0xff] }
 0x531   :  { %13976 = vmatprep.mubr.f32.mxu1 %v6252_v56  ;;  %v6258_v56 = vld [vmem:[#allocation2 + $0x212] sm:$0xff] }
 0x532   :  { %14099 = vmatmul.mubr.f32.gmra.mxu0 %v6778_v1  ;;  %v5534_v5 = vpop.f32.mrf.mxu1  ;;  %v13802_v24 = vpop.f32.mrf.mxu0 }
 0x533   :  { %14101 = vmatprep.mubr.f32.mxu0 %v19785_v15  ;;  %v20144_v34 = vadd.f32 %v13802_v24, %v13674_v45  ;;  %v6261_v24 = vld [vmem:[#allocation2 + $0x232] sm:$0xff] }
 0x534   :  { %13977 = vmatmul.mubr.f32.gmra.mxu1 %v6253_v53  ;;  %v13680_v15 = vpop.f32.mrf.mxu1 }
 0x535   :  { %13979 = vmatprep.mubr.f32.mxu1 %v6254_v48 }
 0x536   :  { %14102 = vmatmul.mubr.f32.gmra.mxu0 %v19792_v46  ;;  %v5909_v46 = vpop.f32.mrf.mxu0  ;;  %v5544_v1 = vpop.f32.mrf.mxu1 }
 0x537   :  { %14104 = vmatprep.mubr.f32.mxu0 %v19795_v23  ;;  %v20147_v53 = vadd.f32 %v5909_v46, %v5524_v52  ;;  %v6259_v23 = vld [vmem:[#allocation2 + $0x21a] sm:$0xff]  ;;  %v6262_v46 = vld [vmem:[#allocation2 + $0x242] sm:$0xff] }
 0x538   :  { %13980 = vmatmul.mubr.f32.gmra.mxu1 %v6255_v61  ;;  %v13805_v48 = vpop.f32.mrf.mxu0 }
 0x539   :  { %13982 = vmatprep.mubr.f32.mxu1 %v6256_v49  ;;  %v6260_v49 = vld [vmem:[#allocation2 + $0x22a] sm:$0xff] }
 0x53a   :  { %14105 = vmatmul.mubr.f32.gmra.mxu0 %v19802_v6  ;;  %v20150_v6 = vadd.f32 %v13805_v48, %v13677_v41  ;;  %v5919_v45 = vpop.f32.mrf.mxu0  ;;  %v6263_v48 = vld [vmem:[#allocation2 + $0x24a] sm:$0xff] }
 0x53b   :  { %14107 = vmatprep.mubr.f32.mxu0 %v19807_v51  ;;  %v13683_v61 = vpop.f32.mrf.mxu1  ;;  %v20153_v51 = vadd.f32 %v5919_v45, %v5534_v5  ;;  %v6264_v45 = vld [vmem:[#allocation2 + $0x25a] sm:$0xff] }
 0x53c   :  { %13983 = vmatmul.mubr.f32.gmra.mxu1 %v6257_v36 }
 0x53d   :  { %13985 = vmatprep.mubr.f32.mxu1 %v6258_v56  ;;  %v5554_v36 = vpop.f32.mrf.mxu1 }
 0x53e   :  { %14108 = vmatmul.mubr.f32.gmra.mxu0 %v19814_v44 }
 0x53f   :  { %14110 = vmatprep.mubr.f32.mxu0 %v19817_v27 }
 0x540   :  { %13986 = vmatmul.mubr.f32.gmra.mxu1 %v6259_v23 }
 0x541   :  { %13988 = vmatprep.mubr.f32.mxu1 %v6260_v49  ;;  %v13808_v56 = vpop.f32.mrf.mxu0 }
 0x542   :  { %14111 = vmatmul.mubr.f32.gmra.mxu0 %v19824_v54  ;;  %v20156_v44 = vadd.f32 %v13808_v56, %v13680_v15  ;;  %v6265_v56 = vld [vmem:[#allocation2 + $0x262] sm:$0xff] }
 0x543   :  { %14113 = vmatprep.mubr.f32.mxu0 %v19827_v17  ;;  %v5929_v41 = vpop.f32.mrf.mxu0 }
 0x544   :  { %v13686_v52 = vpop.f32.mrf.mxu1  ;;  %13989 = vmatmul.mubr.f32.gmra.mxu1 %v6261_v24  ;;  %v20159_v27 = vadd.f32 %v5929_v41, %v5544_v1  ;;  %v6266_v41 = vld [vmem:[#allocation2 + $0x272] sm:$0xff] }
 0x545   :  { %13991 = vmatprep.mubr.f32.mxu1 %v6262_v46  ;;  %v13811_v49 = vpop.f32.mrf.mxu0 }
 0x546   :  { %v5564_v23 = vpop.f32.mrf.mxu1  ;;  %14114 = vmatmul.mubr.f32.gmra.mxu0 %v19834_v39  ;;  %v20162_v54 = vadd.f32 %v13811_v49, %v13683_v61  ;;  %v6267_v49 = vld [vmem:[#allocation2 + $0x27a] sm:$0xff] }
 0x547   :  { %14116 = vmatprep.mubr.f32.mxu0 %v19837_v18  ;;  %v5939_v15 = vpop.f32.mrf.mxu0 }
 0x548   :  { %v13689_v5 = vpop.f32.mrf.mxu1  ;;  %13992 = vmatmul.mubr.f32.gmra.mxu1 %v6263_v48  ;;  %v20165_v17 = vadd.f32 %v5939_v15, %v5554_v36  ;;  %v6268_v15 = vld [vmem:[#allocation2 + $0x28a] sm:$0xff] }
 0x549   :  { %13994 = vmatprep.mubr.f32.mxu1 %v6264_v45  ;;  %v13814_v46 = vpop.f32.mrf.mxu0 }
 0x54a   :  { %v5574_v24 = vpop.f32.mrf.mxu1  ;;  %14117 = vmatmul.mubr.f32.gmra.mxu0 %v19844_v33  ;;  %v20168_v39 = vadd.f32 %v13814_v46, %v13686_v52  ;;  %v6269_v46 = vld [vmem:[#allocation2 + $0x292] sm:$0xff] }
 0x54b   :  { %14119 = vmatprep.mubr.f32.mxu0 %v19847_v13  ;;  %v5949_v61 = vpop.f32.mrf.mxu0 }
 0x54c   :  { %v13692_v1 = vpop.f32.mrf.mxu1  ;;  %13995 = vmatmul.mubr.f32.gmra.mxu1 %v6265_v56  ;;  %v20171_v18 = vadd.f32 %v5949_v61, %v5564_v23  ;;  %v6270_v61 = vld [vmem:[#allocation2 + $0x2a2] sm:$0xff] }
 0x54d   :  { %13997 = vmatprep.mubr.f32.mxu1 %v6266_v41  ;;  %v13817_v45 = vpop.f32.mrf.mxu0 }
 0x54e   :  { %v5584_v48 = vpop.f32.mrf.mxu1  ;;  %14120 = vmatmul.mubr.f32.gmra.mxu0 %v19854_v7  ;;  %v20174_v33 = vadd.f32 %v13817_v45, %v13689_v5  ;;  %v6271_v45 = vld [vmem:[#allocation2 + $0x2aa] sm:$0xff] }
 0x54f   :  { %14122 = vmatprep.mubr.f32.mxu0 %v19857_v11  ;;  %v5959_v52 = vpop.f32.mrf.mxu0 }
 0x550   :  { %v13695_v36 = vpop.f32.mrf.mxu1  ;;  %13998 = vmatmul.mubr.f32.gmra.mxu1 %v6267_v49  ;;  %v20177_v13 = vadd.f32 %v5959_v52, %v5574_v24  ;;  %v6272_v52 = vld [vmem:[#allocation2 + $0x2ba] sm:$0xff] }
 0x551   :  { %14000 = vmatprep.mubr.f32.mxu1 %v6268_v15  ;;  %v13820_v41 = vpop.f32.mrf.mxu0 }
 0x552   :  { %v5594_v56 = vpop.f32.mrf.mxu1  ;;  %14123 = vmatmul.mubr.f32.gmra.mxu0 %v19864_v37  ;;  %v20180_v7 = vadd.f32 %v13820_v41, %v13692_v1 }
 0x553   :  { %14125 = vmatprep.mubr.f32.mxu0 %v19867_v47  ;;  %v5969_v5 = vpop.f32.mrf.mxu0  ;;  %v20192_v47 = vld [vmem:[%s22970_s2 + $0x3f8] sm:$0xff] }
 0x554   :  { %v13698_v23 = vpop.f32.mrf.mxu1  ;;  %14001 = vmatmul.mubr.f32.gmra.mxu1 %v6269_v46  ;;  %v20183_v11 = vadd.f32 %v5969_v5, %v5584_v48  ;;  %14533 = vmatprep.subr.mxu0 %v20192_v47 }
 0x555   :  { %14003 = vmatprep.mubr.f32.mxu1 %v6270_v61  ;;  %v13823_v15 = vpop.f32.mrf.mxu0  ;;  %v6274_v61 = vld [vmem:[#allocation2 + $0x2d2] sm:$0xff] }
 0x556   :  { %v5604_v49 = vpop.f32.mrf.mxu1  ;;  %14126 = vmatmul.mubr.f32.gmra.mxu0 %v19880_v26  ;;  %v20186_v37 = vadd.f32 %v13823_v15, %v13695_v36  ;;  %v6273_v26 = vld [vmem:[#allocation2 + $0x2c2] sm:$0xff] }
 0x557   :  { %14128 = vmatprep.mubr.f32.mxu0 %v19883_v16  ;;  %v5979_v1 = vpop.f32.mrf.mxu0 }
 0x558   :  { %v13701_v24 = vpop.f32.mrf.mxu1  ;;  %14004 = vmatmul.mubr.f32.gmra.mxu1 %v6271_v45  ;;  %23577 = vst [vmem:[#allocation10_spill] sm:$0xff] %v20186_v37  ;;  %v20195_v46 = vadd.f32 %v5979_v1, %v5594_v56  ;;  %v6276_v1 = vld [vmem:[#allocation2 + $0x2ea] sm:$0xff] }
 0x559   :  { %14006 = vmatprep.mubr.f32.mxu1 %v6272_v52  ;;  %v13826_v41 = vpop.f32.mrf.mxu0  ;;  %v6275_v52 = vld [vmem:[#allocation2 + $0x2da] sm:$0xff] }
 0x55a   :  { %v5614_v48 = vpop.f32.mrf.mxu1  ;;  %14129 = vmatmul.mubr.f32.gmra.mxu0 %v19890_v55  ;;  %v20198_v16 = vadd.f32 %v13826_v41, %v13698_v23  ;;  %v6277_v41 = vld [vmem:[#allocation2 + $0x2f2] sm:$0xff] }
 0x55b   :  { %14131 = vmatprep.mubr.f32.mxu0 %v19893_v0  ;;  %v5989_v5 = vpop.f32.mrf.mxu0 }
 0x55c   :  { %v13704_v36 = vpop.f32.mrf.mxu1  ;;  %14007 = vmatmul.mubr.f32.gmra.mxu1 %v6273_v26  ;;  %v20201_v15 = vadd.f32 %v5989_v5, %v5604_v49  ;;  %v6278_v5 = vld [vmem:[#allocation2 + $0x302] sm:$0xff] }
 0x55d   :  { %14009 = vmatprep.mubr.f32.mxu1 %v6274_v61  ;;  %v13829_v37 = vpop.f32.mrf.mxu0 }
 0x55e   :  { %v5624_v45 = vpop.f32.mrf.mxu1  ;;  %14132 = vmatmul.mubr.f32.gmra.mxu0 %v19900_v8  ;;  %v20204_v55 = vadd.f32 %v13829_v37, %v13701_v24 }
 0x55f   :  { %14134 = vmatprep.mubr.f32.mxu0 %v19903_v4  ;;  %v5999_v23 = vpop.f32.mrf.mxu0 }
 0x560   :  { %v13707_v56 = vpop.f32.mrf.mxu1  ;;  %14010 = vmatmul.mubr.f32.gmra.mxu1 %v6275_v52  ;;  %v20207_v0 = vadd.f32 %v5999_v23, %v5614_v48  ;;  %v6279_v52 = vld [vmem:[#allocation2 + $0x30a] sm:$0xff]  ;;  %v6280_v23 = vld [vmem:[#allocation2 + $0x31a] sm:$0xff] }
 0x561   :  { %14012 = vmatprep.mubr.f32.mxu1 %v6276_v1  ;;  %v13832_v61 = vpop.f32.mrf.mxu0 }
 0x562   :  { %v5634_v26 = vpop.f32.mrf.mxu1  ;;  %14135 = vmatmul.mubr.f32.gmra.mxu0 %v19910_v25  ;;  %v20210_v8 = vadd.f32 %v13832_v61, %v13704_v36  ;;  %v6281_v61 = vld [vmem:[#allocation2 + $0x322] sm:$0xff] }
 0x563   :  { %14137 = vmatprep.mubr.f32.mxu0 %v19913_v40  ;;  %v6009_v24 = vpop.f32.mrf.mxu0 }
 0x564   :  { %v13710_v49 = vpop.f32.mrf.mxu1  ;;  %14013 = vmatmul.mubr.f32.gmra.mxu1 %v6277_v41  ;;  %v20213_v4 = vadd.f32 %v6009_v24, %v5624_v45  ;;  %v23581_v45 = vld [vmem:[#allocation5_spill] sm:$0xff] }
 0x565   :  { %14015 = vmatprep.mubr.f32.mxu1 %v6278_v5  ;;  %v13835_v1 = vpop.f32.mrf.mxu0 }
 0x566   :  { %v5644_v37 = vpop.f32.mrf.mxu1  ;;  %23578 = vst [vmem:[#allocation9_spill] sm:$0xff] %v20213_v4  ;;  %14138 = vmatmul.mubr.f32.gmra.mxu0 %v19918_v12  ;;  %v20216_v25 = vadd.f32 %v13835_v1, %v13707_v56  ;;  %v7276_v4 = vld [vmem:[#allocation2 + $0x19] sm:$0xff] }
 0x567   :  { %14140 = vmatprep.mubr.f32.mxu0 %v19921_v32  ;;  %v6019_v36 = vpop.f32.mrf.mxu0 }
 0x568   :  { %v13713_v48 = vpop.f32.mrf.mxu1  ;;  %14016 = vmatmul.mubr.f32.gmra.mxu1 %v6279_v52  ;;  %23579 = vst [vmem:[#allocation81_spill] sm:$0xff] %v20216_v25  ;;  %v20219_v40 = vadd.f32 %v6019_v36, %v5634_v26  ;;  %v23582_v52 = vld [vmem:[#allocation77_spill] sm:$0xff]  ;;  %v23584_v26 = vld [vmem:[#allocation8_spill] sm:$0xff] }
 0x569   :  { %14018 = vmatprep.mubr.f32.mxu1 %v6280_v23  ;;  %v13838_v5 = vpop.f32.mrf.mxu0  ;;  %v7277_v23 = vld [vmem:[#allocation2 + $0x21] sm:$0xff]  ;;  %v6809_v36 = vld [vmem:[#allocation2 + $0x330] sm:$0xff] }
 0x56a   :  { %v5654_v41 = vpop.f32.mrf.mxu1  ;;  %23580 = vst [vmem:[#allocation86_spill] sm:$0xff] %v20219_v40  ;;  %14141 = vmatmul.mubr.f32.gmra.mxu0 %v23581_v45  ;;  %v20222_v12 = vadd.f32 %v13838_v5, %v13710_v49  ;;  %v7278_v45 = vld [vmem:[#allocation2 + $0x31] sm:$0xff] }
 0x56b   :  { %14143 = vmatprep.mubr.f32.mxu0 %v23582_v52  ;;  %v6029_v56 = vpop.f32.mrf.mxu0  ;;  %v8413_v49 = vld [vmem:[%s22970_s2 + $0x370] sm:$0xff]  ;;  %v6810_v52 = vld [vmem:[#allocation2 + $0x338] sm:$0xff] }
 0x56c   :  { %v13716_v24 = vpop.f32.mrf.mxu1  ;;  %14019 = vmatmul.mubr.f32.gmra.mxu1 %v6281_v61  ;;  %v20225_v32 = vadd.f32 %v6029_v56, %v5644_v37  ;;  %v7279_v56 = vld [vmem:[#allocation2 + $0x39] sm:$0xff] }
 0x56d   :  { %14181 = vmatprep.mubr.f32.mxu1 %v7276_v4  ;;  %v13841_v25 = vpop.f32.mrf.mxu0 }
 0x56e   :  { %v5664_v1 = vpop.f32.mrf.mxu1  ;;  %23583 = vst [vmem:[#allocation12_spill] sm:$0xff] %v20225_v32  ;;  %14144 = vmatmul.mubr.f32.gmra.mxu0 %v23584_v26  ;;  %v20231_v61 = vadd.f32 %v13841_v25, %v13713_v48  ;;  %v7280_v32 = vld [vmem:[#allocation2 + $0x49] sm:$0xff] }
 0x56f   :  { %14146 = vmatprep.mubr.f32.mxu0 %v6809_v36  ;;  %v6039_v4 = vpop.f32.mrf.mxu0  ;;  %v8412_v48 = vld [vmem:[%s22970_s2 + $0x368] sm:$0xff]  ;;  %v23587_v36 = vld [vmem:[#allocation82_spill] sm:$0xff] }
 0x570   :  { %v13719_v40 = vpop.f32.mrf.mxu1  ;;  %14182 = vmatmul.mubr.f32.vlgmr.msra.gmra.mxu1 %v7277_v23  ;;  %23585 = vst [vmem:[#allocation11_spill] sm:$0xff] %v20231_v61  ;;  %v20234_v5 = vadd.f32 %v6039_v4, %v5654_v41  ;;  %v7281_v4 = vld [vmem:[#allocation2 + $0x51] sm:$0xff]  ;;  %v7282_v61 = vld [vmem:[#allocation2 + $0x61] sm:$0xff] }
 0x571   :  { %14184 = vmatprep.mubr.f32.mxu1 %v7278_v45  ;;  %14406 = vmatpush3.msra.mxu1 %v20128_v42  ;;  %v13844_v26 = vpop.f32.mrf.mxu0 }
 0x572   :  { %v5674_v37 = vpop.f32.mrf.mxu1  ;;  %23586 = vst [vmem:[#allocation83_spill] sm:$0xff] %v20234_v5  ;;  %14407 = vmatprep.subr.mxu1 %v8413_v49  ;;  %14147 = vmatmul.mubr.f32.gmra.mxu0 %v6810_v52  ;;  %v20239_v25 = vadd.f32 %v13844_v26, %v13716_v24  ;;  %v23589_v5 = vld [vmem:[#allocation7_spill] sm:$0xff] }
 0x573   :  { %14309 = vmatprep.mubr.f32.mxu0 %v23587_v36  ;;  %v6049_v42 = vpop.f32.mrf.mxu0  ;;  %14408 = vmatpush3.msra.mxu1 %v8413_v49  ;;  %v8411_v24 = vld [vmem:[%s22970_s2 + $0x360] sm:$0xff]  ;;  %v7283_v36 = vld [vmem:[#allocation2 + $0x69] sm:$0xff] }
 0x574   :  { %v13722_v23 = vpop.f32.mrf.mxu1  ;;  %14185 = vmatmul.mubr.f32.gmra.mxu1 %v7279_v56  ;;  %v20242_v45 = vadd.f32 %v6049_v42, %v5664_v1  ;;  %14409 = vmatprep.subr.mxu1 %v8412_v48 }
 0x575   :  { %14187 = vmatprep.mubr.f32.mxu1 %v7280_v32  ;;  %v13847_v52 = vpop.f32.mrf.mxu0  ;;  %v8942_v32 = vld [vmem:[%s22970_s2 + $0x3f0] sm:$0xff]  ;;  %14410 = vmatpush3.msra.mxu1 %v8412_v48 }
 0x576   :  { %v5684_v41 = vpop.f32.mrf.mxu1  ;;  %23588 = vst [vmem:[#allocation88_spill] sm:$0xff] %v20242_v45  ;;  %14310 = vmatmul.mubr.f32.vlgmr.msra.gmra.mxu0 %v23589_v5  ;;  %v20251_v26 = vadd.f32 %v13847_v52, %v13719_v40  ;;  %14411 = vmatprep.subr.mxu1 %v8411_v24  ;;  %v7284_v40 = vld [vmem:[#allocation2 + $0x79] sm:$0xff] }
 0x577   :  { %14312 = vmatprep.mubr.f32.mxu0 %v19943_v19  ;;  %v6059_v1 = vpop.f32.mrf.mxu0  ;;  %14534 = vmatpush3.msra.mxu0 %v20192_v47  ;;  %v8410_v19 = vld [vmem:[%s22970_s2 + $0x358] sm:$0xff] }
 0x578   :  { %v13725_v56 = vpop.f32.mrf.mxu1  ;;  %14188 = vmatmul.mubr.f32.gmra.mxu1 %v7281_v4  ;;  %v20255_v5 = vadd.f32 %v6059_v1, %v5674_v37  ;;  %14535 = vmatprep.subr.mxu0 %v8942_v32  ;;  %v23591_v4 = vld [vmem:[#allocation79_spill] sm:$0xff] }
 0x579   :  { %14190 = vmatprep.mubr.f32.mxu1 %v7282_v61  ;;  %v13850_v42 = vpop.f32.mrf.mxu0  ;;  %v8941_v61 = vld [vmem:[%s22970_s2 + $0x3e8] sm:$0xff]  ;;  %14412 = vmatpush3.msra.mxu1 %v8411_v24 }
 0x57a   :  { %v5694_v49 = vpop.f32.mrf.mxu1  ;;  %23590 = vst [vmem:[#allocation14_spill] sm:$0xff] %v20255_v5  ;;  %14313 = vmatmul.mubr.f32.gmra.mxu0 %v23591_v4  ;;  %v20264_v47 = vadd.f32 %v13850_v42, %v13722_v23  ;;  %v7285_v1 = vld [vmem:[#allocation2 + $0x81] sm:$0xff]  ;;  %14413 = vmatprep.subr.mxu1 %v8410_v19  ;;  %v7286_v5 = vld [vmem:[#allocation2 + $0x91] sm:$0xff]  ;;  %v7287_v42 = vld [vmem:[#allocation2 + $0x99] sm:$0xff] }
 0x57b   :  { %14315 = vmatprep.mubr.f32.mxu0 %v19954_v29  ;;  %v6069_v37 = vpop.f32.mrf.mxu0  ;;  %14536 = vmatpush3.msra.mxu0 %v8942_v32  ;;  %v8409_v29 = vld [vmem:[%s22970_s2 + $0x350] sm:$0xff]  ;;  %v8940_v23 = vld [vmem:[%s22970_s2 + $0x3e0] sm:$0xff] }
 0x57c   :  { %v13728_v45 = vpop.f32.mrf.mxu1  ;;  %14191 = vmatmul.mubr.f32.gmra.mxu1 %v7283_v36  ;;  %v20267_v52 = vadd.f32 %v6069_v37, %v5684_v41  ;;  %14537 = vmatprep.subr.mxu0 %v8941_v61 }
 0x57d   :  { %14193 = vmatprep.mubr.f32.mxu1 %v7284_v40  ;;  %v13853_v36 = vpop.f32.mrf.mxu0  ;;  %14414 = vmatpush3.msra.mxu1 %v8410_v19 }
 0x57e   :  { %v5704_v48 = vpop.f32.mrf.mxu1  ;;  %14316 = vmatmul.mubr.f32.gmra.mxu0 %v19965_v38  ;;  %v20276_v24 = vadd.f32 %v13853_v36, %v13725_v56  ;;  %14415 = vmatprep.subr.mxu1 %v8409_v29  ;;  %v8939_v56 = vld [vmem:[%s22970_s2 + $0x3d8] sm:$0xff] }
 0x57f   :  { %14318 = vmatprep.mubr.f32.mxu0 %v19969_v31  ;;  %v6079_v41 = vpop.f32.mrf.mxu0  ;;  %14538 = vmatpush3.msra.mxu0 %v8941_v61  ;;  %v8408_v31 = vld [vmem:[%s22970_s2 + $0x348] sm:$0xff]  ;;  %v7289_v61 = vld [vmem:[#allocation2 + $0xb1] sm:$0xff] }
 0x580   :  { %v13731_v4 = vpop.f32.mrf.mxu1  ;;  %14194 = vmatmul.mubr.f32.gmra.mxu1 %v7285_v1  ;;  %v20279_v38 = vadd.f32 %v6079_v41, %v5694_v49  ;;  %14539 = vmatprep.subr.mxu0 %v8940_v23  ;;  %v7288_v1 = vld [vmem:[#allocation2 + $0xa9] sm:$0xff] }
 0x581   :  { %14196 = vmatprep.mubr.f32.mxu1 %v7286_v5  ;;  %v13856_v40 = vpop.f32.mrf.mxu0  ;;  %14416 = vmatpush3.msra.mxu1 %v8409_v29 }
 0x582   :  { %v5714_v32 = vpop.f32.mrf.mxu1  ;;  %14319 = vmatmul.mubr.f32.gmra.mxu0 %v19979_v14  ;;  %v20288_v5 = vadd.f32 %v13856_v40, %v13728_v45  ;;  %14417 = vmatprep.subr.mxu1 %v8408_v31  ;;  %v8938_v45 = vld [vmem:[%s22970_s2 + $0x3d0] sm:$0xff] }
 0x583   :  { %14321 = vmatprep.mubr.f32.mxu0 %v19983_v9  ;;  %v6089_v49 = vpop.f32.mrf.mxu0  ;;  %14540 = vmatpush3.msra.mxu0 %v8940_v23  ;;  %v8407_v9 = vld [vmem:[%s22970_s2 + $0x340] sm:$0xff]  ;;  %v7291_v40 = vld [vmem:[#allocation2 + $0xc9] sm:$0xff] }
 0x584   :  { %v13734_v37 = vpop.f32.mrf.mxu1  ;;  %14197 = vmatmul.mubr.f32.gmra.mxu1 %v7287_v42  ;;  %v20291_v14 = vadd.f32 %v6089_v49, %v5704_v48  ;;  %14541 = vmatprep.subr.mxu0 %v8939_v56  ;;  %v7290_v42 = vld [vmem:[#allocation2 + $0xc1] sm:$0xff] }
 0x585   :  { %14199 = vmatprep.mubr.f32.mxu1 %v7288_v1  ;;  %v13859_v36 = vpop.f32.mrf.mxu0  ;;  %14418 = vmatpush3.msra.mxu1 %v8408_v31 }
 0x586   :  { %v5724_v19 = vpop.f32.mrf.mxu1  ;;  %14322 = vmatmul.mubr.f32.gmra.mxu0 %v19993_v43  ;;  %v20300_v29 = vadd.f32 %v13859_v36, %v13731_v4  ;;  %14419 = vmatprep.subr.mxu1 %v8407_v9  ;;  %v8937_v4 = vld [vmem:[%s22970_s2 + $0x3c8] sm:$0xff] }
 0x587   :  { %14324 = vmatprep.mubr.f32.mxu0 %v19997_v50  ;;  %v6099_v48 = vpop.f32.mrf.mxu0  ;;  %14542 = vmatpush3.msra.mxu0 %v8939_v56  ;;  %v8406_v50 = vld [vmem:[%s22970_s2 + $0x338] sm:$0xff]  ;;  %v7293_v36 = vld [vmem:[#allocation2 + $0xe1] sm:$0xff] }
 0x588   :  { %v13737_v41 = vpop.f32.mrf.mxu1  ;;  %14200 = vmatmul.mubr.f32.gmra.mxu1 %v7289_v61  ;;  %v20303_v43 = vadd.f32 %v6099_v48, %v5714_v32  ;;  %14543 = vmatprep.subr.mxu0 %v8938_v45  ;;  %v7292_v61 = vld [vmem:[#allocation2 + $0xd9] sm:$0xff] }
 0x589   :  { %14202 = vmatprep.mubr.f32.mxu1 %v7290_v42  ;;  %v13862_v1 = vpop.f32.mrf.mxu0  ;;  %14420 = vmatpush3.msra.mxu1 %v8407_v9 }
 0x58a   :  { %v5734_v23 = vpop.f32.mrf.mxu1  ;;  %14325 = vmatmul.mubr.f32.gmra.mxu0 %v20007_v21  ;;  %v20312_v31 = vadd.f32 %v13862_v1, %v13734_v37  ;;  %14421 = vmatprep.subr.mxu1 %v8406_v50  ;;  %v8936_v37 = vld [vmem:[%s22970_s2 + $0x3c0] sm:$0xff] }
 0x58b   :  { %14327 = vmatprep.mubr.f32.mxu0 %v20011_v58  ;;  %v6109_v32 = vpop.f32.mrf.mxu0  ;;  %14544 = vmatpush3.msra.mxu0 %v8938_v45  ;;  %v8405_v58 = vld [vmem:[%s22970_s2 + $0x330] sm:$0xff]  ;;  %v7295_v1 = vld [vmem:[#allocation2 + $0xf9] sm:$0xff] }
 0x58c   :  { %v13740_v49 = vpop.f32.mrf.mxu1  ;;  %14203 = vmatmul.mubr.f32.gmra.mxu1 %v7291_v40  ;;  %v20315_v21 = vadd.f32 %v6109_v32, %v5724_v19  ;;  %14545 = vmatprep.subr.mxu0 %v8937_v4  ;;  %v7294_v40 = vld [vmem:[#allocation2 + $0xf1] sm:$0xff] }
 0x58d   :  { %14205 = vmatprep.mubr.f32.mxu1 %v7292_v61  ;;  %v13865_v42 = vpop.f32.mrf.mxu0  ;;  %14422 = vmatpush3.msra.mxu1 %v8406_v50 }
 0x58e   :  { %v5744_v56 = vpop.f32.mrf.mxu1  ;;  %14328 = vmatmul.mubr.f32.gmra.mxu0 %v20021_v60  ;;  %v20324_v9 = vadd.f32 %v13865_v42, %v13737_v41  ;;  %14423 = vmatprep.subr.mxu1 %v8405_v58  ;;  %v8935_v41 = vld [vmem:[%s22970_s2 + $0x3b8] sm:$0xff] }
 0x58f   :  { %14330 = vmatprep.mubr.f32.mxu0 %v20025_v10  ;;  %v6119_v19 = vpop.f32.mrf.mxu0  ;;  %14546 = vmatpush3.msra.mxu0 %v8937_v4  ;;  %v8404_v10 = vld [vmem:[%s22970_s2 + $0x328] sm:$0xff]  ;;  %v7297_v42 = vld [vmem:[#allocation2 + $0x111] sm:$0xff] }
 0x590   :  { %v13743_v48 = vpop.f32.mrf.mxu1  ;;  %14206 = vmatmul.mubr.f32.gmra.mxu1 %v7293_v36  ;;  %v20327_v60 = vadd.f32 %v6119_v19, %v5734_v23  ;;  %14547 = vmatprep.subr.mxu0 %v8936_v37  ;;  %v7296_v36 = vld [vmem:[#allocation2 + $0x109] sm:$0xff] }
 0x591   :  { %14208 = vmatprep.mubr.f32.mxu1 %v7294_v40  ;;  %v13868_v61 = vpop.f32.mrf.mxu0  ;;  %14424 = vmatpush3.msra.mxu1 %v8405_v58 }
 0x592   :  { %v5754_v45 = vpop.f32.mrf.mxu1  ;;  %14331 = vmatmul.mubr.f32.gmra.mxu0 %v20035_v30  ;;  %v20336_v50 = vadd.f32 %v13868_v61, %v13740_v49  ;;  %14425 = vmatprep.subr.mxu1 %v8404_v10  ;;  %v8934_v49 = vld [vmem:[%s22970_s2 + $0x3b0] sm:$0xff] }
 0x593   :  { %14333 = vmatprep.mubr.f32.mxu0 %v20039_v3  ;;  %v6129_v23 = vpop.f32.mrf.mxu0  ;;  %14548 = vmatpush3.msra.mxu0 %v8936_v37  ;;  %v8403_v3 = vld [vmem:[%s22970_s2 + $0x320] sm:$0xff]  ;;  %v7299_v61 = vld [vmem:[#allocation2 + $0x129] sm:$0xff] }
 0x594   :  { %v13746_v32 = vpop.f32.mrf.mxu1  ;;  %14209 = vmatmul.mubr.f32.gmra.mxu1 %v7295_v1  ;;  %v20339_v30 = vadd.f32 %v6129_v23, %v5744_v56  ;;  %14549 = vmatprep.subr.mxu0 %v8935_v41  ;;  %v7298_v1 = vld [vmem:[#allocation2 + $0x121] sm:$0xff] }
 0x595   :  { %14211 = vmatprep.mubr.f32.mxu1 %v7296_v36  ;;  %v13871_v40 = vpop.f32.mrf.mxu0  ;;  %14426 = vmatpush3.msra.mxu1 %v8404_v10 }
 0x596   :  { %v5764_v4 = vpop.f32.mrf.mxu1  ;;  %14334 = vmatmul.mubr.f32.gmra.mxu0 %v20049_v59  ;;  %v20348_v58 = vadd.f32 %v13871_v40, %v13743_v48  ;;  %14427 = vmatprep.subr.mxu1 %v8403_v3  ;;  %v8933_v48 = vld [vmem:[%s22970_s2 + $0x3a8] sm:$0xff] }
 0x597   :  { %14336 = vmatprep.mubr.f32.mxu0 %v20053_v2  ;;  %v6139_v56 = vpop.f32.mrf.mxu0  ;;  %14550 = vmatpush3.msra.mxu0 %v8935_v41  ;;  %v8402_v2 = vld [vmem:[%s22970_s2 + $0x318] sm:$0xff]  ;;  %v7301_v40 = vld [vmem:[#allocation2 + $0x141] sm:$0xff] }
 0x598   :  { %v13749_v19 = vpop.f32.mrf.mxu1  ;;  %14212 = vmatmul.mubr.f32.gmra.mxu1 %v7297_v42  ;;  %v20351_v59 = vadd.f32 %v6139_v56, %v5754_v45  ;;  %14551 = vmatprep.subr.mxu0 %v8934_v49  ;;  %v7300_v42 = vld [vmem:[#allocation2 + $0x139] sm:$0xff] }
 0x599   :  { %14214 = vmatprep.mubr.f32.mxu1 %v7298_v1  ;;  %v13874_v36 = vpop.f32.mrf.mxu0  ;;  %14428 = vmatpush3.msra.mxu1 %v8403_v3 }
 0x59a   :  { %v5774_v37 = vpop.f32.mrf.mxu1  ;;  %14337 = vmatmul.mubr.f32.gmra.mxu0 %v20063_v63  ;;  %v20360_v10 = vadd.f32 %v13874_v36, %v13746_v32  ;;  %14429 = vmatprep.subr.mxu1 %v8402_v2  ;;  %v8932_v32 = vld [vmem:[%s22970_s2 + $0x3a0] sm:$0xff] }
 0x59b   :  { %14339 = vmatprep.mubr.f32.mxu0 %v20067_v28  ;;  %v6149_v45 = vpop.f32.mrf.mxu0  ;;  %14552 = vmatpush3.msra.mxu0 %v8934_v49  ;;  %v8401_v28 = vld [vmem:[%s22970_s2 + $0x310] sm:$0xff]  ;;  %v7303_v36 = vld [vmem:[#allocation2 + $0x159] sm:$0xff] }
 0x59c   :  { %v13752_v23 = vpop.f32.mrf.mxu1  ;;  %14215 = vmatmul.mubr.f32.gmra.mxu1 %v7299_v61  ;;  %23592 = vst [vmem:[#allocation13_spill] sm:$0xff] %v20360_v10  ;;  %v20363_v63 = vadd.f32 %v6149_v45, %v5764_v4  ;;  %14553 = vmatprep.subr.mxu0 %v8933_v48  ;;  %v7302_v61 = vld [vmem:[#allocation2 + $0x151] sm:$0xff]  ;;  %v23596_v45 = vld [vmem:[#allocation84_spill] sm:$0xff]  ;;  %v7312_v10 = vld [vmem:[#allocation2 + $0x1f9] sm:$0xff] }
 0x59d   :  { %14217 = vmatprep.mubr.f32.mxu1 %v7300_v42  ;;  %v13877_v1 = vpop.f32.mrf.mxu0  ;;  %14430 = vmatpush3.msra.mxu1 %v8402_v2 }
 0x59e   :  { %v5784_v41 = vpop.f32.mrf.mxu1  ;;  %23593 = vst [vmem:[#allocation85_spill] sm:$0xff] %v20363_v63  ;;  %14340 = vmatmul.mubr.f32.gmra.mxu0 %v20077_v57  ;;  %v20372_v3 = vadd.f32 %v13877_v1, %v13749_v19  ;;  %14431 = vmatprep.subr.mxu1 %v8401_v28  ;;  %v7304_v63 = vld [vmem:[#allocation2 + $0x169] sm:$0xff]  ;;  %v8931_v19 = vld [vmem:[%s22970_s2 + $0x398] sm:$0xff] }
 0x59f   :  { %14342 = vmatprep.mubr.f32.mxu0 %v20081_v20  ;;  %v6159_v4 = vpop.f32.mrf.mxu0  ;;  %14554 = vmatpush3.msra.mxu0 %v8933_v48  ;;  %v8400_v20 = vld [vmem:[%s22970_s2 + $0x308] sm:$0xff] }
 0x5a0   :  { %v13755_v56 = vpop.f32.mrf.mxu1  ;;  %14218 = vmatmul.mubr.f32.gmra.mxu1 %v7301_v40  ;;  %23594 = vst [vmem:[#allocation90_spill] sm:$0xff] %v20372_v3  ;;  %v20375_v57 = vadd.f32 %v6159_v4, %v5774_v37  ;;  %14555 = vmatprep.subr.mxu0 %v8932_v32  ;;  %v7831_v4 = vld [vmem:[#allocation2 + $0x152] sm:$0xff]  ;;  %v7308_v3 = vld [vmem:[#allocation2 + $0x1c9] sm:$0xff] }
 0x5a1   :  { %14220 = vmatprep.mubr.f32.mxu1 %v7302_v61  ;;  %v13880_v42 = vpop.f32.mrf.mxu0  ;;  %14432 = vmatpush3.msra.mxu1 %v8401_v28  ;;  %v7830_v61 = vld [vmem:[#allocation2 + $0x142] sm:$0xff] }
 0x5a2   :  { %v5794_v49 = vpop.f32.mrf.mxu1  ;;  %23595 = vst [vmem:[#allocation45_spill] sm:$0xff] %v20375_v57  ;;  %14343 = vmatmul.mubr.f32.gmra.mxu0 %v23596_v45  ;;  %v20384_v2 = vadd.f32 %v13880_v42, %v13752_v23  ;;  %14433 = vmatprep.subr.mxu1 %v8400_v20  ;;  %v7306_v23 = vld [vmem:[#allocation2 + $0x181] sm:$0xff] }
 0x5a3   :  { %14345 = vmatprep.mubr.f32.mxu0 %v20095_v62  ;;  %v6169_v37 = vpop.f32.mrf.mxu0  ;;  %14556 = vmatpush3.msra.mxu0 %v8932_v32  ;;  %v8399_v62 = vld [vmem:[%s22970_s2 + $0x300] sm:$0xff] }
 0x5a4   :  { %v13758_v40 = vpop.f32.mrf.mxu1  ;;  %14221 = vmatmul.mubr.f32.gmra.mxu1 %v7303_v36  ;;  %23597 = vst [vmem:[#allocation44_spill] sm:$0xff] %v20384_v2  ;;  %v20387_v1 = vadd.f32 %v6169_v37, %v5784_v41  ;;  %v7305_v36 = vld [vmem:[#allocation2 + $0x171] sm:$0xff]  ;;  %14557 = vmatprep.subr.mxu0 %v8931_v19  ;;  %v7832_v37 = vld [vmem:[#allocation2 + $0x15a] sm:$0xff] }
 0x5a5   :  { %14223 = vmatprep.mubr.f32.mxu1 %v7304_v63  ;;  %v13883_v45 = vpop.f32.mrf.mxu0  ;;  %v8930_v63 = vld [vmem:[%s22970_s2 + $0x390] sm:$0xff]  ;;  %14434 = vmatpush3.msra.mxu1 %v8400_v20  ;;  %v20405_v20 = vld [vmem:[%s22970_s2 + $0x478] sm:$0xff] }
 0x5a6   :  { %v5804_v48 = vpop.f32.mrf.mxu1  ;;  %23598 = vst [vmem:[#allocation87_spill] sm:$0xff] %v20387_v1  ;;  %14346 = vmatmul.mubr.f32.gmra.mxu0 %v7830_v61  ;;  %v20395_v41 = vadd.f32 %v13883_v45, %v13755_v56  ;;  %v7833_v61 = vld [vmem:[#allocation2 + $0x16a] sm:$0xff]  ;;  %14435 = vmatprep.subr.mxu1 %v8399_v62 }
 0x5a7   :  { %14348 = vmatprep.mubr.f32.mxu0 %v7831_v4  ;;  %v6179_v28 = vpop.f32.mrf.mxu0  ;;  %14558 = vmatpush3.msra.mxu0 %v8931_v19  ;;  %v8929_v56 = vld [vmem:[%s22970_s2 + $0x388] sm:$0xff] }
 0x5a8   :  { %v13761_v57 = vpop.f32.mrf.mxu1  ;;  %14224 = vmatmul.mubr.f32.gmra.mxu1 %v7305_v36  ;;  %23599 = vst [vmem:[#allocation92_spill] sm:$0xff] %v20395_v41  ;;  %v20397_v42 = vadd.f32 %v6179_v28, %v5794_v49  ;;  %v7307_v36 = vld [vmem:[#allocation2 + $0x189] sm:$0xff]  ;;  %14559 = vmatprep.subr.mxu0 %v8930_v63  ;;  %v7309_v28 = vld [vmem:[#allocation2 + $0x1d1] sm:$0xff] }
 0x5a9   :  { %14226 = vmatprep.mubr.f32.mxu1 %v7306_v23  ;;  %v13886_v1 = vpop.f32.mrf.mxu0  ;;  %14436 = vmatpush3.msra.mxu1 %v8399_v62  ;;  %v7834_v23 = vld [vmem:[#allocation2 + $0x172] sm:$0xff] }
 0x5aa   :  { %v5814_v32 = vpop.f32.mrf.mxu1  ;;  %23600 = vst [vmem:[#allocation47_spill] sm:$0xff] %v20397_v42  ;;  %14349 = vmatmul.mubr.f32.gmra.mxu0 %v7832_v37  ;;  %v20407_v49 = vadd.f32 %v13886_v1, %v13758_v40  ;;  %14661 = vmatprep.subr.mxu1 %v20405_v20  ;;  %v7310_v40 = vld [vmem:[#allocation2 + $0x1e1] sm:$0xff] }
 0x5ab   :  { %14351 = vmatprep.mubr.f32.mxu0 %v7833_v61  ;;  %v6189_v19 = vpop.f32.mrf.mxu0  ;;  %14560 = vmatpush3.msra.mxu0 %v8930_v63 }
 0x5ac   :  { %v13764_v2 = vpop.f32.mrf.mxu1  ;;  %14227 = vmatmul.mubr.f32.gmra.mxu1 %v7307_v36  ;;  %23601 = vst [vmem:[#allocation46_spill] sm:$0xff] %v20407_v49  ;;  %v20409_v45 = vadd.f32 %v6189_v19, %v5804_v48  ;;  %14561 = vmatprep.subr.mxu0 %v8929_v56  ;;  %v7835_v36 = vld [vmem:[#allocation2 + $0x182] sm:$0xff]  ;;  %v23603_v48 = vld [vmem:[#allocation6_spill] sm:$0xff]  ;;  %v7837_v49 = vld [vmem:[#allocation2 + $0x1ca] sm:$0xff] }
 0x5ad   :  { %14229 = vmatprep.mubr.f32.mxu1 %v7308_v3  ;;  %v13889_v37 = vpop.f32.mrf.mxu0  ;;  %v8928_v3 = vld [vmem:[%s22970_s2 + $0x380] sm:$0xff]  ;;  %14562 = vmatpush3.msra.mxu0 %v8929_v56 }
 0x5ae   :  { %v5824_v4 = vpop.f32.mrf.mxu1  ;;  %23602 = vst [vmem:[#allocation89_spill] sm:$0xff] %v20409_v45  ;;  %14352 = vmatmul.mubr.f32.gmra.mxu0 %v7834_v23  ;;  %v20415_v1 = vadd.f32 %v13889_v37, %v13761_v57  ;;  %v7836_v23 = vld [vmem:[#allocation2 + $0x18a] sm:$0xff]  ;;  %14563 = vmatprep.subr.mxu0 %v8928_v3 }
 0x5af   :  { %14354 = vmatprep.mubr.f32.mxu0 %v7835_v36  ;;  %v6199_v63 = vpop.f32.mrf.mxu0  ;;  %v7311_v45 = vld [vmem:[#allocation2 + $0x1e9] sm:$0xff]  ;;  %14564 = vmatpush3.msra.mxu0 %v8928_v3 }
 0x5b0   :  { %v13927_v42 = vpop.f32.mrf.mxu1  ;;  %14230 = vmatmul.mubr.f32.gmra.mxu1 %v7309_v28  ;;  %v20418_v19 = vadd.f32 %v6199_v63, %v5814_v32  ;;  %v5900_v32 = vadd.f32 %v20141_v22, %v20136_v35  ;;  %v7313_v63 = vld [vmem:[#allocation2 + $0x201] sm:$0xff]  ;;  %v7840_v3 = vld [vmem:[#allocation2 + $0x1ea] sm:$0xff] }
 0x5b1   :  { %v6684_v62 = vadd.f32 %v13927_v42, %v23603_v48  ;;  %14232 = vmatprep.mubr.f32.mxu1 %v7310_v40  ;;  %v7838_v40 = vld [vmem:[#allocation2 + $0x1d2] sm:$0xff] }
 0x5b2   :  { %v6364_v61 = vpop.f32.mrf.mxu1  ;;  %v13892_v28 = vpop.f32.mrf.mxu0  ;;  %14355 = vmatmul.mubr.f32.gmra.mxu0 %v7836_v23 }
 0x5b3   :  { %v20420_v57 = vadd.f32 %v13892_v28, %v13764_v2  ;;  %14357 = vmatprep.mubr.f32.mxu0 %v7837_v49  ;;  %v7839_v2 = vld [vmem:[#allocation2 + $0x1e2] sm:$0xff]  ;;  %v7314_v49 = vld [vmem:[#allocation2 + $0x211] sm:$0xff]  ;;  %v7315_v28 = vld [vmem:[#allocation2 + $0x219] sm:$0xff] }
 0x5b4   :  { %v13930_v41 = vpop.f32.mrf.mxu1  ;;  %14233 = vmatmul.mubr.f32.gmra.mxu1 %v7311_v45  ;;  %v6209_v37 = vpop.f32.mrf.mxu0 }
 0x5b5   :  { %v6686_v42 = vadd.f32 %v13930_v41, %v20144_v34  ;;  %14235 = vmatprep.mubr.f32.mxu1 %v7312_v10  ;;  %v20425_v56 = vadd.f32 %v6209_v37, %v5824_v4  ;;  %v6683_v10 = vadd.f32 %v6364_v61, %v5900_v32 }
 0x5b6   :  { %v6374_v36 = vpop.f32.mrf.mxu1  ;;  %v14055_v45 = vpop.f32.mrf.mxu0  ;;  %14358 = vmatmul.mubr.f32.gmra.mxu0 %v7838_v40 }
 0x5b7   :  { %v6685_v48 = vadd.f32 %v6374_v36, %v20147_v53  ;;  %v20428_v34 = vadd.f32 %v14055_v45, %v6684_v62  ;;  %14360 = vmatprep.mubr.f32.mxu0 %v7839_v2  ;;  %v7841_v36 = vld [vmem:[#allocation2 + $0x1fa] sm:$0xff]  ;;  %v7316_v62 = vld [vmem:[#allocation2 + $0x229] sm:$0xff] }
 0x5b8   :  { %v13933_v23 = vpop.f32.mrf.mxu1  ;;  %14236 = vmatmul.mubr.f32.gmra.mxu1 %v7313_v63  ;;  %v6893_v35 = vpop.f32.mrf.mxu0  ;;  %v7842_v2 = vld [vmem:[#allocation2 + $0x202] sm:$0xff] }
 0x5b9   :  { %v6688_v41 = vadd.f32 %v13933_v23, %v20150_v6  ;;  %14238 = vmatprep.mubr.f32.mxu1 %v7314_v49  ;;  %v20431_v4 = vadd.f32 %v6893_v35, %v6683_v10  ;;  %v7317_v23 = vld [vmem:[#allocation2 + $0x231] sm:$0xff] }
 0x5ba   :  { %v6384_v22 = vpop.f32.mrf.mxu1  ;;  %v14058_v37 = vpop.f32.mrf.mxu0  ;;  %14361 = vmatmul.mubr.f32.gmra.mxu0 %v7840_v3  ;;  %v7843_v10 = vld [vmem:[#allocation2 + $0x212] sm:$0xff] }
 0x5bb   :  { %v6687_v53 = vadd.f32 %v6384_v22, %v20153_v51  ;;  %v20434_v63 = vadd.f32 %v14058_v37, %v6686_v42  ;;  %14363 = vmatprep.mubr.f32.mxu0 %v7841_v36  ;;  %v7318_v22 = vld [vmem:[#allocation2 + $0x241] sm:$0xff]  ;;  %v7319_v36 = vld [vmem:[#allocation2 + $0x249] sm:$0xff] }
 0x5bc   :  { %v13936_v40 = vpop.f32.mrf.mxu1  ;;  %14239 = vmatmul.mubr.f32.gmra.mxu1 %v7315_v28  ;;  %v6903_v61 = vpop.f32.mrf.mxu0  ;;  %v7844_v37 = vld [vmem:[#allocation2 + $0x21a] sm:$0xff] }
 0x5bd   :  { %v6690_v6 = vadd.f32 %v13936_v40, %v20156_v44  ;;  %14241 = vmatprep.mubr.f32.mxu1 %v7316_v62  ;;  %v20437_v45 = vadd.f32 %v6903_v61, %v6685_v48  ;;  %v7845_v62 = vld [vmem:[#allocation2 + $0x22a] sm:$0xff] }
 0x5be   :  { %v6394_v32 = vpop.f32.mrf.mxu1  ;;  %v14061_v49 = vpop.f32.mrf.mxu0  ;;  %14364 = vmatmul.mubr.f32.gmra.mxu0 %v7842_v2 }
 0x5bf   :  { %v6689_v51 = vadd.f32 %v6394_v32, %v20159_v27  ;;  %v20440_v42 = vadd.f32 %v14061_v49, %v6688_v41  ;;  %14366 = vmatprep.mubr.f32.mxu0 %v7843_v10  ;;  %v7320_v32 = vld [vmem:[#allocation2 + $0x259] sm:$0xff]  ;;  %v7321_v10 = vld [vmem:[#allocation2 + $0x261] sm:$0xff] }
 0x5c0   :  { %v13939_v35 = vpop.f32.mrf.mxu1  ;;  %14242 = vmatmul.mubr.f32.gmra.mxu1 %v7317_v23  ;;  %v6913_v3 = vpop.f32.mrf.mxu0  ;;  %v7846_v49 = vld [vmem:[#allocation2 + $0x232] sm:$0xff] }
 0x5c1   :  { %v6692_v44 = vadd.f32 %v13939_v35, %v20162_v54  ;;  %14244 = vmatprep.mubr.f32.mxu1 %v7318_v22  ;;  %v20443_v48 = vadd.f32 %v6913_v3, %v6687_v53  ;;  %v7847_v22 = vld [vmem:[#allocation2 + $0x242] sm:$0xff] }
 0x5c2   :  { %v6404_v28 = vpop.f32.mrf.mxu1  ;;  %v14064_v40 = vpop.f32.mrf.mxu0  ;;  %14367 = vmatmul.mubr.f32.gmra.mxu0 %v7844_v37 }
 0x5c3   :  { %v6691_v27 = vadd.f32 %v6404_v28, %v20165_v17  ;;  %v20446_v41 = vadd.f32 %v14064_v40, %v6690_v6  ;;  %14369 = vmatprep.mubr.f32.mxu0 %v7845_v62  ;;  %v7322_v28 = vld [vmem:[#allocation2 + $0x271] sm:$0xff]  ;;  %v7323_v62 = vld [vmem:[#allocation2 + $0x279] sm:$0xff] }
 0x5c4   :  { %v13942_v61 = vpop.f32.mrf.mxu1  ;;  %14245 = vmatmul.mubr.f32.gmra.mxu1 %v7319_v36  ;;  %v6923_v2 = vpop.f32.mrf.mxu0  ;;  %v7848_v40 = vld [vmem:[#allocation2 + $0x24a] sm:$0xff] }
 0x5c5   :  { %v6694_v54 = vadd.f32 %v13942_v61, %v20168_v39  ;;  %14247 = vmatprep.mubr.f32.mxu1 %v7320_v32  ;;  %v20449_v53 = vadd.f32 %v6923_v2, %v6689_v51  ;;  %v7849_v32 = vld [vmem:[#allocation2 + $0x25a] sm:$0xff] }
 0x5c6   :  { %v6414_v23 = vpop.f32.mrf.mxu1  ;;  %v14067_v35 = vpop.f32.mrf.mxu0  ;;  %14370 = vmatmul.mubr.f32.gmra.mxu0 %v7846_v49 }
 0x5c7   :  { %v6693_v17 = vadd.f32 %v6414_v23, %v20171_v18  ;;  %v20452_v6 = vadd.f32 %v14067_v35, %v6692_v44  ;;  %14372 = vmatprep.mubr.f32.mxu0 %v7847_v22  ;;  %v7324_v23 = vld [vmem:[#allocation2 + $0x289] sm:$0xff]  ;;  %v7325_v22 = vld [vmem:[#allocation2 + $0x291] sm:$0xff] }
 0x5c8   :  { %v13945_v3 = vpop.f32.mrf.mxu1  ;;  %14248 = vmatmul.mubr.f32.gmra.mxu1 %v7321_v10  ;;  %v6933_v37 = vpop.f32.mrf.mxu0  ;;  %v7850_v35 = vld [vmem:[#allocation2 + $0x262] sm:$0xff] }
 0x5c9   :  { %v6696_v39 = vadd.f32 %v13945_v3, %v20174_v33  ;;  %14250 = vmatprep.mubr.f32.mxu1 %v7322_v28  ;;  %v20455_v51 = vadd.f32 %v6933_v37, %v6691_v27  ;;  %v7851_v28 = vld [vmem:[#allocation2 + $0x272] sm:$0xff] }
 0x5ca   :  { %v6424_v36 = vpop.f32.mrf.mxu1  ;;  %v14070_v61 = vpop.f32.mrf.mxu0  ;;  %14373 = vmatmul.mubr.f32.gmra.mxu0 %v7848_v40  ;;  %v23604_v40 = vld [vmem:[#allocation10_spill] sm:$0xff] }
 0x5cb   :  { %v6695_v18 = vadd.f32 %v6424_v36, %v20177_v13  ;;  %v20458_v44 = vadd.f32 %v14070_v61, %v6694_v54  ;;  %14375 = vmatprep.mubr.f32.mxu0 %v7849_v32  ;;  %v7326_v36 = vld [vmem:[#allocation2 + $0x2a1] sm:$0xff] }
 0x5cc   :  { %v13948_v2 = vpop.f32.mrf.mxu1  ;;  %14251 = vmatmul.mubr.f32.gmra.mxu1 %v7323_v62  ;;  %v6943_v49 = vpop.f32.mrf.mxu0  ;;  %v7852_v32 = vld [vmem:[#allocation2 + $0x27a] sm:$0xff] }
 0x5cd   :  { %v6698_v33 = vadd.f32 %v13948_v2, %v20180_v7  ;;  %14253 = vmatprep.mubr.f32.mxu1 %v7324_v23  ;;  %v20461_v27 = vadd.f32 %v6943_v49, %v6693_v17  ;;  %v7327_v2 = vld [vmem:[#allocation2 + $0x2a9] sm:$0xff] }
 0x5ce   :  { %v6434_v10 = vpop.f32.mrf.mxu1  ;;  %v14073_v3 = vpop.f32.mrf.mxu0  ;;  %14376 = vmatmul.mubr.f32.gmra.mxu0 %v7850_v35  ;;  %v7853_v49 = vld [vmem:[#allocation2 + $0x28a] sm:$0xff]  ;;  %v7328_v35 = vld [vmem:[#allocation2 + $0x2b9] sm:$0xff] }
 0x5cf   :  { %v6697_v13 = vadd.f32 %v6434_v10, %v20183_v11  ;;  %v20464_v54 = vadd.f32 %v14073_v3, %v6696_v39  ;;  %14378 = vmatprep.mubr.f32.mxu0 %v7851_v28 }
 0x5d0   :  { %v13951_v37 = vpop.f32.mrf.mxu1  ;;  %14254 = vmatmul.mubr.f32.gmra.mxu1 %v7325_v22  ;;  %v6953_v62 = vpop.f32.mrf.mxu0 }
 0x5d1   :  { %v6700_v7 = vadd.f32 %v13951_v37, %v23604_v40  ;;  %14256 = vmatprep.mubr.f32.mxu1 %v7326_v36  ;;  %v20467_v17 = vadd.f32 %v6953_v62, %v6695_v18  ;;  %v7854_v37 = vld [vmem:[#allocation2 + $0x292] sm:$0xff]  ;;  %v7329_v36 = vld [vmem:[#allocation2 + $0x2c1] sm:$0xff] }
 0x5d2   :  { %v6444_v61 = vpop.f32.mrf.mxu1  ;;  %v14076_v23 = vpop.f32.mrf.mxu0  ;;  %14379 = vmatmul.mubr.f32.gmra.mxu0 %v7852_v32  ;;  %v7855_v62 = vld [vmem:[#allocation2 + $0x2a2] sm:$0xff]  ;;  %v7330_v32 = vld [vmem:[#allocation2 + $0x2d1] sm:$0xff] }
 0x5d3   :  { %v6699_v11 = vadd.f32 %v6444_v61, %v20195_v46  ;;  %v20470_v39 = vadd.f32 %v14076_v23, %v6698_v33  ;;  %14381 = vmatprep.mubr.f32.mxu0 %v7853_v49  ;;  %v7856_v49 = vld [vmem:[#allocation2 + $0x2aa] sm:$0xff] }
 0x5d4   :  { %v13954_v10 = vpop.f32.mrf.mxu1  ;;  %14257 = vmatmul.mubr.f32.gmra.mxu1 %v7327_v2  ;;  %v6963_v3 = vpop.f32.mrf.mxu0 }
 0x5d5   :  { %v6702_v22 = vadd.f32 %v13954_v10, %v20198_v16  ;;  %14259 = vmatprep.mubr.f32.mxu1 %v7328_v35  ;;  %v20473_v18 = vadd.f32 %v6963_v3, %v6697_v13  ;;  %v7331_v10 = vld [vmem:[#allocation2 + $0x2d9] sm:$0xff] }
 0x5d6   :  { %v6454_v28 = vpop.f32.mrf.mxu1  ;;  %v14079_v40 = vpop.f32.mrf.mxu0  ;;  %14382 = vmatmul.mubr.f32.gmra.mxu0 %v7854_v37  ;;  %v7857_v3 = vld [vmem:[#allocation2 + $0x2ba] sm:$0xff]  ;;  %v7332_v37 = vld [vmem:[#allocation2 + $0x2e9] sm:$0xff] }
 0x5d7   :  { %v6701_v46 = vadd.f32 %v6454_v28, %v20201_v15  ;;  %v20476_v33 = vadd.f32 %v14079_v40, %v6700_v7  ;;  %14384 = vmatprep.mubr.f32.mxu0 %v7855_v62  ;;  %v7858_v62 = vld [vmem:[#allocation2 + $0x2c2] sm:$0xff] }
 0x5d8   :  { %v13957_v61 = vpop.f32.mrf.mxu1  ;;  %14260 = vmatmul.mubr.f32.gmra.mxu1 %v7329_v36  ;;  %v6973_v2 = vpop.f32.mrf.mxu0 }
 0x5d9   :  { %v6704_v16 = vadd.f32 %v13957_v61, %v20204_v55  ;;  %14262 = vmatprep.mubr.f32.mxu1 %v7330_v32  ;;  %v20479_v13 = vadd.f32 %v6973_v2, %v6699_v11  ;;  %v23607_v61 = vld [vmem:[#allocation9_spill] sm:$0xff] }
 0x5da   :  { %v6464_v23 = vpop.f32.mrf.mxu1  ;;  %v14082_v35 = vpop.f32.mrf.mxu0  ;;  %14385 = vmatmul.mubr.f32.gmra.mxu0 %v7856_v49  ;;  %v7333_v32 = vld [vmem:[#allocation2 + $0x2f1] sm:$0xff] }
 0x5db   :  { %v6703_v15 = vadd.f32 %v6464_v23, %v20207_v0  ;;  %v20482_v7 = vadd.f32 %v14082_v35, %v6702_v22  ;;  %14387 = vmatprep.mubr.f32.mxu0 %v7857_v3  ;;  %v7859_v23 = vld [vmem:[#allocation2 + $0x2d2] sm:$0xff] }
 0x5dc   :  { %v13960_v28 = vpop.f32.mrf.mxu1  ;;  %14263 = vmatmul.mubr.f32.gmra.mxu1 %v7331_v10  ;;  %v6983_v36 = vpop.f32.mrf.mxu0  ;;  %v7334_v10 = vld [vmem:[#allocation2 + $0x301] sm:$0xff]  ;;  %v23608_v35 = vld [vmem:[#allocation81_spill] sm:$0xff] }
 0x5dd   :  { %23605 = vst [vmem:[#allocation95_spill] sm:$0xff] %v20482_v7  ;;  %v6706_v55 = vadd.f32 %v13960_v28, %v20210_v8  ;;  %14265 = vmatprep.mubr.f32.mxu1 %v7332_v37  ;;  %v20485_v11 = vadd.f32 %v6983_v36, %v6701_v46  ;;  %v7860_v37 = vld [vmem:[#allocation2 + $0x2da] sm:$0xff] }
 0x5de   :  { %v6474_v40 = vpop.f32.mrf.mxu1  ;;  %v14085_v2 = vpop.f32.mrf.mxu0  ;;  %14388 = vmatmul.mubr.f32.gmra.mxu0 %v7858_v62  ;;  %v23610_v36 = vld [vmem:[#allocation86_spill] sm:$0xff]  ;;  %v7861_v62 = vld [vmem:[#allocation2 + $0x2ea] sm:$0xff] }
 0x5df   :  { %23606 = vst [vmem:[#allocation91_spill] sm:$0xff] %v20485_v11  ;;  %v6705_v0 = vadd.f32 %v6474_v40, %v23607_v61  ;;  %v20488_v22 = vadd.f32 %v14085_v2, %v6704_v16  ;;  %14390 = vmatprep.mubr.f32.mxu0 %v7859_v23  ;;  %v7335_v61 = vld [vmem:[#allocation2 + $0x309] sm:$0xff] }
 0x5e0   :  { %v13963_v49 = vpop.f32.mrf.mxu1  ;;  %14266 = vmatmul.mubr.f32.gmra.mxu1 %v7333_v32  ;;  %v6993_v3 = vpop.f32.mrf.mxu0  ;;  %v7336_v32 = vld [vmem:[#allocation2 + $0x319] sm:$0xff] }
 0x5e1   :  { %v6708_v8 = vadd.f32 %v13963_v49, %v23608_v35  ;;  %14268 = vmatprep.mubr.f32.mxu1 %v7334_v10  ;;  %v20491_v46 = vadd.f32 %v6993_v3, %v6703_v15  ;;  %v7862_v10 = vld [vmem:[#allocation2 + $0x2f2] sm:$0xff]  ;;  %v23613_v35 = vld [vmem:[#allocation12_spill] sm:$0xff] }
 0x5e2   :  { %v6484_v28 = vpop.f32.mrf.mxu1  ;;  %v14088_v11 = vpop.f32.mrf.mxu0  ;;  %14391 = vmatmul.mubr.f32.gmra.mxu0 %v7860_v37  ;;  %v7863_v37 = vld [vmem:[#allocation2 + $0x302] sm:$0xff] }
 0x5e3   :  { %23609 = vst [vmem:[#allocation93_spill] sm:$0xff] %v20491_v46  ;;  %v6707_v40 = vadd.f32 %v6484_v28, %v23610_v36  ;;  %v20494_v16 = vadd.f32 %v14088_v11, %v6706_v55  ;;  %14393 = vmatprep.mubr.f32.mxu0 %v7861_v62  ;;  %v7337_v28 = vld [vmem:[#allocation2 + $0x321] sm:$0xff] }
 0x5e4   :  { %v13966_v7 = vpop.f32.mrf.mxu1  ;;  %14269 = vmatmul.mubr.f32.gmra.mxu1 %v7335_v61  ;;  %v7003_v23 = vpop.f32.mrf.mxu0  ;;  %v7338_v61 = vld [vmem:[#allocation2 + $0x331] sm:$0xff]  ;;  %v23614_v11 = vld [vmem:[#allocation11_spill] sm:$0xff] }
 0x5e5   :  { %23611 = vst [vmem:[#allocation15_spill] sm:$0xff] %v20494_v16  ;;  %v6710_v2 = vadd.f32 %v13966_v7, %v20222_v12  ;;  %14271 = vmatprep.mubr.f32.mxu1 %v7336_v32  ;;  %v20497_v15 = vadd.f32 %v7003_v23, %v6705_v0  ;;  %v7864_v32 = vld [vmem:[#allocation2 + $0x30a] sm:$0xff]  ;;  %v23616_v23 = vld [vmem:[#allocation83_spill] sm:$0xff] }
 0x5e6   :  { %v6494_v49 = vpop.f32.mrf.mxu1  ;;  %v14091_v36 = vpop.f32.mrf.mxu0  ;;  %14394 = vmatmul.mubr.f32.gmra.mxu0 %v7862_v10  ;;  %v7865_v10 = vld [vmem:[#allocation2 + $0x31a] sm:$0xff] }
 0x5e7   :  { %23612 = vst [vmem:[#allocation50_spill] sm:$0xff] %v20497_v15  ;;  %v6709_v3 = vadd.f32 %v6494_v49, %v23613_v35  ;;  %v20500_v55 = vadd.f32 %v14091_v36, %v6708_v8  ;;  %14396 = vmatprep.mubr.f32.mxu0 %v7863_v37  ;;  %v7339_v35 = vld [vmem:[#allocation2 + $0x339] sm:$0xff] }
 0x5e8   :  { %v13969_v46 = vpop.f32.mrf.mxu1  ;;  %14272 = vmatmul.mubr.f32.gmra.mxu1 %v7337_v28  ;;  %v7013_v7 = vpop.f32.mrf.mxu0  ;;  %v8335_v28 = vld [vmem:[#allocation2 + $0x30] sm:$0xff] }
 0x5e9   :  { %v6712_v12 = vadd.f32 %v13969_v46, %v23614_v11  ;;  %14274 = vmatprep.mubr.f32.mxu1 %v7338_v61  ;;  %v20503_v0 = vadd.f32 %v7013_v7, %v6707_v40  ;;  %v7866_v61 = vld [vmem:[#allocation2 + $0x322] sm:$0xff] }
 0x5ea   :  { %v6504_v62 = vpop.f32.mrf.mxu1  ;;  %v14094_v15 = vpop.f32.mrf.mxu0  ;;  %14397 = vmatmul.mubr.f32.gmra.mxu0 %v7864_v32  ;;  %v23617_v11 = vld [vmem:[#allocation88_spill] sm:$0xff]  ;;  %v7867_v32 = vld [vmem:[#allocation2 + $0x332] sm:$0xff] }
 0x5eb   :  { %23615 = vst [vmem:[#allocation17_spill] sm:$0xff] %v20503_v0  ;;  %v6711_v49 = vadd.f32 %v6504_v62, %v23616_v23  ;;  %v20506_v8 = vadd.f32 %v14094_v15, %v6710_v2  ;;  %14399 = vmatprep.mubr.f32.mxu0 %v7865_v10  ;;  %v8336_v62 = vld [vmem:[#allocation2 + $0x38] sm:$0xff]  ;;  %v9471_v2 = vld [vmem:[%s22970_s2 + $0x470] sm:$0xff] }
 0x5ec   :  { %v13972_v16 = vpop.f32.mrf.mxu1  ;;  %14275 = vmatmul.mubr.f32.gmra.mxu1 %v7339_v35  ;;  %v7023_v36 = vpop.f32.mrf.mxu0  ;;  %v8337_v35 = vld [vmem:[#allocation2 + $0x48] sm:$0xff] }
 0x5ed   :  { %v6714_v46 = vadd.f32 %v13972_v16, %v20239_v25  ;;  %14437 = vmatprep.mubr.f32.mxu1 %v8335_v28  ;;  %v20509_v40 = vadd.f32 %v7023_v36, %v6709_v3  ;;  %v7868_v28 = vld [vmem:[#allocation2 + $0x33a] sm:$0xff] }
 0x5ee   :  { %v6514_v37 = vpop.f32.mrf.mxu1  ;;  %v14097_v23 = vpop.f32.mrf.mxu0  ;;  %14400 = vmatmul.mubr.f32.gmra.mxu0 %v7866_v61  ;;  %v23619_v36 = vld [vmem:[#allocation14_spill] sm:$0xff]  ;;  %v8338_v61 = vld [vmem:[#allocation2 + $0x50] sm:$0xff] }
 0x5ef   :  { %v6713_v7 = vadd.f32 %v6514_v37, %v23617_v11  ;;  %v20515_v25 = vadd.f32 %v14097_v23, %v6712_v12  ;;  %14402 = vmatprep.mubr.f32.mxu0 %v7867_v32  ;;  %v8339_v23 = vld [vmem:[#allocation2 + $0x60] sm:$0xff] }
 0x5f0   :  { %v13975_v0 = vpop.f32.mrf.mxu1  ;;  %14438 = vmatmul.mubr.f32.vlgmr.msra.gmra.mxu1 %v8336_v62  ;;  %v7033_v15 = vpop.f32.mrf.mxu0  ;;  %v8864_v62 = vld [vmem:[#allocation2 + $0x31] sm:$0xff] }
 0x5f1   :  { %v6716_v16 = vadd.f32 %v13975_v0, %v20251_v26  ;;  %14440 = vmatprep.mubr.f32.mxu1 %v8337_v35  ;;  %14662 = vmatpush3.msra.mxu1 %v20405_v20  ;;  %v20519_v10 = vadd.f32 %v7033_v15, %v6711_v49  ;;  %v9470_v26 = vld [vmem:[%s22970_s2 + $0x468] sm:$0xff]  ;;  %v8865_v15 = vld [vmem:[#allocation2 + $0x39] sm:$0xff] }
 0x5f2   :  { %v6524_v3 = vpop.f32.mrf.mxu1  ;;  %14663 = vmatprep.subr.mxu1 %v9471_v2  ;;  %v14100_v11 = vpop.f32.mrf.mxu0  ;;  %14403 = vmatmul.mubr.f32.gmra.mxu0 %v7868_v28  ;;  %v8340_v28 = vld [vmem:[#allocation2 + $0x68] sm:$0xff] }
 0x5f3   :  { %23618 = vst [vmem:[#allocation16_spill] sm:$0xff] %v20519_v10  ;;  %v6715_v37 = vadd.f32 %v6524_v3, %v23619_v36  ;;  %v20525_v0 = vadd.f32 %v14100_v11, %v6714_v46  ;;  %14565 = vmatprep.mubr.f32.mxu0 %v8864_v62  ;;  %14664 = vmatpush3.msra.mxu1 %v9471_v2  ;;  %v8341_v46 = vld [vmem:[#allocation2 + $0x78] sm:$0xff] }
 0x5f4   :  { %v13978_v12 = vpop.f32.mrf.mxu1  ;;  %14441 = vmatmul.mubr.f32.gmra.mxu1 %v8338_v61  ;;  %v7043_v49 = vpop.f32.mrf.mxu0  ;;  %14665 = vmatprep.subr.mxu1 %v9470_v26  ;;  %v8866_v61 = vld [vmem:[#allocation2 + $0x49] sm:$0xff] }
 0x5f5   :  { %v6718_v20 = vadd.f32 %v13978_v12, %v20264_v47  ;;  %14443 = vmatprep.mubr.f32.mxu1 %v8339_v23  ;;  %v20528_v35 = vadd.f32 %v7043_v49, %v6713_v7  ;;  %v9469_v47 = vld [vmem:[%s22970_s2 + $0x460] sm:$0xff]  ;;  %14666 = vmatpush3.msra.mxu1 %v9470_v26  ;;  %v8867_v12 = vld [vmem:[#allocation2 + $0x51] sm:$0xff] }
 0x5f6   :  { %v6534_v32 = vpop.f32.mrf.mxu1  ;;  %v14103_v36 = vpop.f32.mrf.mxu0  ;;  %14566 = vmatmul.mubr.f32.vlgmr.msra.gmra.mxu0 %v8865_v15  ;;  %v8342_v49 = vld [vmem:[#allocation2 + $0x80] sm:$0xff]  ;;  %14667 = vmatprep.subr.mxu1 %v9469_v47 }
 0x5f7   :  { %v6717_v3 = vadd.f32 %v6534_v32, %v20267_v52  ;;  %v20534_v11 = vadd.f32 %v14103_v36, %v6716_v16  ;;  %14568 = vmatprep.mubr.f32.mxu0 %v8866_v61  ;;  %v8868_v15 = vld [vmem:[#allocation2 + $0x61] sm:$0xff]  ;;  %v8343_v16 = vld [vmem:[#allocation2 + $0x90] sm:$0xff]  ;;  %14668 = vmatpush3.msra.mxu1 %v9469_v47 }
 0x5f8   :  { %v13981_v10 = vpop.f32.mrf.mxu1  ;;  %14444 = vmatmul.mubr.f32.gmra.mxu1 %v8340_v28  ;;  %v7053_v2 = vpop.f32.mrf.mxu0  ;;  %v8869_v61 = vld [vmem:[#allocation2 + $0x69] sm:$0xff] }
 0x5f9   :  { %v6720_v7 = vadd.f32 %v13981_v10, %v20276_v24  ;;  %14446 = vmatprep.mubr.f32.mxu1 %v8341_v46  ;;  %v20537_v62 = vadd.f32 %v7053_v2, %v6715_v37  ;;  %v9468_v24 = vld [vmem:[%s22970_s2 + $0x458] sm:$0xff] }
 0x5fa   :  { %v6544_v52 = vpop.f32.mrf.mxu1  ;;  %v14106_v32 = vpop.f32.mrf.mxu0  ;;  %14569 = vmatmul.mubr.f32.gmra.mxu0 %v8867_v12  ;;  %v8344_v2 = vld [vmem:[#allocation2 + $0x98] sm:$0xff]  ;;  %14669 = vmatprep.subr.mxu1 %v9468_v24 }
 0x5fb   :  { %v6719_v23 = vadd.f32 %v6544_v52, %v20279_v38  ;;  %v20543_v10 = vadd.f32 %v14106_v32, %v6718_v20  ;;  %14571 = vmatprep.mubr.f32.mxu0 %v8868_v15  ;;  %v8870_v12 = vld [vmem:[#allocation2 + $0x79] sm:$0xff]  ;;  %v8345_v20 = vld [vmem:[#allocation2 + $0xa8] sm:$0xff]  ;;  %14670 = vmatpush3.msra.mxu1 %v9468_v24 }
 0x5fc   :  { %v13984_v28 = vpop.f32.mrf.mxu1  ;;  %14447 = vmatmul.mubr.f32.gmra.mxu1 %v8342_v49  ;;  %v7063_v26 = vpop.f32.mrf.mxu0 }
 0x5fd   :  { %v6722_v37 = vadd.f32 %v13984_v28, %v20288_v5  ;;  %14449 = vmatprep.mubr.f32.mxu1 %v8343_v16  ;;  %v20546_v36 = vadd.f32 %v7063_v26, %v6717_v3  ;;  %v9467_v5 = vld [vmem:[%s22970_s2 + $0x450] sm:$0xff]  ;;  %v8871_v28 = vld [vmem:[#allocation2 + $0x81] sm:$0xff] }
 0x5fe   :  { %v6554_v38 = vpop.f32.mrf.mxu1  ;;  %v14109_v52 = vpop.f32.mrf.mxu0  ;;  %14572 = vmatmul.mubr.f32.gmra.mxu0 %v8869_v61  ;;  %v8346_v26 = vld [vmem:[#allocation2 + $0xb0] sm:$0xff]  ;;  %14671 = vmatprep.subr.mxu1 %v9467_v5 }
 0x5ff   :  { %v6721_v46 = vadd.f32 %v6554_v38, %v20291_v14  ;;  %v20552_v32 = vadd.f32 %v14109_v52, %v6720_v7  ;;  %14574 = vmatprep.mubr.f32.mxu0 %v8870_v12  ;;  %v8872_v61 = vld [vmem:[#allocation2 + $0x91] sm:$0xff]  ;;  %v8347_v7 = vld [vmem:[#allocation2 + $0xc0] sm:$0xff]  ;;  %14672 = vmatpush3.msra.mxu1 %v9467_v5 }
 0x600   :  { %v13987_v49 = vpop.f32.mrf.mxu1  ;;  %14450 = vmatmul.mubr.f32.gmra.mxu1 %v8344_v2  ;;  %v7073_v47 = vpop.f32.mrf.mxu0 }
 0x601   :  { %v6724_v3 = vadd.f32 %v13987_v49, %v20300_v29  ;;  %14452 = vmatprep.mubr.f32.mxu1 %v8345_v20  ;;  %v20555_v15 = vadd.f32 %v7073_v47, %v6719_v23  ;;  %v9466_v29 = vld [vmem:[%s22970_s2 + $0x448] sm:$0xff]  ;;  %v8873_v49 = vld [vmem:[#allocation2 + $0x99] sm:$0xff] }
 0x602   :  { %v6564_v14 = vpop.f32.mrf.mxu1  ;;  %v14112_v38 = vpop.f32.mrf.mxu0  ;;  %14575 = vmatmul.mubr.f32.gmra.mxu0 %v8871_v28  ;;  %v8348_v47 = vld [vmem:[#allocation2 + $0xc8] sm:$0xff]  ;;  %14673 = vmatprep.subr.mxu1 %v9466_v29 }
 0x603   :  { %v6723_v16 = vadd.f32 %v6564_v14, %v20303_v43  ;;  %v20561_v52 = vadd.f32 %v14112_v38, %v6722_v37  ;;  %14577 = vmatprep.mubr.f32.mxu0 %v8872_v61  ;;  %v8874_v28 = vld [vmem:[#allocation2 + $0xa9] sm:$0xff]  ;;  %v8349_v37 = vld [vmem:[#allocation2 + $0xd8] sm:$0xff]  ;;  %14674 = vmatpush3.msra.mxu1 %v9466_v29 }
 0x604   :  { %v13990_v2 = vpop.f32.mrf.mxu1  ;;  %14453 = vmatmul.mubr.f32.gmra.mxu1 %v8346_v26  ;;  %v7083_v24 = vpop.f32.mrf.mxu0 }
 0x605   :  { %v6726_v23 = vadd.f32 %v13990_v2, %v20312_v31  ;;  %14455 = vmatprep.mubr.f32.mxu1 %v8347_v7  ;;  %v20564_v12 = vadd.f32 %v7083_v24, %v6721_v46  ;;  %v9465_v31 = vld [vmem:[%s22970_s2 + $0x440] sm:$0xff]  ;;  %v8875_v2 = vld [vmem:[#allocation2 + $0xb1] sm:$0xff] }
 0x606   :  { %v6574_v43 = vpop.f32.mrf.mxu1  ;;  %v14115_v14 = vpop.f32.mrf.mxu0  ;;  %14578 = vmatmul.mubr.f32.gmra.mxu0 %v8873_v49  ;;  %v8350_v24 = vld [vmem:[#allocation2 + $0xe0] sm:$0xff]  ;;  %14675 = vmatprep.subr.mxu1 %v9465_v31 }
 0x607   :  { %v6725_v20 = vadd.f32 %v6574_v43, %v20315_v21  ;;  %v20570_v38 = vadd.f32 %v14115_v14, %v6724_v3  ;;  %14580 = vmatprep.mubr.f32.mxu0 %v8874_v28  ;;  %v8876_v49 = vld [vmem:[#allocation2 + $0xc1] sm:$0xff]  ;;  %v8351_v3 = vld [vmem:[#allocation2 + $0xf0] sm:$0xff]  ;;  %14676 = vmatpush3.msra.mxu1 %v9465_v31 }
 0x608   :  { %v13993_v26 = vpop.f32.mrf.mxu1  ;;  %14456 = vmatmul.mubr.f32.gmra.mxu1 %v8348_v47  ;;  %v7093_v5 = vpop.f32.mrf.mxu0 }
 0x609   :  { %v6728_v46 = vadd.f32 %v13993_v26, %v20324_v9  ;;  %14458 = vmatprep.mubr.f32.mxu1 %v8349_v37  ;;  %v20573_v61 = vadd.f32 %v7093_v5, %v6723_v16  ;;  %v9464_v9 = vld [vmem:[%s22970_s2 + $0x438] sm:$0xff]  ;;  %v8877_v26 = vld [vmem:[#allocation2 + $0xc9] sm:$0xff] }
 0x60a   :  { %v6584_v21 = vpop.f32.mrf.mxu1  ;;  %v14118_v43 = vpop.f32.mrf.mxu0  ;;  %14581 = vmatmul.mubr.f32.gmra.mxu0 %v8875_v2  ;;  %v8352_v5 = vld [vmem:[#allocation2 + $0xf8] sm:$0xff]  ;;  %14677 = vmatprep.subr.mxu1 %v9464_v9 }
 0x60b   :  { %v6727_v7 = vadd.f32 %v6584_v21, %v20327_v60  ;;  %v20579_v14 = vadd.f32 %v14118_v43, %v6726_v23  ;;  %14583 = vmatprep.mubr.f32.mxu0 %v8876_v49  ;;  %v8878_v2 = vld [vmem:[#allocation2 + $0xd9] sm:$0xff]  ;;  %v8353_v23 = vld [vmem:[#allocation2 + $0x108] sm:$0xff]  ;;  %14678 = vmatpush3.msra.mxu1 %v9464_v9 }
 0x60c   :  { %v13996_v47 = vpop.f32.mrf.mxu1  ;;  %14459 = vmatmul.mubr.f32.gmra.mxu1 %v8350_v24  ;;  %v7103_v29 = vpop.f32.mrf.mxu0 }
 0x60d   :  { %v6730_v16 = vadd.f32 %v13996_v47, %v20336_v50  ;;  %14461 = vmatprep.mubr.f32.mxu1 %v8351_v3  ;;  %v20582_v28 = vadd.f32 %v7103_v29, %v6725_v20  ;;  %v9463_v50 = vld [vmem:[%s22970_s2 + $0x430] sm:$0xff]  ;;  %v8879_v47 = vld [vmem:[#allocation2 + $0xe1] sm:$0xff] }
 0x60e   :  { %v6594_v60 = vpop.f32.mrf.mxu1  ;;  %v14121_v21 = vpop.f32.mrf.mxu0  ;;  %14584 = vmatmul.mubr.f32.gmra.mxu0 %v8877_v26  ;;  %v8354_v29 = vld [vmem:[#allocation2 + $0x110] sm:$0xff]  ;;  %14679 = vmatprep.subr.mxu1 %v9463_v50 }
 0x60f   :  { %v6729_v37 = vadd.f32 %v6594_v60, %v20339_v30  ;;  %v20588_v43 = vadd.f32 %v14121_v21, %v6728_v46  ;;  %14586 = vmatprep.mubr.f32.mxu0 %v8878_v2  ;;  %v8880_v26 = vld [vmem:[#allocation2 + $0xf1] sm:$0xff]  ;;  %v8355_v46 = vld [vmem:[#allocation2 + $0x120] sm:$0xff]  ;;  %14680 = vmatpush3.msra.mxu1 %v9463_v50 }
 0x610   :  { %v13999_v24 = vpop.f32.mrf.mxu1  ;;  %14462 = vmatmul.mubr.f32.gmra.mxu1 %v8352_v5  ;;  %v7113_v31 = vpop.f32.mrf.mxu0 }
 0x611   :  { %23620 = vst [vmem:[#allocation48_spill] sm:$0xff] %v20588_v43  ;;  %v6732_v20 = vadd.f32 %v13999_v24, %v20348_v58  ;;  %14464 = vmatprep.mubr.f32.mxu1 %v8353_v23  ;;  %v20591_v49 = vadd.f32 %v7113_v31, %v6727_v7  ;;  %v9462_v58 = vld [vmem:[%s22970_s2 + $0x428] sm:$0xff]  ;;  %v23623_v7 = vld [vmem:[#allocation13_spill] sm:$0xff]  ;;  %v8881_v23 = vld [vmem:[#allocation2 + $0xf9] sm:$0xff] }
 0x612   :  { %v6604_v30 = vpop.f32.mrf.mxu1  ;;  %v14124_v60 = vpop.f32.mrf.mxu0  ;;  %14587 = vmatmul.mubr.f32.gmra.mxu0 %v8879_v47  ;;  %v23625_v31 = vld [vmem:[#allocation85_spill] sm:$0xff]  ;;  %v8356_v47 = vld [vmem:[#allocation2 + $0x128] sm:$0xff]  ;;  %14681 = vmatprep.subr.mxu1 %v9462_v58 }
 0x613   :  { %23621 = vst [vmem:[#allocation52_spill] sm:$0xff] %v20591_v49  ;;  %v6731_v3 = vadd.f32 %v6604_v30, %v20351_v59  ;;  %v20597_v21 = vadd.f32 %v14124_v60, %v6730_v16  ;;  %14589 = vmatprep.mubr.f32.mxu0 %v8880_v26  ;;  %v8882_v49 = vld [vmem:[#allocation2 + $0x109] sm:$0xff]  ;;  %v8357_v16 = vld [vmem:[#allocation2 + $0x138] sm:$0xff]  ;;  %v9461_v60 = vld [vmem:[%s22970_s2 + $0x420] sm:$0xff]  ;;  %14682 = vmatpush3.msra.mxu1 %v9462_v58 }
 0x614   :  { %v14002_v5 = vpop.f32.mrf.mxu1  ;;  %14465 = vmatmul.mubr.f32.gmra.mxu1 %v8354_v29  ;;  %v7123_v2 = vpop.f32.mrf.mxu0  ;;  %14683 = vmatprep.subr.mxu1 %v9461_v60 }
 0x615   :  { %23622 = vst [vmem:[#allocation21_spill] sm:$0xff] %v20597_v21  ;;  %v6734_v9 = vadd.f32 %v14002_v5, %v23623_v7  ;;  %14467 = vmatprep.mubr.f32.mxu1 %v8355_v46  ;;  %v20600_v24 = vadd.f32 %v7123_v2, %v6729_v37  ;;  %v23627_v37 = vld [vmem:[#allocation90_spill] sm:$0xff]  ;;  %14684 = vmatpush3.msra.mxu1 %v9461_v60 }
 0x616   :  { %v6614_v59 = vpop.f32.mrf.mxu1  ;;  %v14127_v29 = vpop.f32.mrf.mxu0  ;;  %14590 = vmatmul.mubr.f32.gmra.mxu0 %v8881_v23  ;;  %v8883_v2 = vld [vmem:[#allocation2 + $0x111] sm:$0xff] }
 0x617   :  { %23624 = vst [vmem:[#allocation20_spill] sm:$0xff] %v20600_v24  ;;  %v6733_v30 = vadd.f32 %v6614_v59, %v23625_v31  ;;  %v20606_v26 = vadd.f32 %v14127_v29, %v6732_v20  ;;  %14592 = vmatprep.mubr.f32.mxu0 %v8882_v49  ;;  %v23629_v59 = vld [vmem:[#allocation45_spill] sm:$0xff]  ;;  %v8358_v31 = vld [vmem:[#allocation2 + $0x140] sm:$0xff] }
 0x618   :  { %v14005_v43 = vpop.f32.mrf.mxu1  ;;  %14468 = vmatmul.mubr.f32.gmra.mxu1 %v8356_v47  ;;  %v7133_v5 = vpop.f32.mrf.mxu0  ;;  %v8884_v24 = vld [vmem:[#allocation2 + $0x121] sm:$0xff]  ;;  %v8359_v20 = vld [vmem:[#allocation2 + $0x150] sm:$0xff] }
 0x619   :  { %23626 = vst [vmem:[#allocation49_spill] sm:$0xff] %v20606_v26  ;;  %v6736_v50 = vadd.f32 %v14005_v43, %v23627_v37  ;;  %14470 = vmatprep.mubr.f32.mxu1 %v8357_v16  ;;  %v20609_v7 = vadd.f32 %v7133_v5, %v6731_v3  ;;  %v9460_v43 = vld [vmem:[%s22970_s2 + $0x418] sm:$0xff]  ;;  %v23631_v3 = vld [vmem:[#allocation44_spill] sm:$0xff] }
 0x61a   :  { %v6624_v46 = vpop.f32.mrf.mxu1  ;;  %v14130_v47 = vpop.f32.mrf.mxu0  ;;  %14593 = vmatmul.mubr.f32.gmra.mxu0 %v8883_v2  ;;  %v8885_v5 = vld [vmem:[#allocation2 + $0x129] sm:$0xff]  ;;  %14685 = vmatprep.subr.mxu1 %v9460_v43 }
 0x61b   :  { %23628 = vst [vmem:[#allocation54_spill] sm:$0xff] %v20609_v7  ;;  %v6735_v23 = vadd.f32 %v6624_v46, %v23629_v59  ;;  %v20615_v49 = vadd.f32 %v14130_v47, %v6734_v9  ;;  %14595 = vmatprep.mubr.f32.mxu0 %v8884_v24  ;;  %v23633_v46 = vld [vmem:[#allocation87_spill] sm:$0xff]  ;;  %v8360_v59 = vld [vmem:[#allocation2 + $0x158] sm:$0xff]  ;;  %v8361_v9 = vld [vmem:[#allocation2 + $0x168] sm:$0xff]  ;;  %14686 = vmatpush3.msra.mxu1 %v9460_v43 }
 0x61c   :  { %v14008_v21 = vpop.f32.mrf.mxu1  ;;  %14471 = vmatmul.mubr.f32.gmra.mxu1 %v8358_v31  ;;  %v7143_v29 = vpop.f32.mrf.mxu0  ;;  %v8886_v7 = vld [vmem:[#allocation2 + $0x139] sm:$0xff] }
 0x61d   :  { %23630 = vst [vmem:[#allocation18_spill] sm:$0xff] %v20615_v49  ;;  %v6738_v58 = vadd.f32 %v14008_v21, %v23631_v3  ;;  %14473 = vmatprep.mubr.f32.mxu1 %v8359_v20  ;;  %v20618_v37 = vadd.f32 %v7143_v29, %v6733_v30  ;;  %v9459_v21 = vld [vmem:[%s22970_s2 + $0x410] sm:$0xff]  ;;  %v23635_v30 = vld [vmem:[#allocation92_spill] sm:$0xff] }
 0x61e   :  { %v6634_v16 = vpop.f32.mrf.mxu1  ;;  %v14133_v31 = vpop.f32.mrf.mxu0  ;;  %14596 = vmatmul.mubr.f32.gmra.mxu0 %v8885_v5  ;;  %v8887_v29 = vld [vmem:[#allocation2 + $0x141] sm:$0xff]  ;;  %14687 = vmatprep.subr.mxu1 %v9459_v21 }
 0x61f   :  { %23632 = vst [vmem:[#allocation22_spill] sm:$0xff] %v20618_v37  ;;  %v6737_v2 = vadd.f32 %v6634_v16, %v23633_v46  ;;  %v20624_v24 = vadd.f32 %v14133_v31, %v6736_v50  ;;  %14598 = vmatprep.mubr.f32.mxu0 %v8886_v7  ;;  %v23637_v16 = vld [vmem:[#allocation47_spill] sm:$0xff]  ;;  %v8362_v46 = vld [vmem:[#allocation2 + $0x170] sm:$0xff]  ;;  %14688 = vmatpush3.msra.mxu1 %v9459_v21 }
 0x620   :  { %v14011_v26 = vpop.f32.mrf.mxu1  ;;  %14474 = vmatmul.mubr.f32.gmra.mxu1 %v8360_v59  ;;  %v7153_v47 = vpop.f32.mrf.mxu0  ;;  %v8888_v37 = vld [vmem:[#allocation2 + $0x151] sm:$0xff]  ;;  %v8363_v50 = vld [vmem:[#allocation2 + $0x180] sm:$0xff] }
 0x621   :  { %23634 = vst [vmem:[#allocation51_spill] sm:$0xff] %v20624_v24  ;;  %v6740_v60 = vadd.f32 %v14011_v26, %v23635_v30  ;;  %14476 = vmatprep.mubr.f32.mxu1 %v8361_v9  ;;  %v20627_v3 = vadd.f32 %v7153_v47, %v6735_v23  ;;  %v9458_v26 = vld [vmem:[%s22970_s2 + $0x408] sm:$0xff]  ;;  %v23638_v23 = vld [vmem:[#allocation46_spill] sm:$0xff] }
 0x622   :  { %v6644_v20 = vpop.f32.mrf.mxu1  ;;  %v14136_v59 = vpop.f32.mrf.mxu0  ;;  %14599 = vmatmul.mubr.f32.gmra.mxu0 %v8887_v29  ;;  %v8365_v30 = vld [vmem:[#allocation2 + $0x198] sm:$0xff]  ;;  %v23639_v29 = vld [vmem:[#allocation89_spill] sm:$0xff]  ;;  %14689 = vmatprep.subr.mxu1 %v9458_v26 }
 0x623   :  { %23636 = vst [vmem:[#allocation56_spill] sm:$0xff] %v20627_v3  ;;  %v6739_v5 = vadd.f32 %v6644_v20, %v23637_v16  ;;  %v20633_v7 = vadd.f32 %v14136_v59, %v6738_v58  ;;  %14601 = vmatprep.mubr.f32.mxu0 %v8888_v37  ;;  %v8889_v20 = vld [vmem:[#allocation2 + $0x159] sm:$0xff]  ;;  %v8890_v24 = vld [vmem:[#allocation2 + $0x169] sm:$0xff]  ;;  %14690 = vmatpush3.msra.mxu1 %v9458_v26 }
 0x624   :  { %v14014_v49 = vpop.f32.mrf.mxu1  ;;  %14477 = vmatmul.mubr.f32.gmra.mxu1 %v8362_v46  ;;  %v7163_v31 = vpop.f32.mrf.mxu0  ;;  %v8364_v46 = vld [vmem:[#allocation2 + $0x188] sm:$0xff] }
 0x625   :  { %v6742_v43 = vadd.f32 %v14014_v49, %v23638_v23  ;;  %14479 = vmatprep.mubr.f32.mxu1 %v8363_v50  ;;  %v20636_v47 = vadd.f32 %v7163_v31, %v6737_v2  ;;  %v9457_v49 = vld [vmem:[%s22970_s2 + $0x400] sm:$0xff]  ;;  %v8891_v23 = vld [vmem:[#allocation2 + $0x171] sm:$0xff] }
 0x626   :  { %v6654_v9 = vpop.f32.mrf.mxu1  ;;  %v14139_v3 = vpop.f32.mrf.mxu0  ;;  %14602 = vmatmul.mubr.f32.gmra.mxu0 %v8889_v20  ;;  %14691 = vmatprep.subr.mxu1 %v9457_v49  ;;  %v8892_v20 = vld [vmem:[#allocation2 + $0x181] sm:$0xff] }
 0x627   :  { %v6741_v16 = vadd.f32 %v6654_v9, %v23639_v29  ;;  %v20642_v37 = vadd.f32 %v14139_v3, %v6740_v60  ;;  %14604 = vmatprep.mubr.f32.mxu0 %v8890_v24  ;;  %v8367_v24 = vld [vmem:[#allocation2 + $0x1e0] sm:$0xff]  ;;  %14692 = vmatpush3.msra.mxu1 %v9457_v49 }
 0x628   :  { %v14017_v58 = vpop.f32.mrf.mxu1  ;;  %14480 = vmatmul.mubr.f32.gmra.mxu1 %v8364_v46  ;;  %v7173_v21 = vpop.f32.mrf.mxu0  ;;  %v20648_v46 = vld [vmem:[#allocation2 + $0x8] sm:$0xff] }
 0x629   :  { %v6744_v2 = vadd.f32 %v14017_v58, %v20415_v1  ;;  %14482 = vmatprep.mubr.f32.mxu1 %v8365_v30  ;;  %v20645_v50 = vadd.f32 %v7173_v21, %v6739_v5  ;;  %v8894_v5 = vld [vmem:[#allocation2 + $0x199] sm:$0xff]  ;;  %v8893_v30 = vld [vmem:[#allocation2 + $0x189] sm:$0xff] }
 0x62a   :  { %v6664_v59 = vpop.f32.mrf.mxu1  ;;  %v14142_v9 = vpop.f32.mrf.mxu0  ;;  %14605 = vmatmul.mubr.f32.gmra.mxu0 %v8891_v23  ;;  %v8368_v21 = vld [vmem:[#allocation2 + $0x1e8] sm:$0xff] }
 0x62b   :  { %v6743_v31 = vadd.f32 %v6664_v59, %v20418_v19  ;;  %v20651_v1 = vadd.f32 %v14142_v9, %v6742_v43  ;;  %14607 = vmatprep.mubr.f32.mxu0 %v8892_v20  ;;  %v8369_v43 = vld [vmem:[#allocation2 + $0x1f8] sm:$0xff] }
 0x62c   :  { %v14020_v29 = vpop.f32.mrf.mxu1  ;;  %14483 = vmatmul.mubr.f32.gmra.mxu1 %v20648_v46  ;;  %v7183_v3 = vpop.f32.mrf.mxu0 }
 0x62d   :  { %v6746_v60 = vadd.f32 %v14020_v29, %v20420_v57  ;;  %14485 = vmatprep.mubr.f32.mxu1 %v8367_v24  ;;  %v20654_v19 = vadd.f32 %v7183_v3, %v6741_v16  ;;  %v8895_v57 = vld [vmem:[#allocation2 + $0x1a1] sm:$0xff] }
 0x62e   :  { %v6674_v26 = vpop.f32.mrf.mxu1  ;;  %v14145_v59 = vpop.f32.mrf.mxu0  ;;  %14608 = vmatmul.mubr.f32.gmra.mxu0 %v8893_v30 }
 0x62f   :  { %v6745_v58 = vadd.f32 %v6674_v26, %v20425_v56  ;;  %v20657_v9 = vadd.f32 %v14145_v59, %v6744_v2  ;;  %14610 = vmatprep.mubr.f32.mxu0 %v8894_v5  ;;  %v8370_v56 = vld [vmem:[#allocation2 + $0x200] sm:$0xff] }
 0x630   :  { %v14183_v23 = vpop.f32.mrf.mxu1  ;;  %14486 = vmatmul.mubr.f32.gmra.mxu1 %v8368_v21  ;;  %v7193_v29 = vpop.f32.mrf.mxu0  ;;  %v8896_v26 = vld [vmem:[#allocation2 + $0x1e1] sm:$0xff]  ;;  %v8371_v21 = vld [vmem:[#allocation2 + $0x210] sm:$0xff] }
 0x631   :  { %v7742_v20 = vadd.f32 %v14183_v23, %v20428_v34  ;;  %14488 = vmatprep.mubr.f32.mxu1 %v8369_v43  ;;  %v20660_v16 = vadd.f32 %v7193_v29, %v6743_v31  ;;  %v8897_v31 = vld [vmem:[#allocation2 + $0x1e9] sm:$0xff]  ;;  %v8372_v43 = vld [vmem:[#allocation2 + $0x218] sm:$0xff] }
 0x632   :  { %v7422_v49 = vpop.f32.mrf.mxu1  ;;  %v14148_v3 = vpop.f32.mrf.mxu0  ;;  %14611 = vmatmul.mubr.f32.gmra.mxu0 %v8895_v57  ;;  %v8898_v57 = vld [vmem:[#allocation2 + $0x1f9] sm:$0xff] }
 0x633   :  { %v7741_v24 = vadd.f32 %v7422_v49, %v20431_v4  ;;  %v20663_v2 = vadd.f32 %v14148_v3, %v6746_v60  ;;  %14613 = vmatprep.mubr.f32.mxu0 %v8896_v26 }
 0x634   :  { %v14186_v30 = vpop.f32.mrf.mxu1  ;;  %14489 = vmatmul.mubr.f32.gmra.mxu1 %v8370_v56  ;;  %v7203_v34 = vpop.f32.mrf.mxu0  ;;  %v8373_v56 = vld [vmem:[#allocation2 + $0x228] sm:$0xff] }
 0x635   :  { %v7744_v5 = vadd.f32 %v14186_v30, %v20434_v63  ;;  %14491 = vmatprep.mubr.f32.mxu1 %v8371_v21  ;;  %v20666_v23 = vadd.f32 %v7203_v34, %v6745_v58  ;;  %v8899_v30 = vld [vmem:[#allocation2 + $0x201] sm:$0xff]  ;;  %v8374_v21 = vld [vmem:[#allocation2 + $0x230] sm:$0xff] }
 0x636   :  { %v7432_v59 = vpop.f32.mrf.mxu1  ;;  %v14311_v29 = vpop.f32.mrf.mxu0  ;;  %14614 = vmatmul.mubr.f32.gmra.mxu0 %v8897_v31 }
 0x637   :  { %v7743_v4 = vadd.f32 %v7432_v59, %v20437_v45  ;;  %v20669_v60 = vadd.f32 %v14311_v29, %v7742_v20  ;;  %14616 = vmatprep.mubr.f32.mxu0 %v8898_v57  ;;  %v8900_v59 = vld [vmem:[#allocation2 + $0x211] sm:$0xff] }
 0x638   :  { %v14189_v49 = vpop.f32.mrf.mxu1  ;;  %14492 = vmatmul.mubr.f32.gmra.mxu1 %v8372_v43  ;;  %v7951_v3 = vpop.f32.mrf.mxu0  ;;  %v8375_v43 = vld [vmem:[#allocation2 + $0x240] sm:$0xff] }
 0x639   :  { %v7746_v63 = vadd.f32 %v14189_v49, %v20440_v42  ;;  %14494 = vmatprep.mubr.f32.mxu1 %v8373_v56  ;;  %v20672_v58 = vadd.f32 %v7951_v3, %v7741_v24  ;;  %v8901_v49 = vld [vmem:[#allocation2 + $0x219] sm:$0xff]  ;;  %v8376_v56 = vld [vmem:[#allocation2 + $0x248] sm:$0xff] }
 0x63a   :  { %v7442_v26 = vpop.f32.mrf.mxu1  ;;  %v14314_v34 = vpop.f32.mrf.mxu0  ;;  %14617 = vmatmul.mubr.f32.gmra.mxu0 %v8899_v30 }
 0x63b   :  { %v7745_v45 = vadd.f32 %v7442_v26, %v20443_v48  ;;  %v20675_v20 = vadd.f32 %v14314_v34, %v7744_v5  ;;  %14619 = vmatprep.mubr.f32.mxu0 %v8900_v59  ;;  %v8902_v26 = vld [vmem:[#allocation2 + $0x229] sm:$0xff] }
 0x63c   :  { %v14192_v31 = vpop.f32.mrf.mxu1  ;;  %14495 = vmatmul.mubr.f32.gmra.mxu1 %v8374_v21  ;;  %v7961_v29 = vpop.f32.mrf.mxu0  ;;  %v8377_v21 = vld [vmem:[#allocation2 + $0x258] sm:$0xff] }
 0x63d   :  { %v7748_v42 = vadd.f32 %v14192_v31, %v20446_v41  ;;  %14497 = vmatprep.mubr.f32.mxu1 %v8375_v43  ;;  %v20678_v24 = vadd.f32 %v7961_v29, %v7743_v4  ;;  %v8903_v31 = vld [vmem:[#allocation2 + $0x231] sm:$0xff]  ;;  %v8378_v43 = vld [vmem:[#allocation2 + $0x260] sm:$0xff] }
 0x63e   :  { %v7452_v57 = vpop.f32.mrf.mxu1  ;;  %v14317_v3 = vpop.f32.mrf.mxu0  ;;  %14620 = vmatmul.mubr.f32.gmra.mxu0 %v8901_v49 }
 0x63f   :  { %v7747_v48 = vadd.f32 %v7452_v57, %v20449_v53  ;;  %v20681_v5 = vadd.f32 %v14317_v3, %v7746_v63  ;;  %14622 = vmatprep.mubr.f32.mxu0 %v8902_v26  ;;  %v8904_v57 = vld [vmem:[#allocation2 + $0x241] sm:$0xff] }
 0x640   :  { %v14195_v30 = vpop.f32.mrf.mxu1  ;;  %14498 = vmatmul.mubr.f32.gmra.mxu1 %v8376_v56  ;;  %v7971_v34 = vpop.f32.mrf.mxu0  ;;  %v8379_v56 = vld [vmem:[#allocation2 + $0x270] sm:$0xff] }
 0x641   :  { %v7750_v41 = vadd.f32 %v14195_v30, %v20452_v6  ;;  %14500 = vmatprep.mubr.f32.mxu1 %v8377_v21  ;;  %v20684_v4 = vadd.f32 %v7971_v34, %v7745_v45  ;;  %v8905_v30 = vld [vmem:[#allocation2 + $0x249] sm:$0xff]  ;;  %v8380_v21 = vld [vmem:[#allocation2 + $0x278] sm:$0xff] }
 0x642   :  { %v7462_v59 = vpop.f32.mrf.mxu1  ;;  %v14320_v29 = vpop.f32.mrf.mxu0  ;;  %14623 = vmatmul.mubr.f32.gmra.mxu0 %v8903_v31 }
 0x643   :  { %v7749_v53 = vadd.f32 %v7462_v59, %v20455_v51  ;;  %v20687_v63 = vadd.f32 %v14320_v29, %v7748_v42  ;;  %14625 = vmatprep.mubr.f32.mxu0 %v8904_v57  ;;  %v8906_v59 = vld [vmem:[#allocation2 + $0x259] sm:$0xff] }
 0x644   :  { %v14198_v49 = vpop.f32.mrf.mxu1  ;;  %14501 = vmatmul.mubr.f32.gmra.mxu1 %v8378_v43  ;;  %v7981_v3 = vpop.f32.mrf.mxu0  ;;  %v8381_v43 = vld [vmem:[#allocation2 + $0x288] sm:$0xff] }
 0x645   :  { %v7752_v6 = vadd.f32 %v14198_v49, %v20458_v44  ;;  %14503 = vmatprep.mubr.f32.mxu1 %v8379_v56  ;;  %v20690_v45 = vadd.f32 %v7981_v3, %v7747_v48  ;;  %v8907_v49 = vld [vmem:[#allocation2 + $0x261] sm:$0xff]  ;;  %v8382_v56 = vld [vmem:[#allocation2 + $0x290] sm:$0xff] }
 0x646   :  { %v7472_v26 = vpop.f32.mrf.mxu1  ;;  %v14323_v34 = vpop.f32.mrf.mxu0  ;;  %14626 = vmatmul.mubr.f32.gmra.mxu0 %v8905_v30 }
 0x647   :  { %v7751_v51 = vadd.f32 %v7472_v26, %v20461_v27  ;;  %v20693_v42 = vadd.f32 %v14323_v34, %v7750_v41  ;;  %14628 = vmatprep.mubr.f32.mxu0 %v8906_v59  ;;  %v8908_v26 = vld [vmem:[#allocation2 + $0x271] sm:$0xff] }
 0x648   :  { %v14201_v31 = vpop.f32.mrf.mxu1  ;;  %14504 = vmatmul.mubr.f32.gmra.mxu1 %v8380_v21  ;;  %v7991_v29 = vpop.f32.mrf.mxu0  ;;  %v8383_v21 = vld [vmem:[#allocation2 + $0x2a0] sm:$0xff] }
 0x649   :  { %v7754_v44 = vadd.f32 %v14201_v31, %v20464_v54  ;;  %14506 = vmatprep.mubr.f32.mxu1 %v8381_v43  ;;  %v20696_v48 = vadd.f32 %v7991_v29, %v7749_v53  ;;  %v8909_v31 = vld [vmem:[#allocation2 + $0x279] sm:$0xff]  ;;  %v8384_v43 = vld [vmem:[#allocation2 + $0x2a8] sm:$0xff] }
 0x64a   :  { %v7482_v57 = vpop.f32.mrf.mxu1  ;;  %v14326_v3 = vpop.f32.mrf.mxu0  ;;  %14629 = vmatmul.mubr.f32.gmra.mxu0 %v8907_v49 }
 0x64b   :  { %v7753_v27 = vadd.f32 %v7482_v57, %v20467_v17  ;;  %v20699_v41 = vadd.f32 %v14326_v3, %v7752_v6  ;;  %14631 = vmatprep.mubr.f32.mxu0 %v8908_v26  ;;  %v8910_v57 = vld [vmem:[#allocation2 + $0x289] sm:$0xff] }
 0x64c   :  { %v14204_v30 = vpop.f32.mrf.mxu1  ;;  %14507 = vmatmul.mubr.f32.gmra.mxu1 %v8382_v56  ;;  %v8001_v34 = vpop.f32.mrf.mxu0  ;;  %v8385_v56 = vld [vmem:[#allocation2 + $0x2b8] sm:$0xff] }
 0x64d   :  { %v7756_v54 = vadd.f32 %v14204_v30, %v20470_v39  ;;  %14509 = vmatprep.mubr.f32.mxu1 %v8383_v21  ;;  %v20702_v53 = vadd.f32 %v8001_v34, %v7751_v51  ;;  %v8911_v30 = vld [vmem:[#allocation2 + $0x291] sm:$0xff]  ;;  %v8386_v21 = vld [vmem:[#allocation2 + $0x2c0] sm:$0xff] }
 0x64e   :  { %v7492_v59 = vpop.f32.mrf.mxu1  ;;  %v14329_v29 = vpop.f32.mrf.mxu0  ;;  %14632 = vmatmul.mubr.f32.gmra.mxu0 %v8909_v31 }
 0x64f   :  { %v7755_v17 = vadd.f32 %v7492_v59, %v20473_v18  ;;  %v20705_v6 = vadd.f32 %v14329_v29, %v7754_v44  ;;  %14634 = vmatprep.mubr.f32.mxu0 %v8910_v57  ;;  %v8912_v59 = vld [vmem:[#allocation2 + $0x2a1] sm:$0xff] }
 0x650   :  { %v14207_v49 = vpop.f32.mrf.mxu1  ;;  %14510 = vmatmul.mubr.f32.gmra.mxu1 %v8384_v43  ;;  %v8011_v3 = vpop.f32.mrf.mxu0  ;;  %v8387_v43 = vld [vmem:[#allocation2 + $0x2d0] sm:$0xff]  ;;  %v23642_v29 = vld [vmem:[#allocation95_spill] sm:$0xff] }
 0x651   :  { %23640 = vst [vmem:[#allocation24_spill] sm:$0xff] %v20705_v6  ;;  %v7758_v39 = vadd.f32 %v14207_v49, %v20476_v33  ;;  %14512 = vmatprep.mubr.f32.mxu1 %v8385_v56  ;;  %v20708_v51 = vadd.f32 %v8011_v3, %v7753_v27  ;;  %v8913_v56 = vld [vmem:[#allocation2 + $0x2a9] sm:$0xff]  ;;  %v23644_v3 = vld [vmem:[#allocation91_spill] sm:$0xff] }
 0x652   :  { %v7502_v26 = vpop.f32.mrf.mxu1  ;;  %v14332_v34 = vpop.f32.mrf.mxu0  ;;  %14635 = vmatmul.mubr.f32.gmra.mxu0 %v8911_v30  ;;  %v8914_v30 = vld [vmem:[#allocation2 + $0x2b9] sm:$0xff] }
 0x653   :  { %23641 = vst [vmem:[#allocation23_spill] sm:$0xff] %v20708_v51  ;;  %v7757_v18 = vadd.f32 %v7502_v26, %v20479_v13  ;;  %v20711_v44 = vadd.f32 %v14332_v34, %v7756_v54  ;;  %14637 = vmatprep.mubr.f32.mxu0 %v8912_v59  ;;  %v8388_v26 = vld [vmem:[#allocation2 + $0x2d8] sm:$0xff] }
 0x654   :  { %v14210_v31 = vpop.f32.mrf.mxu1  ;;  %14513 = vmatmul.mubr.f32.gmra.mxu1 %v8386_v21  ;;  %v8021_v57 = vpop.f32.mrf.mxu0  ;;  %v8389_v21 = vld [vmem:[#allocation2 + $0x2e8] sm:$0xff] }
 0x655   :  { %v7760_v33 = vadd.f32 %v14210_v31, %v23642_v29  ;;  %14515 = vmatprep.mubr.f32.mxu1 %v8387_v43  ;;  %v20714_v27 = vadd.f32 %v8021_v57, %v7755_v17  ;;  %v8915_v43 = vld [vmem:[#allocation2 + $0x2c1] sm:$0xff]  ;;  %v23647_v29 = vld [vmem:[#allocation93_spill] sm:$0xff] }
 0x656   :  { %v7512_v49 = vpop.f32.mrf.mxu1  ;;  %v14335_v51 = vpop.f32.mrf.mxu0  ;;  %14638 = vmatmul.mubr.f32.gmra.mxu0 %v8913_v56  ;;  %v8916_v56 = vld [vmem:[#allocation2 + $0x2d1] sm:$0xff] }
 0x657   :  { %23643 = vst [vmem:[#allocation53_spill] sm:$0xff] %v20714_v27  ;;  %v7759_v13 = vadd.f32 %v7512_v49, %v23644_v3  ;;  %v20717_v54 = vadd.f32 %v14335_v51, %v7758_v39  ;;  %14640 = vmatprep.mubr.f32.mxu0 %v8914_v30  ;;  %v8390_v49 = vld [vmem:[#allocation2 + $0x2f0] sm:$0xff]  ;;  %v23648_v51 = vld [vmem:[#allocation15_spill] sm:$0xff] }
 0x658   :  { %v14213_v6 = vpop.f32.mrf.mxu1  ;;  %14516 = vmatmul.mubr.f32.gmra.mxu1 %v8388_v26  ;;  %v8031_v59 = vpop.f32.mrf.mxu0  ;;  %v8391_v26 = vld [vmem:[#allocation2 + $0x300] sm:$0xff] }
 0x659   :  { %23645 = vst [vmem:[#allocation58_spill] sm:$0xff] %v20717_v54  ;;  %v7762_v34 = vadd.f32 %v14213_v6, %v20488_v22  ;;  %14518 = vmatprep.mubr.f32.mxu1 %v8389_v21  ;;  %v20720_v17 = vadd.f32 %v8031_v59, %v7757_v18  ;;  %v8917_v21 = vld [vmem:[#allocation2 + $0x2d9] sm:$0xff] }
 0x65a   :  { %v7522_v31 = vpop.f32.mrf.mxu1  ;;  %v14338_v3 = vpop.f32.mrf.mxu0  ;;  %14641 = vmatmul.mubr.f32.gmra.mxu0 %v8915_v43  ;;  %v23650_v59 = vld [vmem:[#allocation50_spill] sm:$0xff]  ;;  %v8918_v43 = vld [vmem:[#allocation2 + $0x2e9] sm:$0xff] }
 0x65b   :  { %23646 = vst [vmem:[#allocation26_spill] sm:$0xff] %v20720_v17  ;;  %v7761_v57 = vadd.f32 %v7522_v31, %v23647_v29  ;;  %v20723_v39 = vadd.f32 %v14338_v3, %v7760_v33  ;;  %14643 = vmatprep.mubr.f32.mxu0 %v8916_v56  ;;  %v8392_v29 = vld [vmem:[#allocation2 + $0x308] sm:$0xff] }
 0x65c   :  { %v14216_v27 = vpop.f32.mrf.mxu1  ;;  %14519 = vmatmul.mubr.f32.gmra.mxu1 %v8390_v49  ;;  %v8041_v6 = vpop.f32.mrf.mxu0  ;;  %v8393_v49 = vld [vmem:[#allocation2 + $0x318] sm:$0xff] }
 0x65d   :  { %v7764_v22 = vadd.f32 %v14216_v27, %v23648_v51  ;;  %14521 = vmatprep.mubr.f32.mxu1 %v8391_v26  ;;  %v20726_v18 = vadd.f32 %v8041_v6, %v7759_v13  ;;  %v8919_v26 = vld [vmem:[#allocation2 + $0x2f1] sm:$0xff] }
 0x65e   :  { %v7532_v30 = vpop.f32.mrf.mxu1  ;;  %v14341_v17 = vpop.f32.mrf.mxu0  ;;  %14644 = vmatmul.mubr.f32.gmra.mxu0 %v8917_v21  ;;  %v23651_v51 = vld [vmem:[#allocation17_spill] sm:$0xff]  ;;  %v8920_v21 = vld [vmem:[#allocation2 + $0x301] sm:$0xff] }
 0x65f   :  { %23649 = vst [vmem:[#allocation25_spill] sm:$0xff] %v20726_v18  ;;  %v7763_v31 = vadd.f32 %v7532_v30, %v23650_v59  ;;  %v20729_v33 = vadd.f32 %v14341_v17, %v7762_v34  ;;  %14646 = vmatprep.mubr.f32.mxu0 %v8918_v43  ;;  %v8394_v30 = vld [vmem:[#allocation2 + $0x320] sm:$0xff] }
 0x660   :  { %v14219_v54 = vpop.f32.mrf.mxu1  ;;  %14522 = vmatmul.mubr.f32.gmra.mxu1 %v8392_v29  ;;  %v8051_v3 = vpop.f32.mrf.mxu0  ;;  %v8395_v29 = vld [vmem:[#allocation2 + $0x330] sm:$0xff] }
 0x661   :  { %v7766_v27 = vadd.f32 %v14219_v54, %v20500_v55  ;;  %14524 = vmatprep.mubr.f32.mxu1 %v8393_v49  ;;  %v20732_v13 = vadd.f32 %v8051_v3, %v7761_v57  ;;  %v8397_v57 = vld [vmem:[#allocation2 + $0x348] sm:$0xff] }
 0x662   :  { %v7542_v56 = vpop.f32.mrf.mxu1  ;;  %v14344_v59 = vpop.f32.mrf.mxu0  ;;  %14647 = vmatmul.mubr.f32.gmra.mxu0 %v8919_v26  ;;  %v8921_v49 = vld [vmem:[#allocation2 + $0x309] sm:$0xff] }
 0x663   :  { %v7765_v6 = vadd.f32 %v7542_v56, %v23651_v51  ;;  %v20735_v34 = vadd.f32 %v14344_v59, %v7764_v22  ;;  %14649 = vmatprep.mubr.f32.mxu0 %v8920_v21  ;;  %v8396_v56 = vld [vmem:[#allocation2 + $0x338] sm:$0xff] }
 0x664   :  { %v14222_v18 = vpop.f32.mrf.mxu1  ;;  %14525 = vmatmul.mubr.f32.gmra.mxu1 %v8394_v30  ;;  %v8061_v54 = vpop.f32.mrf.mxu0  ;;  %v8922_v51 = vld [vmem:[#allocation2 + $0x319] sm:$0xff] }
 0x665   :  { %v7768_v55 = vadd.f32 %v14222_v18, %v20506_v8  ;;  %14527 = vmatprep.mubr.f32.mxu1 %v8395_v29  ;;  %v20738_v43 = vadd.f32 %v8061_v54, %v7763_v31  ;;  %v8923_v31 = vld [vmem:[#allocation2 + $0x321] sm:$0xff] }
 0x666   :  { %v7552_v17 = vpop.f32.mrf.mxu1  ;;  %v14347_v26 = vpop.f32.mrf.mxu0  ;;  %14650 = vmatmul.mubr.f32.gmra.mxu0 %v8921_v49  ;;  %v23652_v29 = vld [vmem:[#allocation16_spill] sm:$0xff] }
 0x667   :  { %v7767_v3 = vadd.f32 %v7552_v17, %v20509_v40  ;;  %v20741_v22 = vadd.f32 %v14347_v26, %v7766_v27  ;;  %14652 = vmatprep.mubr.f32.mxu0 %v8922_v51  ;;  %v8924_v17 = vld [vmem:[#allocation2 + $0x331] sm:$0xff]  ;;  %v8926_v26 = vld [vmem:[#allocation2 + $0x349] sm:$0xff] }
 0x668   :  { %v14225_v30 = vpop.f32.mrf.mxu1  ;;  %14528 = vmatmul.mubr.f32.gmra.mxu1 %v8396_v56  ;;  %v8071_v18 = vpop.f32.mrf.mxu0  ;;  %v9393_v56 = vld [vmem:[#allocation2 + $0x32] sm:$0xff] }
 0x669   :  { %v7770_v8 = vadd.f32 %v14225_v30, %v20515_v25  ;;  %14530 = vmatprep.mubr.f32.mxu1 %v8397_v57  ;;  %v20744_v21 = vadd.f32 %v8071_v18, %v7765_v6  ;;  %v8925_v30 = vld [vmem:[#allocation2 + $0x339] sm:$0xff] }
 0x66a   :  { %v7562_v59 = vpop.f32.mrf.mxu1  ;;  %v14350_v40 = vpop.f32.mrf.mxu0  ;;  %14653 = vmatmul.mubr.f32.gmra.mxu0 %v8923_v31 }
 0x66b   :  { %v7769_v54 = vadd.f32 %v7562_v59, %v23652_v29  ;;  %v20748_v27 = vadd.f32 %v14350_v40, %v7768_v55  ;;  %14655 = vmatprep.mubr.f32.mxu0 %v8924_v17  ;;  %v9394_v59 = vld [vmem:[#allocation2 + $0x3a] sm:$0xff]  ;;  %v8927_v40 = vld [vmem:[#allocation2 + $0x351] sm:$0xff] }
 0x66c   :  { %v14228_v49 = vpop.f32.mrf.mxu1  ;;  %14531 = vmatmul.mubr.f32.gmra.mxu1 %v20648_v46  ;;  %v8081_v57 = vpop.f32.mrf.mxu0  ;;  %v9395_v46 = vld [vmem:[#allocation2 + $0x4a] sm:$0xff] }
 0x66d   :  { %v7772_v25 = vadd.f32 %v14228_v49, %v20525_v0  ;;  %14693 = vmatprep.mubr.f32.mxu1 %v9393_v56  ;;  %v20751_v51 = vadd.f32 %v8081_v57, %v7767_v3 }
 0x66e   :  { %v7572_v6 = vpop.f32.mrf.mxu1  ;;  %v14353_v31 = vpop.f32.mrf.mxu0  ;;  %14656 = vmatmul.mubr.f32.gmra.mxu0 %v8925_v30  ;;  %v9397_v30 = vld [vmem:[#allocation2 + $0x62] sm:$0xff] }
 0x66f   :  { %v7771_v18 = vadd.f32 %v7572_v6, %v20528_v35  ;;  %v20754_v55 = vadd.f32 %v14353_v31, %v7770_v8  ;;  %14658 = vmatprep.mubr.f32.mxu0 %v8926_v26  ;;  %v9396_v35 = vld [vmem:[#allocation2 + $0x52] sm:$0xff] }
 0x670   :  { %v14231_v29 = vpop.f32.mrf.mxu1  ;;  %14694 = vmatmul.mubr.f32.vlgmr.msra.gmra.mxu1 %v9394_v59  ;;  %v8091_v17 = vpop.f32.mrf.mxu0 }
 0x671   :  { %v7774_v0 = vadd.f32 %v14231_v29, %v20534_v11  ;;  %14696 = vmatprep.mubr.f32.mxu1 %v9395_v46  ;;  %v20757_v3 = vadd.f32 %v8091_v17, %v7769_v54  ;;  %v9398_v29 = vld [vmem:[#allocation2 + $0x6a] sm:$0xff]  ;;  %v9399_v17 = vld [vmem:[#allocation2 + $0x7a] sm:$0xff] }
 0x672   :  { %v7582_v49 = vpop.f32.mrf.mxu1  ;;  %v14356_v57 = vpop.f32.mrf.mxu0  ;;  %14659 = vmatmul.mubr.f32.gmra.mxu0 %v8927_v40 }
 0x673   :  { %v7773_v56 = vadd.f32 %v7582_v49, %v20537_v62  ;;  %v20760_v59 = vadd.f32 %v14356_v57, %v7772_v25 }
 0x674   :  { %v14234_v6 = vpop.f32.mrf.mxu1  ;;  %14697 = vmatmul.mubr.f32.gmra.mxu1 %v9396_v35  ;;  %v8101_v26 = vpop.f32.mrf.mxu0 }
 0x675   :  { %v7776_v8 = vadd.f32 %v14234_v6, %v20543_v10  ;;  %14699 = vmatprep.mubr.f32.mxu1 %v9397_v30  ;;  %v20763_v31 = vadd.f32 %v8101_v26, %v7771_v18  ;;  %v9400_v18 = vld [vmem:[#allocation2 + $0x82] sm:$0xff] }
 0x676   :  { %v7592_v11 = vpop.f32.mrf.mxu1  ;;  %v14359_v46 = vpop.f32.mrf.mxu0 }
 0x677   :  { %v7775_v54 = vadd.f32 %v7592_v11, %v20546_v36  ;;  %v20766_v40 = vadd.f32 %v14359_v46, %v7774_v0  ;;  %v9401_v36 = vld [vmem:[#allocation2 + $0x92] sm:$0xff] }
 0x678   :  { %v14237_v62 = vpop.f32.mrf.mxu1  ;;  %14700 = vmatmul.mubr.f32.gmra.mxu1 %v9398_v29  ;;  %v8111_v25 = vpop.f32.mrf.mxu0 }
 0x679   :  { %v7778_v49 = vadd.f32 %v14237_v62, %v20552_v32  ;;  %14702 = vmatprep.mubr.f32.mxu1 %v9399_v17  ;;  %v20769_v10 = vadd.f32 %v8111_v25, %v7773_v56  ;;  %v9402_v56 = vld [vmem:[#allocation2 + $0x9a] sm:$0xff] }
 0x67a   :  { %v7602_v35 = vpop.f32.mrf.mxu1  ;;  %v14362_v6 = vpop.f32.mrf.mxu0 }
 0x67b   :  { %v7777_v57 = vadd.f32 %v7602_v35, %v20555_v15  ;;  %v20772_v26 = vadd.f32 %v14362_v6, %v7776_v8  ;;  %v9403_v15 = vld [vmem:[#allocation2 + $0xaa] sm:$0xff] }
 0x67c   :  { %v14240_v30 = vpop.f32.mrf.mxu1  ;;  %14703 = vmatmul.mubr.f32.gmra.mxu1 %v9400_v18  ;;  %v8121_v0 = vpop.f32.mrf.mxu0 }
 0x67d   :  { %v7780_v11 = vadd.f32 %v14240_v30, %v20561_v52  ;;  %14705 = vmatprep.mubr.f32.mxu1 %v9401_v36  ;;  %v20775_v32 = vadd.f32 %v8121_v0, %v7775_v54  ;;  %v9404_v54 = vld [vmem:[#allocation2 + $0xb2] sm:$0xff] }
 0x67e   :  { %v7612_v29 = vpop.f32.mrf.mxu1  ;;  %v14365_v62 = vpop.f32.mrf.mxu0 }
 0x67f   :  { %v7779_v46 = vadd.f32 %v7612_v29, %v20564_v12  ;;  %v20778_v25 = vadd.f32 %v14365_v62, %v7778_v49  ;;  %v9405_v12 = vld [vmem:[#allocation2 + $0xc2] sm:$0xff] }
 0x680   :  { %v14243_v17 = vpop.f32.mrf.mxu1  ;;  %14706 = vmatmul.mubr.f32.gmra.mxu1 %v9402_v56  ;;  %v8131_v8 = vpop.f32.mrf.mxu0 }
 0x681   :  { %v7782_v35 = vadd.f32 %v14243_v17, %v20570_v38  ;;  %14708 = vmatprep.mubr.f32.mxu1 %v9403_v15  ;;  %v20781_v52 = vadd.f32 %v8131_v8, %v7777_v57  ;;  %v9406_v57 = vld [vmem:[#allocation2 + $0xca] sm:$0xff] }
 0x682   :  { %v7622_v18 = vpop.f32.mrf.mxu1  ;;  %v14368_v30 = vpop.f32.mrf.mxu0 }
 0x683   :  { %v7781_v6 = vadd.f32 %v7622_v18, %v20573_v61  ;;  %v20784_v0 = vadd.f32 %v14368_v30, %v7780_v11  ;;  %v9407_v61 = vld [vmem:[#allocation2 + $0xda] sm:$0xff]  ;;  %v23656_v18 = vld [vmem:[#allocation48_spill] sm:$0xff] }
 0x684   :  { %v14246_v36 = vpop.f32.mrf.mxu1  ;;  %14709 = vmatmul.mubr.f32.gmra.mxu1 %v9404_v54  ;;  %v8141_v49 = vpop.f32.mrf.mxu0 }
 0x685   :  { %23653 = vst [vmem:[#allocation55_spill] sm:$0xff] %v20784_v0  ;;  %v7784_v29 = vadd.f32 %v14246_v36, %v20579_v14  ;;  %14711 = vmatprep.mubr.f32.mxu1 %v9405_v12  ;;  %v20787_v38 = vadd.f32 %v8141_v49, %v7779_v46  ;;  %v23658_v36 = vld [vmem:[#allocation52_spill] sm:$0xff] }
 0x686   :  { %v7632_v56 = vpop.f32.mrf.mxu1  ;;  %v14371_v17 = vpop.f32.mrf.mxu0  ;;  %v9408_v46 = vld [vmem:[#allocation2 + $0xe2] sm:$0xff] }
 0x687   :  { %23654 = vst [vmem:[#allocation60_spill] sm:$0xff] %v20787_v38  ;;  %v7783_v62 = vadd.f32 %v7632_v56, %v20582_v28  ;;  %v20790_v8 = vadd.f32 %v14371_v17, %v7782_v35  ;;  %v9409_v28 = vld [vmem:[#allocation2 + $0xf2] sm:$0xff] }
 0x688   :  { %v14249_v15 = vpop.f32.mrf.mxu1  ;;  %14712 = vmatmul.mubr.f32.gmra.mxu1 %v9406_v57  ;;  %v8151_v11 = vpop.f32.mrf.mxu0  ;;  %v23660_v57 = vld [vmem:[#allocation21_spill] sm:$0xff] }
 0x689   :  { %23655 = vst [vmem:[#allocation28_spill] sm:$0xff] %v20790_v8  ;;  %v7786_v54 = vadd.f32 %v14249_v15, %v23656_v18  ;;  %14714 = vmatprep.mubr.f32.mxu1 %v9407_v61  ;;  %v20793_v14 = vadd.f32 %v8151_v11, %v7781_v6  ;;  %v23662_v61 = vld [vmem:[#allocation20_spill] sm:$0xff]  ;;  %v9410_v6 = vld [vmem:[#allocation2 + $0xfa] sm:$0xff] }
 0x68a   :  { %v7642_v30 = vpop.f32.mrf.mxu1  ;;  %v14374_v49 = vpop.f32.mrf.mxu0 }
 0x68b   :  { %23657 = vst [vmem:[#allocation27_spill] sm:$0xff] %v20793_v14  ;;  %v7785_v12 = vadd.f32 %v7642_v30, %v23658_v36  ;;  %v20796_v56 = vadd.f32 %v14374_v49, %v7784_v29  ;;  %v9411_v30 = vld [vmem:[#allocation2 + $0x10a] sm:$0xff] }
 0x68c   :  { %v14252_v38 = vpop.f32.mrf.mxu1  ;;  %14715 = vmatmul.mubr.f32.gmra.mxu1 %v9408_v46  ;;  %v8161_v35 = vpop.f32.mrf.mxu0  ;;  %v23664_v46 = vld [vmem:[#allocation49_spill] sm:$0xff] }
 0x68d   :  { %23659 = vst [vmem:[#allocation57_spill] sm:$0xff] %v20796_v56  ;;  %v7788_v0 = vadd.f32 %v14252_v38, %v23660_v57  ;;  %14717 = vmatprep.mubr.f32.mxu1 %v9409_v28  ;;  %v20799_v15 = vadd.f32 %v8161_v35, %v7783_v62  ;;  %v23666_v28 = vld [vmem:[#allocation54_spill] sm:$0xff] }
 0x68e   :  { %v7652_v17 = vpop.f32.mrf.mxu1  ;;  %v14377_v11 = vpop.f32.mrf.mxu0  ;;  %v9412_v62 = vld [vmem:[#allocation2 + $0x112] sm:$0xff] }
 0x68f   :  { %23661 = vst [vmem:[#allocation30_spill] sm:$0xff] %v20799_v15  ;;  %v7787_v18 = vadd.f32 %v7652_v17, %v23662_v61  ;;  %v20802_v36 = vadd.f32 %v14377_v11, %v7786_v54  ;;  %v9413_v17 = vld [vmem:[#allocation2 + $0x122] sm:$0xff] }
 0x690   :  { %v14255_v14 = vpop.f32.mrf.mxu1  ;;  %14718 = vmatmul.mubr.f32.gmra.mxu1 %v9410_v6  ;;  %v8171_v29 = vpop.f32.mrf.mxu0  ;;  %v23667_v6 = vld [vmem:[#allocation18_spill] sm:$0xff] }
 0x691   :  { %23663 = vst [vmem:[#allocation29_spill] sm:$0xff] %v20802_v36  ;;  %v7790_v8 = vadd.f32 %v14255_v14, %v23664_v46  ;;  %14720 = vmatprep.mubr.f32.mxu1 %v9411_v30  ;;  %v20805_v38 = vadd.f32 %v8171_v29, %v7785_v12  ;;  %v23669_v30 = vld [vmem:[#allocation22_spill] sm:$0xff]  ;;  %v9414_v12 = vld [vmem:[#allocation2 + $0x12a] sm:$0xff] }
 0x692   :  { %v7662_v49 = vpop.f32.mrf.mxu1  ;;  %v14380_v35 = vpop.f32.mrf.mxu0 }
 0x693   :  { %23665 = vst [vmem:[#allocation59_spill] sm:$0xff] %v20805_v38  ;;  %v7789_v57 = vadd.f32 %v7662_v49, %v23666_v28  ;;  %v20808_v61 = vadd.f32 %v14380_v35, %v7788_v0  ;;  %v9415_v49 = vld [vmem:[#allocation2 + $0x13a] sm:$0xff] }
 0x694   :  { %v14258_v15 = vpop.f32.mrf.mxu1  ;;  %14721 = vmatmul.mubr.f32.gmra.mxu1 %v9412_v62  ;;  %v8181_v54 = vpop.f32.mrf.mxu0  ;;  %v23670_v62 = vld [vmem:[#allocation51_spill] sm:$0xff] }
 0x695   :  { %v7792_v56 = vadd.f32 %v14258_v15, %v23667_v6  ;;  %14723 = vmatprep.mubr.f32.mxu1 %v9413_v17  ;;  %v20811_v14 = vadd.f32 %v8181_v54, %v7787_v18  ;;  %v23671_v17 = vld [vmem:[#allocation56_spill] sm:$0xff] }
 0x696   :  { %v7672_v11 = vpop.f32.mrf.mxu1  ;;  %v14383_v29 = vpop.f32.mrf.mxu0  ;;  %v9416_v18 = vld [vmem:[#allocation2 + $0x142] sm:$0xff] }
 0x697   :  { %23668 = vst [vmem:[#allocation64_spill] sm:$0xff] %v20811_v14  ;;  %v7791_v46 = vadd.f32 %v7672_v11, %v23669_v30  ;;  %v20814_v28 = vadd.f32 %v14383_v29, %v7790_v8  ;;  %v9417_v11 = vld [vmem:[#allocation2 + $0x152] sm:$0xff] }
 0x698   :  { %v14261_v38 = vpop.f32.mrf.mxu1  ;;  %14724 = vmatmul.mubr.f32.gmra.mxu1 %v9414_v12  ;;  %v8191_v0 = vpop.f32.mrf.mxu0 }
 0x699   :  { %v7794_v36 = vadd.f32 %v14261_v38, %v23670_v62  ;;  %14726 = vmatprep.mubr.f32.mxu1 %v9415_v49  ;;  %v20817_v15 = vadd.f32 %v8191_v0, %v7789_v57  ;;  %v9418_v57 = vld [vmem:[#allocation2 + $0x15a] sm:$0xff] }
 0x69a   :  { %v7682_v35 = vpop.f32.mrf.mxu1  ;;  %v14386_v54 = vpop.f32.mrf.mxu0 }
 0x69b   :  { %v7793_v6 = vadd.f32 %v7682_v35, %v23671_v17  ;;  %v20820_v30 = vadd.f32 %v14386_v54, %v7792_v56  ;;  %v9419_v35 = vld [vmem:[#allocation2 + $0x16a] sm:$0xff] }
 0x69c   :  { %v14264_v14 = vpop.f32.mrf.mxu1  ;;  %14727 = vmatmul.mubr.f32.gmra.mxu1 %v9416_v18  ;;  %v8201_v8 = vpop.f32.mrf.mxu0 }
 0x69d   :  { %v7796_v12 = vadd.f32 %v14264_v14, %v20633_v7  ;;  %14729 = vmatprep.mubr.f32.mxu1 %v9417_v11  ;;  %v20823_v38 = vadd.f32 %v8201_v8, %v7791_v46  ;;  %v9420_v46 = vld [vmem:[#allocation2 + $0x172] sm:$0xff] }
 0x69e   :  { %v7692_v29 = vpop.f32.mrf.mxu1  ;;  %v14389_v62 = vpop.f32.mrf.mxu0 }
 0x69f   :  { %v7795_v49 = vadd.f32 %v7692_v29, %v20636_v47  ;;  %v20826_v17 = vadd.f32 %v14389_v62, %v7794_v36  ;;  %v9421_v47 = vld [vmem:[#allocation2 + $0x182] sm:$0xff] }
 0x6a0   :  { %v14267_v0 = vpop.f32.mrf.mxu1  ;;  %14730 = vmatmul.mubr.f32.gmra.mxu1 %v9418_v57  ;;  %v8211_v56 = vpop.f32.mrf.mxu0 }
 0x6a1   :  { %v7798_v18 = vadd.f32 %v14267_v0, %v20642_v37  ;;  %14732 = vmatprep.mubr.f32.mxu1 %v9419_v35  ;;  %v20829_v7 = vadd.f32 %v8211_v56, %v7793_v6  ;;  %v9423_v37 = vld [vmem:[#allocation2 + $0x19a] sm:$0xff]  ;;  %v9422_v35 = vld [vmem:[#allocation2 + $0x18a] sm:$0xff] }
 0x6a2   :  { %v7702_v54 = vpop.f32.mrf.mxu1  ;;  %v14392_v11 = vpop.f32.mrf.mxu0 }
 0x6a3   :  { %v7797_v14 = vadd.f32 %v7702_v54, %v20645_v50  ;;  %v20832_v29 = vadd.f32 %v14392_v11, %v7796_v12  ;;  %v9424_v12 = vld [vmem:[#allocation2 + $0x1a2] sm:$0xff] }
 0x6a4   :  { %v14270_v8 = vpop.f32.mrf.mxu1  ;;  %14733 = vmatmul.mubr.f32.gmra.mxu1 %v9420_v46  ;;  %v8221_v36 = vpop.f32.mrf.mxu0 }
 0x6a5   :  { %v7800_v57 = vadd.f32 %v14270_v8, %v20651_v1  ;;  %14735 = vmatprep.mubr.f32.mxu1 %v9421_v47  ;;  %v20835_v0 = vadd.f32 %v8221_v36, %v7795_v49 }
 0x6a6   :  { %v7712_v62 = vpop.f32.mrf.mxu1  ;;  %v14395_v56 = vpop.f32.mrf.mxu0 }
 0x6a7   :  { %v7799_v6 = vadd.f32 %v7712_v62, %v20654_v19  ;;  %v20838_v54 = vadd.f32 %v14395_v56, %v7798_v18  ;;  %v9425_v19 = vld [vmem:[#allocation2 + $0x1e2] sm:$0xff] }
 0x6a8   :  { %v14273_v50 = vpop.f32.mrf.mxu1  ;;  %14736 = vmatmul.mubr.f32.gmra.mxu1 %v9422_v35  ;;  %v8231_v11 = vpop.f32.mrf.mxu0 }
 0x6a9   :  { %v7802_v46 = vadd.f32 %v14273_v50, %v20657_v9  ;;  %14738 = vmatprep.mubr.f32.mxu1 %v9423_v37  ;;  %v20841_v8 = vadd.f32 %v8231_v11, %v7797_v14  ;;  %v9426_v50 = vld [vmem:[#allocation2 + $0x1ea] sm:$0xff] }
 0x6aa   :  { %v7722_v1 = vpop.f32.mrf.mxu1  ;;  %v14398_v49 = vpop.f32.mrf.mxu0 }
 0x6ab   :  { %v7801_v47 = vadd.f32 %v7722_v1, %v20660_v16  ;;  %v20844_v62 = vadd.f32 %v14398_v49, %v7800_v57  ;;  %v9427_v16 = vld [vmem:[#allocation2 + $0x1fa] sm:$0xff] }
 0x6ac   :  { %v14276_v36 = vpop.f32.mrf.mxu1  ;;  %14739 = vmatmul.mubr.f32.gmra.mxu1 %v9424_v12  ;;  %v8241_v18 = vpop.f32.mrf.mxu0 }
 0x6ad   :  { %v7804_v35 = vadd.f32 %v14276_v36, %v20663_v2  ;;  %14741 = vmatprep.mubr.f32.mxu1 %v9425_v19  ;;  %v20847_v9 = vadd.f32 %v8241_v18, %v7799_v6  ;;  %v9428_v36 = vld [vmem:[#allocation2 + $0x202] sm:$0xff]  ;;  %v9429_v18 = vld [vmem:[#allocation2 + $0x212] sm:$0xff] }
 0x6ae   :  { %v7732_v56 = vpop.f32.mrf.mxu1  ;;  %v14401_v14 = vpop.f32.mrf.mxu0 }
 0x6af   :  { %v7803_v37 = vadd.f32 %v7732_v56, %v20666_v23  ;;  %v20850_v1 = vadd.f32 %v14401_v14, %v7802_v46 }
 0x6b0   :  { %v14439_v11 = vpop.f32.mrf.mxu1  ;;  %14742 = vmatmul.mubr.f32.gmra.mxu1 %v9426_v50  ;;  %v8251_v57 = vpop.f32.mrf.mxu0 }
 0x6b1   :  { %v20853_v12 = vadd.f32 %v14439_v11, %v20669_v60  ;;  %14744 = vmatprep.mubr.f32.mxu1 %v9427_v16  ;;  %v20855_v49 = vadd.f32 %v8251_v57, %v7801_v47  ;;  %v9431_v57 = vld [vmem:[#allocation2 + $0x22a] sm:$0xff] }
 0x6b2   :  { %v8481_v2 = vpop.f32.mrf.mxu1  ;;  %v14404_v23 = vpop.f32.mrf.mxu0 }
 0x6b3   :  { %v20858_v6 = vadd.f32 %v8481_v2, %v20672_v58  ;;  %v20860_v56 = vadd.f32 %v14404_v23, %v7804_v35  ;;  %v9430_v58 = vld [vmem:[#allocation2 + $0x21a] sm:$0xff] }
 0x6b4   :  { %v14442_v19 = vpop.f32.mrf.mxu1  ;;  %14745 = vmatmul.mubr.f32.gmra.mxu1 %v9428_v36  ;;  %v8261_v60 = vpop.f32.mrf.mxu0 }
 0x6b5   :  { %v20863_v46 = vadd.f32 %v14442_v19, %v20675_v20  ;;  %14747 = vmatprep.mubr.f32.mxu1 %v9429_v18  ;;  %v20865_v14 = vadd.f32 %v8261_v60, %v7803_v37  ;;  %v9432_v37 = vld [vmem:[#allocation2 + $0x232] sm:$0xff]  ;;  %v9433_v19 = vld [vmem:[#allocation2 + $0x242] sm:$0xff] }
 0x6b6   :  { %v8491_v50 = vpop.f32.mrf.mxu1  ;;  %v20870_v11 = vpop.f32.mrf.mxu0 }
 0x6b7   :  { %v20868_v47 = vadd.f32 %v8491_v50, %v20678_v24 }
 0x6b8   :  { %v14445_v16 = vpop.f32.mrf.mxu1  ;;  %14748 = vmatmul.mubr.f32.gmra.mxu1 %v9430_v58  ;;  %v20875_v20 = vpop.f32.mrf.mxu0  ;;  %v9434_v58 = vld [vmem:[#allocation2 + $0x24a] sm:$0xff] }
 0x6b9   :  { %v20873_v35 = vadd.f32 %v14445_v16, %v20681_v5  ;;  %14750 = vmatprep.mubr.f32.mxu1 %v9431_v57  ;;  %v9435_v57 = vld [vmem:[#allocation2 + $0x25a] sm:$0xff] }
 0x6ba   :  { %v8501_v2 = vpop.f32.mrf.mxu1  ;;  %v20880_v23 = vpop.f32.mrf.mxu0 }
 0x6bb   :  { %v20878_v36 = vadd.f32 %v8501_v2, %v20684_v4 }
 0x6bc   :  { %v14448_v24 = vpop.f32.mrf.mxu1  ;;  %14751 = vmatmul.mubr.f32.gmra.mxu1 %v9432_v37  ;;  %v20885_v60 = vpop.f32.mrf.mxu0 }
 0x6bd   :  { %v20883_v18 = vadd.f32 %v14448_v24, %v20687_v63  ;;  %14753 = vmatprep.mubr.f32.mxu1 %v9433_v19  ;;  %v9436_v19 = vld [vmem:[#allocation2 + $0x262] sm:$0xff] }
 0x6be   :  { %v8511_v5 = vpop.f32.mrf.mxu1  ;;  %v20890_v16 = vpop.f32.mrf.mxu0 }
 0x6bf   :  { %23672 = vst [vmem:[#allocation32_spill] sm:$0xff] %v20883_v18  ;;  %v20888_v50 = vadd.f32 %v8511_v5, %v20690_v45  ;;  %v9437_v45 = vld [vmem:[#allocation2 + $0x272] sm:$0xff] }
 0x6c0   :  { %v14451_v4 = vpop.f32.mrf.mxu1  ;;  %14754 = vmatmul.mubr.f32.gmra.mxu1 %v9434_v58  ;;  %v20895_v37 = vpop.f32.mrf.mxu0 }
 0x6c1   :  { %23673 = vst [vmem:[#allocation31_spill] sm:$0xff] %v20888_v50  ;;  %v20893_v2 = vadd.f32 %v14451_v4, %v20693_v42  ;;  %14756 = vmatprep.mubr.f32.mxu1 %v9435_v57  ;;  %v9438_v4 = vld [vmem:[#allocation2 + $0x27a] sm:$0xff] }
 0x6c2   :  { %v8521_v63 = vpop.f32.mrf.mxu1  ;;  %v20903_v58 = vpop.f32.mrf.mxu0 }
 0x6c3   :  { %23674 = vst [vmem:[#allocation61_spill] sm:$0xff] %v20893_v2  ;;  %v20898_v24 = vadd.f32 %v8521_v63, %v20696_v48  ;;  %23677 = vst [vmem:[#allocation33_spill] sm:$0xff] %v20903_v58  ;;  %v9439_v2 = vld [vmem:[#allocation2 + $0x28a] sm:$0xff]  ;;  %v9441_v58 = vld [vmem:[#allocation2 + $0x2a2] sm:$0xff] }
 0x6c4   :  { %v14454_v18 = vpop.f32.mrf.mxu1  ;;  %14757 = vmatmul.mubr.f32.gmra.mxu1 %v9436_v19  ;;  %v23679_v48 = vld [vmem:[#allocation24_spill] sm:$0xff]  ;;  %v20911_v19 = vpop.f32.mrf.mxu0 }
 0x6c5   :  { %23675 = vst [vmem:[#allocation66_spill] sm:$0xff] %v20898_v24  ;;  %v20901_v5 = vadd.f32 %v14454_v18, %v20699_v41  ;;  %14759 = vmatprep.mubr.f32.mxu1 %v9437_v45  ;;  %v23681_v41 = vld [vmem:[#allocation23_spill] sm:$0xff]  ;;  %v9440_v45 = vld [vmem:[#allocation2 + $0x292] sm:$0xff] }
 0x6c6   :  { %v8531_v50 = vpop.f32.mrf.mxu1 }
 0x6c7   :  { %23676 = vst [vmem:[#allocation34_spill] sm:$0xff] %v20901_v5  ;;  %v20906_v42 = vadd.f32 %v8531_v50, %v20702_v53  ;;  %v20919_v50 = vpop.f32.mrf.mxu0 }
 0x6c8   :  { %v14457_v57 = vpop.f32.mrf.mxu1  ;;  %14760 = vmatmul.mubr.f32.gmra.mxu1 %v9438_v4  ;;  %23684 = vst [vmem:[#allocation35_spill] sm:$0xff] %v20919_v50  ;;  %v9445_v50 = vld [vmem:[#allocation2 + $0x2d2] sm:$0xff] }
 0x6c9   :  { %23678 = vst [vmem:[#allocation63_spill] sm:$0xff] %v20906_v42  ;;  %v20909_v63 = vadd.f32 %v14457_v57, %v23679_v48  ;;  %14762 = vmatprep.mubr.f32.mxu1 %v9439_v2  ;;  %v23685_v57 = vld [vmem:[#allocation53_spill] sm:$0xff]  ;;  %v9443_v42 = vld [vmem:[#allocation2 + $0x2ba] sm:$0xff] }
 0x6ca   :  { %v8541_v24 = vpop.f32.mrf.mxu1  ;;  %v9442_v2 = vld [vmem:[#allocation2 + $0x2aa] sm:$0xff] }
 0x6cb   :  { %23680 = vst [vmem:[#allocation94_spill] sm:$0xff] %v20909_v63  ;;  %v20914_v18 = vadd.f32 %v8541_v24, %v23681_v41  ;;  %v23687_v24 = vld [vmem:[#allocation58_spill] sm:$0xff] }
 0x6cc   :  { %v14460_v5 = vpop.f32.mrf.mxu1  ;;  %14763 = vmatmul.mubr.f32.gmra.mxu1 %v9440_v45  ;;  %v20927_v45 = vpop.f32.mrf.mxu0 }
 0x6cd   :  { %23682 = vst [vmem:[#allocation68_spill] sm:$0xff] %v20914_v18  ;;  %v20917_v53 = vadd.f32 %v14460_v5, %v20711_v44  ;;  %14765 = vmatprep.mubr.f32.mxu1 %v9441_v58  ;;  %v23689_v44 = vld [vmem:[#allocation26_spill] sm:$0xff]  ;;  %v9444_v58 = vld [vmem:[#allocation2 + $0x2c2] sm:$0xff] }
 0x6ce   :  { %v8551_v4 = vpop.f32.mrf.mxu1 }
 0x6cf   :  { %23683 = vst [vmem:[#allocation62_spill] sm:$0xff] %v20917_v53  ;;  %v20922_v48 = vadd.f32 %v8551_v4, %v23685_v57  ;;  %v20935_v57 = vpop.f32.mrf.mxu0 }
 0x6d0   :  { %v14463_v63 = vpop.f32.mrf.mxu1  ;;  %14766 = vmatmul.mubr.f32.gmra.mxu1 %v9442_v2 }
 0x6d1   :  { %23686 = vst [vmem:[#allocation65_spill] sm:$0xff] %v20922_v48  ;;  %v20925_v41 = vadd.f32 %v14463_v63, %v23687_v24  ;;  %14768 = vmatprep.mubr.f32.mxu1 %v9443_v42  ;;  %v23691_v63 = vld [vmem:[#allocation25_spill] sm:$0xff]  ;;  %v9446_v42 = vld [vmem:[#allocation2 + $0x2da] sm:$0xff] }
 0x6d2   :  { %v8561_v18 = vpop.f32.mrf.mxu1  ;;  %v9447_v48 = vld [vmem:[#allocation2 + $0x2ea] sm:$0xff] }
 0x6d3   :  { %23688 = vst [vmem:[#allocation70_spill] sm:$0xff] %v20925_v41  ;;  %v20930_v5 = vadd.f32 %v8561_v18, %v23689_v44  ;;  %v20943_v44 = vpop.f32.mrf.mxu0 }
 0x6d4   :  { %v14466_v53 = vpop.f32.mrf.mxu1  ;;  %14769 = vmatmul.mubr.f32.gmra.mxu1 %v9444_v58 }
 0x6d5   :  { %v20933_v4 = vadd.f32 %v14466_v53, %v20723_v39  ;;  %14771 = vmatprep.mubr.f32.mxu1 %v9445_v50  ;;  %v9448_v53 = vld [vmem:[#allocation2 + $0x2f2] sm:$0xff] }
 0x6d6   :  { %v8571_v2 = vpop.f32.mrf.mxu1 }
 0x6d7   :  { %23690 = vst [vmem:[#allocation38_spill] sm:$0xff] %v20933_v4  ;;  %v20938_v24 = vadd.f32 %v8571_v2, %v23691_v63  ;;  %v9449_v4 = vld [vmem:[#allocation2 + $0x302] sm:$0xff]  ;;  %v20951_v63 = vpop.f32.mrf.mxu0 }
 0x6d8   :  { %v14469_v41 = vpop.f32.mrf.mxu1  ;;  %14772 = vmatmul.mubr.f32.gmra.mxu1 %v9446_v42 }
 0x6d9   :  { %v20941_v18 = vadd.f32 %v14469_v41, %v20729_v33  ;;  %14774 = vmatprep.mubr.f32.mxu1 %v9447_v48  ;;  %v9450_v48 = vld [vmem:[#allocation2 + $0x30a] sm:$0xff] }
 0x6da   :  { %v8581_v58 = vpop.f32.mrf.mxu1 }
 0x6db   :  { %23692 = vst [vmem:[#allocation37_spill] sm:$0xff] %v20941_v18  ;;  %v20946_v39 = vadd.f32 %v8581_v58, %v20732_v13  ;;  %v9451_v18 = vld [vmem:[#allocation2 + $0x31a] sm:$0xff]  ;;  %v20959_v58 = vpop.f32.mrf.mxu0 }
 0x6dc   :  { %v14472_v50 = vpop.f32.mrf.mxu1  ;;  %14775 = vmatmul.mubr.f32.gmra.mxu1 %v9448_v53 }
 0x6dd   :  { %v20949_v2 = vadd.f32 %v14472_v50, %v20735_v34  ;;  %14777 = vmatprep.mubr.f32.mxu1 %v9449_v4  ;;  %v9452_v4 = vld [vmem:[#allocation2 + $0x322] sm:$0xff] }
 0x6de   :  { %v8591_v42 = vpop.f32.mrf.mxu1 }
 0x6df   :  { %23693 = vst [vmem:[#allocation67_spill] sm:$0xff] %v20949_v2  ;;  %v20954_v33 = vadd.f32 %v8591_v42, %v20738_v43  ;;  %v9453_v2 = vld [vmem:[#allocation2 + $0x332] sm:$0xff]  ;;  %v20967_v42 = vpop.f32.mrf.mxu0 }
 0x6e0   :  { %v14475_v41 = vpop.f32.mrf.mxu1  ;;  %14778 = vmatmul.mubr.f32.gmra.mxu1 %v9450_v48 }
 0x6e1   :  { %v20957_v13 = vadd.f32 %v14475_v41, %v20741_v22  ;;  %14780 = vmatprep.mubr.f32.mxu1 %v9451_v18  ;;  %v9455_v22 = vld [vmem:[#allocation2 + $0x34a] sm:$0xff]  ;;  %v9454_v41 = vld [vmem:[#allocation2 + $0x33a] sm:$0xff] }
 0x6e2   :  { %v8601_v53 = vpop.f32.mrf.mxu1 }
 0x6e3   :  { %23694 = vst [vmem:[#allocation72_spill] sm:$0xff] %v20957_v13  ;;  %v20962_v34 = vadd.f32 %v8601_v53, %v20744_v21  ;;  %v9456_v53 = vld [vmem:[#allocation2 + $0x352] sm:$0xff] }
 0x6e4   :  { %v14478_v50 = vpop.f32.mrf.mxu1  ;;  %14781 = vmatmul.mubr.f32.gmra.mxu1 %v9452_v4  ;;  %v20975_v4 = vpop.f32.mrf.mxu0 }
 0x6e5   :  { %v20965_v43 = vadd.f32 %v14478_v50, %v20748_v27  ;;  %14783 = vmatprep.mubr.f32.mxu1 %v9453_v2 }
 0x6e6   :  { %v8611_v48 = vpop.f32.mrf.mxu1 }
 0x6e7   :  { %23695 = vst [vmem:[#allocation40_spill] sm:$0xff] %v20965_v43  ;;  %v20970_v18 = vadd.f32 %v8611_v48, %v20751_v51  ;;  %v20983_v51 = vpop.f32.mrf.mxu0 }
 0x6e8   :  { %v14481_v13 = vpop.f32.mrf.mxu1  ;;  %14784 = vmatmul.mubr.f32.gmra.mxu1 %v9454_v41 }
 0x6e9   :  { %23696 = vst [vmem:[#allocation74_spill] sm:$0xff] %v20970_v18  ;;  %v20973_v21 = vadd.f32 %v14481_v13, %v20754_v55  ;;  %14786 = vmatprep.mubr.f32.mxu1 %v9455_v22  ;;  %v20991_v22 = vpop.f32.mrf.mxu0  ;;  %v23720_v18 = vld [vmem:[#allocation59_spill] sm:$0xff] }
 0x6ea   :  { %v8621_v27 = vpop.f32.mrf.mxu1 }
 0x6eb   :  { %23697 = vst [vmem:[#allocation42_spill] sm:$0xff] %v20973_v21  ;;  %v20978_v2 = vadd.f32 %v8621_v27, %v20757_v3  ;;  %v20999_v27 = vpop.f32.mrf.mxu0 }
 0x6ec   :  { %v14484_v50 = vpop.f32.mrf.mxu1  ;;  %14787 = vmatmul.mubr.f32.gmra.mxu1 %v9456_v53 }
 0x6ed   :  { %23698 = vst [vmem:[#allocation41_spill] sm:$0xff] %v20978_v2  ;;  %v20981_v43 = vadd.f32 %v14484_v50, %v20760_v59  ;;  %v23717_v2 = vld [vmem:[#allocation30_spill] sm:$0xff] }
 0x6ee   :  { %v8631_v48 = vpop.f32.mrf.mxu1 }
 0x6ef   :  { %23699 = vst [vmem:[#allocation71_spill] sm:$0xff] %v20981_v43  ;;  %v20986_v41 = vadd.f32 %v8631_v48, %v20763_v31  ;;  %v23709_v43 = vld [vmem:[#allocation60_spill] sm:$0xff] }
 0x6f0   :  { %v14487_v55 = vpop.f32.mrf.mxu1 }
 0x6f1   :  { %23700 = vst [vmem:[#allocation76_spill] sm:$0xff] %v20986_v41  ;;  %v20989_v13 = vadd.f32 %v14487_v55, %v20766_v40  ;;  %v21007_v55 = vpop.f32.mrf.mxu0  ;;  %v23713_v41 = vld [vmem:[#allocation27_spill] sm:$0xff] }
 0x6f2   :  { %v8641_v21 = vpop.f32.mrf.mxu1 }
 0x6f3   :  { %23701 = vst [vmem:[#allocation3_spill] sm:$0xff] %v20989_v13  ;;  %v20994_v3 = vadd.f32 %v8641_v21, %v20769_v10 }
 0x6f4   :  { %v14490_v53 = vpop.f32.mrf.mxu1 }
 0x6f5   :  { %23702 = vst [vmem:[#allocation43_spill] sm:$0xff] %v20994_v3  ;;  %v20997_v59 = vadd.f32 %v14490_v53, %v20772_v26  ;;  %v23707_v3 = vld [vmem:[#allocation55_spill] sm:$0xff]  ;;  %v21015_v53 = vpop.f32.mrf.mxu0 }
 0x6f6   :  { %v8651_v50 = vpop.f32.mrf.mxu1 }
 0x6f7   :  { %23703 = vst [vmem:[#allocation73_spill] sm:$0xff] %v20997_v59  ;;  %v21002_v31 = vadd.f32 %v8651_v50, %v20775_v32 }
 0x6f8   :  { %v14493_v48 = vpop.f32.mrf.mxu1 }
 0x6f9   :  { %23704 = vst [vmem:[#allocation78_spill] sm:$0xff] %v21002_v31  ;;  %v21005_v40 = vadd.f32 %v14493_v48, %v20778_v25  ;;  %v23711_v31 = vld [vmem:[#allocation28_spill] sm:$0xff]  ;;  %v21023_v48 = vpop.f32.mrf.mxu0 }
 0x6fa   :  { %v8661_v13 = vpop.f32.mrf.mxu1 }
 0x6fb   :  { %23705 = vst [vmem:[#allocation4_spill] sm:$0xff] %v21005_v40  ;;  %v21010_v10 = vadd.f32 %v8661_v13, %v20781_v52 }
 0x6fc   :  { %v14496_v21 = vpop.f32.mrf.mxu1 }
 0x6fd   :  { %23706 = vst [vmem:[#allocation19_spill] sm:$0xff] %v21010_v10  ;;  %v21013_v26 = vadd.f32 %v14496_v21, %v23707_v3  ;;  %v23715_v10 = vld [vmem:[#allocation57_spill] sm:$0xff]  ;;  %v21031_v21 = vpop.f32.mrf.mxu0 }
 0x6fe   :  { %v8671_v59 = vpop.f32.mrf.mxu1 }
 0x6ff   :  { %23708 = vst [vmem:[#allocation39_spill] sm:$0xff] %v21013_v26  ;;  %v21018_v32 = vadd.f32 %v8671_v59, %v23709_v43 }
 0x700   :  { %v14499_v50 = vpop.f32.mrf.mxu1 }
 0x701   :  { %23710 = vst [vmem:[#allocation69_spill] sm:$0xff] %v21018_v32  ;;  %v21021_v25 = vadd.f32 %v14499_v50, %v23711_v31  ;;  %v23718_v32 = vld [vmem:[#allocation29_spill] sm:$0xff]  ;;  %v21039_v50 = vpop.f32.mrf.mxu0 }
 0x702   :  { %v8681_v40 = vpop.f32.mrf.mxu1 }
 0x703   :  { %23712 = vst [vmem:[#allocation75_spill] sm:$0xff] %v21021_v25  ;;  %v21026_v52 = vadd.f32 %v8681_v40, %v23713_v41 }
 0x704   :  { %v14502_v13 = vpop.f32.mrf.mxu1 }
 0x705   :  { %23714 = vst [vmem:[#allocation80_spill] sm:$0xff] %v21026_v52  ;;  %v21029_v3 = vadd.f32 %v14502_v13, %v23715_v10  ;;  %v21047_v13 = vpop.f32.mrf.mxu0  ;;  %v23722_v52 = vld [vmem:[#allocation64_spill] sm:$0xff] }
 0x706   :  { %v8691_v26 = vpop.f32.mrf.mxu1 }
 0x707   :  { %23716 = vst [vmem:[#allocation5_spill] sm:$0xff] %v21029_v3  ;;  %v21034_v43 = vadd.f32 %v8691_v26, %v23717_v2 }
 0x708   :  { %v14505_v59 = vpop.f32.mrf.mxu1 }
 0x709   :  { %v21037_v31 = vadd.f32 %v14505_v59, %v23718_v32  ;;  %v21055_v59 = vpop.f32.mrf.mxu0 }
 0x70a   :  { %v8701_v25 = vpop.f32.mrf.mxu1 }
 0x70b   :  { %23719 = vst [vmem:[#allocation77_spill] sm:$0xff] %v21037_v31  ;;  %v21042_v41 = vadd.f32 %v8701_v25, %v23720_v18 }
 0x70c   :  { %v14508_v40 = vpop.f32.mrf.mxu1 }
 0x70d   :  { %v21045_v10 = vadd.f32 %v14508_v40, %v20808_v61  ;;  %v21063_v40 = vpop.f32.mrf.mxu0 }
 0x70e   :  { %v8711_v3 = vpop.f32.mrf.mxu1 }
 0x70f   :  { %23721 = vst [vmem:[#allocation8_spill] sm:$0xff] %v21045_v10  ;;  %v21050_v2 = vadd.f32 %v8711_v3, %v23722_v52 }
 0x710   :  { %v14511_v26 = vpop.f32.mrf.mxu1 }
 0x711   :  { %v21053_v32 = vadd.f32 %v14511_v26, %v20814_v28  ;;  %v21071_v26 = vpop.f32.mrf.mxu0 }
 0x712   :  { %v8721_v31 = vpop.f32.mrf.mxu1 }
 0x713   :  { %23723 = vst [vmem:[#allocation82_spill] sm:$0xff] %v21053_v32  ;;  %v21058_v18 = vadd.f32 %v8721_v31, %v20817_v15 }
 0x714   :  { %v14514_v25 = vpop.f32.mrf.mxu1 }
 0x715   :  { %v21061_v61 = vadd.f32 %v14514_v25, %v20820_v30  ;;  %v21079_v25 = vpop.f32.mrf.mxu0 }
 0x716   :  { %v8731_v10 = vpop.f32.mrf.mxu1 }
 0x717   :  { %23724 = vst [vmem:[#allocation7_spill] sm:$0xff] %v21061_v61  ;;  %v21066_v52 = vadd.f32 %v8731_v10, %v20823_v38 }
 0x718   :  { %v14517_v3 = vpop.f32.mrf.mxu1 }
 0x719   :  { %v21069_v28 = vadd.f32 %v14517_v3, %v20826_v17  ;;  %v21087_v3 = vpop.f32.mrf.mxu0 }
 0x71a   :  { %v8741_v32 = vpop.f32.mrf.mxu1 }
 0x71b   :  { %23725 = vst [vmem:[#allocation79_spill] sm:$0xff] %v21069_v28  ;;  %v21074_v15 = vadd.f32 %v8741_v32, %v20829_v7 }
 0x71c   :  { %v14520_v31 = vpop.f32.mrf.mxu1 }
 0x71d   :  { %v21077_v30 = vadd.f32 %v14520_v31, %v20832_v29  ;;  %v21095_v31 = vpop.f32.mrf.mxu0 }
 0x71e   :  { %v8751_v61 = vpop.f32.mrf.mxu1 }
 0x71f   :  { %23726 = vst [vmem:[#allocation84_spill] sm:$0xff] %v21077_v30  ;;  %v21082_v38 = vadd.f32 %v8751_v61, %v20835_v0 }
 0x720   :  { %v14523_v10 = vpop.f32.mrf.mxu1 }
 0x721   :  { %v21085_v17 = vadd.f32 %v14523_v10, %v20838_v54  ;;  %v21103_v10 = vpop.f32.mrf.mxu0 }
 0x722   :  { %v8761_v28 = vpop.f32.mrf.mxu1 }
 0x723   :  { %23727 = vst [vmem:[#allocation6_spill] sm:$0xff] %v21085_v17  ;;  %v21090_v7 = vadd.f32 %v8761_v28, %v20841_v8 }
 0x724   :  { %v14526_v32 = vpop.f32.mrf.mxu1 }
 0x725   :  { %v21093_v29 = vadd.f32 %v14526_v32, %v20844_v62  ;;  %v21111_v32 = vpop.f32.mrf.mxu0 }
 0x726   :  { %v8771_v30 = vpop.f32.mrf.mxu1 }
 0x727   :  { %23728 = vst [vmem:[#allocation10_spill] sm:$0xff] %v21093_v29  ;;  %v21098_v0 = vadd.f32 %v8771_v30, %v20847_v9 }
 0x728   :  { %v14529_v61 = vpop.f32.mrf.mxu1 }
 0x729   :  { %v21101_v54 = vadd.f32 %v14529_v61, %v20850_v1  ;;  %v9329_v1 = vadd.f32 %v20875_v20, %v20858_v6  ;;  %v21118_v61 = vpop.f32.mrf.mxu0  ;;  %v9332_v6 = vadd.f32 %v20880_v23, %v20863_v46 }
 0x72a   :  { %v8781_v17 = vpop.f32.mrf.mxu1 }
 0x72b   :  { %23729 = vst [vmem:[#allocation9_spill] sm:$0xff] %v21101_v54  ;;  %v21106_v8 = vadd.f32 %v8781_v17, %v20855_v49  ;;  %v9330_v49 = vadd.f32 %v20870_v11, %v20853_v12  ;;  %v9333_v11 = vadd.f32 %v20895_v37, %v20878_v36 }
 0x72c   :  { %v14532_v28 = vpop.f32.mrf.mxu1 }
 0x72d   :  { %v21109_v62 = vadd.f32 %v14532_v28, %v20860_v56  ;;  %v9331_v28 = vadd.f32 %v20885_v60, %v20868_v47 }
 0x72e   :  { %v8791_v29 = vpop.f32.mrf.mxu1 }
 0x72f   :  { %23730 = vst [vmem:[#allocation81_spill] sm:$0xff] %v21109_v62  ;;  %v21114_v9 = vadd.f32 %v8791_v29, %v20865_v14  ;;  %v21128_v14 = vpop.f32.mrf.mxu0 }
 0x730   :  { %v14695_v30 = vpop.f32.mrf.mxu1 }
 0x731   :  { %23731 = vst [vmem:[#allocation86_spill] sm:$0xff] %v21114_v9  ;;  %v21126_v62 = vadd.f32 %v14695_v30, %v9330_v49  ;;  %v21141_v60 = vpop.f32.mrf.mxu0 }
 0x732   :  { %v9539_v54 = vpop.f32.mrf.mxu1 }
 0x733   :  { %v21122_v17 = vadd.f32 %v9539_v54, %v9329_v1  ;;  %23733 = vst [vmem:[#allocation11_spill] sm:$0xff] %v21126_v62  ;;  %v9334_v1 = vadd.f32 %v20890_v16, %v20873_v35  ;;  %v21153_v37 = vpop.f32.mrf.mxu0 }
 0x734   :  { %v14698_v56 = vpop.f32.mrf.mxu1 }
 0x735   :  { %23732 = vst [vmem:[#allocation12_spill] sm:$0xff] %v21122_v17  ;;  %v9924_v20 = vadd.f32 %v21126_v62, %v21122_v17  ;;  %v21138_v54 = vadd.f32 %v14698_v56, %v9332_v6  ;;  %v23738_v6 = vld [vmem:[#allocation32_spill] sm:$0xff] }
 0x736   :  { %v9549_v29 = vpop.f32.mrf.mxu1 }
 0x737   :  { %v21134_v9 = vadd.f32 %v9549_v29, %v9331_v28  ;;  %23735 = vst [vmem:[#allocation88_spill] sm:$0xff] %v21138_v54  ;;  %v23737_v28 = vld [vmem:[#allocation31_spill] sm:$0xff] }
 0x738   :  { %v14701_v12 = vpop.f32.mrf.mxu1  ;;  %v9335_v29 = vadd.f32 %v20911_v19, %v23737_v28  ;;  %v23743_v28 = vld [vmem:[#allocation35_spill] sm:$0xff] }
 0x739   :  { %23734 = vst [vmem:[#allocation83_spill] sm:$0xff] %v21134_v9  ;;  %v9925_v47 = vadd.f32 %v9924_v20, %v21134_v9  ;;  %v21150_v62 = vadd.f32 %v14701_v12, %v9334_v1  ;;  %v23739_v20 = vld [vmem:[#allocation33_spill] sm:$0xff]  ;;  %v21165_v12 = vpop.f32.mrf.mxu0 }
 0x73a   :  { %v9559_v30 = vpop.f32.mrf.mxu1  ;;  %v9336_v9 = vadd.f32 %v23739_v20, %v23738_v6 }
 0x73b   :  { %v9926_v46 = vadd.f32 %v9925_v47, %v21138_v54  ;;  %v21146_v23 = vadd.f32 %v9559_v30, %v9333_v11  ;;  %v23741_v11 = vld [vmem:[#allocation66_spill] sm:$0xff] }
 0x73c   :  { %v14704_v49 = vpop.f32.mrf.mxu1  ;;  %v9337_v47 = vadd.f32 %v20927_v45, %v23741_v11 }
 0x73d   :  { %23736 = vst [vmem:[#allocation14_spill] sm:$0xff] %v21146_v23  ;;  %v9927_v36 = vadd.f32 %v9926_v46, %v21146_v23  ;;  %v21162_v30 = vadd.f32 %v14704_v49, %v9336_v9  ;;  %v23742_v46 = vld [vmem:[#allocation61_spill] sm:$0xff]  ;;  %v21177_v9 = vpop.f32.mrf.mxu0 }
 0x73e   :  { %v9569_v56 = vpop.f32.mrf.mxu1  ;;  %v9338_v23 = vadd.f32 %v23743_v28, %v23742_v46 }
 0x73f   :  { %v21157_v17 = vadd.f32 %v9569_v56, %v9335_v29  ;;  %v9928_v35 = vadd.f32 %v9927_v36, %v21150_v62  ;;  %v23745_v36 = vld [vmem:[#allocation63_spill] sm:$0xff] }
 0x740   :  { %v14707_v16 = vpop.f32.mrf.mxu1  ;;  %v9339_v6 = vadd.f32 %v20943_v44, %v23745_v36 }
 0x741   :  { %23740 = vst [vmem:[#allocation13_spill] sm:$0xff] %v21157_v17  ;;  %v9929_v19 = vadd.f32 %v9928_v35, %v21157_v17  ;;  %v21174_v20 = vadd.f32 %v14707_v16, %v9338_v23  ;;  %v23746_v35 = vld [vmem:[#allocation34_spill] sm:$0xff]  ;;  %v21189_v23 = vpop.f32.mrf.mxu0 }
 0x742   :  { %v9579_v1 = vpop.f32.mrf.mxu1  ;;  %v9340_v11 = vadd.f32 %v20935_v57, %v23746_v35 }
 0x743   :  { %v21169_v54 = vadd.f32 %v9579_v1, %v9337_v47  ;;  %v9930_v29 = vadd.f32 %v9929_v19, %v21162_v30  ;;  %v23748_v19 = vld [vmem:[#allocation68_spill] sm:$0xff] }
 0x744   :  { %v14710_v56 = vpop.f32.mrf.mxu1  ;;  %v9341_v46 = vadd.f32 %v20959_v58, %v23748_v19 }
 0x745   :  { %23744 = vst [vmem:[#allocation85_spill] sm:$0xff] %v21169_v54  ;;  %v9931_v45 = vadd.f32 %v9930_v29, %v21169_v54  ;;  %v21186_v28 = vadd.f32 %v14710_v56, %v9340_v11  ;;  %v23749_v29 = vld [vmem:[#allocation94_spill] sm:$0xff]  ;;  %v21201_v56 = vpop.f32.mrf.mxu0 }
 0x746   :  { %v9589_v49 = vpop.f32.mrf.mxu1  ;;  %v9342_v36 = vadd.f32 %v20951_v63, %v23749_v29 }
 0x747   :  { %v21181_v17 = vadd.f32 %v9589_v49, %v9339_v6  ;;  %v9932_v47 = vadd.f32 %v9931_v45, %v21174_v20  ;;  %v23750_v45 = vld [vmem:[#allocation65_spill] sm:$0xff] }
 0x748   :  { %v14713_v1 = vpop.f32.mrf.mxu1  ;;  %v9343_v49 = vadd.f32 %v20975_v4, %v23750_v45 }
 0x749   :  { %23747 = vst [vmem:[#allocation90_spill] sm:$0xff] %v21181_v17  ;;  %v9933_v44 = vadd.f32 %v9932_v47, %v21181_v17  ;;  %v21198_v35 = vadd.f32 %v14713_v1, %v9342_v36  ;;  %v23751_v47 = vld [vmem:[#allocation62_spill] sm:$0xff]  ;;  %v21213_v1 = vpop.f32.mrf.mxu0 }
 0x74a   :  { %v9599_v16 = vpop.f32.mrf.mxu1  ;;  %v9344_v19 = vadd.f32 %v20967_v42, %v23751_v47  ;;  %v23752_v36 = vld [vmem:[#allocation70_spill] sm:$0xff] }
 0x74b   :  { %v21193_v54 = vadd.f32 %v9599_v16, %v9341_v46  ;;  %v9934_v57 = vadd.f32 %v9933_v44, %v21186_v28  ;;  %v9345_v44 = vadd.f32 %v20991_v22, %v20930_v5  ;;  %v21225_v22 = vpop.f32.mrf.mxu0  ;;  %v23753_v47 = vld [vmem:[#allocation38_spill] sm:$0xff] }
 0x74c   :  { %v14716_v6 = vpop.f32.mrf.mxu1 }
 0x74d   :  { %v9935_v58 = vadd.f32 %v9934_v57, %v21193_v54  ;;  %v21210_v16 = vadd.f32 %v14716_v6, %v9344_v19  ;;  %v9346_v57 = vadd.f32 %v20983_v51, %v23752_v36  ;;  %v9348_v19 = vadd.f32 %v20999_v27, %v23753_v47  ;;  %v23754_v36 = vld [vmem:[#allocation37_spill] sm:$0xff]  ;;  %v23755_v47 = vld [vmem:[#allocation67_spill] sm:$0xff] }
 0x74e   :  { %v9609_v11 = vpop.f32.mrf.mxu1 }
 0x74f   :  { %v21205_v17 = vadd.f32 %v9609_v11, %v9343_v49  ;;  %v9936_v63 = vadd.f32 %v9935_v58, %v21198_v35  ;;  %v9347_v58 = vadd.f32 %v21007_v55, %v20938_v24  ;;  %v21237_v55 = vpop.f32.mrf.mxu0 }
 0x750   :  { %v14719_v46 = vpop.f32.mrf.mxu1 }
 0x751   :  { %v9937_v4 = vadd.f32 %v9936_v63, %v21205_v17  ;;  %v21222_v11 = vadd.f32 %v14719_v46, %v9346_v57  ;;  %v9350_v57 = vadd.f32 %v21015_v53, %v23754_v36  ;;  %v23757_v36 = vld [vmem:[#allocation72_spill] sm:$0xff] }
 0x752   :  { %v9619_v29 = vpop.f32.mrf.mxu1 }
 0x753   :  { %v21217_v45 = vadd.f32 %v9619_v29, %v9345_v44  ;;  %v9938_v42 = vadd.f32 %v9937_v4, %v21210_v16  ;;  %v9349_v4 = vadd.f32 %v21023_v48, %v20946_v39  ;;  %v21249_v48 = vpop.f32.mrf.mxu0 }
 0x754   :  { %v14722_v49 = vpop.f32.mrf.mxu1 }
 0x755   :  { %v9939_v5 = vadd.f32 %v9938_v42, %v21217_v45  ;;  %v21234_v29 = vadd.f32 %v14722_v49, %v9348_v19  ;;  %v9352_v19 = vadd.f32 %v21031_v21, %v23755_v47 }
 0x756   :  { %v9629_v6 = vpop.f32.mrf.mxu1 }
 0x757   :  { %v21229_v63 = vadd.f32 %v9629_v6, %v9347_v58  ;;  %v9940_v51 = vadd.f32 %v9939_v5, %v21222_v11  ;;  %v9351_v5 = vadd.f32 %v21039_v50, %v20954_v33  ;;  %v21261_v50 = vpop.f32.mrf.mxu0 }
 0x758   :  { %v14725_v44 = vpop.f32.mrf.mxu1 }
 0x759   :  { %v9941_v24 = vadd.f32 %v9940_v51, %v21229_v63  ;;  %v21246_v6 = vadd.f32 %v14725_v44, %v9350_v57  ;;  %v9354_v57 = vadd.f32 %v21047_v13, %v23757_v36 }
 0x75a   :  { %v9639_v46 = vpop.f32.mrf.mxu1 }
 0x75b   :  { %v21241_v42 = vadd.f32 %v9639_v46, %v9349_v4  ;;  %v9942_v27 = vadd.f32 %v9941_v24, %v21234_v29  ;;  %v9353_v24 = vadd.f32 %v21055_v59, %v20962_v34  ;;  %v21273_v59 = vpop.f32.mrf.mxu0 }
 0x75c   :  { %v14728_v58 = vpop.f32.mrf.mxu1 }
 0x75d   :  { %v9943_v39 = vadd.f32 %v9942_v27, %v21241_v42  ;;  %v21258_v46 = vadd.f32 %v14728_v58, %v9352_v19  ;;  %v23760_v19 = vld [vmem:[#allocation40_spill] sm:$0xff] }
 0x75e   :  { %v9649_v49 = vpop.f32.mrf.mxu1 }
 0x75f   :  { %v21253_v51 = vadd.f32 %v9649_v49, %v9351_v5  ;;  %v9944_v53 = vadd.f32 %v9943_v39, %v21246_v6  ;;  %v23759_v39 = vld [vmem:[#allocation74_spill] sm:$0xff] }
 0x760   :  { %v14731_v4 = vpop.f32.mrf.mxu1  ;;  %v9355_v49 = vadd.f32 %v21071_v26, %v23759_v39 }
 0x761   :  { %23756 = vst [vmem:[#allocation45_spill] sm:$0xff] %v21253_v51  ;;  %v9945_v33 = vadd.f32 %v9944_v53, %v21253_v51  ;;  %v21270_v47 = vadd.f32 %v14731_v4, %v9354_v57  ;;  %v9356_v53 = vadd.f32 %v21063_v40, %v23760_v19  ;;  %v21285_v4 = vpop.f32.mrf.mxu0 }
 0x762   :  { %v9659_v44 = vpop.f32.mrf.mxu1 }
 0x763   :  { %v21265_v27 = vadd.f32 %v9659_v44, %v9353_v24  ;;  %v9946_v21 = vadd.f32 %v9945_v33, %v21258_v46  ;;  %v23762_v33 = vld [vmem:[#allocation41_spill] sm:$0xff] }
 0x764   :  { %v14734_v5 = vpop.f32.mrf.mxu1  ;;  %v9357_v44 = vadd.f32 %v21087_v3, %v23762_v33 }
 0x765   :  { %23758 = vst [vmem:[#allocation44_spill] sm:$0xff] %v21265_v27  ;;  %v9947_v34 = vadd.f32 %v9946_v21, %v21265_v27  ;;  %v21282_v36 = vadd.f32 %v14734_v5, %v9356_v53  ;;  %v23763_v21 = vld [vmem:[#allocation42_spill] sm:$0xff]  ;;  %v21297_v5 = vpop.f32.mrf.mxu0 }
 0x766   :  { %v9669_v58 = vpop.f32.mrf.mxu1  ;;  %v9358_v39 = vadd.f32 %v21079_v25, %v23763_v21 }
 0x767   :  { %v21277_v51 = vadd.f32 %v9669_v58, %v9355_v49  ;;  %v9948_v13 = vadd.f32 %v9947_v34, %v21270_v47  ;;  %v23765_v34 = vld [vmem:[#allocation76_spill] sm:$0xff] }
 0x768   :  { %v14737_v24 = vpop.f32.mrf.mxu1  ;;  %v9359_v58 = vadd.f32 %v21103_v10, %v23765_v34 }
 0x769   :  { %23761 = vst [vmem:[#allocation87_spill] sm:$0xff] %v21277_v51  ;;  %v9949_v26 = vadd.f32 %v9948_v13, %v21277_v51  ;;  %v21294_v19 = vadd.f32 %v14737_v24, %v9358_v39  ;;  %v23766_v13 = vld [vmem:[#allocation71_spill] sm:$0xff]  ;;  %v21309_v24 = vpop.f32.mrf.mxu0 }
 0x76a   :  { %v9679_v57 = vpop.f32.mrf.mxu1  ;;  %v9360_v33 = vadd.f32 %v21095_v31, %v23766_v13 }
 0x76b   :  { %v21289_v27 = vadd.f32 %v9679_v57, %v9357_v44  ;;  %v9950_v40 = vadd.f32 %v9949_v26, %v21282_v36  ;;  %v23768_v26 = vld [vmem:[#allocation43_spill] sm:$0xff] }
 0x76c   :  { %v14740_v49 = vpop.f32.mrf.mxu1  ;;  %v9361_v57 = vadd.f32 %v21118_v61, %v23768_v26 }
 0x76d   :  { %23764 = vst [vmem:[#allocation92_spill] sm:$0xff] %v21289_v27  ;;  %v9951_v3 = vadd.f32 %v9950_v40, %v21289_v27  ;;  %v21306_v21 = vadd.f32 %v14740_v49, %v9360_v33  ;;  %v23769_v40 = vld [vmem:[#allocation3_spill] sm:$0xff]  ;;  %v21321_v49 = vpop.f32.mrf.mxu0 }
 0x76e   :  { %v9689_v53 = vpop.f32.mrf.mxu1  ;;  %v9362_v34 = vadd.f32 %v21111_v32, %v23769_v40 }
 0x76f   :  { %v21301_v51 = vadd.f32 %v9689_v53, %v9359_v58  ;;  %v9952_v25 = vadd.f32 %v9951_v3, %v21294_v19  ;;  %v23771_v3 = vld [vmem:[#allocation78_spill] sm:$0xff] }
 0x770   :  { %v14743_v44 = vpop.f32.mrf.mxu1  ;;  %v9363_v53 = vadd.f32 %v21141_v60, %v23771_v3 }
 0x771   :  { %23767 = vst [vmem:[#allocation47_spill] sm:$0xff] %v21301_v51  ;;  %v9953_v10 = vadd.f32 %v9952_v25, %v21301_v51  ;;  %v21318_v13 = vadd.f32 %v14743_v44, %v9362_v34  ;;  %v23772_v25 = vld [vmem:[#allocation73_spill] sm:$0xff]  ;;  %v9260_v44 = vpop.f32.mrf.mxu0 }
 0x772   :  { %v9699_v39 = vpop.f32.mrf.mxu1  ;;  %v9364_v26 = vadd.f32 %v21128_v14, %v23772_v25 }
 0x773   :  { %v21313_v27 = vadd.f32 %v9699_v39, %v9361_v57  ;;  %v9954_v31 = vadd.f32 %v9953_v10, %v21306_v21  ;;  %v23774_v10 = vld [vmem:[#allocation19_spill] sm:$0xff] }
 0x774   :  { %v14746_v58 = vpop.f32.mrf.mxu1  ;;  %v9365_v39 = vadd.f32 %v21165_v12, %v23774_v10 }
 0x775   :  { %23770 = vst [vmem:[#allocation46_spill] sm:$0xff] %v21313_v27  ;;  %v9955_v61 = vadd.f32 %v9954_v31, %v21313_v27  ;;  %v21330_v40 = vadd.f32 %v14746_v58, %v9364_v26  ;;  %v23775_v31 = vld [vmem:[#allocation4_spill] sm:$0xff]  ;;  %v21343_v58 = vpop.f32.mrf.mxu0 }
 0x776   :  { %v9709_v33 = vpop.f32.mrf.mxu1  ;;  %v9366_v3 = vadd.f32 %v21153_v37, %v23775_v31 }
 0x777   :  { %v21325_v51 = vadd.f32 %v9709_v33, %v9363_v53  ;;  %v9956_v32 = vadd.f32 %v9955_v61, %v21318_v13  ;;  %v23777_v33 = vld [vmem:[#allocation69_spill] sm:$0xff] }
 0x778   :  { %v14749_v57 = vpop.f32.mrf.mxu1  ;;  %v9367_v61 = vadd.f32 %v21189_v23, %v23777_v33 }
 0x779   :  { %23773 = vst [vmem:[#allocation89_spill] sm:$0xff] %v21325_v51  ;;  %v9957_v60 = vadd.f32 %v9956_v32, %v21325_v51  ;;  %v21340_v25 = vadd.f32 %v14749_v57, %v9366_v3  ;;  %v23779_v32 = vld [vmem:[#allocation39_spill] sm:$0xff]  ;;  %v9270_v57 = vpop.f32.mrf.mxu0 }
 0x77a   :  { %v9719_v34 = vpop.f32.mrf.mxu1  ;;  %v9368_v10 = vadd.f32 %v21177_v9, %v23779_v32 }
 0x77b   :  { %v21335_v27 = vadd.f32 %v9719_v34, %v9365_v39  ;;  %v9958_v14 = vadd.f32 %v9957_v60, %v21330_v40  ;;  %23778 = vst [vmem:[#allocation91_spill] sm:$0xff] %v21340_v25  ;;  %v23781_v60 = vld [vmem:[#allocation80_spill] sm:$0xff] }
 0x77c   :  { %v14752_v53 = vpop.f32.mrf.mxu1  ;;  %v9369_v34 = vadd.f32 %v21213_v1, %v23781_v60 }
 0x77d   :  { %23776 = vst [vmem:[#allocation95_spill] sm:$0xff] %v21335_v27  ;;  %v9959_v12 = vadd.f32 %v9958_v14, %v21335_v27  ;;  %v21352_v31 = vadd.f32 %v14752_v53, %v9368_v10  ;;  %v23783_v14 = vld [vmem:[#allocation75_spill] sm:$0xff]  ;;  %v14648_v53 = vpop.f32.mrf.mxu0  ;;  %v23786_v10 = vld [vmem:[#allocation5_spill] sm:$0xff] }
 0x77e   :  { %v9729_v26 = vpop.f32.mrf.mxu1  ;;  %v9370_v33 = vadd.f32 %v21201_v56, %v23783_v14  ;;  %v23789_v14 = vld [vmem:[#allocation77_spill] sm:$0xff] }
 0x77f   :  { %v21347_v51 = vadd.f32 %v9729_v26, %v9367_v61  ;;  %v9960_v37 = vadd.f32 %v9959_v12, %v21340_v25  ;;  %23782 = vst [vmem:[#allocation15_spill] sm:$0xff] %v21352_v31  ;;  %v9371_v12 = vadd.f32 %v21237_v55, %v21034_v43  ;;  %v9280_v55 = vpop.f32.mrf.mxu0 }
 0x780   :  { %v14755_v39 = vpop.f32.mrf.mxu1 }
 0x781   :  { %23780 = vst [vmem:[#allocation93_spill] sm:$0xff] %v21347_v51  ;;  %v9961_v23 = vadd.f32 %v9960_v37, %v21347_v51  ;;  %v21362_v26 = vadd.f32 %v14755_v39, %v9370_v33  ;;  %v9372_v37 = vadd.f32 %v21225_v22, %v23786_v10  ;;  %v9374_v33 = vadd.f32 %v21249_v48, %v23789_v14  ;;  %v23791_v10 = vld [vmem:[#allocation8_spill] sm:$0xff]  ;;  %v23792_v14 = vld [vmem:[#allocation82_spill] sm:$0xff] }
 0x782   :  { %v9739_v3 = vpop.f32.mrf.mxu1 }
 0x783   :  { %v21357_v27 = vadd.f32 %v9739_v3, %v9369_v34  ;;  %v9962_v9 = vadd.f32 %v9961_v23, %v21352_v31  ;;  %23785 = vst [vmem:[#allocation17_spill] sm:$0xff] %v21362_v26  ;;  %v9373_v23 = vadd.f32 %v21261_v50, %v21042_v41  ;;  %v14651_v50 = vpop.f32.mrf.mxu0 }
 0x784   :  { %v14758_v61 = vpop.f32.mrf.mxu1 }
 0x785   :  { %23784 = vst [vmem:[#allocation50_spill] sm:$0xff] %v21357_v27  ;;  %v9963_v1 = vadd.f32 %v9962_v9, %v21357_v27  ;;  %v21372_v3 = vadd.f32 %v14758_v61, %v9372_v37  ;;  %v9376_v37 = vadd.f32 %v21273_v59, %v23791_v10  ;;  %v23793_v10 = vld [vmem:[#allocation7_spill] sm:$0xff] }
 0x786   :  { %v9749_v32 = vpop.f32.mrf.mxu1 }
 0x787   :  { %v21367_v60 = vadd.f32 %v9749_v32, %v9371_v12  ;;  %v9964_v56 = vadd.f32 %v9963_v1, %v21362_v26  ;;  %23788 = vst [vmem:[#allocation48_spill] sm:$0xff] %v21372_v3  ;;  %v9375_v1 = vadd.f32 %v21285_v4, %v21050_v2  ;;  %v9290_v4 = vpop.f32.mrf.mxu0 }
 0x788   :  { %v14761_v34 = vpop.f32.mrf.mxu1 }
 0x789   :  { %23787 = vst [vmem:[#allocation16_spill] sm:$0xff] %v21367_v60  ;;  %v9965_v43 = vadd.f32 %v9964_v56, %v21367_v60  ;;  %v21382_v32 = vadd.f32 %v14761_v34, %v9374_v33  ;;  %v9378_v33 = vadd.f32 %v21297_v5, %v23792_v14  ;;  %v23794_v14 = vld [vmem:[#allocation79_spill] sm:$0xff]  ;;  %v9385_v60 = vadd.f32 %v9290_v4, %v21090_v7 }
 0x78a   :  { %v9759_v39 = vpop.f32.mrf.mxu1 }
 0x78b   :  { %v21377_v9 = vadd.f32 %v9759_v39, %v9373_v23  ;;  %v9966_v22 = vadd.f32 %v9965_v43, %v21372_v3  ;;  %v9377_v43 = vadd.f32 %v21309_v24, %v21058_v18  ;;  %v14654_v24 = vpop.f32.mrf.mxu0 }
 0x78c   :  { %v14764_v12 = vpop.f32.mrf.mxu1 }
 0x78d   :  { %23790 = vst [vmem:[#allocation52_spill] sm:$0xff] %v21377_v9  ;;  %v9967_v41 = vadd.f32 %v9966_v22, %v21377_v9  ;;  %v21392_v39 = vadd.f32 %v14764_v12, %v9376_v37  ;;  %v9380_v37 = vadd.f32 %v21321_v49, %v23793_v10 }
 0x78e   :  { %v9769_v61 = vpop.f32.mrf.mxu1 }
 0x78f   :  { %v21387_v56 = vadd.f32 %v9769_v61, %v9375_v1  ;;  %v9968_v48 = vadd.f32 %v9967_v41, %v21382_v32  ;;  %v9379_v41 = vadd.f32 %v9260_v44, %v21066_v52  ;;  %v9300_v44 = vpop.f32.mrf.mxu0 }
 0x790   :  { %v14767_v23 = vpop.f32.mrf.mxu1 }
 0x791   :  { %v9969_v2 = vadd.f32 %v9968_v48, %v21387_v56  ;;  %v21401_v61 = vadd.f32 %v14767_v23, %v9378_v33  ;;  %v9382_v33 = vadd.f32 %v21343_v58, %v23794_v14 }
 0x792   :  { %v9779_v34 = vpop.f32.mrf.mxu1 }
 0x793   :  { %v21397_v22 = vadd.f32 %v9779_v34, %v9377_v43  ;;  %v9970_v59 = vadd.f32 %v9969_v2, %v21392_v39  ;;  %v9381_v34 = vadd.f32 %v9270_v57, %v21074_v15  ;;  %v14657_v15 = vpop.f32.mrf.mxu0 }
 0x794   :  { %v14770_v1 = vpop.f32.mrf.mxu1 }
 0x795   :  { %v9971_v18 = vadd.f32 %v9970_v59, %v21397_v22  ;;  %v21410_v2 = vadd.f32 %v14770_v1, %v9380_v37  ;;  %v23795_v1 = vld [vmem:[#allocation84_spill] sm:$0xff] }
 0x796   :  { %v9789_v12 = vpop.f32.mrf.mxu1  ;;  %v9384_v37 = vadd.f32 %v14648_v53, %v23795_v1 }
 0x797   :  { %v21406_v48 = vadd.f32 %v9789_v12, %v9379_v41  ;;  %v9972_v5 = vadd.f32 %v9971_v18, %v21401_v61  ;;  %v9383_v12 = vadd.f32 %v9280_v55, %v21082_v38 }
 0x798   :  { %v14773_v43 = vpop.f32.mrf.mxu1 }
 0x799   :  { %v9973_v52 = vadd.f32 %v9972_v5, %v21406_v48  ;;  %v9911_v18 = vadd.f32 %v14773_v43, %v9382_v33  ;;  %v9387_v43 = vadd.f32 %v9300_v44, %v21098_v0 }
 0x79a   :  { %v9799_v23 = vpop.f32.mrf.mxu1 }
 0x79b   :  { %v21415_v59 = vadd.f32 %v9799_v23, %v9381_v34  ;;  %v9974_v49 = vadd.f32 %v9973_v52, %v21410_v2  ;;  %v9310_v23 = vpop.f32.mrf.mxu0  ;;  %v23796_v52 = vld [vmem:[#allocation6_spill] sm:$0xff] }
 0x79c   :  { %v14776_v41 = vpop.f32.mrf.mxu1  ;;  %v9386_v26 = vadd.f32 %v14651_v50, %v23796_v52 }
 0x79d   :  { %v9975_v10 = vadd.f32 %v9974_v49, %v21415_v59  ;;  %v9913_v58 = vadd.f32 %v14776_v41, %v9384_v37  ;;  %v14660_v31 = vpop.f32.mrf.mxu0 }
 0x79e   :  { %v9809_v57 = vpop.f32.mrf.mxu1 }
 0x79f   :  { %v9912_v5 = vadd.f32 %v9809_v57, %v9383_v12  ;;  %v9976_v9 = vadd.f32 %v9975_v10, %v9911_v18  ;;  %v23797_v12 = vld [vmem:[#allocation10_spill] sm:$0xff]  ;;  %v9320_v37 = vpop.f32.mrf.mxu0 }
 0x7a0   :  { %v14779_v3 = vpop.f32.mrf.mxu1  ;;  %v9388_v10 = vadd.f32 %v14654_v24, %v23797_v12  ;;  %v23800_v24 = vld [vmem:[#allocation81_spill] sm:$0xff] }
 0x7a1   :  { %v9977_v34 = vadd.f32 %v9976_v9, %v9912_v5  ;;  %v9915_v33 = vadd.f32 %v14779_v3, %v9386_v26  ;;  %v9389_v9 = vadd.f32 %v9310_v23, %v21106_v8  ;;  %v23799_v26 = vld [vmem:[#allocation86_spill] sm:$0xff] }
 0x7a2   :  { %v9819_v14 = vpop.f32.mrf.mxu1  ;;  %v9391_v3 = vadd.f32 %v9320_v37, %v23799_v26 }
 0x7a3   :  { %v9914_v27 = vadd.f32 %v9819_v14, %v9385_v60  ;;  %v9978_v38 = vadd.f32 %v9977_v34, %v9913_v58  ;;  %v23798_v60 = vld [vmem:[#allocation9_spill] sm:$0xff] }
 0x7a4   :  { %v14782_v55 = vpop.f32.mrf.mxu1  ;;  %v9390_v34 = vadd.f32 %v14657_v15, %v23798_v60 }
 0x7a5   :  { %v9979_v49 = vadd.f32 %v9978_v38, %v9914_v27  ;;  %v9917_v4 = vadd.f32 %v14782_v55, %v9388_v10 }
 0x7a6   :  { %v9829_v53 = vpop.f32.mrf.mxu1 }
 0x7a7   :  { %v9916_v57 = vadd.f32 %v9829_v53, %v9387_v43  ;;  %v9980_v1 = vadd.f32 %v9979_v49, %v9915_v33  ;;  %v9392_v43 = vadd.f32 %v14660_v31, %v23800_v24 }
 0x7a8   :  { %v14785_v7 = vpop.f32.mrf.mxu1 }
 0x7a9   :  { %v9981_v41 = vadd.f32 %v9980_v1, %v9916_v57  ;;  %v9919_v44 = vadd.f32 %v14785_v7, %v9390_v34 }
 0x7aa   :  { %v9839_v50 = vpop.f32.mrf.mxu1 }
 0x7ab   :  { %v9918_v14 = vadd.f32 %v9839_v50, %v9389_v9  ;;  %v9982_v52 = vadd.f32 %v9981_v41, %v9917_v4 }
 0x7ac   :  { %v14788_v0 = vpop.f32.mrf.mxu1 }
 0x7ad   :  { %v9983_v38 = vadd.f32 %v9982_v52, %v9918_v14  ;;  %v9921_v12 = vadd.f32 %v14788_v0, %v9392_v43 }
 0x7ae   :  { %v9849_v51 = vpop.f32.mrf.mxu1 }
 0x7af   :  { %v9920_v49 = vadd.f32 %v9849_v51, %v9391_v3  ;;  %v9984_v53 = vadd.f32 %v9983_v38, %v9919_v44  ;;  %v23810_v3 = vld [vmem:[#allocation88_spill] sm:$0xff]  ;;  %v23811_v38 = vld [vmem:[#allocation14_spill] sm:$0xff] }
 0x7b1   :  { %v9985_v8 = vadd.f32 %v9984_v53, %v9920_v49 }
 0x7b3   :  { %v9986_v23 = vadd.f32 %v9985_v8, %v9921_v12 }
 0x7b5   :  { %v9987_v55 = vrot.slane %v9986_v23, 4 }
 0x7b7   :  { %v9988_v10 = vadd.f32 %v9987_v55, %v9986_v23  ;;  %v23812_v23 = vld [vmem:[#allocation13_spill] sm:$0xff] }
 0x7b9   :  { %v9989_v1 = vrot.slane %v9988_v10, 2 }
 0x7bb   :  { %v9990_v25 = vadd.f32 %v9989_v1, %v9988_v10 }
 0x7bd   :  { %v9991_v15 = vrot.slane %v9990_v25, 1 }
 0x7bf   :  { %v9992_v9 = vadd.f32 %v9991_v15, %v9990_v25 }
 0x7c1   :  { %v21429_v41 = vmul.f32 0.001953125, %v9992_v9 }
 0x7c3   :  { %v21433_v7 = vsub.f32 %v21382_v32, %v21429_v41  ;;  %v21437_v31 = vsub.f32 %v21387_v56, %v21429_v41  ;;  %v21441_v51 = vsub.f32 %v21392_v39, %v21429_v41  ;;  %v21445_v37 = vsub.f32 %v21397_v22, %v21429_v41 }
 0x7c4   :  { %v21449_v25 = vsub.f32 %v21401_v61, %v21429_v41  ;;  %v21453_v32 = vsub.f32 %v21406_v48, %v21429_v41  ;;  %v21457_v56 = vsub.f32 %v21410_v2, %v21429_v41  ;;  %v21461_v39 = vsub.f32 %v21415_v59, %v21429_v41 }
 0x7c5   :  { %v21464_v50 = vsub.f32 %v9911_v18, %v21429_v41  ;;  %v21467_v22 = vsub.f32 %v9912_v5, %v21429_v41  ;;  %v21470_v61 = vsub.f32 %v9913_v58, %v21429_v41  ;;  %v21473_v48 = vsub.f32 %v9914_v27, %v21429_v41 }
 0x7c6   :  { %v21476_v60 = vsub.f32 %v9915_v33, %v21429_v41  ;;  %v21479_v2 = vsub.f32 %v9916_v57, %v21429_v41  ;;  %v21482_v59 = vsub.f32 %v9917_v4, %v21429_v41  ;;  %v21485_v18 = vsub.f32 %v9918_v14, %v21429_v41  ;;  %v23807_v33 = vld [vmem:[#allocation12_spill] sm:$0xff]  ;;  %v23808_v57 = vld [vmem:[#allocation11_spill] sm:$0xff] }
 0x7c7   :  { %v21488_v5 = vsub.f32 %v9919_v44, %v21429_v41  ;;  %v21491_v58 = vsub.f32 %v9920_v49, %v21429_v41  ;;  %v21494_v27 = vsub.f32 %v9921_v12, %v21429_v41  ;;  %v21498_v34 = vsub.f32 %v23807_v33, %v21429_v41  ;;  %v23809_v14 = vld [vmem:[#allocation83_spill] sm:$0xff]  ;;  %v23813_v33 = vld [vmem:[#allocation85_spill] sm:$0xff] }
 0x7c8   :  { %23801 = vst [vmem:[#allocation21_spill] sm:$0xff] %v21476_v60  ;;  %23802 = vst [vmem:[#allocation20_spill] sm:$0xff] %v21479_v2  ;;  %v21502_v4 = vsub.f32 %v23808_v57, %v21429_v41  ;;  %v21506_v52 = vsub.f32 %v23809_v14, %v21429_v41  ;;  %v21514_v44 = vsub.f32 %v23810_v3, %v21429_v41 }
 0x7c9   :  { %23803 = vst [vmem:[#allocation49_spill] sm:$0xff] %v21482_v59  ;;  %23804 = vst [vmem:[#allocation54_spill] sm:$0xff] %v21485_v18  ;;  %v10058_v0 = vmul.f32 %v21498_v34, %v21498_v34  ;;  %v21518_v24 = vsub.f32 %v23811_v38, %v21429_v41  ;;  %v21524_v53 = vsub.f32 %v21150_v62, %v21429_v41  ;;  %v23814_v38 = vld [vmem:[#allocation90_spill] sm:$0xff] }
 0x7ca   :  { %23805 = vst [vmem:[#allocation18_spill] sm:$0xff] %v21491_v58  ;;  %23806 = vst [vmem:[#allocation22_spill] sm:$0xff] %v21494_v27  ;;  %v10059_v26 = vmul.f32 %v21502_v4, %v21502_v4  ;;  %v10060_v43 = vmul.f32 %v21506_v52, %v21506_v52  ;;  %v10061_v12 = vmul.f32 %v21514_v44, %v21514_v44 }
 0x7cb   :  { %v21530_v55 = vsub.f32 %v23812_v23, %v21429_v41  ;;  %v10062_v10 = vmul.f32 %v21518_v24, %v21518_v24  ;;  %v21536_v15 = vsub.f32 %v21162_v30, %v21429_v41  ;;  %v10063_v62 = vmul.f32 %v21524_v53, %v21524_v53 }
 0x7cc   :  { %v10122_v49 = vadd.f32 %v10059_v26, %v10058_v0  ;;  %v21542_v57 = vsub.f32 %v23813_v33, %v21429_v41  ;;  %v21548_v26 = vsub.f32 %v21174_v20, %v21429_v41 }
 0x7cd   :  { %v10064_v14 = vmul.f32 %v21530_v55, %v21530_v55  ;;  %v10065_v30 = vmul.f32 %v21536_v15, %v21536_v15 }
 0x7ce   :  { %v10123_v8 = vadd.f32 %v10122_v49, %v10060_v43  ;;  %v21554_v43 = vsub.f32 %v23814_v38, %v21429_v41  ;;  %v10066_v49 = vmul.f32 %v21542_v57, %v21542_v57  ;;  %v10067_v20 = vmul.f32 %v21548_v26, %v21548_v26 }
 0x7cf   :  { %v21590_v38 = vsub.f32 %v21217_v45, %v21429_v41 }
 0x7d0   :  { %v10124_v1 = vadd.f32 %v10123_v8, %v10061_v12  ;;  %v21560_v8 = vsub.f32 %v21186_v28, %v21429_v41 }
 0x7d1   :  { %v10074_v45 = vmul.f32 %v21590_v38, %v21590_v38 }
 0x7d2   :  { %v10125_v9 = vadd.f32 %v10124_v1, %v10062_v10  ;;  %v21566_v10 = vsub.f32 %v21193_v54, %v21429_v41  ;;  %v10068_v1 = vmul.f32 %v21554_v43, %v21554_v43  ;;  %v10069_v28 = vmul.f32 %v21560_v8, %v21560_v8 }
 0x7d4   :  { %v10126_v0 = vadd.f32 %v10125_v9, %v10063_v62  ;;  %v21572_v9 = vsub.f32 %v21198_v35, %v21429_v41  ;;  %v10070_v54 = vmul.f32 %v21566_v10, %v21566_v10 }
 0x7d6   :  { %v10127_v3 = vadd.f32 %v10126_v0, %v10064_v14  ;;  %v21578_v14 = vsub.f32 %v21205_v17, %v21429_v41  ;;  %v10071_v35 = vmul.f32 %v21572_v9, %v21572_v9 }
 0x7d8   :  { %v10128_v12 = vadd.f32 %v10127_v3, %v10065_v30  ;;  %v21584_v30 = vsub.f32 %v21210_v16, %v21429_v41  ;;  %v10072_v17 = vmul.f32 %v21578_v14, %v21578_v14 }
 0x7da   :  { %v10129_v23 = vadd.f32 %v10128_v12, %v10066_v49  ;;  %v21596_v12 = vsub.f32 %v21222_v11, %v21429_v41  ;;  %v10073_v16 = vmul.f32 %v21584_v30, %v21584_v30 }
 0x7dc   :  { %v10130_v62 = vadd.f32 %v10129_v23, %v10067_v20  ;;  %v21602_v23 = vsub.f32 %v21229_v63, %v21429_v41  ;;  %v10075_v11 = vmul.f32 %v21596_v12, %v21596_v12 }
 0x7de   :  { %v10131_v33 = vadd.f32 %v10130_v62, %v10068_v1  ;;  %v21608_v62 = vsub.f32 %v21234_v29, %v21429_v41  ;;  %v10076_v63 = vmul.f32 %v21602_v23, %v21602_v23 }
 0x7e0   :  { %v10132_v0 = vadd.f32 %v10131_v33, %v10069_v28  ;;  %v21614_v33 = vsub.f32 %v21241_v42, %v21429_v41  ;;  %v10077_v29 = vmul.f32 %v21608_v62, %v21608_v62 }
 0x7e2   :  { %v10133_v3 = vadd.f32 %v10132_v0, %v10070_v54  ;;  %v21620_v0 = vsub.f32 %v21246_v6, %v21429_v41  ;;  %v10078_v42 = vmul.f32 %v21614_v33, %v21614_v33 }
 0x7e4   :  { %v10134_v49 = vadd.f32 %v10133_v3, %v10071_v35  ;;  %v23815_v3 = vld [vmem:[#allocation45_spill] sm:$0xff]  ;;  %v10079_v6 = vmul.f32 %v21620_v0, %v21620_v0 }
 0x7e6   :  { %v10135_v20 = vadd.f32 %v10134_v49, %v10072_v17  ;;  %v21626_v17 = vsub.f32 %v23815_v3, %v21429_v41 }
 0x7e8   :  { %v10136_v1 = vadd.f32 %v10135_v20, %v10073_v16  ;;  %v21632_v16 = vsub.f32 %v21258_v46, %v21429_v41 }
 0x7ea   :  { %v10137_v28 = vadd.f32 %v10136_v1, %v10074_v45  ;;  %v23816_v45 = vld [vmem:[#allocation44_spill] sm:$0xff]  ;;  %v10081_v46 = vmul.f32 %v21632_v16, %v21632_v16 }
 0x7eb   :  { %v21638_v1 = vsub.f32 %v23816_v45, %v21429_v41 }
 0x7ec   :  { %v10138_v54 = vadd.f32 %v10137_v28, %v10075_v11  ;;  %v10080_v11 = vmul.f32 %v21626_v17, %v21626_v17 }
 0x7ed   :  { %v10082_v3 = vmul.f32 %v21638_v1, %v21638_v1 }
 0x7ee   :  { %v10139_v35 = vadd.f32 %v10138_v54, %v10076_v63  ;;  %v21644_v63 = vsub.f32 %v21270_v47, %v21429_v41 }
 0x7f0   :  { %v10140_v49 = vadd.f32 %v10139_v35, %v10077_v29  ;;  %23817 = vst [vmem:[#allocation51_spill] sm:$0xff] %v21644_v63  ;;  %v23818_v29 = vld [vmem:[#allocation87_spill] sm:$0xff]  ;;  %v10083_v47 = vmul.f32 %v21644_v63, %v21644_v63 }
 0x7f1   :  { %v21650_v35 = vsub.f32 %v23818_v29, %v21429_v41  ;;  %v21668_v29 = vsub.f32 %v21294_v19, %v21429_v41 }
 0x7f2   :  { %v10141_v20 = vadd.f32 %v10140_v49, %v10078_v42  ;;  %v21656_v49 = vsub.f32 %v21282_v36, %v21429_v41 }
 0x7f3   :  { %23821 = vst [vmem:[#allocation24_spill] sm:$0xff] %v21668_v29  ;;  %v10087_v19 = vmul.f32 %v21668_v29, %v21668_v29 }
 0x7f4   :  { %v10142_v28 = vadd.f32 %v10141_v20, %v10079_v6  ;;  %23819 = vst [vmem:[#allocation56_spill] sm:$0xff] %v21656_v49  ;;  %v23820_v20 = vld [vmem:[#allocation92_spill] sm:$0xff]  ;;  %v10085_v36 = vmul.f32 %v21656_v49, %v21656_v49 }
 0x7f5   :  { %v21662_v45 = vsub.f32 %v23820_v20, %v21429_v41  ;;  %v21680_v20 = vsub.f32 %v21306_v21, %v21429_v41 }
 0x7f6   :  { %v10143_v54 = vadd.f32 %v10142_v28, %v10080_v11  ;;  %v10084_v11 = vmul.f32 %v21650_v35, %v21650_v35 }
 0x7f7   :  { %23823 = vst [vmem:[#allocation23_spill] sm:$0xff] %v21680_v20  ;;  %v10089_v21 = vmul.f32 %v21680_v20, %v21680_v20 }
 0x7f8   :  { %v10144_v42 = vadd.f32 %v10143_v54, %v10081_v46  ;;  %v23822_v54 = vld [vmem:[#allocation47_spill] sm:$0xff] }
 0x7f9   :  { %v21674_v63 = vsub.f32 %v23822_v54, %v21429_v41  ;;  %v21692_v54 = vsub.f32 %v21318_v13, %v21429_v41 }
 0x7fa   :  { %v10145_v6 = vadd.f32 %v10144_v42, %v10082_v3  ;;  %v10086_v3 = vmul.f32 %v21662_v45, %v21662_v45 }
 0x7fb   :  { %23826 = vst [vmem:[#allocation58_spill] sm:$0xff] %v21692_v54  ;;  %v10091_v13 = vmul.f32 %v21692_v54, %v21692_v54 }
 0x7fc   :  { %v10146_v28 = vadd.f32 %v10145_v6, %v10083_v47  ;;  %v23824_v6 = vld [vmem:[#allocation46_spill] sm:$0xff] }
 0x7fd   :  { %v21686_v49 = vsub.f32 %v23824_v6, %v21429_v41  ;;  %v21704_v6 = vsub.f32 %v21330_v40, %v21429_v41 }
 0x7fe   :  { %v10147_v46 = vadd.f32 %v10146_v28, %v10084_v11  ;;  %v10088_v11 = vmul.f32 %v21674_v63, %v21674_v63 }
 0x7ff   :  { %23825 = vst [vmem:[#allocation53_spill] sm:$0xff] %v21686_v49  ;;  %23829 = vst [vmem:[#allocation25_spill] sm:$0xff] %v21704_v6  ;;  %v10093_v40 = vmul.f32 %v21704_v6, %v21704_v6 }
 0x800   :  { %v10148_v42 = vadd.f32 %v10147_v46, %v10085_v36  ;;  %v23827_v46 = vld [vmem:[#allocation89_spill] sm:$0xff] }
 0x801   :  { %v21698_v29 = vsub.f32 %v23827_v46, %v21429_v41  ;;  %v23832_v46 = vld [vmem:[#allocation91_spill] sm:$0xff] }
 0x802   :  { %v10149_v47 = vadd.f32 %v10148_v42, %v10086_v3  ;;  %v10090_v3 = vmul.f32 %v21686_v49, %v21686_v49  ;;  %v21716_v49 = vsub.f32 %v23832_v46, %v21429_v41  ;;  %v23838_v46 = vld [vmem:[#allocation50_spill] sm:$0xff] }
 0x803   :  { %23828 = vst [vmem:[#allocation26_spill] sm:$0xff] %v21698_v29  ;;  %v21734_v6 = vsub.f32 %v23838_v46, %v21429_v41  ;;  %v23842_v46 = vld [vmem:[#allocation48_spill] sm:$0xff] }
 0x804   :  { %v10150_v28 = vadd.f32 %v10149_v47, %v10087_v19  ;;  %v23830_v47 = vld [vmem:[#allocation95_spill] sm:$0xff]  ;;  %23833 = vst [vmem:[#allocation60_spill] sm:$0xff] %v21716_v49 }
 0x805   :  { %v21710_v20 = vsub.f32 %v23830_v47, %v21429_v41  ;;  %v23836_v47 = vld [vmem:[#allocation15_spill] sm:$0xff] }
 0x806   :  { %v10151_v36 = vadd.f32 %v10150_v28, %v10088_v11  ;;  %v10092_v11 = vmul.f32 %v21698_v29, %v21698_v29  ;;  %v21728_v29 = vsub.f32 %v23836_v47, %v21429_v41  ;;  %v23841_v47 = vld [vmem:[#allocation16_spill] sm:$0xff] }
 0x807   :  { %23831 = vst [vmem:[#allocation55_spill] sm:$0xff] %v21710_v20 }
 0x808   :  { %v10152_v42 = vadd.f32 %v10151_v36, %v10089_v21  ;;  %v23834_v36 = vld [vmem:[#allocation93_spill] sm:$0xff]  ;;  %23837 = vst [vmem:[#allocation27_spill] sm:$0xff] %v21728_v29 }
 0x809   :  { %v21722_v54 = vsub.f32 %v23834_v36, %v21429_v41  ;;  %v23839_v36 = vld [vmem:[#allocation17_spill] sm:$0xff] }
 0x80a   :  { %v10153_v19 = vadd.f32 %v10152_v42, %v10090_v3  ;;  %v10094_v3 = vmul.f32 %v21710_v20, %v21710_v20  ;;  %v21740_v20 = vsub.f32 %v23839_v36, %v21429_v41  ;;  %v23843_v36 = vld [vmem:[#allocation52_spill] sm:$0xff] }
 0x80b   :  { %23835 = vst [vmem:[#allocation28_spill] sm:$0xff] %v21722_v54 }
 0x80c   :  { %v10154_v28 = vadd.f32 %v10153_v19, %v10091_v13  ;;  %v10095_v13 = vmul.f32 %v21716_v49, %v21716_v49  ;;  %23840 = vst [vmem:[#allocation57_spill] sm:$0xff] %v21740_v20  ;;  %v21746_v49 = vsub.f32 %v23841_v47, %v21429_v41 }
 0x80e   :  { %v10155_v21 = vadd.f32 %v10154_v28, %v10092_v11  ;;  %v10096_v11 = vmul.f32 %v21722_v54, %v21722_v54  ;;  %v21752_v54 = vsub.f32 %v23842_v46, %v21429_v41 }
 0x810   :  { %v10156_v42 = vadd.f32 %v10155_v21, %v10093_v40  ;;  %v10097_v40 = vmul.f32 %v21728_v29, %v21728_v29  ;;  %v21758_v29 = vsub.f32 %v23843_v36, %v21429_v41  ;;  %v10101_v47 = vmul.f32 %v21752_v54, %v21752_v54 }
 0x811   :  { %v10104_v41 = vmul.f32 %v21437_v31, %v21437_v31  ;;  %v10105_v36 = vmul.f32 %v21441_v51, %v21441_v51 }
 0x812   :  { %v10157_v19 = vadd.f32 %v10156_v42, %v10094_v3  ;;  %v10098_v3 = vmul.f32 %v21734_v6, %v21734_v6 }
 0x814   :  { %v10158_v28 = vadd.f32 %v10157_v19, %v10095_v13  ;;  %v10099_v13 = vmul.f32 %v21740_v20, %v21740_v20  ;;  %v10103_v20 = vmul.f32 %v21433_v7, %v21433_v7 }
 0x816   :  { %v10159_v21 = vadd.f32 %v10158_v28, %v10096_v11  ;;  %v10100_v11 = vmul.f32 %v21746_v49, %v21746_v49 }
 0x818   :  { %v10160_v42 = vadd.f32 %v10159_v21, %v10097_v40  ;;  %v10102_v21 = vmul.f32 %v21758_v29, %v21758_v29 }
 0x81a   :  { %v10161_v19 = vadd.f32 %v10160_v42, %v10098_v3 }
 0x81c   :  { %v10162_v28 = vadd.f32 %v10161_v19, %v10099_v13  ;;  %v10106_v19 = vmul.f32 %v21445_v37, %v21445_v37 }
 0x81e   :  { %v10163_v40 = vadd.f32 %v10162_v28, %v10100_v11  ;;  %v10107_v28 = vmul.f32 %v21449_v25, %v21449_v25 }
 0x820   :  { %v10164_v46 = vadd.f32 %v10163_v40, %v10101_v47  ;;  %v10108_v40 = vmul.f32 %v21453_v32, %v21453_v32 }
 0x822   :  { %v10165_v3 = vadd.f32 %v10164_v46, %v10102_v21  ;;  %v10109_v46 = vmul.f32 %v21457_v56, %v21457_v56 }
 0x824   :  { %v10166_v42 = vadd.f32 %v10165_v3, %v10103_v20  ;;  %v10110_v3 = vmul.f32 %v21461_v39, %v21461_v39 }
 0x826   :  { %v10167_v13 = vadd.f32 %v10166_v42, %v10104_v41  ;;  %v10111_v42 = vmul.f32 %v21464_v50, %v21464_v50 }
 0x828   :  { %v10168_v11 = vadd.f32 %v10167_v13, %v10105_v36  ;;  %v10112_v13 = vmul.f32 %v21467_v22, %v21467_v22 }
 0x82a   :  { %v10169_v47 = vadd.f32 %v10168_v11, %v10106_v19  ;;  %v10113_v11 = vmul.f32 %v21470_v61, %v21470_v61 }
 0x82c   :  { %v10170_v21 = vadd.f32 %v10169_v47, %v10107_v28  ;;  %v10114_v47 = vmul.f32 %v21473_v48, %v21473_v48 }
 0x82e   :  { %v10171_v20 = vadd.f32 %v10170_v21, %v10108_v40  ;;  %v10115_v21 = vmul.f32 %v21476_v60, %v21476_v60 }
 0x830   :  { %v10172_v41 = vadd.f32 %v10171_v20, %v10109_v46  ;;  %v10116_v20 = vmul.f32 %v21479_v2, %v21479_v2 }
 0x832   :  { %v10173_v36 = vadd.f32 %v10172_v41, %v10110_v3  ;;  %v10117_v41 = vmul.f32 %v21482_v59, %v21482_v59 }
 0x834   :  { %v10174_v19 = vadd.f32 %v10173_v36, %v10111_v42  ;;  %v10118_v36 = vmul.f32 %v21485_v18, %v21485_v18 }
 0x836   :  { %v10175_v28 = vadd.f32 %v10174_v19, %v10112_v13  ;;  %v10119_v19 = vmul.f32 %v21488_v5, %v21488_v5 }
 0x838   :  { %v10176_v40 = vadd.f32 %v10175_v28, %v10113_v11  ;;  %v10120_v28 = vmul.f32 %v21491_v58, %v21491_v58 }
 0x83a   :  { %v10177_v46 = vadd.f32 %v10176_v40, %v10114_v47  ;;  %v10121_v40 = vmul.f32 %v21494_v27, %v21494_v27 }
 0x83c   :  { %v10178_v3 = vadd.f32 %v10177_v46, %v10115_v21 }
 0x83e   :  { %v10179_v42 = vadd.f32 %v10178_v3, %v10116_v20 }
 0x840   :  { %v10180_v13 = vadd.f32 %v10179_v42, %v10117_v41 }
 0x842   :  { %v10181_v11 = vadd.f32 %v10180_v13, %v10118_v36  ;;  %v9922_v36 = vld [vmem:[%s22973_s5] sm:$0x1] }
 0x844   :  { %v10182_v47 = vadd.f32 %v10181_v11, %v10119_v19  ;;  %v23844_v11 = vld [vmem:[#allocation36_spill] sm:$0xff] }
 0x845   :  { %v23845_v58 = vsub.s32 0, %v23844_v11 }
 0x846   :  { %v10183_v21 = vadd.f32 %v10182_v47, %v10120_v28  ;;  %v23846_v28 = vld [vmem:[#allocation51_spill] sm:$0xff]  ;;  %v23847_v47 = vld [vmem:[#allocation56_spill] sm:$0xff] }
 0x848   :  { %v10184_v46 = vadd.f32 %v10183_v21, %v10121_v40  ;;  %v23848_v40 = vld [vmem:[#allocation24_spill] sm:$0xff] }
 0x84a   :  { %v10185_v2 = vrot.slane %v10184_v46, 4 }
 0x84c   :  { %v10186_v59 = vadd.f32 %v10185_v2, %v10184_v46  ;;  %v23849_v46 = vld [vmem:[#allocation23_spill] sm:$0xff] }
 0x84e   :  { %v10187_v20 = vrot.slane %v10186_v59, 2 }
 0x850   :  { %v10188_v3 = vadd.f32 %v10187_v20, %v10186_v59  ;;  %v23850_v20 = vld [vmem:[#allocation53_spill] sm:$0xff] }
 0x852   :  { %v10189_v60 = vrot.slane %v10188_v3, 1 }
 0x854   :  { %v10190_v18 = vadd.f32 %v10189_v60, %v10188_v3 }
 0x856   :  { %v10191_v41 = vmul.f32 0.001953125, %v10190_v18 }
 0x858   :  { %v10192_v42 = vadd.f32 1e-05, %v10191_v41  ;;  %v23851_v41 = vld [vmem:[#allocation58_spill] sm:$0xff] }
 0x85a   :  { %14792 = vrsqrt.f32 %v10192_v42  ;;  %v23852_v42 = vld [vmem:[#allocation26_spill] sm:$0xff] }
 0x867   :  { %v14793_v13 = vpop.eup %14792 }
 0x868   :  { %v10194_v19 = vmul.f32 %v14793_v13, %v9922_v36  ;;  %v23853_v13 = vld [vmem:[#allocation25_spill] sm:$0xff] }
 0x86a   :  { %v21809_v27 = vrot.slane %v10194_v19, %v23845_v58  ;;  %v23854_v19 = vld [vmem:[#allocation55_spill] sm:$0xff] }
 0x86c   :  { %v21813_v2 = vmul.f32 %v21809_v27, %v21498_v34  ;;  %v21817_v60 = vmul.f32 %v21809_v27, %v21502_v4  ;;  %v21821_v59 = vmul.f32 %v21809_v27, %v21506_v52  ;;  %v21825_v18 = vmul.f32 %v21809_v27, %v21514_v44 }
 0x86d   :  { %v21829_v58 = vmul.f32 %v21809_v27, %v21518_v24  ;;  %v21833_v34 = vmul.f32 %v21809_v27, %v21524_v53  ;;  %v21837_v4 = vmul.f32 %v21809_v27, %v21530_v55  ;;  %v21841_v52 = vmul.f32 %v21809_v27, %v21536_v15 }
 0x86e   :  { %v21845_v44 = vmul.f32 %v21809_v27, %v21542_v57  ;;  %v21849_v24 = vmul.f32 %v21809_v27, %v21548_v26  ;;  %v21853_v53 = vmul.f32 %v21809_v27, %v21554_v43  ;;  %v21857_v55 = vmul.f32 %v21809_v27, %v21560_v8 }
 0x86f   :  { %v21861_v15 = vmul.f32 %v21809_v27, %v21566_v10  ;;  %v21865_v57 = vmul.f32 %v21809_v27, %v21572_v9  ;;  %v21869_v26 = vmul.f32 %v21809_v27, %v21578_v14  ;;  %v21873_v43 = vmul.f32 %v21809_v27, %v21584_v30 }
 0x870   :  { %v21877_v8 = vmul.f32 %v21809_v27, %v21590_v38  ;;  %v21881_v10 = vmul.f32 %v21809_v27, %v21596_v12  ;;  %v21885_v9 = vmul.f32 %v21809_v27, %v21602_v23  ;;  %v21889_v14 = vmul.f32 %v21809_v27, %v21608_v62 }
 0x871   :  { %v21893_v30 = vmul.f32 %v21809_v27, %v21614_v33  ;;  %v21897_v38 = vmul.f32 %v21809_v27, %v21620_v0  ;;  %v21901_v12 = vmul.f32 %v21809_v27, %v21626_v17  ;;  %v21905_v23 = vmul.f32 %v21809_v27, %v21632_v16 }
 0x872   :  { %v21909_v62 = vmul.f32 %v21809_v27, %v21638_v1  ;;  %v21913_v33 = vmul.f32 %v21809_v27, %v23846_v28  ;;  %v21917_v0 = vmul.f32 %v21809_v27, %v21650_v35  ;;  %v21921_v17 = vmul.f32 %v21809_v27, %v23847_v47  ;;  %v23855_v28 = vld [vmem:[#allocation60_spill] sm:$0xff] }
 0x873   :  { %v21925_v16 = vmul.f32 %v21809_v27, %v21662_v45  ;;  %v21929_v1 = vmul.f32 %v21809_v27, %v23848_v40  ;;  %v21933_v21 = vmul.f32 %v21809_v27, %v21674_v63  ;;  %v21937_v35 = vmul.f32 %v21809_v27, %v23849_v46  ;;  %v23856_v40 = vld [vmem:[#allocation28_spill] sm:$0xff] }
 0x874   :  { %v21941_v3 = vmul.f32 %v21809_v27, %v23850_v20  ;;  %v21945_v45 = vmul.f32 %v21809_v27, %v23851_v41  ;;  %v21949_v36 = vmul.f32 %v21809_v27, %v23852_v42  ;;  %v21953_v63 = vmul.f32 %v21809_v27, %v23853_v13  ;;  %v23857_v20 = vld [vmem:[#allocation27_spill] sm:$0xff]  ;;  %v23858_v13 = vld [vmem:[#allocation57_spill] sm:$0xff] }
 0x875   :  { %v21957_v11 = vmul.f32 %v21809_v27, %v23854_v19  ;;  %v21961_v47 = vmul.f32 %v21809_v27, %v23855_v28  ;;  %v21965_v46 = vmul.f32 %v21809_v27, %v23856_v40  ;;  %v21969_v41 = vmul.f32 %v21809_v27, %v23857_v20 }
 0x876   :  { %v21973_v42 = vmul.f32 %v21809_v27, %v21734_v6  ;;  %v21977_v19 = vmul.f32 %v21809_v27, %v23858_v13  ;;  %v21981_v28 = vmul.f32 %v21809_v27, %v21746_v49  ;;  %v21985_v40 = vmul.f32 %v21809_v27, %v21752_v54 }
 0x877   :  { %v21989_v20 = vmul.f32 %v21809_v27, %v21758_v29  ;;  %v21993_v6 = vmul.f32 %v21809_v27, %v21433_v7  ;;  %v21997_v13 = vmul.f32 %v21809_v27, %v21437_v31  ;;  %v22001_v49 = vmul.f32 %v21809_v27, %v21441_v51  ;;  %v22022_v51 = vld [vmem:[%s22974_s6] ss:$0 sm:$0xff] }
 0x878   :  { %v22005_v54 = vmul.f32 %v21809_v27, %v21445_v37  ;;  %v22009_v29 = vmul.f32 %v21809_v27, %v21449_v25  ;;  %v22013_v7 = vmul.f32 %v21809_v27, %v21453_v32  ;;  %v22017_v31 = vmul.f32 %v21809_v27, %v21457_v56 }
 0x879   :  { %v22026_v37 = vmul.f32 %v21809_v27, %v21461_v39  ;;  %v22030_v25 = vmul.f32 %v21809_v27, %v21464_v50  ;;  %v22034_v32 = vmul.f32 %v21809_v27, %v21467_v22  ;;  %v22038_v56 = vmul.f32 %v21809_v27, %v21470_v61 }
 0x87a   :  { %23859 = vst [vmem:[#allocation30_spill] sm:$0xff] %v22013_v7  ;;  %23860 = vst [vmem:[#allocation29_spill] sm:$0xff] %v22017_v31  ;;  %v22042_v31 = vmul.f32 %v21809_v27, %v21473_v48  ;;  %v23865_v7 = vld [vmem:[#allocation21_spill] sm:$0xff]  ;;  %v22062_v48 = vmul.f32 %v21809_v27, %v21488_v5  ;;  %v22082_v5 = vadd.f32 %v22022_v51, %v21821_v59 }
 0x87b   :  { %23861 = vst [vmem:[#allocation59_spill] sm:$0xff] %v22026_v37  ;;  %23862 = vst [vmem:[#allocation64_spill] sm:$0xff] %v22030_v25  ;;  %v22046_v39 = vmul.f32 %v21809_v27, %v23865_v7  ;;  %v23867_v37 = vld [vmem:[#allocation20_spill] sm:$0xff]  ;;  %v23868_v25 = vld [vmem:[#allocation49_spill] sm:$0xff]  ;;  %v22102_v59 = vadd.f32 %v22022_v51, %v21841_v52  ;;  %v22122_v52 = vadd.f32 %v22022_v51, %v21861_v15 }
 0x87c   :  { %23863 = vst [vmem:[#allocation31_spill] sm:$0xff] %v22034_v32  ;;  %23864 = vst [vmem:[#allocation32_spill] sm:$0xff] %v22042_v31  ;;  %v22050_v50 = vmul.f32 %v21809_v27, %v23867_v37  ;;  %v22054_v22 = vmul.f32 %v21809_v27, %v23868_v25  ;;  %v23869_v32 = vld [vmem:[#allocation54_spill] sm:$0xff]  ;;  %v22074_v25 = vadd.f32 %v22022_v51, %v21813_v2 }
 0x87d   :  { %23866 = vst [vmem:[#allocation33_spill] sm:$0xff] %v22046_v39  ;;  %v22058_v61 = vmul.f32 %v21809_v27, %v23869_v32  ;;  %v23870_v31 = vld [vmem:[#allocation18_spill] sm:$0xff]  ;;  %v22078_v32 = vadd.f32 %v22022_v51, %v21817_v60  ;;  %v22094_v2 = vadd.f32 %v22022_v51, %v21833_v34  ;;  %v22098_v60 = vadd.f32 %v22022_v51, %v21837_v4 }
 0x87e   :  { %v22066_v7 = vmul.f32 %v21809_v27, %v23870_v31  ;;  %v23871_v39 = vld [vmem:[#allocation22_spill] sm:$0xff]  ;;  %v22086_v31 = vadd.f32 %v22022_v51, %v21825_v18  ;;  %v22106_v18 = vadd.f32 %v22022_v51, %v21845_v44  ;;  %v22114_v34 = vadd.f32 %v22022_v51, %v21853_v53 }
 0x87f   :  { %v22070_v37 = vmul.f32 %v21809_v27, %v23871_v39  ;;  %v22090_v27 = vadd.f32 %v22022_v51, %v21829_v58  ;;  %v22110_v58 = vadd.f32 %v22022_v51, %v21849_v24  ;;  %v22118_v4 = vadd.f32 %v22022_v51, %v21857_v55 }
 0x880   :  { %v22126_v44 = vadd.f32 %v22022_v51, %v21865_v57  ;;  %v22130_v24 = vadd.f32 %v22022_v51, %v21869_v26  ;;  %v22134_v53 = vadd.f32 %v22022_v51, %v21873_v43  ;;  %v22138_v55 = vadd.f32 %v22022_v51, %v21877_v8 }
 0x881   :  { %v22142_v15 = vadd.f32 %v22022_v51, %v21881_v10  ;;  %v22146_v57 = vadd.f32 %v22022_v51, %v21885_v9  ;;  %v22150_v26 = vadd.f32 %v22022_v51, %v21889_v14  ;;  %v22154_v43 = vadd.f32 %v22022_v51, %v21893_v30 }
 0x882   :  { %v22158_v8 = vadd.f32 %v22022_v51, %v21897_v38  ;;  %v22162_v10 = vadd.f32 %v22022_v51, %v21901_v12  ;;  %v22166_v9 = vadd.f32 %v22022_v51, %v21905_v23  ;;  %v22170_v14 = vadd.f32 %v22022_v51, %v21909_v62 }
 0x883   :  { %v22174_v30 = vadd.f32 %v22022_v51, %v21913_v33  ;;  %v22178_v38 = vadd.f32 %v22022_v51, %v21917_v0  ;;  %v22182_v12 = vadd.f32 %v22022_v51, %v21921_v17  ;;  %v22186_v23 = vadd.f32 %v22022_v51, %v21925_v16 }
 0x884   :  { %v22190_v62 = vadd.f32 %v22022_v51, %v21929_v1  ;;  %v22194_v33 = vadd.f32 %v22022_v51, %v21933_v21  ;;  %v22198_v0 = vadd.f32 %v22022_v51, %v21937_v35  ;;  %v22202_v17 = vadd.f32 %v22022_v51, %v21941_v3 }
 0x885   :  { %v22206_v16 = vadd.f32 %v22022_v51, %v21945_v45  ;;  %v22210_v1 = vadd.f32 %v22022_v51, %v21949_v36  ;;  %v22214_v21 = vadd.f32 %v22022_v51, %v21953_v63  ;;  %v22218_v35 = vadd.f32 %v22022_v51, %v21957_v11 }
 0x886   :  { %v22222_v3 = vadd.f32 %v22022_v51, %v21961_v47  ;;  %v22226_v45 = vadd.f32 %v22022_v51, %v21965_v46  ;;  %v22230_v36 = vadd.f32 %v22022_v51, %v21969_v41  ;;  %v22234_v63 = vadd.f32 %v22022_v51, %v21973_v42 }
 0x887   :  { %23872 = vst [vmem:[#allocation66_spill] sm:$0xff] %v22210_v1  ;;  %23873 = vst [vmem:[#allocation61_spill] sm:$0xff] %v22214_v21  ;;  %v22238_v11 = vadd.f32 %v22022_v51, %v21977_v19  ;;  %v22242_v47 = vadd.f32 %v22022_v51, %v21981_v28  ;;  %v22246_v46 = vadd.f32 %v22022_v51, %v21985_v40  ;;  %v10981_v40 = vld [vmem:[%s22969_s0 + $0x19] sm:$0xff]  ;;  %v11006_v1 = vld [vmem:[%s22969_s0 + $0x141] sm:$0xff] }
 0x888   :  { %23874 = vst [vmem:[#allocation35_spill] sm:$0xff] %v22218_v35  ;;  %23875 = vst [vmem:[#allocation63_spill] sm:$0xff] %v22222_v3  ;;  %v22250_v41 = vadd.f32 %v22022_v51, %v21989_v20  ;;  %v22254_v42 = vadd.f32 %v22022_v51, %v21993_v6  ;;  %v22258_v19 = vadd.f32 %v22022_v51, %v21997_v13  ;;  %v10982_v20 = vld [vmem:[%s22969_s0 + $0x21] sm:$0xff]  ;;  %v10983_v6 = vld [vmem:[%s22969_s0 + $0x31] sm:$0xff] }
 0x889   :  { %23876 = vst [vmem:[#allocation34_spill] sm:$0xff] %v22226_v45  ;;  %23877 = vst [vmem:[#allocation68_spill] sm:$0xff] %v22230_v36  ;;  %v22262_v28 = vadd.f32 %v22022_v51, %v22001_v49  ;;  %v10984_v13 = vld [vmem:[%s22969_s0 + $0x39] sm:$0xff]  ;;  %v22278_v49 = vadd.f32 %v22022_v51, %v22005_v54  ;;  %v22282_v39 = vadd.f32 %v22022_v51, %v22009_v29  ;;  %v10986_v54 = vld [vmem:[%s22969_s0 + $0x51] sm:$0xff] }
 0x88a   :  { %23878 = vst [vmem:[#allocation94_spill] sm:$0xff] %v22234_v63  ;;  %23879 = vst [vmem:[#allocation65_spill] sm:$0xff] %v22238_v11  ;;  %v10987_v29 = vld [vmem:[%s22969_s0 + $0x61] sm:$0xff]  ;;  %v22318_v11 = vadd.f32 %v22022_v51, %v22038_v56  ;;  %v10989_v63 = vld [vmem:[%s22969_s0 + $0x79] sm:$0xff]  ;;  %v22346_v36 = vadd.f32 %v22022_v51, %v22054_v22  ;;  %v22362_v22 = vadd.f32 %v22022_v51, %v22058_v61 }
 0x88b   :  { %23880 = vst [vmem:[#allocation62_spill] sm:$0xff] %v22242_v47  ;;  %23881 = vst [vmem:[#allocation70_spill] sm:$0xff] %v22246_v46  ;;  %v10985_v46 = vld [vmem:[%s22969_s0 + $0x49] sm:$0xff]  ;;  %v10998_v61 = vld [vmem:[%s22969_s0 + $0xe1] sm:$0xff]  ;;  %v22407_v3 = vadd.f32 %v10983_v6, %v22082_v5  ;;  %v22410_v35 = vadd.f32 %v10984_v13, %v22086_v31  ;;  %v22428_v31 = vadd.f32 %v10986_v54, %v22094_v2 }
 0x88c   :  { %23882 = vst [vmem:[#allocation38_spill] sm:$0xff] %v22250_v41  ;;  %23883 = vst [vmem:[#allocation37_spill] sm:$0xff] %v22254_v42  ;;  %v23890_v42 = vld [vmem:[#allocation29_spill] sm:$0xff]  ;;  %v11005_v21 = vld [vmem:[%s22969_s0 + $0x139] sm:$0xff]  ;;  %v22425_v5 = vadd.f32 %v10985_v46, %v22090_v27 }
 0x88d   :  { %23884 = vst [vmem:[#allocation67_spill] sm:$0xff] %v22258_v19  ;;  %23885 = vst [vmem:[#allocation72_spill] sm:$0xff] %v22262_v28  ;;  %v23888_v28 = vld [vmem:[#allocation30_spill] sm:$0xff]  ;;  %v22290_v41 = vadd.f32 %v22022_v51, %v23890_v42  ;;  %v10993_v45 = vld [vmem:[%s22969_s0 + $0xa9] sm:$0xff] }
 0x88e   :  { %23886 = vst [vmem:[#allocation74_spill] sm:$0xff] %v22278_v49  ;;  %23887 = vst [vmem:[#allocation40_spill] sm:$0xff] %v22282_v39  ;;  %v22286_v19 = vadd.f32 %v22022_v51, %v23888_v28  ;;  %v10988_v28 = vld [vmem:[%s22969_s0 + $0x69] sm:$0xff]  ;;  %v23896_v49 = vld [vmem:[#allocation31_spill] sm:$0xff] }
 0x88f   :  { %23891 = vst [vmem:[#allocation42_spill] sm:$0xff] %v22290_v41  ;;  %v23894_v41 = vld [vmem:[#allocation64_spill] sm:$0xff]  ;;  %v22314_v47 = vadd.f32 %v22022_v51, %v23896_v49  ;;  %23898 = vst [vmem:[#allocation3_spill] sm:$0xff] %v22318_v11  ;;  %v10992_v49 = vld [vmem:[%s22969_s0 + $0x99] sm:$0xff] }
 0x890   :  { %23889 = vst [vmem:[#allocation41_spill] sm:$0xff] %v22286_v19  ;;  %v23892_v19 = vld [vmem:[#allocation59_spill] sm:$0xff]  ;;  %v22310_v39 = vadd.f32 %v22022_v51, %v23894_v41  ;;  %v10991_v41 = vld [vmem:[%s22969_s0 + $0x91] sm:$0xff]  ;;  %23904 = vst [vmem:[#allocation4_spill] sm:$0xff] %v22346_v36  ;;  %v22366_v36 = vadd.f32 %v22022_v51, %v22062_v48  ;;  %v22458_v54 = vadd.f32 %v10992_v49, %v22118_v4 }
 0x891   :  { %v22306_v42 = vadd.f32 %v22022_v51, %v23892_v19  ;;  %23897 = vst [vmem:[#allocation43_spill] sm:$0xff] %v22314_v47  ;;  %v10990_v19 = vld [vmem:[%s22969_s0 + $0x81] sm:$0xff]  ;;  %v23901_v11 = vld [vmem:[#allocation33_spill] sm:$0xff]  ;;  %23905 = vst [vmem:[#allocation69_spill] sm:$0xff] %v22362_v22  ;;  %v22404_v22 = vadd.f32 %v10982_v20, %v22078_v32  ;;  %v22434_v20 = vadd.f32 %v10988_v28, %v22102_v59 }
 0x892   :  { %23895 = vst [vmem:[#allocation71_spill] sm:$0xff] %v22310_v39  ;;  %v23899_v47 = vld [vmem:[#allocation32_spill] sm:$0xff]  ;;  %v22338_v39 = vadd.f32 %v22022_v51, %v23901_v11  ;;  %23906 = vst [vmem:[#allocation39_spill] sm:$0xff] %v22366_v36  ;;  %v10999_v48 = vld [vmem:[%s22969_s0 + $0xf1] sm:$0xff]  ;;  %v22401_v36 = vadd.f32 %v10981_v40, %v22074_v25  ;;  %v22431_v40 = vadd.f32 %v10987_v29, %v22098_v60 }
 0x893   :  { %23893 = vst [vmem:[#allocation76_spill] sm:$0xff] %v22306_v42  ;;  %v22334_v56 = vadd.f32 %v22022_v51, %v23899_v47  ;;  %v22342_v42 = vadd.f32 %v22022_v51, %v22050_v50  ;;  %v10994_v47 = vld [vmem:[%s22969_s0 + $0xb1] sm:$0xff]  ;;  %v10995_v11 = vld [vmem:[%s22969_s0 + $0xc1] sm:$0xff]  ;;  %v10996_v50 = vld [vmem:[%s22969_s0 + $0xc9] sm:$0xff]  ;;  %v22449_v60 = vadd.f32 %v10989_v63, %v22106_v18  ;;  %v22452_v59 = vadd.f32 %v10990_v19, %v22110_v58 }
 0x894   :  { %23902 = vst [vmem:[#allocation73_spill] sm:$0xff] %v22338_v39  ;;  %v22374_v39 = vadd.f32 %v22022_v51, %v22070_v37  ;;  %v11002_v37 = vld [vmem:[%s22969_s0 + $0x111] sm:$0xff]  ;;  %v11008_v32 = vld [vmem:[%s22969_s0 + $0x159] sm:$0xff]  ;;  %v11009_v6 = vld [vmem:[%s22969_s0 + $0x169] sm:$0xff]  ;;  %v22455_v46 = vadd.f32 %v10991_v41, %v22114_v34  ;;  %v22473_v34 = vadd.f32 %v10993_v45, %v22122_v52  ;;  %v22476_v4 = vadd.f32 %v10994_v47, %v22126_v44 }
 0x895   :  { %23900 = vst [vmem:[#allocation78_spill] sm:$0xff] %v22334_v56  ;;  %23903 = vst [vmem:[#allocation19_spill] sm:$0xff] %v22342_v42  ;;  %v22370_v42 = vadd.f32 %v22022_v51, %v22066_v7  ;;  %v10997_v56 = vld [vmem:[%s22969_s0 + $0xd9] sm:$0xff]  ;;  %v11001_v51 = vld [vmem:[%s22969_s0 + $0x109] sm:$0xff]  ;;  %v22479_v63 = vadd.f32 %v10995_v11, %v22130_v24  ;;  %v22482_v19 = vadd.f32 %v10996_v50, %v22134_v53 }
 0x896   :  { %23908 = vst [vmem:[#allocation75_spill] sm:$0xff] %v22374_v39  ;;  %v11000_v7 = vld [vmem:[%s22969_s0 + $0xf9] sm:$0xff]  ;;  %v11003_v39 = vld [vmem:[%s22969_s0 + $0x121] sm:$0xff]  ;;  %v11007_v25 = vld [vmem:[%s22969_s0 + $0x151] sm:$0xff]  ;;  %v22497_v24 = vadd.f32 %v10997_v56, %v22138_v55  ;;  %v22500_v53 = vadd.f32 %v10998_v61, %v22142_v15  ;;  %v22503_v45 = vadd.f32 %v10999_v48, %v22146_v57  ;;  %v22518_v15 = vadd.f32 %v11001_v51, %v22154_v43 }
 0x897   :  { %23907 = vst [vmem:[#allocation80_spill] sm:$0xff] %v22370_v42  ;;  %v11004_v42 = vld [vmem:[%s22969_s0 + $0x129] sm:$0xff]  ;;  %v11010_v13 = vld [vmem:[%s22969_s0 + $0x171] sm:$0xff]  ;;  %v11011_v27 = vld [vmem:[%s22969_s0 + $0x181] sm:$0xff]  ;;  %v22506_v47 = vadd.f32 %v11000_v7, %v22150_v26  ;;  %v22521_v57 = vadd.f32 %v11002_v37, %v22158_v8  ;;  %v22524_v26 = vadd.f32 %v11003_v39, %v22162_v10  ;;  %v22539_v8 = vadd.f32 %v11005_v21, %v22170_v14 }
 0x898   :  { %v11012_v2 = vld [vmem:[%s22969_s0 + $0x189] sm:$0xff]  ;;  %v11014_v28 = vld [vmem:[%s22969_s0 + $0x1d1] sm:$0xff]  ;;  %v11015_v18 = vld [vmem:[%s22969_s0 + $0x1e1] sm:$0xff]  ;;  %v22527_v56 = vadd.f32 %v11004_v42, %v22166_v9  ;;  %v22542_v10 = vadd.f32 %v11006_v1, %v22174_v30  ;;  %v22545_v9 = vadd.f32 %v11007_v25, %v22178_v38  ;;  %v22548_v39 = vadd.f32 %v11008_v32, %v22182_v12 }
 0x899   :  { %v11013_v29 = vld [vmem:[%s22969_s0 + $0x1c9] sm:$0xff]  ;;  %v11017_v41 = vld [vmem:[%s22969_s0 + $0x1f9] sm:$0xff]  ;;  %v11018_v49 = vld [vmem:[%s22969_s0 + $0x201] sm:$0xff]  ;;  %v22560_v30 = vadd.f32 %v11009_v6, %v22186_v23  ;;  %v22563_v38 = vadd.f32 %v11010_v13, %v22190_v62  ;;  %v22566_v12 = vadd.f32 %v11011_v27, %v22194_v33  ;;  %v22569_v1 = vadd.f32 %v11012_v2, %v22198_v0 }
 0x89a   :  { %v11016_v58 = vld [vmem:[%s22969_s0 + $0x1e9] sm:$0xff]  ;;  %v11019_v52 = vld [vmem:[%s22969_s0 + $0x211] sm:$0xff]  ;;  %v11020_v44 = vld [vmem:[%s22969_s0 + $0x219] sm:$0xff]  ;;  %v22581_v62 = vadd.f32 %v11013_v29, %v22202_v17  ;;  %v22584_v33 = vadd.f32 %v11014_v28, %v22206_v16 }
 0x89b   :  { %v11021_v11 = vld [vmem:[%s22969_s0 + $0x229] sm:$0xff]  ;;  %v11022_v50 = vld [vmem:[%s22969_s0 + $0x231] sm:$0xff]  ;;  %v11023_v55 = vld [vmem:[%s22969_s0 + $0x241] sm:$0xff] }
 0x89c   :  { %v11024_v61 = vld [vmem:[%s22969_s0 + $0x249] sm:$0xff]  ;;  %v11025_v48 = vld [vmem:[%s22969_s0 + $0x259] sm:$0xff]  ;;  %v11026_v43 = vld [vmem:[%s22969_s0 + $0x261] sm:$0xff] }
 0x89d   :  { %v11027_v42 = vld [vmem:[%s22969_s0 + $0x271] sm:$0xff]  ;;  %v11028_v7 = vld [vmem:[%s22969_s0 + $0x279] sm:$0xff]  ;;  %v11029_v14 = vld [vmem:[%s22969_s0 + $0x289] sm:$0xff] }
 0x89e   :  { %v11030_v21 = vld [vmem:[%s22969_s0 + $0x291] sm:$0xff]  ;;  %v11031_v51 = vld [vmem:[%s22969_s0 + $0x2a1] sm:$0xff]  ;;  %v11032_v23 = vld [vmem:[%s22969_s0 + $0x2a9] sm:$0xff] }
 0x89f   :  { %v23909_v0 = vld [vmem:[#allocation66_spill] sm:$0xff]  ;;  %v23911_v25 = vld [vmem:[#allocation61_spill] sm:$0xff]  ;;  %v11034_v13 = vld [vmem:[%s22969_s0 + $0x2c1] sm:$0xff] }
 0x8a0   :  { %v22587_v37 = vadd.f32 %v11015_v18, %v23909_v0  ;;  %v22590_v32 = vadd.f32 %v11016_v58, %v23911_v25  ;;  %v11033_v6 = vld [vmem:[%s22969_s0 + $0x2b9] sm:$0xff]  ;;  %v11035_v17 = vld [vmem:[%s22969_s0 + $0x2d1] sm:$0xff]  ;;  %v23919_v58 = vld [vmem:[#allocation68_spill] sm:$0xff] }
 0x8a1   :  { %v23913_v16 = vld [vmem:[#allocation35_spill] sm:$0xff]  ;;  %v23917_v28 = vld [vmem:[#allocation34_spill] sm:$0xff]  ;;  %v22611_v0 = vadd.f32 %v11020_v44, %v23919_v58 }
 0x8a2   :  { %23910 = vst [vmem:[#allocation5_spill] sm:$0xff] %v22587_v37  ;;  %23912 = vst [vmem:[#allocation77_spill] sm:$0xff] %v22590_v32  ;;  %v22602_v27 = vadd.f32 %v11017_v41, %v23913_v16  ;;  %v23915_v2 = vld [vmem:[#allocation63_spill] sm:$0xff]  ;;  %v22608_v18 = vadd.f32 %v11019_v52, %v23917_v28  ;;  %v11037_v32 = vld [vmem:[%s22969_s0 + $0x2e9] sm:$0xff] }
 0x8a3   :  { %v22605_v29 = vadd.f32 %v11018_v49, %v23915_v2  ;;  %23920 = vst [vmem:[#allocation79_spill] sm:$0xff] %v22611_v0  ;;  %v11036_v25 = vld [vmem:[%s22969_s0 + $0x2d9] sm:$0xff]  ;;  %v11038_v41 = vld [vmem:[%s22969_s0 + $0x2f1] sm:$0xff] }
 0x8a4   :  { %23914 = vst [vmem:[#allocation8_spill] sm:$0xff] %v22602_v27  ;;  %23918 = vst [vmem:[#allocation7_spill] sm:$0xff] %v22608_v18  ;;  %v23921_v49 = vld [vmem:[#allocation94_spill] sm:$0xff]  ;;  %v23923_v52 = vld [vmem:[#allocation65_spill] sm:$0xff] }
 0x8a5   :  { %23916 = vst [vmem:[#allocation82_spill] sm:$0xff] %v22605_v29  ;;  %v22623_v16 = vadd.f32 %v11021_v11, %v23921_v49  ;;  %v22626_v2 = vadd.f32 %v11022_v50, %v23923_v52  ;;  %v23925_v44 = vld [vmem:[#allocation62_spill] sm:$0xff]  ;;  %v11039_v18 = vld [vmem:[%s22969_s0 + $0x301] sm:$0xff]  ;;  %v11040_v29 = vld [vmem:[%s22969_s0 + $0x309] sm:$0xff] }
 0x8a6   :  { %v22629_v28 = vadd.f32 %v11023_v55, %v23925_v44  ;;  %v23927_v58 = vld [vmem:[#allocation70_spill] sm:$0xff]  ;;  %v23931_v55 = vld [vmem:[#allocation37_spill] sm:$0xff]  ;;  %v23943_v27 = vld [vmem:[#allocation43_spill] sm:$0xff] }
 0x8a7   :  { %23922 = vst [vmem:[#allocation84_spill] sm:$0xff] %v22623_v16  ;;  %23924 = vst [vmem:[#allocation6_spill] sm:$0xff] %v22626_v2  ;;  %v22632_v0 = vadd.f32 %v11024_v61, %v23927_v58  ;;  %v11041_v11 = vld [vmem:[%s22969_s0 + $0x319] sm:$0xff]  ;;  %v22647_v52 = vadd.f32 %v11026_v43, %v23931_v55  ;;  %v23935_v58 = vld [vmem:[#allocation72_spill] sm:$0xff]  ;;  %v22683_v37 = vadd.f32 %v11035_v17, %v23943_v27 }
 0x8a8   :  { %23926 = vst [vmem:[#allocation10_spill] sm:$0xff] %v22629_v28  ;;  %v23929_v50 = vld [vmem:[#allocation38_spill] sm:$0xff]  ;;  %v23933_v61 = vld [vmem:[#allocation67_spill] sm:$0xff] }
 0x8a9   :  { %23928 = vst [vmem:[#allocation9_spill] sm:$0xff] %v22632_v0  ;;  %v22644_v49 = vadd.f32 %v11025_v48, %v23929_v50  ;;  %23932 = vst [vmem:[#allocation81_spill] sm:$0xff] %v22647_v52  ;;  %v22650_v44 = vadd.f32 %v11027_v42, %v23933_v61  ;;  %v22653_v0 = vadd.f32 %v11028_v7, %v23935_v58  ;;  %v11042_v28 = vld [vmem:[%s22969_s0 + $0x321] sm:$0xff]  ;;  %v11043_v2 = vld [vmem:[%s22969_s0 + $0x331] sm:$0xff] }
 0x8aa   :  { %v11044_v48 = vld [vmem:[%s22969_s0 + $0x339] sm:$0xff]  ;;  %v23938_v42 = vld [vmem:[#allocation40_spill] sm:$0xff]  ;;  %v23939_v7 = vld [vmem:[#allocation41_spill] sm:$0xff] }
 0x8ab   :  { %23930 = vst [vmem:[#allocation86_spill] sm:$0xff] %v22644_v49  ;;  %23934 = vst [vmem:[#allocation12_spill] sm:$0xff] %v22650_v44  ;;  %v23937_v43 = vld [vmem:[#allocation74_spill] sm:$0xff]  ;;  %v22668_v55 = vadd.f32 %v11030_v21, %v23938_v42  ;;  %v22671_v61 = vadd.f32 %v11031_v51, %v23939_v7  ;;  %v23941_v44 = vld [vmem:[#allocation76_spill] sm:$0xff] }
 0x8ac   :  { %23936 = vst [vmem:[#allocation11_spill] sm:$0xff] %v22653_v0  ;;  %v22665_v50 = vadd.f32 %v11029_v14, %v23937_v43  ;;  %v23940_v58 = vld [vmem:[#allocation42_spill] sm:$0xff]  ;;  %v22677_v52 = vadd.f32 %v11033_v6, %v23941_v44  ;;  %v23942_v49 = vld [vmem:[#allocation71_spill] sm:$0xff]  ;;  %v23946_v51 = vld [vmem:[#allocation73_spill] sm:$0xff] }
 0x8ad   :  { %v22674_v0 = vadd.f32 %v11032_v23, %v23940_v58  ;;  %v22680_v16 = vadd.f32 %v11034_v13, %v23942_v49  ;;  %v23944_v14 = vld [vmem:[#allocation3_spill] sm:$0xff]  ;;  %v23945_v21 = vld [vmem:[#allocation78_spill] sm:$0xff]  ;;  %v22692_v7 = vadd.f32 %v11038_v41, %v23946_v51  ;;  %v23948_v6 = vld [vmem:[#allocation4_spill] sm:$0xff]  ;;  %v10463_v41 = vmax.f32 %v22401_v36, 0.0 }
 0x8ae   :  { %v22686_v43 = vadd.f32 %v11036_v25, %v23944_v14  ;;  %v22689_v42 = vadd.f32 %v11037_v32, %v23945_v21  ;;  %v23947_v23 = vld [vmem:[#allocation19_spill] sm:$0xff]  ;;  %v22698_v44 = vadd.f32 %v11040_v29, %v23948_v6  ;;  %v23949_v13 = vld [vmem:[#allocation69_spill] sm:$0xff]  ;;  %v23951_v25 = vld [vmem:[#allocation80_spill] sm:$0xff]  ;;  %v10465_v51 = vmax.f32 %v22407_v3, 0.0 }
 0x8af   :  { %v22695_v58 = vadd.f32 %v11039_v18, %v23947_v23  ;;  %v22701_v49 = vadd.f32 %v11041_v11, %v23949_v13  ;;  %v23950_v17 = vld [vmem:[#allocation39_spill] sm:$0xff]  ;;  %v22707_v14 = vadd.f32 %v11043_v2, %v23951_v25  ;;  %v10464_v18 = vmax.f32 %v22404_v22, 0.0  ;;  %10527 = vst [vmem:[%s22975_s7] sm:$0xff] %v10463_v41  ;;  %v23959_v25 = vld [vmem:[#allocation84_spill] sm:$0xff]  ;;  %v23960_v41 = vld [vmem:[#allocation6_spill] sm:$0xff] }
 0x8b0   :  { %v22704_v27 = vadd.f32 %v11042_v28, %v23950_v17  ;;  %v23952_v32 = vld [vmem:[#allocation75_spill] sm:$0xff]  ;;  %v10466_v29 = vmax.f32 %v22410_v35, 0.0  ;;  %v10467_v11 = vmax.f32 %v22425_v5, 0.0  ;;  %v10468_v23 = vmax.f32 %v22428_v31, 0.0  ;;  %10529 = vst [vmem:[%s22975_s7 + $0x10] sm:$0xff] %v10465_v51  ;;  %v23961_v51 = vld [vmem:[#allocation10_spill] sm:$0xff] }
 0x8b1   :  { %v22710_v21 = vadd.f32 %v11044_v48, %v23952_v32  ;;  %v10469_v28 = vmax.f32 %v22431_v40, 0.0  ;;  %v10470_v2 = vmax.f32 %v22434_v20, 0.0  ;;  %v10471_v6 = vmax.f32 %v22449_v60, 0.0  ;;  %10528 = vst [vmem:[%s22975_s7 + $0x8] sm:$0xff] %v10464_v18  ;;  %v23958_v13 = vld [vmem:[#allocation79_spill] sm:$0xff] }
 0x8b2   :  { %v10472_v48 = vmax.f32 %v22452_v59, 0.0  ;;  %v10473_v36 = vmax.f32 %v22455_v46, 0.0  ;;  %v10474_v22 = vmax.f32 %v22458_v54, 0.0  ;;  %10530 = vst [vmem:[%s22975_s7 + $0x18] sm:$0xff] %v10466_v29  ;;  %v10475_v35 = vmax.f32 %v22473_v34, 0.0  ;;  %10531 = vst [vmem:[%s22975_s7 + $0x20] sm:$0xff] %v10467_v11 }
 0x8b3   :  { %v10476_v3 = vmax.f32 %v22476_v4, 0.0  ;;  %v10477_v5 = vmax.f32 %v22479_v63, 0.0  ;;  %v10478_v31 = vmax.f32 %v22482_v19, 0.0  ;;  %10532 = vst [vmem:[%s22975_s7 + $0x28] sm:$0xff] %v10468_v23  ;;  %10533 = vst [vmem:[%s22975_s7 + $0x30] sm:$0xff] %v10469_v28  ;;  %v10479_v40 = vmax.f32 %v22497_v24, 0.0 }
 0x8b4   :  { %10534 = vst [vmem:[%s22975_s7 + $0x38] sm:$0xff] %v10470_v2  ;;  %v10480_v20 = vmax.f32 %v22500_v53, 0.0  ;;  %v10481_v60 = vmax.f32 %v22503_v45, 0.0  ;;  %v10482_v59 = vmax.f32 %v22506_v47, 0.0  ;;  %10535 = vst [vmem:[%s22975_s7 + $0x40] sm:$0xff] %v10471_v6  ;;  %v10483_v46 = vmax.f32 %v22518_v15, 0.0 }
 0x8b5   :  { %10536 = vst [vmem:[%s22975_s7 + $0x48] sm:$0xff] %v10472_v48  ;;  %10537 = vst [vmem:[%s22975_s7 + $0x50] sm:$0xff] %v10473_v36  ;;  %v10484_v54 = vmax.f32 %v22521_v57, 0.0  ;;  %v10485_v34 = vmax.f32 %v22524_v26, 0.0  ;;  %v10486_v4 = vmax.f32 %v22527_v56, 0.0  ;;  %v10487_v63 = vmax.f32 %v22539_v8, 0.0 }
 0x8b6   :  { %10538 = vst [vmem:[%s22975_s7 + $0x58] sm:$0xff] %v10474_v22  ;;  %10539 = vst [vmem:[%s22975_s7 + $0x60] sm:$0xff] %v10475_v35  ;;  %v10488_v19 = vmax.f32 %v22542_v10, 0.0  ;;  %v10489_v24 = vmax.f32 %v22545_v9, 0.0  ;;  %v10490_v53 = vmax.f32 %v22548_v39, 0.0  ;;  %v10491_v45 = vmax.f32 %v22560_v30, 0.0 }
 0x8b7   :  { %10540 = vst [vmem:[%s22975_s7 + $0x68] sm:$0xff] %v10476_v3  ;;  %10541 = vst [vmem:[%s22975_s7 + $0x70] sm:$0xff] %v10477_v5  ;;  %v10492_v47 = vmax.f32 %v22563_v38, 0.0  ;;  %v10493_v15 = vmax.f32 %v22566_v12, 0.0  ;;  %v10494_v57 = vmax.f32 %v22569_v1, 0.0  ;;  %v10495_v26 = vmax.f32 %v22581_v62, 0.0 }
 0x8b8   :  { %10542 = vst [vmem:[%s22975_s7 + $0x78] sm:$0xff] %v10478_v31  ;;  %10543 = vst [vmem:[%s22975_s7 + $0x80] sm:$0xff] %v10479_v40  ;;  %v10496_v56 = vmax.f32 %v22584_v33, 0.0  ;;  %v23953_v8 = vld [vmem:[#allocation5_spill] sm:$0xff]  ;;  %v23955_v30 = vld [vmem:[#allocation8_spill] sm:$0xff]  ;;  %v10502_v17 = vmax.f32 %v23958_v13, 0.0 }
 0x8b9   :  { %10544 = vst [vmem:[%s22975_s7 + $0x88] sm:$0xff] %v10480_v20  ;;  %10545 = vst [vmem:[%s22975_s7 + $0x90] sm:$0xff] %v10481_v60  ;;  %v10497_v10 = vmax.f32 %v23953_v8, 0.0  ;;  %v23954_v9 = vld [vmem:[#allocation77_spill] sm:$0xff]  ;;  %v10499_v38 = vmax.f32 %v23955_v30, 0.0  ;;  %v23956_v12 = vld [vmem:[#allocation82_spill] sm:$0xff] }
 0x8ba   :  { %10546 = vst [vmem:[%s22975_s7 + $0x98] sm:$0xff] %v10482_v59  ;;  %10547 = vst [vmem:[%s22975_s7 + $0xa0] sm:$0xff] %v10483_v46  ;;  %v10498_v39 = vmax.f32 %v23954_v9, 0.0  ;;  %v10500_v1 = vmax.f32 %v23956_v12, 0.0  ;;  %v23957_v62 = vld [vmem:[#allocation7_spill] sm:$0xff]  ;;  %v10503_v32 = vmax.f32 %v23959_v25, 0.0 }
 0x8bb   :  { %10548 = vst [vmem:[%s22975_s7 + $0xa8] sm:$0xff] %v10484_v54  ;;  %10549 = vst [vmem:[%s22975_s7 + $0xb0] sm:$0xff] %v10485_v34  ;;  %v10501_v33 = vmax.f32 %v23957_v62, 0.0  ;;  %v10504_v18 = vmax.f32 %v23960_v41, 0.0  ;;  %v10505_v29 = vmax.f32 %v23961_v51, 0.0  ;;  %v23962_v11 = vld [vmem:[#allocation9_spill] sm:$0xff] }
 0x8bc   :  { %10550 = vst [vmem:[%s22975_s7 + $0xb8] sm:$0xff] %v10486_v4  ;;  %10551 = vst [vmem:[%s22975_s7 + $0xc0] sm:$0xff] %v10487_v63  ;;  %v10506_v23 = vmax.f32 %v23962_v11, 0.0  ;;  %v23963_v28 = vld [vmem:[#allocation86_spill] sm:$0xff]  ;;  %v23964_v6 = vld [vmem:[#allocation81_spill] sm:$0xff]  ;;  %v10511_v5 = vmax.f32 %v22665_v50, 0.0 }
 0x8bd   :  { %10552 = vst [vmem:[%s22975_s7 + $0xc8] sm:$0xff] %v10488_v19  ;;  %10553 = vst [vmem:[%s22975_s7 + $0xd0] sm:$0xff] %v10489_v24  ;;  %v10507_v2 = vmax.f32 %v23963_v28, 0.0  ;;  %v10508_v48 = vmax.f32 %v23964_v6, 0.0  ;;  %v23965_v36 = vld [vmem:[#allocation12_spill] sm:$0xff]  ;;  %v23966_v35 = vld [vmem:[#allocation11_spill] sm:$0xff] }
 0x8be   :  { %10554 = vst [vmem:[%s22975_s7 + $0xd8] sm:$0xff] %v10490_v53  ;;  %10555 = vst [vmem:[%s22975_s7 + $0xe0] sm:$0xff] %v10491_v45  ;;  %v10509_v22 = vmax.f32 %v23965_v36, 0.0  ;;  %v10510_v3 = vmax.f32 %v23966_v35, 0.0  ;;  %v10512_v31 = vmax.f32 %v22668_v55, 0.0  ;;  %v10513_v40 = vmax.f32 %v22671_v61, 0.0 }
 0x8bf   :  { %10556 = vst [vmem:[%s22975_s7 + $0xe8] sm:$0xff] %v10492_v47  ;;  %10557 = vst [vmem:[%s22975_s7 + $0xf0] sm:$0xff] %v10493_v15  ;;  %v10514_v20 = vmax.f32 %v22674_v0, 0.0  ;;  %v10515_v50 = vmax.f32 %v22677_v52, 0.0  ;;  %v10516_v0 = vmax.f32 %v22680_v16, 0.0  ;;  %v10517_v55 = vmax.f32 %v22683_v37, 0.0 }
 0x8c0   :  { %10558 = vst [vmem:[%s22975_s7 + $0xf8] sm:$0xff] %v10494_v57  ;;  %10559 = vst [vmem:[%s22975_s7 + $0x100] sm:$0xff] %v10495_v26  ;;  %v10518_v61 = vmax.f32 %v22686_v43, 0.0  ;;  %v10519_v37 = vmax.f32 %v22689_v42, 0.0  ;;  %v10520_v16 = vmax.f32 %v22692_v7, 0.0  ;;  %v10521_v52 = vmax.f32 %v22695_v58, 0.0 }
 0x8c1   :  { %10560 = vst [vmem:[%s22975_s7 + $0x108] sm:$0xff] %v10496_v56  ;;  %10561 = vst [vmem:[%s22975_s7 + $0x110] sm:$0xff] %v10497_v10  ;;  %v10522_v43 = vmax.f32 %v22698_v44, 0.0  ;;  %v10523_v42 = vmax.f32 %v22701_v49, 0.0  ;;  %v10524_v7 = vmax.f32 %v22704_v27, 0.0  ;;  %v10525_v58 = vmax.f32 %v22707_v14, 0.0 }
 0x8c2   :  { %10562 = vst [vmem:[%s22975_s7 + $0x118] sm:$0xff] %v10498_v39  ;;  %10563 = vst [vmem:[%s22975_s7 + $0x120] sm:$0xff] %v10499_v38  ;;  %v10526_v44 = vmax.f32 %v22710_v21, 0.0 }
 0x8c3   :  { %10564 = vst [vmem:[%s22975_s7 + $0x128] sm:$0xff] %v10500_v1  ;;  %10565 = vst [vmem:[%s22975_s7 + $0x130] sm:$0xff] %v10501_v33 }
 0x8c4   :  { %10566 = vst [vmem:[%s22975_s7 + $0x138] sm:$0xff] %v10502_v17  ;;  %10567 = vst [vmem:[%s22975_s7 + $0x140] sm:$0xff] %v10503_v32 }
 0x8c5   :  { %10568 = vst [vmem:[%s22975_s7 + $0x148] sm:$0xff] %v10504_v18  ;;  %10569 = vst [vmem:[%s22975_s7 + $0x150] sm:$0xff] %v10505_v29 }
 0x8c6   :  { %10570 = vst [vmem:[%s22975_s7 + $0x158] sm:$0xff] %v10506_v23  ;;  %10571 = vst [vmem:[%s22975_s7 + $0x160] sm:$0xff] %v10507_v2 }
 0x8c7   :  { %10572 = vst [vmem:[%s22975_s7 + $0x168] sm:$0xff] %v10508_v48  ;;  %10573 = vst [vmem:[%s22975_s7 + $0x170] sm:$0xff] %v10509_v22 }
 0x8c8   :  { %10574 = vst [vmem:[%s22975_s7 + $0x178] sm:$0xff] %v10510_v3  ;;  %10575 = vst [vmem:[%s22975_s7 + $0x180] sm:$0xff] %v10511_v5 }
 0x8c9   :  { %10576 = vst [vmem:[%s22975_s7 + $0x188] sm:$0xff] %v10512_v31  ;;  %10577 = vst [vmem:[%s22975_s7 + $0x190] sm:$0xff] %v10513_v40 }
 0x8ca   :  { %10578 = vst [vmem:[%s22975_s7 + $0x198] sm:$0xff] %v10514_v20  ;;  %10579 = vst [vmem:[%s22975_s7 + $0x1a0] sm:$0xff] %v10515_v50 }
 0x8cb   :  { %10580 = vst [vmem:[%s22975_s7 + $0x1a8] sm:$0xff] %v10516_v0  ;;  %10581 = vst [vmem:[%s22975_s7 + $0x1b0] sm:$0xff] %v10517_v55 }
 0x8cc   :  { %10582 = vst [vmem:[%s22975_s7 + $0x1b8] sm:$0xff] %v10518_v61  ;;  %10583 = vst [vmem:[%s22975_s7 + $0x1c0] sm:$0xff] %v10519_v37 }
 0x8cd   :  { %10584 = vst [vmem:[%s22975_s7 + $0x1c8] sm:$0xff] %v10520_v16  ;;  %10585 = vst [vmem:[%s22975_s7 + $0x1d0] sm:$0xff] %v10521_v52 }
 0x8ce   :  { %10586 = vst [vmem:[%s22975_s7 + $0x1d8] sm:$0xff] %v10522_v43  ;;  %10587 = vst [vmem:[%s22975_s7 + $0x1e0] sm:$0xff] %v10523_v42 }
 0x8cf   :  { %10588 = vst [vmem:[%s22975_s7 + $0x1e8] sm:$0xff] %v10524_v7  ;;  %10589 = vst [vmem:[%s22975_s7 + $0x1f0] sm:$0xff] %v10525_v58 }
 0x8d0   :  { %10590 = vst [vmem:[%s22975_s7 + $0x1f8] sm:$0xff] %v10526_v44 }

</bundles_post_ra>
